<compile_context>
chip_gen: v5e
topology: v5e:2x2
jax: 0.10.0
libtpu: 0.0.40
codegen_flags: <defaults>
</compile_context>

<pallas_src>
import functools

import jax
import jax.numpy as jnp
from jax.experimental import pallas as pl
from jax.experimental.pallas import tpu as pltpu


def _round_up(x, m):
    return (x + m - 1) // m * m


def _cdiv(a, b):
    return -(-a // b)


def _choose_tile(rows, tile_rows):
    """Pick a lane-dense row tile (multiple of 128) and padded row count."""
    rows_p = _round_up(rows, 128)
    nt = max(1, _cdiv(rows_p, tile_rows))
    if rows_p >= 256:
        nt = max(nt, 2)          # >=2 parallel tiles so v7x's two TCs both get work
    tile = _round_up(_cdiv(rows_p, nt), 128)
    rows_p = _round_up(rows_p, tile)
    return rows_p, tile


# --------------------------------------------------------------------------- #
# Pallas kernels
# --------------------------------------------------------------------------- #
def _conv_kernel(p_ref, w_ref, b_ref, o_ref, *, apply_relu):
    """One row-tile of the K-folded im2col conv (transposed, lane-dense).

    p_ref : (K, TILE)      patches for this row tile (K = 27*Cin, tap-major)
    w_ref : (Cout, K)      full flattened weights (VMEM-resident, constant block)
    b_ref : (Cout, 1)      bias
    o_ref : (Cout, TILE)   output tile; TILE (multiple of 128) is the lane axis
    """
    y = jnp.dot(w_ref[...], p_ref[...], preferred_element_type=jnp.float32)
    y = y + b_ref[...]
    if apply_relu:
        y = jnp.maximum(y, 0.0)
    o_ref[...] = y.astype(o_ref.dtype)


def _maxpool_kernel(x_ref, o_ref):
    """x_ref: (8, C, TILE) stacked 2x2x2 window views -> o_ref: (C, TILE)."""
    o_ref[...] = jnp.max(x_ref[...], axis=0)


# --------------------------------------------------------------------------- #
# Wrappers
# --------------------------------------------------------------------------- #
def conv3d_3x3x3(x, w, b, *, relu=True, tile_rows=2048):
    """3x3x3 'same' conv, channel-first.

    x: (Cin, N, D, H, W); w: (27, Cin, Cout) (tap index = kz*9+ky*3+kx); b: (Cout,).
    Returns (Cout, N, D, H, W).
    """
    cin, n, d, h, wd = x.shape
    cout = w.shape[-1]
    k_dim = 27 * cin
    rows = n * d * h * wd

    # TODO(synk): wrapper-side im2col (27x activation read amplification); a
    # production kernel would stream halo'd slabs with in-kernel DMA instead.
    xp = jnp.pad(x, ((0, 0), (0, 0), (1, 1), (1, 1), (1, 1)))
    views = [
        xp[:, :, dz:dz + d, dy:dy + h, dx:dx + wd].reshape(cin, rows)
        for dz in range(3) for dy in range(3) for dx in range(3)
    ]
    patches = jnp.concatenate(views, axis=0)                 # (27*Cin, rows)
    w_flat = jnp.transpose(w, (2, 0, 1)).reshape(cout, k_dim)  # (Cout, 27*Cin)
    b2 = b.reshape(cout, 1)

    rows_p, tile = _choose_tile(rows, tile_rows)
    if rows_p != rows:
        patches = jnp.pad(patches, ((0, 0), (0, rows_p - rows)))

    flops = 2 * rows_p * k_dim * cout
    bytes_accessed = 4 * (k_dim * rows_p + cout * k_dim + cout + cout * rows_p)

    out = pl.pallas_call(
        functools.partial(_conv_kernel, apply_relu=relu),
        out_shape=jax.ShapeDtypeStruct((cout, rows_p), x.dtype),
        grid=(rows_p // tile,),
        in_specs=[
            pl.BlockSpec((k_dim, tile), lambda i: (0, i)),   # patches (per row tile)
            pl.BlockSpec((cout, k_dim), lambda i: (0, 0)),   # full weights, resident
            pl.BlockSpec((cout, 1), lambda i: (0, 0)),       # bias
        ],
        out_specs=pl.BlockSpec((cout, tile), lambda i: (0, i)),
        compiler_params=pltpu.CompilerParams(
            dimension_semantics=("parallel",),
        ),
        cost_estimate=pl.CostEstimate(
            flops=flops, transcendentals=0, bytes_accessed=bytes_accessed
        ),
    )(patches, w_flat, b2)

    return out[:, :rows].reshape(cout, n, d, h, wd)


def maxpool3d_2(x, *, tile_rows=2048):
    """nn.MaxPool3d(2): window 2, stride 2.  x: (C, N, D, H, W)."""
    c, n, d, h, w = x.shape
    do, ho, wo = d // 2, h // 2, w // 2
    rows = n * do * ho * wo
    views = [
        x[:, :, dz::2, dy::2, dx::2].reshape(c, rows)
        for dz in (0, 1) for dy in (0, 1) for dx in (0, 1)
    ]
    stacked = jnp.stack(views, axis=0)                       # (8, C, rows)

    rows_p, tile = _choose_tile(rows, tile_rows)
    if rows_p != rows:
        stacked = jnp.pad(stacked, ((0, 0), (0, 0), (0, rows_p - rows)))

    out = pl.pallas_call(
        _maxpool_kernel,
        out_shape=jax.ShapeDtypeStruct((c, rows_p), x.dtype),
        grid=(rows_p // tile,),
        in_specs=[pl.BlockSpec((8, c, tile), lambda i: (0, 0, i))],
        out_specs=pl.BlockSpec((c, tile), lambda i: (0, i)),
        compiler_params=pltpu.CompilerParams(dimension_semantics=("parallel",)),
    )(stacked)

    return out[:, :rows].reshape(c, n, do, ho, wo)


def upsample_nearest2x(x):
    # TODO(synk): nearest-neighbour upsample is pure data movement; done with
    # jnp.repeat in the wrapper rather than a dedicated Pallas kernel.
    x = jnp.repeat(x, 2, axis=2)
    x = jnp.repeat(x, 2, axis=3)
    return jnp.repeat(x, 2, axis=4)


def geo_processor(x, params):
    """x: (N, C, D, H, W) float32 -> (N, 1, D, H, W), matching GeoProcessor.forward."""
    v = jnp.transpose(x, (1, 0, 2, 3, 4))          # NCDHW -> CNDHW (channel-first)
    x0 = v
    v = conv3d_3x3x3(v, params["w1"], params["b1"], relu=True)
    v = maxpool3d_2(v)
    x1 = v
    v = conv3d_3x3x3(v, params["w2"], params["b2"], relu=True)
    v = maxpool3d_2(v)
    x2 = v
    v = conv3d_3x3x3(v, params["w3"], params["b3"], relu=True)
    v = maxpool3d_2(v)
    v = conv3d_3x3x3(v, params["w3_1"], params["b3_1"], relu=True)
    v = conv3d_3x3x3(v, params["w4"], params["b4"], relu=True)
    v = upsample_nearest2x(v)
    v = jnp.concatenate([v, x2], axis=0)           # TODO(synk): concat is wrapper-side
    v = conv3d_3x3x3(v, params["w5"], params["b5"], relu=True)
    v = upsample_nearest2x(v)
    v = jnp.concatenate([v, x1], axis=0)
    v = conv3d_3x3x3(v, params["w6"], params["b6"], relu=True)
    v = upsample_nearest2x(v)
    v = jnp.concatenate([v, x0], axis=0)
    v = conv3d_3x3x3(v, params["w7"], params["b7"], relu=True)
    v = conv3d_3x3x3(v, params["w8"], params["b8"], relu=False)
    return jnp.transpose(v, (1, 0, 2, 3, 4))       # CNDHW -> NCDHW


# --------------------------------------------------------------------------- #
# Parameters & pure-JAX reference
# --------------------------------------------------------------------------- #
def init_params(key, input_filters, base_filters, dtype=jnp.float32):
    specs = {
        "1":   (input_filters, base_filters),
        "2":   (base_filters, 2 * base_filters),
        "3":   (2 * base_filters, 4 * base_filters),
        "3_1": (4 * base_filters, 4 * base_filters),
        "4":   (4 * base_filters, 2 * base_filters),
        "5":   (4 * base_filters, base_filters),
        "6":   (2 * base_filters, input_filters),
        "7":   (2 * input_filters, input_filters),
        "8":   (input_filters, 1),
    }
    params = {}
    keys = jax.random.split(key, 2 * len(specs))
    for idx, (name, (cin, cout)) in enumerate(specs.items()):
        s = 1.0 / (27.0 * cin) ** 0.5
        params[f"w{name}"] = jax.random.uniform(keys[2 * idx], (27, cin, cout), dtype, -s, s)
        params[f"b{name}"] = jax.random.uniform(keys[2 * idx + 1], (cout,), dtype, -s, s)
    return params


def reference_forward(x, params):
    """Plain-JAX (XLA conv) reference mirroring the PyTorch forward."""
    act = lambda a: jnp.maximum(a, 0.0)

    def conv(v, w, b):
        k = w.reshape(3, 3, 3, w.shape[1], w.shape[2])
        y = jax.lax.conv_general_dilated(
            v, k, (1, 1, 1), "SAME",
            dimension_numbers=("NDHWC", "DHWIO", "NDHWC"),
            precision=jax.lax.Precision.HIGHEST)
        return y + b

    def pool(v):
        return jax.lax.reduce_window(
            v, -jnp.inf, jax.lax.max, (1, 2, 2, 2, 1), (1, 2, 2, 2, 1), "VALID")

    def up(v):
        v = jnp.repeat(v, 2, axis=1)
        v = jnp.repeat(v, 2, axis=2)
        return jnp.repeat(v, 2, axis=3)

    v = jnp.transpose(x, (0, 2, 3, 4, 1))
    x0 = v
    v = act(conv(v, params["w1"], params["b1"])); v = pool(v); x1 = v
    v = act(conv(v, params["w2"], params["b2"])); v = pool(v); x2 = v
    v = act(conv(v, params["w3"], params["b3"])); v = pool(v)
    v = act(conv(v, params["w3_1"], params["b3_1"]))
    v = act(conv(v, params["w4"], params["b4"]))
    v = up(v); v = jnp.concatenate([v, x2], axis=-1)
    v = act(conv(v, params["w5"], params["b5"]))
    v = up(v); v = jnp.concatenate([v, x1], axis=-1)
    v = act(conv(v, params["w6"], params["b6"]))
    v = up(v); v = jnp.concatenate([v, x0], axis=-1)
    v = act(conv(v, params["w7"], params["b7"]))
    v = conv(v, params["w8"], params["b8"])
    return jnp.transpose(v, (0, 4, 1, 2, 3))


if __name__ == "__main__":
    key = jax.random.PRNGKey(0)
    k_x, k_p = jax.random.split(key)

    batch, input_filters, base_filters, res = 2, 2, 4, 16
    x = jax.random.normal(k_x, (batch, input_filters, res, res, res), jnp.float32)
    params = init_params(k_p, input_filters, base_filters)

    out = jax.jit(geo_processor)(x, params)
    out = jax.block_until_ready(out)

    ref = reference_forward(x, params)
    assert out.shape == (batch, 1, res, res, res), out.shape
    max_err = float(jnp.max(jnp.abs(out - ref)))
    assert jnp.allclose(out, ref, atol=1e-3, rtol=1e-3), f"max_err={max_err}"

    print("KERNEL_OK")
</pallas_src>

<mosaic_0001>
module attributes {stable_mosaic.version = 11 : i64} {
  func.func @_conv_kernel(%arg0: i32, %arg1: memref<54x2048xf32, #tpu.memory_space<vmem>>, %arg2: memref<4x54xf32, #tpu.memory_space<vmem>>, %arg3: memref<4x1xf32, #tpu.memory_space<vmem>>, %arg4: memref<4x2048xf32, #tpu.memory_space<vmem>>) attributes {dimension_semantics = [#tpu.dimension_semantics<parallel>], iteration_bounds = array<i64: 4>, scalar_prefetch = 0 : i64, scratch_operands = 0 : i64, tpu.core_type = #tpu.core_type<tc>, window_params = [{transform_indices = @transform_0, window_bounds = array<i64: 54, 2048>}, {pipeline_mode = #tpu.pipeline_mode<synchronous>, transform_indices = @transform_1, window_bounds = array<i64: 4, 54>}, {pipeline_mode = #tpu.pipeline_mode<synchronous>, transform_indices = @transform_2, window_bounds = array<i64: 4, 1>}, {transform_indices = @transform_3, window_bounds = array<i64: 4, 2048>}]} {
    %c0 = arith.constant 0 : index
    %c0_0 = arith.constant 0 : index
    %0 = vector.load %arg2[%c0, %c0_0] : memref<4x54xf32, #tpu.memory_space<vmem>>, vector<4x54xf32>
    %c0_1 = arith.constant 0 : index
    %c0_2 = arith.constant 0 : index
    %1 = vector.load %arg1[%c0_1, %c0_2] : memref<54x2048xf32, #tpu.memory_space<vmem>>, vector<54x2048xf32>
    %cst = arith.constant dense<0.000000e+00> : vector<4x2048xf32>
    %2 = tpu.matmul %0, %1, %cst {dimension_numbers = #tpu.dot_dimension_numbers<[1], [0], [0], [1], [0, 0, 1, 1], [], []>} : vector<4x54xf32>, vector<54x2048xf32>, vector<4x2048xf32> -> vector<4x2048xf32>
    %c0_3 = arith.constant 0 : index
    %c0_4 = arith.constant 0 : index
    %3 = vector.load %arg3[%c0_3, %c0_4] : memref<4x1xf32, #tpu.memory_space<vmem>>, vector<4x1xf32>
    %4 = vector.broadcast %3 : vector<4x1xf32> to vector<4x2048xf32>
    %5 = arith.addf %2, %4 : vector<4x2048xf32>
    %cst_5 = arith.constant 0.000000e+00 : f32
    %6 = vector.broadcast %cst_5 : f32 to vector<4x2048xf32>
    %7 = arith.maximumf %5, %6 : vector<4x2048xf32>
    %c0_6 = arith.constant 0 : index
    %c0_7 = arith.constant 0 : index
    %8 = vector.load %arg4[%c0_6, %c0_7] : memref<4x2048xf32, #tpu.memory_space<vmem>>, vector<4x2048xf32>
    tpu.vector_store %arg4[%c0_6, %c0_7], %7 {strides = array<i32>} : memref<4x2048xf32, #tpu.memory_space<vmem>>, vector<4x2048xf32>,
    return
  }
  func.func @transform_0(%arg0: i32) -> (i32, i32) {
    %c0_i32 = arith.constant 0 : i32
    %c0_i32_0 = arith.constant 0 : i32
    return %c0_i32, %arg0 : i32, i32
  }
  func.func @transform_1(%arg0: i32) -> (i32, i32) {
    %c0_i32 = arith.constant 0 : i32
    %c0_i32_0 = arith.constant 0 : i32
    %c0_i32_1 = arith.constant 0 : i32
    return %c0_i32, %c0_i32_0 : i32, i32
  }
  func.func @transform_2(%arg0: i32) -> (i32, i32) {
    %c0_i32 = arith.constant 0 : i32
    %c0_i32_0 = arith.constant 0 : i32
    %c0_i32_1 = arith.constant 0 : i32
    return %c0_i32, %c0_i32_0 : i32, i32
  }
  func.func @transform_3(%arg0: i32) -> (i32, i32) {
    %c0_i32 = arith.constant 0 : i32
    %c0_i32_0 = arith.constant 0 : i32
    return %c0_i32, %arg0 : i32, i32
  }
}

module attributes {stable_mosaic.version = 11 : i64} {
  func.func @_maxpool_kernel(%arg0: i32, %arg1: memref<8x4x512xf32, #tpu.memory_space<vmem>>, %arg2: memref<4x512xf32, #tpu.memory_space<vmem>>) attributes {dimension_semantics = [#tpu.dimension_semantics<parallel>], iteration_bounds = array<i64: 2>, scalar_prefetch = 0 : i64, scratch_operands = 0 : i64, tpu.core_type = #tpu.core_type<tc>, window_params = [{transform_indices = @transform_0, window_bounds = array<i64: 8, 4, 512>}, {transform_indices = @transform_1, window_bounds = array<i64: 4, 512>}]} {
    %c0 = arith.constant 0 : index
    %c0_0 = arith.constant 0 : index
    %c0_1 = arith.constant 0 : index
    %0 = vector.load %arg1[%c0, %c0_0, %c0_1] : memref<8x4x512xf32, #tpu.memory_space<vmem>>, vector<8x4x512xf32>
    %cst = arith.constant dense<0xFF800000> : vector<4x512xf32>
    %1 = vector.multi_reduction <maximumf>, %0, %cst [0] : vector<8x4x512xf32> to vector<4x512xf32>
    %c0_2 = arith.constant 0 : index
    %c0_3 = arith.constant 0 : index
    %2 = vector.load %arg2[%c0_2, %c0_3] : memref<4x512xf32, #tpu.memory_space<vmem>>, vector<4x512xf32>
    tpu.vector_store %arg2[%c0_2, %c0_3], %1 {strides = array<i32>} : memref<4x512xf32, #tpu.memory_space<vmem>>, vector<4x512xf32>,
    return
  }
  func.func @transform_0(%arg0: i32) -> (i32, i32, i32) {
    %c0_i32 = arith.constant 0 : i32
    %c0_i32_0 = arith.constant 0 : i32
    %c0_i32_1 = arith.constant 0 : i32
    return %c0_i32, %c0_i32_0, %arg0 : i32, i32, i32
  }
  func.func @transform_1(%arg0: i32) -> (i32, i32) {
    %c0_i32 = arith.constant 0 : i32
    %c0_i32_0 = arith.constant 0 : i32
    return %c0_i32, %arg0 : i32, i32
  }
}

module attributes {stable_mosaic.version = 11 : i64} {
  func.func @_conv_kernel(%arg0: i32, %arg1: memref<108x512xf32, #tpu.memory_space<vmem>>, %arg2: memref<8x108xf32, #tpu.memory_space<vmem>>, %arg3: memref<8x1xf32, #tpu.memory_space<vmem>>, %arg4: memref<8x512xf32, #tpu.memory_space<vmem>>) attributes {dimension_semantics = [#tpu.dimension_semantics<parallel>], iteration_bounds = array<i64: 2>, scalar_prefetch = 0 : i64, scratch_operands = 0 : i64, tpu.core_type = #tpu.core_type<tc>, window_params = [{transform_indices = @transform_0, window_bounds = array<i64: 108, 512>}, {pipeline_mode = #tpu.pipeline_mode<synchronous>, transform_indices = @transform_1, window_bounds = array<i64: 8, 108>}, {pipeline_mode = #tpu.pipeline_mode<synchronous>, transform_indices = @transform_2, window_bounds = array<i64: 8, 1>}, {transform_indices = @transform_3, window_bounds = array<i64: 8, 512>}]} {
    %c0 = arith.constant 0 : index
    %c0_0 = arith.constant 0 : index
    %0 = vector.load %arg2[%c0, %c0_0] : memref<8x108xf32, #tpu.memory_space<vmem>>, vector<8x108xf32>
    %c0_1 = arith.constant 0 : index
    %c0_2 = arith.constant 0 : index
    %1 = vector.load %arg1[%c0_1, %c0_2] : memref<108x512xf32, #tpu.memory_space<vmem>>, vector<108x512xf32>
    %cst = arith.constant dense<0.000000e+00> : vector<8x512xf32>
    %2 = tpu.matmul %0, %1, %cst {dimension_numbers = #tpu.dot_dimension_numbers<[1], [0], [0], [1], [0, 0, 1, 1], [], []>} : vector<8x108xf32>, vector<108x512xf32>, vector<8x512xf32> -> vector<8x512xf32>
    %c0_3 = arith.constant 0 : index
    %c0_4 = arith.constant 0 : index
    %3 = vector.load %arg3[%c0_3, %c0_4] : memref<8x1xf32, #tpu.memory_space<vmem>>, vector<8x1xf32>
    %4 = vector.broadcast %3 : vector<8x1xf32> to vector<8x512xf32>
    %5 = arith.addf %2, %4 : vector<8x512xf32>
    %cst_5 = arith.constant 0.000000e+00 : f32
    %6 = vector.broadcast %cst_5 : f32 to vector<8x512xf32>
    %7 = arith.maximumf %5, %6 : vector<8x512xf32>
    %c0_6 = arith.constant 0 : index
    %c0_7 = arith.constant 0 : index
    %8 = vector.load %arg4[%c0_6, %c0_7] : memref<8x512xf32, #tpu.memory_space<vmem>>, vector<8x512xf32>
    tpu.vector_store %arg4[%c0_6, %c0_7], %7 {strides = array<i32>} : memref<8x512xf32, #tpu.memory_space<vmem>>, vector<8x512xf32>,
    return
  }
  func.func @transform_0(%arg0: i32) -> (i32, i32) {
    %c0_i32 = arith.constant 0 : i32
    %c0_i32_0 = arith.constant 0 : i32
    return %c0_i32, %arg0 : i32, i32
  }
  func.func @transform_1(%arg0: i32) -> (i32, i32) {
    %c0_i32 = arith.constant 0 : i32
    %c0_i32_0 = arith.constant 0 : i32
    %c0_i32_1 = arith.constant 0 : i32
    return %c0_i32, %c0_i32_0 : i32, i32
  }
  func.func @transform_2(%arg0: i32) -> (i32, i32) {
    %c0_i32 = arith.constant 0 : i32
    %c0_i32_0 = arith.constant 0 : i32
    %c0_i32_1 = arith.constant 0 : i32
    return %c0_i32, %c0_i32_0 : i32, i32
  }
  func.func @transform_3(%arg0: i32) -> (i32, i32) {
    %c0_i32 = arith.constant 0 : i32
    %c0_i32_0 = arith.constant 0 : i32
    return %c0_i32, %arg0 : i32, i32
  }
}

module attributes {stable_mosaic.version = 11 : i64} {
  func.func @_maxpool_kernel(%arg0: i32, %arg1: memref<8x8x128xf32, #tpu.memory_space<vmem>>, %arg2: memref<8x128xf32, #tpu.memory_space<vmem>>) attributes {dimension_semantics = [#tpu.dimension_semantics<parallel>], iteration_bounds = array<i64: 1>, scalar_prefetch = 0 : i64, scratch_operands = 0 : i64, tpu.core_type = #tpu.core_type<tc>, window_params = [{transform_indices = @transform_0, window_bounds = array<i64: 8, 8, 128>}, {transform_indices = @transform_1, window_bounds = array<i64: 8, 128>}]} {
    %c0 = arith.constant 0 : index
    %c0_0 = arith.constant 0 : index
    %c0_1 = arith.constant 0 : index
    %0 = vector.load %arg1[%c0, %c0_0, %c0_1] : memref<8x8x128xf32, #tpu.memory_space<vmem>>, vector<8x8x128xf32>
    %cst = arith.constant dense<0xFF800000> : vector<8x128xf32>
    %1 = vector.multi_reduction <maximumf>, %0, %cst [0] : vector<8x8x128xf32> to vector<8x128xf32>
    %c0_2 = arith.constant 0 : index
    %c0_3 = arith.constant 0 : index
    %2 = vector.load %arg2[%c0_2, %c0_3] : memref<8x128xf32, #tpu.memory_space<vmem>>, vector<8x128xf32>
    tpu.vector_store %arg2[%c0_2, %c0_3], %1 {strides = array<i32>} : memref<8x128xf32, #tpu.memory_space<vmem>>, vector<8x128xf32>,
    return
  }
  func.func @transform_0(%arg0: i32) -> (i32, i32, i32) {
    %c0_i32 = arith.constant 0 : i32
    %c0_i32_0 = arith.constant 0 : i32
    %c0_i32_1 = arith.constant 0 : i32
    return %c0_i32, %c0_i32_0, %arg0 : i32, i32, i32
  }
  func.func @transform_1(%arg0: i32) -> (i32, i32) {
    %c0_i32 = arith.constant 0 : i32
    %c0_i32_0 = arith.constant 0 : i32
    return %c0_i32, %arg0 : i32, i32
  }
}

module attributes {stable_mosaic.version = 11 : i64} {
  func.func @_conv_kernel(%arg0: i32, %arg1: memref<216x128xf32, #tpu.memory_space<vmem>>, %arg2: memref<16x216xf32, #tpu.memory_space<vmem>>, %arg3: memref<16x1xf32, #tpu.memory_space<vmem>>, %arg4: memref<16x128xf32, #tpu.memory_space<vmem>>) attributes {dimension_semantics = [#tpu.dimension_semantics<parallel>], iteration_bounds = array<i64: 1>, scalar_prefetch = 0 : i64, scratch_operands = 0 : i64, tpu.core_type = #tpu.core_type<tc>, window_params = [{transform_indices = @transform_0, window_bounds = array<i64: 216, 128>}, {pipeline_mode = #tpu.pipeline_mode<synchronous>, transform_indices = @transform_1, window_bounds = array<i64: 16, 216>}, {pipeline_mode = #tpu.pipeline_mode<synchronous>, transform_indices = @transform_2, window_bounds = array<i64: 16, 1>}, {transform_indices = @transform_3, window_bounds = array<i64: 16, 128>}]} {
    %c0 = arith.constant 0 : index
    %c0_0 = arith.constant 0 : index
    %0 = vector.load %arg2[%c0, %c0_0] : memref<16x216xf32, #tpu.memory_space<vmem>>, vector<16x216xf32>
    %c0_1 = arith.constant 0 : index
    %c0_2 = arith.constant 0 : index
    %1 = vector.load %arg1[%c0_1, %c0_2] : memref<216x128xf32, #tpu.memory_space<vmem>>, vector<216x128xf32>
    %cst = arith.constant dense<0.000000e+00> : vector<16x128xf32>
    %2 = tpu.matmul %0, %1, %cst {dimension_numbers = #tpu.dot_dimension_numbers<[1], [0], [0], [1], [0, 0, 1, 1], [], []>} : vector<16x216xf32>, vector<216x128xf32>, vector<16x128xf32> -> vector<16x128xf32>
    %c0_3 = arith.constant 0 : index
    %c0_4 = arith.constant 0 : index
    %3 = vector.load %arg3[%c0_3, %c0_4] : memref<16x1xf32, #tpu.memory_space<vmem>>, vector<16x1xf32>
    %4 = vector.broadcast %3 : vector<16x1xf32> to vector<16x128xf32>
    %5 = arith.addf %2, %4 : vector<16x128xf32>
    %cst_5 = arith.constant 0.000000e+00 : f32
    %6 = vector.broadcast %cst_5 : f32 to vector<16x128xf32>
    %7 = arith.maximumf %5, %6 : vector<16x128xf32>
    %c0_6 = arith.constant 0 : index
    %c0_7 = arith.constant 0 : index
    %8 = vector.load %arg4[%c0_6, %c0_7] : memref<16x128xf32, #tpu.memory_space<vmem>>, vector<16x128xf32>
    tpu.vector_store %arg4[%c0_6, %c0_7], %7 {strides = array<i32>} : memref<16x128xf32, #tpu.memory_space<vmem>>, vector<16x128xf32>,
    return
  }
  func.func @transform_0(%arg0: i32) -> (i32, i32) {
    %c0_i32 = arith.constant 0 : i32
    %c0_i32_0 = arith.constant 0 : i32
    return %c0_i32, %arg0 : i32, i32
  }
  func.func @transform_1(%arg0: i32) -> (i32, i32) {
    %c0_i32 = arith.constant 0 : i32
    %c0_i32_0 = arith.constant 0 : i32
    %c0_i32_1 = arith.constant 0 : i32
    return %c0_i32, %c0_i32_0 : i32, i32
  }
  func.func @transform_2(%arg0: i32) -> (i32, i32) {
    %c0_i32 = arith.constant 0 : i32
    %c0_i32_0 = arith.constant 0 : i32
    %c0_i32_1 = arith.constant 0 : i32
    return %c0_i32, %c0_i32_0 : i32, i32
  }
  func.func @transform_3(%arg0: i32) -> (i32, i32) {
    %c0_i32 = arith.constant 0 : i32
    %c0_i32_0 = arith.constant 0 : i32
    return %c0_i32, %arg0 : i32, i32
  }
}

module attributes {stable_mosaic.version = 11 : i64} {
  func.func @_maxpool_kernel(%arg0: i32, %arg1: memref<8x16x128xf32, #tpu.memory_space<vmem>>, %arg2: memref<16x128xf32, #tpu.memory_space<vmem>>) attributes {dimension_semantics = [#tpu.dimension_semantics<parallel>], iteration_bounds = array<i64: 1>, scalar_prefetch = 0 : i64, scratch_operands = 0 : i64, tpu.core_type = #tpu.core_type<tc>, window_params = [{transform_indices = @transform_0, window_bounds = array<i64: 8, 16, 128>}, {transform_indices = @transform_1, window_bounds = array<i64: 16, 128>}]} {
    %c0 = arith.constant 0 : index
    %c0_0 = arith.constant 0 : index
    %c0_1 = arith.constant 0 : index
    %0 = vector.load %arg1[%c0, %c0_0, %c0_1] : memref<8x16x128xf32, #tpu.memory_space<vmem>>, vector<8x16x128xf32>
    %cst = arith.constant dense<0xFF800000> : vector<16x128xf32>
    %1 = vector.multi_reduction <maximumf>, %0, %cst [0] : vector<8x16x128xf32> to vector<16x128xf32>
    %c0_2 = arith.constant 0 : index
    %c0_3 = arith.constant 0 : index
    %2 = vector.load %arg2[%c0_2, %c0_3] : memref<16x128xf32, #tpu.memory_space<vmem>>, vector<16x128xf32>
    tpu.vector_store %arg2[%c0_2, %c0_3], %1 {strides = array<i32>} : memref<16x128xf32, #tpu.memory_space<vmem>>, vector<16x128xf32>,
    return
  }
  func.func @transform_0(%arg0: i32) -> (i32, i32, i32) {
    %c0_i32 = arith.constant 0 : i32
    %c0_i32_0 = arith.constant 0 : i32
    %c0_i32_1 = arith.constant 0 : i32
    return %c0_i32, %c0_i32_0, %arg0 : i32, i32, i32
  }
  func.func @transform_1(%arg0: i32) -> (i32, i32) {
    %c0_i32 = arith.constant 0 : i32
    %c0_i32_0 = arith.constant 0 : i32
    return %c0_i32, %arg0 : i32, i32
  }
}

module attributes {stable_mosaic.version = 11 : i64} {
  func.func @_conv_kernel(%arg0: i32, %arg1: memref<432x128xf32, #tpu.memory_space<vmem>>, %arg2: memref<8x432xf32, #tpu.memory_space<vmem>>, %arg3: memref<8x1xf32, #tpu.memory_space<vmem>>, %arg4: memref<8x128xf32, #tpu.memory_space<vmem>>) attributes {dimension_semantics = [#tpu.dimension_semantics<parallel>], iteration_bounds = array<i64: 1>, scalar_prefetch = 0 : i64, scratch_operands = 0 : i64, tpu.core_type = #tpu.core_type<tc>, window_params = [{transform_indices = @transform_0, window_bounds = array<i64: 432, 128>}, {pipeline_mode = #tpu.pipeline_mode<synchronous>, transform_indices = @transform_1, window_bounds = array<i64: 8, 432>}, {pipeline_mode = #tpu.pipeline_mode<synchronous>, transform_indices = @transform_2, window_bounds = array<i64: 8, 1>}, {transform_indices = @transform_3, window_bounds = array<i64: 8, 128>}]} {
    %c0 = arith.constant 0 : index
    %c0_0 = arith.constant 0 : index
    %0 = vector.load %arg2[%c0, %c0_0] : memref<8x432xf32, #tpu.memory_space<vmem>>, vector<8x432xf32>
    %c0_1 = arith.constant 0 : index
    %c0_2 = arith.constant 0 : index
    %1 = vector.load %arg1[%c0_1, %c0_2] : memref<432x128xf32, #tpu.memory_space<vmem>>, vector<432x128xf32>
    %cst = arith.constant dense<0.000000e+00> : vector<8x128xf32>
    %2 = tpu.matmul %0, %1, %cst {dimension_numbers = #tpu.dot_dimension_numbers<[1], [0], [0], [1], [0, 0, 1, 1], [], []>} : vector<8x432xf32>, vector<432x128xf32>, vector<8x128xf32> -> vector<8x128xf32>
    %c0_3 = arith.constant 0 : index
    %c0_4 = arith.constant 0 : index
    %3 = vector.load %arg3[%c0_3, %c0_4] : memref<8x1xf32, #tpu.memory_space<vmem>>, vector<8x1xf32>
    %4 = vector.broadcast %3 : vector<8x1xf32> to vector<8x128xf32>
    %5 = arith.addf %2, %4 : vector<8x128xf32>
    %cst_5 = arith.constant 0.000000e+00 : f32
    %6 = vector.broadcast %cst_5 : f32 to vector<8x128xf32>
    %7 = arith.maximumf %5, %6 : vector<8x128xf32>
    %c0_6 = arith.constant 0 : index
    %c0_7 = arith.constant 0 : index
    %8 = vector.load %arg4[%c0_6, %c0_7] : memref<8x128xf32, #tpu.memory_space<vmem>>, vector<8x128xf32>
    tpu.vector_store %arg4[%c0_6, %c0_7], %7 {strides = array<i32>} : memref<8x128xf32, #tpu.memory_space<vmem>>, vector<8x128xf32>,
    return
  }
  func.func @transform_0(%arg0: i32) -> (i32, i32) {
    %c0_i32 = arith.constant 0 : i32
    %c0_i32_0 = arith.constant 0 : i32
    return %c0_i32, %arg0 : i32, i32
  }
  func.func @transform_1(%arg0: i32) -> (i32, i32) {
    %c0_i32 = arith.constant 0 : i32
    %c0_i32_0 = arith.constant 0 : i32
    %c0_i32_1 = arith.constant 0 : i32
    return %c0_i32, %c0_i32_0 : i32, i32
  }
  func.func @transform_2(%arg0: i32) -> (i32, i32) {
    %c0_i32 = arith.constant 0 : i32
    %c0_i32_0 = arith.constant 0 : i32
    %c0_i32_1 = arith.constant 0 : i32
    return %c0_i32, %c0_i32_0 : i32, i32
  }
  func.func @transform_3(%arg0: i32) -> (i32, i32) {
    %c0_i32 = arith.constant 0 : i32
    %c0_i32_0 = arith.constant 0 : i32
    return %c0_i32, %arg0 : i32, i32
  }
}

module attributes {stable_mosaic.version = 11 : i64} {
  func.func @_conv_kernel(%arg0: i32, %arg1: memref<432x128xf32, #tpu.memory_space<vmem>>, %arg2: memref<16x432xf32, #tpu.memory_space<vmem>>, %arg3: memref<16x1xf32, #tpu.memory_space<vmem>>, %arg4: memref<16x128xf32, #tpu.memory_space<vmem>>) attributes {dimension_semantics = [#tpu.dimension_semantics<parallel>], iteration_bounds = array<i64: 1>, scalar_prefetch = 0 : i64, scratch_operands = 0 : i64, tpu.core_type = #tpu.core_type<tc>, window_params = [{transform_indices = @transform_0, window_bounds = array<i64: 432, 128>}, {pipeline_mode = #tpu.pipeline_mode<synchronous>, transform_indices = @transform_1, window_bounds = array<i64: 16, 432>}, {pipeline_mode = #tpu.pipeline_mode<synchronous>, transform_indices = @transform_2, window_bounds = array<i64: 16, 1>}, {transform_indices = @transform_3, window_bounds = array<i64: 16, 128>}]} {
    %c0 = arith.constant 0 : index
    %c0_0 = arith.constant 0 : index
    %0 = vector.load %arg2[%c0, %c0_0] : memref<16x432xf32, #tpu.memory_space<vmem>>, vector<16x432xf32>
    %c0_1 = arith.constant 0 : index
    %c0_2 = arith.constant 0 : index
    %1 = vector.load %arg1[%c0_1, %c0_2] : memref<432x128xf32, #tpu.memory_space<vmem>>, vector<432x128xf32>
    %cst = arith.constant dense<0.000000e+00> : vector<16x128xf32>
    %2 = tpu.matmul %0, %1, %cst {dimension_numbers = #tpu.dot_dimension_numbers<[1], [0], [0], [1], [0, 0, 1, 1], [], []>} : vector<16x432xf32>, vector<432x128xf32>, vector<16x128xf32> -> vector<16x128xf32>
    %c0_3 = arith.constant 0 : index
    %c0_4 = arith.constant 0 : index
    %3 = vector.load %arg3[%c0_3, %c0_4] : memref<16x1xf32, #tpu.memory_space<vmem>>, vector<16x1xf32>
    %4 = vector.broadcast %3 : vector<16x1xf32> to vector<16x128xf32>
    %5 = arith.addf %2, %4 : vector<16x128xf32>
    %cst_5 = arith.constant 0.000000e+00 : f32
    %6 = vector.broadcast %cst_5 : f32 to vector<16x128xf32>
    %7 = arith.maximumf %5, %6 : vector<16x128xf32>
    %c0_6 = arith.constant 0 : index
    %c0_7 = arith.constant 0 : index
    %8 = vector.load %arg4[%c0_6, %c0_7] : memref<16x128xf32, #tpu.memory_space<vmem>>, vector<16x128xf32>
    tpu.vector_store %arg4[%c0_6, %c0_7], %7 {strides = array<i32>} : memref<16x128xf32, #tpu.memory_space<vmem>>, vector<16x128xf32>,
    return
  }
  func.func @transform_0(%arg0: i32) -> (i32, i32) {
    %c0_i32 = arith.constant 0 : i32
    %c0_i32_0 = arith.constant 0 : i32
    return %c0_i32, %arg0 : i32, i32
  }
  func.func @transform_1(%arg0: i32) -> (i32, i32) {
    %c0_i32 = arith.constant 0 : i32
    %c0_i32_0 = arith.constant 0 : i32
    %c0_i32_1 = arith.constant 0 : i32
    return %c0_i32, %c0_i32_0 : i32, i32
  }
  func.func @transform_2(%arg0: i32) -> (i32, i32) {
    %c0_i32 = arith.constant 0 : i32
    %c0_i32_0 = arith.constant 0 : i32
    %c0_i32_1 = arith.constant 0 : i32
    return %c0_i32, %c0_i32_0 : i32, i32
  }
  func.func @transform_3(%arg0: i32) -> (i32, i32) {
    %c0_i32 = arith.constant 0 : i32
    %c0_i32_0 = arith.constant 0 : i32
    return %c0_i32, %arg0 : i32, i32
  }
}

module attributes {stable_mosaic.version = 11 : i64} {
  func.func @_conv_kernel(%arg0: i32, %arg1: memref<432x128xf32, #tpu.memory_space<vmem>>, %arg2: memref<4x432xf32, #tpu.memory_space<vmem>>, %arg3: memref<4x1xf32, #tpu.memory_space<vmem>>, %arg4: memref<4x128xf32, #tpu.memory_space<vmem>>) attributes {dimension_semantics = [#tpu.dimension_semantics<parallel>], iteration_bounds = array<i64: 1>, scalar_prefetch = 0 : i64, scratch_operands = 0 : i64, tpu.core_type = #tpu.core_type<tc>, window_params = [{transform_indices = @transform_0, window_bounds = array<i64: 432, 128>}, {pipeline_mode = #tpu.pipeline_mode<synchronous>, transform_indices = @transform_1, window_bounds = array<i64: 4, 432>}, {pipeline_mode = #tpu.pipeline_mode<synchronous>, transform_indices = @transform_2, window_bounds = array<i64: 4, 1>}, {transform_indices = @transform_3, window_bounds = array<i64: 4, 128>}]} {
    %c0 = arith.constant 0 : index
    %c0_0 = arith.constant 0 : index
    %0 = vector.load %arg2[%c0, %c0_0] : memref<4x432xf32, #tpu.memory_space<vmem>>, vector<4x432xf32>
    %c0_1 = arith.constant 0 : index
    %c0_2 = arith.constant 0 : index
    %1 = vector.load %arg1[%c0_1, %c0_2] : memref<432x128xf32, #tpu.memory_space<vmem>>, vector<432x128xf32>
    %cst = arith.constant dense<0.000000e+00> : vector<4x128xf32>
    %2 = tpu.matmul %0, %1, %cst {dimension_numbers = #tpu.dot_dimension_numbers<[1], [0], [0], [1], [0, 0, 1, 1], [], []>} : vector<4x432xf32>, vector<432x128xf32>, vector<4x128xf32> -> vector<4x128xf32>
    %c0_3 = arith.constant 0 : index
    %c0_4 = arith.constant 0 : index
    %3 = vector.load %arg3[%c0_3, %c0_4] : memref<4x1xf32, #tpu.memory_space<vmem>>, vector<4x1xf32>
    %4 = vector.broadcast %3 : vector<4x1xf32> to vector<4x128xf32>
    %5 = arith.addf %2, %4 : vector<4x128xf32>
    %cst_5 = arith.constant 0.000000e+00 : f32
    %6 = vector.broadcast %cst_5 : f32 to vector<4x128xf32>
    %7 = arith.maximumf %5, %6 : vector<4x128xf32>
    %c0_6 = arith.constant 0 : index
    %c0_7 = arith.constant 0 : index
    %8 = vector.load %arg4[%c0_6, %c0_7] : memref<4x128xf32, #tpu.memory_space<vmem>>, vector<4x128xf32>
    tpu.vector_store %arg4[%c0_6, %c0_7], %7 {strides = array<i32>} : memref<4x128xf32, #tpu.memory_space<vmem>>, vector<4x128xf32>,
    return
  }
  func.func @transform_0(%arg0: i32) -> (i32, i32) {
    %c0_i32 = arith.constant 0 : i32
    %c0_i32_0 = arith.constant 0 : i32
    return %c0_i32, %arg0 : i32, i32
  }
  func.func @transform_1(%arg0: i32) -> (i32, i32) {
    %c0_i32 = arith.constant 0 : i32
    %c0_i32_0 = arith.constant 0 : i32
    %c0_i32_1 = arith.constant 0 : i32
    return %c0_i32, %c0_i32_0 : i32, i32
  }
  func.func @transform_2(%arg0: i32) -> (i32, i32) {
    %c0_i32 = arith.constant 0 : i32
    %c0_i32_0 = arith.constant 0 : i32
    %c0_i32_1 = arith.constant 0 : i32
    return %c0_i32, %c0_i32_0 : i32, i32
  }
  func.func @transform_3(%arg0: i32) -> (i32, i32) {
    %c0_i32 = arith.constant 0 : i32
    %c0_i32_0 = arith.constant 0 : i32
    return %c0_i32, %arg0 : i32, i32
  }
}

module attributes {stable_mosaic.version = 11 : i64} {
  func.func @_conv_kernel(%arg0: i32, %arg1: memref<216x512xf32, #tpu.memory_space<vmem>>, %arg2: memref<2x216xf32, #tpu.memory_space<vmem>>, %arg3: memref<2x1xf32, #tpu.memory_space<vmem>>, %arg4: memref<2x512xf32, #tpu.memory_space<vmem>>) attributes {dimension_semantics = [#tpu.dimension_semantics<parallel>], iteration_bounds = array<i64: 2>, scalar_prefetch = 0 : i64, scratch_operands = 0 : i64, tpu.core_type = #tpu.core_type<tc>, window_params = [{transform_indices = @transform_0, window_bounds = array<i64: 216, 512>}, {pipeline_mode = #tpu.pipeline_mode<synchronous>, transform_indices = @transform_1, window_bounds = array<i64: 2, 216>}, {pipeline_mode = #tpu.pipeline_mode<synchronous>, transform_indices = @transform_2, window_bounds = array<i64: 2, 1>}, {transform_indices = @transform_3, window_bounds = array<i64: 2, 512>}]} {
    %c0 = arith.constant 0 : index
    %c0_0 = arith.constant 0 : index
    %0 = vector.load %arg2[%c0, %c0_0] : memref<2x216xf32, #tpu.memory_space<vmem>>, vector<2x216xf32>
    %c0_1 = arith.constant 0 : index
    %c0_2 = arith.constant 0 : index
    %1 = vector.load %arg1[%c0_1, %c0_2] : memref<216x512xf32, #tpu.memory_space<vmem>>, vector<216x512xf32>
    %cst = arith.constant dense<0.000000e+00> : vector<2x512xf32>
    %2 = tpu.matmul %0, %1, %cst {dimension_numbers = #tpu.dot_dimension_numbers<[1], [0], [0], [1], [0, 0, 1, 1], [], []>} : vector<2x216xf32>, vector<216x512xf32>, vector<2x512xf32> -> vector<2x512xf32>
    %c0_3 = arith.constant 0 : index
    %c0_4 = arith.constant 0 : index
    %3 = vector.load %arg3[%c0_3, %c0_4] : memref<2x1xf32, #tpu.memory_space<vmem>>, vector<2x1xf32>
    %4 = vector.broadcast %3 : vector<2x1xf32> to vector<2x512xf32>
    %5 = arith.addf %2, %4 : vector<2x512xf32>
    %cst_5 = arith.constant 0.000000e+00 : f32
    %6 = vector.broadcast %cst_5 : f32 to vector<2x512xf32>
    %7 = arith.maximumf %5, %6 : vector<2x512xf32>
    %c0_6 = arith.constant 0 : index
    %c0_7 = arith.constant 0 : index
    %8 = vector.load %arg4[%c0_6, %c0_7] : memref<2x512xf32, #tpu.memory_space<vmem>>, vector<2x512xf32>
    tpu.vector_store %arg4[%c0_6, %c0_7], %7 {strides = array<i32>} : memref<2x512xf32, #tpu.memory_space<vmem>>, vector<2x512xf32>,
    return
  }
  func.func @transform_0(%arg0: i32) -> (i32, i32) {
    %c0_i32 = arith.constant 0 : i32
    %c0_i32_0 = arith.constant 0 : i32
    return %c0_i32, %arg0 : i32, i32
  }
  func.func @transform_1(%arg0: i32) -> (i32, i32) {
    %c0_i32 = arith.constant 0 : i32
    %c0_i32_0 = arith.constant 0 : i32
    %c0_i32_1 = arith.constant 0 : i32
    return %c0_i32, %c0_i32_0 : i32, i32
  }
  func.func @transform_2(%arg0: i32) -> (i32, i32) {
    %c0_i32 = arith.constant 0 : i32
    %c0_i32_0 = arith.constant 0 : i32
    %c0_i32_1 = arith.constant 0 : i32
    return %c0_i32, %c0_i32_0 : i32, i32
  }
  func.func @transform_3(%arg0: i32) -> (i32, i32) {
    %c0_i32 = arith.constant 0 : i32
    %c0_i32_0 = arith.constant 0 : i32
    return %c0_i32, %arg0 : i32, i32
  }
}

module attributes {stable_mosaic.version = 11 : i64} {
  func.func @_conv_kernel(%arg0: i32, %arg1: memref<108x2048xf32, #tpu.memory_space<vmem>>, %arg2: memref<2x108xf32, #tpu.memory_space<vmem>>, %arg3: memref<2x1xf32, #tpu.memory_space<vmem>>, %arg4: memref<2x2048xf32, #tpu.memory_space<vmem>>) attributes {dimension_semantics = [#tpu.dimension_semantics<parallel>], iteration_bounds = array<i64: 4>, scalar_prefetch = 0 : i64, scratch_operands = 0 : i64, tpu.core_type = #tpu.core_type<tc>, window_params = [{transform_indices = @transform_0, window_bounds = array<i64: 108, 2048>}, {pipeline_mode = #tpu.pipeline_mode<synchronous>, transform_indices = @transform_1, window_bounds = array<i64: 2, 108>}, {pipeline_mode = #tpu.pipeline_mode<synchronous>, transform_indices = @transform_2, window_bounds = array<i64: 2, 1>}, {transform_indices = @transform_3, window_bounds = array<i64: 2, 2048>}]} {
    %c0 = arith.constant 0 : index
    %c0_0 = arith.constant 0 : index
    %0 = vector.load %arg2[%c0, %c0_0] : memref<2x108xf32, #tpu.memory_space<vmem>>, vector<2x108xf32>
    %c0_1 = arith.constant 0 : index
    %c0_2 = arith.constant 0 : index
    %1 = vector.load %arg1[%c0_1, %c0_2] : memref<108x2048xf32, #tpu.memory_space<vmem>>, vector<108x2048xf32>
    %cst = arith.constant dense<0.000000e+00> : vector<2x2048xf32>
    %2 = tpu.matmul %0, %1, %cst {dimension_numbers = #tpu.dot_dimension_numbers<[1], [0], [0], [1], [0, 0, 1, 1], [], []>} : vector<2x108xf32>, vector<108x2048xf32>, vector<2x2048xf32> -> vector<2x2048xf32>
    %c0_3 = arith.constant 0 : index
    %c0_4 = arith.constant 0 : index
    %3 = vector.load %arg3[%c0_3, %c0_4] : memref<2x1xf32, #tpu.memory_space<vmem>>, vector<2x1xf32>
    %4 = vector.broadcast %3 : vector<2x1xf32> to vector<2x2048xf32>
    %5 = arith.addf %2, %4 : vector<2x2048xf32>
    %cst_5 = arith.constant 0.000000e+00 : f32
    %6 = vector.broadcast %cst_5 : f32 to vector<2x2048xf32>
    %7 = arith.maximumf %5, %6 : vector<2x2048xf32>
    %c0_6 = arith.constant 0 : index
    %c0_7 = arith.constant 0 : index
    %8 = vector.load %arg4[%c0_6, %c0_7] : memref<2x2048xf32, #tpu.memory_space<vmem>>, vector<2x2048xf32>
    tpu.vector_store %arg4[%c0_6, %c0_7], %7 {strides = array<i32>} : memref<2x2048xf32, #tpu.memory_space<vmem>>, vector<2x2048xf32>,
    return
  }
  func.func @transform_0(%arg0: i32) -> (i32, i32) {
    %c0_i32 = arith.constant 0 : i32
    %c0_i32_0 = arith.constant 0 : i32
    return %c0_i32, %arg0 : i32, i32
  }
  func.func @transform_1(%arg0: i32) -> (i32, i32) {
    %c0_i32 = arith.constant 0 : i32
    %c0_i32_0 = arith.constant 0 : i32
    %c0_i32_1 = arith.constant 0 : i32
    return %c0_i32, %c0_i32_0 : i32, i32
  }
  func.func @transform_2(%arg0: i32) -> (i32, i32) {
    %c0_i32 = arith.constant 0 : i32
    %c0_i32_0 = arith.constant 0 : i32
    %c0_i32_1 = arith.constant 0 : i32
    return %c0_i32, %c0_i32_0 : i32, i32
  }
  func.func @transform_3(%arg0: i32) -> (i32, i32) {
    %c0_i32 = arith.constant 0 : i32
    %c0_i32_0 = arith.constant 0 : i32
    return %c0_i32, %arg0 : i32, i32
  }
}

module attributes {stable_mosaic.version = 11 : i64} {
  func.func @_conv_kernel(%arg0: i32, %arg1: memref<54x2048xf32, #tpu.memory_space<vmem>>, %arg2: memref<1x54xf32, #tpu.memory_space<vmem>>, %arg3: memref<1x1xf32, #tpu.memory_space<vmem>>, %arg4: memref<1x2048xf32, #tpu.memory_space<vmem>>) attributes {dimension_semantics = [#tpu.dimension_semantics<parallel>], iteration_bounds = array<i64: 4>, scalar_prefetch = 0 : i64, scratch_operands = 0 : i64, tpu.core_type = #tpu.core_type<tc>, window_params = [{transform_indices = @transform_0, window_bounds = array<i64: 54, 2048>}, {pipeline_mode = #tpu.pipeline_mode<synchronous>, transform_indices = @transform_1, window_bounds = array<i64: 1, 54>}, {pipeline_mode = #tpu.pipeline_mode<synchronous>, transform_indices = @transform_2, window_bounds = array<i64: 1, 1>}, {transform_indices = @transform_3, window_bounds = array<i64: 1, 2048>}]} {
    %c0 = arith.constant 0 : index
    %c0_0 = arith.constant 0 : index
    %0 = vector.load %arg2[%c0, %c0_0] : memref<1x54xf32, #tpu.memory_space<vmem>>, vector<1x54xf32>
    %c0_1 = arith.constant 0 : index
    %c0_2 = arith.constant 0 : index
    %1 = vector.load %arg1[%c0_1, %c0_2] : memref<54x2048xf32, #tpu.memory_space<vmem>>, vector<54x2048xf32>
    %cst = arith.constant dense<0.000000e+00> : vector<1x2048xf32>
    %2 = tpu.matmul %0, %1, %cst {dimension_numbers = #tpu.dot_dimension_numbers<[1], [0], [0], [1], [0, 0, 1, 1], [], []>} : vector<1x54xf32>, vector<54x2048xf32>, vector<1x2048xf32> -> vector<1x2048xf32>
    %c0_3 = arith.constant 0 : index
    %c0_4 = arith.constant 0 : index
    %3 = vector.load %arg3[%c0_3, %c0_4] : memref<1x1xf32, #tpu.memory_space<vmem>>, vector<1x1xf32>
    %4 = vector.broadcast %3 : vector<1x1xf32> to vector<1x2048xf32>
    %5 = arith.addf %2, %4 : vector<1x2048xf32>
    %c0_5 = arith.constant 0 : index
    %c0_6 = arith.constant 0 : index
    %6 = vector.load %arg4[%c0_5, %c0_6] : memref<1x2048xf32, #tpu.memory_space<vmem>>, vector<1x2048xf32>
    tpu.vector_store %arg4[%c0_5, %c0_6], %5 {strides = array<i32>} : memref<1x2048xf32, #tpu.memory_space<vmem>>, vector<1x2048xf32>,
    return
  }
  func.func @transform_0(%arg0: i32) -> (i32, i32) {
    %c0_i32 = arith.constant 0 : i32
    %c0_i32_0 = arith.constant 0 : i32
    return %c0_i32, %arg0 : i32, i32
  }
  func.func @transform_1(%arg0: i32) -> (i32, i32) {
    %c0_i32 = arith.constant 0 : i32
    %c0_i32_0 = arith.constant 0 : i32
    %c0_i32_1 = arith.constant 0 : i32
    return %c0_i32, %c0_i32_0 : i32, i32
  }
  func.func @transform_2(%arg0: i32) -> (i32, i32) {
    %c0_i32 = arith.constant 0 : i32
    %c0_i32_0 = arith.constant 0 : i32
    %c0_i32_1 = arith.constant 0 : i32
    return %c0_i32, %c0_i32_0 : i32, i32
  }
  func.func @transform_3(%arg0: i32) -> (i32, i32) {
    %c0_i32 = arith.constant 0 : i32
    %c0_i32_0 = arith.constant 0 : i32
    return %c0_i32, %arg0 : i32, i32
  }
}

</mosaic_0001>

<bundles_post_ra>
// kernel: geo_processor.12
= control target key start
LH: loop header
LB: loop body
LE: loop exit
PB: predicated region body
PF: predicated region fallthrough
CT: control target
= control target key end

     0   :  { %s1151_s12 = smov 0   ;;  %s1153_s13 = smov 0   ;;  %s1619_s0 = inlined_call_operand.vmem [shape: f32[54,8192], index: 0, kind: input, shape index: {}]   ;;  %s1620_s1 = inlined_call_operand.vmem [shape: f32[4,54], index: 1, kind: input, shape index: {}]   ;;  %s1621_s2 = inlined_call_operand.vmem [shape: f32[4,1], index: 2, kind: input, shape index: {}]   ;;  %s1622_s3 = inlined_call_operand.vmem [shape: f32[4,8192], index: 3, kind: output, shape index: {}]  }
   0x1   :  { %s1155_s14 = smov 0  }
   0x2 LB: > { %s1034_s15 = sadd.s32 4294967295, %s1128_s14   ;;  %s1168_s16 = sadd.s32 1, %s1128_s14   ;;  %s1128_s14 = sphi %s1155_s14, %s1625_s14   ;;  %s1124_s13 = sphi %s1153_s13, %s1624_s13   ;;  %s1120_s12 = sphi %s1151_s12, %s1623_s12  }
   0x3   : > { %s17_s17 = ssub.s32 %s1128_s14, %s1168_s16  ;;  %s20_s18 = sadd.s32 1, %s1124_s13 }
   0x4   : > { %p18_p0 = scmp.eq.s32.totalorder %s17_s17, 0  ;;  %p27_p1 = scmp.ne.s32.totalorder %s1124_s13, %s1120_s12 }
   0x5   : > { %p28_p2 = scmp.eq.s32.totalorder %s1128_s14, 0  ;;  %p1037_p4 = scmp.ge.s32.totalorder %s1128_s14, 4 }
   0x6   : > { %s1177_s19 = scalar_select %p18_p0, %s1124_s13, %s20_s18  }
   0x7   : > { %p29_p3 = por %p28_p2, %p27_p1  ;;  %127 = sbr.rel (%p1037_p4) target bundleno = 128 (0x80), region = 24 }
   0xc   : > { %130 = sbr.rel (!%p29_p3) target bundleno = 128 (0x80), region = 28  ;;  %s132_s20 = sand.u32 (%p29_p3), 1, %s1124_s13  }
   0xd   : > { %s1077_s21 = sshll.u32 (%p29_p3), %s1128_s14, 7  ;;  %s1078_s22 = smul.u32 (%p29_p3), 896, %s132_s20 }
   0xe   : > { %s1185_s25 = scalar_lea.vmem (%p29_p3), %s1619_s0, %s1077_s21 }
   0xf   : > { %v150_v0 = vld [vmem:[%s1185_s25] sm:$0xff] (%p29_p3)  ;;  %v152_v1 = vld [vmem:[%s1185_s25 + $0x8] sm:$0xff] (%p29_p3)  ;;  %v154_v2 = vld [vmem:[%s1185_s25 + $0x10] sm:$0xff] (%p29_p3)  ;;  %s1190_s26 = scalar_lea.vmem (%p29_p3), [#allocation2], %s1078_s22 }
  0x10   : > { %151 = vst [vmem:[%s1190_s26] sm:$0xff] (%p29_p3), %v150_v0  ;;  %v156_v3 = vld [vmem:[%s1185_s25 + $0x18] sm:$0xff] (%p29_p3)  ;;  %v158_v4 = vld [vmem:[%s1185_s25 + $0x20] sm:$0xff] (%p29_p3)  ;;  %v160_v5 = vld [vmem:[%s1185_s25 + $0x28] sm:$0xff] (%p29_p3) }
  0x11   : > { %153 = vst [vmem:[%s1190_s26 + $0x8] sm:$0xff] %v152_v1  ;;  %v162_v6 = vld [vmem:[%s1185_s25 + $0x30] sm:$0xff]  ;;  %v164_v7 = vld [vmem:[%s1185_s25 + $0x38] sm:$0xff]  ;;  %v166_v8 = vld [vmem:[%s1185_s25 + $0x40] sm:$0xff] }
  0x12   : > { %155 = vst [vmem:[%s1190_s26 + $0x10] sm:$0xff] %v154_v2  ;;  %v168_v9 = vld [vmem:[%s1185_s25 + $0x48] sm:$0xff]  ;;  %v170_v10 = vld [vmem:[%s1185_s25 + $0x50] sm:$0xff]  ;;  %v172_v11 = vld [vmem:[%s1185_s25 + $0x58] sm:$0xff] }
  0x13   : > { %157 = vst [vmem:[%s1190_s26 + $0x18] sm:$0xff] %v156_v3  ;;  %v174_v12 = vld [vmem:[%s1185_s25 + $0x60] sm:$0xff]  ;;  %v176_v13 = vld [vmem:[%s1185_s25 + $0x68] sm:$0xff]  ;;  %v178_v14 = vld [vmem:[%s1185_s25 + $0x70] sm:$0xff] }
  0x14   : > { %159 = vst [vmem:[%s1190_s26 + $0x20] sm:$0xff] %v158_v4  ;;  %v180_v15 = vld [vmem:[%s1185_s25 + $0x78] sm:$0xff]  ;;  %v182_v16 = vld [vmem:[%s1185_s25 + $0x200] sm:$0xff]  ;;  %v184_v17 = vld [vmem:[%s1185_s25 + $0x208] sm:$0xff] }
  0x15   : > { %161 = vst [vmem:[%s1190_s26 + $0x28] sm:$0xff] %v160_v5  ;;  %v186_v18 = vld [vmem:[%s1185_s25 + $0x210] sm:$0xff]  ;;  %v188_v19 = vld [vmem:[%s1185_s25 + $0x218] sm:$0xff]  ;;  %v190_v20 = vld [vmem:[%s1185_s25 + $0x220] sm:$0xff] }
  0x16   : > { %163 = vst [vmem:[%s1190_s26 + $0x30] sm:$0xff] %v162_v6  ;;  %v192_v21 = vld [vmem:[%s1185_s25 + $0x228] sm:$0xff]  ;;  %v194_v22 = vld [vmem:[%s1185_s25 + $0x230] sm:$0xff]  ;;  %v196_v23 = vld [vmem:[%s1185_s25 + $0x238] sm:$0xff] }
  0x17   : > { %165 = vst [vmem:[%s1190_s26 + $0x38] sm:$0xff] %v164_v7  ;;  %v198_v24 = vld [vmem:[%s1185_s25 + $0x240] sm:$0xff]  ;;  %v200_v25 = vld [vmem:[%s1185_s25 + $0x248] sm:$0xff]  ;;  %v202_v26 = vld [vmem:[%s1185_s25 + $0x250] sm:$0xff] }
  0x18   : > { %167 = vst [vmem:[%s1190_s26 + $0x40] sm:$0xff] %v166_v8  ;;  %v204_v27 = vld [vmem:[%s1185_s25 + $0x258] sm:$0xff]  ;;  %v206_v28 = vld [vmem:[%s1185_s25 + $0x260] sm:$0xff]  ;;  %v208_v29 = vld [vmem:[%s1185_s25 + $0x268] sm:$0xff] }
  0x19   : > { %169 = vst [vmem:[%s1190_s26 + $0x48] sm:$0xff] %v168_v9  ;;  %v210_v30 = vld [vmem:[%s1185_s25 + $0x270] sm:$0xff]  ;;  %v212_v31 = vld [vmem:[%s1185_s25 + $0x278] sm:$0xff]  ;;  %v214_v32 = vld [vmem:[%s1185_s25 + $0x400] sm:$0xff] }
  0x1a   : > { %171 = vst [vmem:[%s1190_s26 + $0x50] sm:$0xff] %v170_v10  ;;  %v216_v33 = vld [vmem:[%s1185_s25 + $0x408] sm:$0xff]  ;;  %v218_v34 = vld [vmem:[%s1185_s25 + $0x410] sm:$0xff]  ;;  %v220_v35 = vld [vmem:[%s1185_s25 + $0x418] sm:$0xff] }
  0x1b   : > { %173 = vst [vmem:[%s1190_s26 + $0x58] sm:$0xff] %v172_v11  ;;  %v222_v36 = vld [vmem:[%s1185_s25 + $0x420] sm:$0xff]  ;;  %v224_v37 = vld [vmem:[%s1185_s25 + $0x428] sm:$0xff]  ;;  %v226_v38 = vld [vmem:[%s1185_s25 + $0x430] sm:$0xff] }
  0x1c   : > { %175 = vst [vmem:[%s1190_s26 + $0x60] sm:$0xff] %v174_v12  ;;  %v228_v39 = vld [vmem:[%s1185_s25 + $0x438] sm:$0xff]  ;;  %v230_v40 = vld [vmem:[%s1185_s25 + $0x440] sm:$0xff]  ;;  %v232_v41 = vld [vmem:[%s1185_s25 + $0x448] sm:$0xff] }
  0x1d   : > { %177 = vst [vmem:[%s1190_s26 + $0x68] sm:$0xff] %v176_v13  ;;  %v234_v42 = vld [vmem:[%s1185_s25 + $0x450] sm:$0xff]  ;;  %v236_v43 = vld [vmem:[%s1185_s25 + $0x458] sm:$0xff]  ;;  %v238_v44 = vld [vmem:[%s1185_s25 + $0x460] sm:$0xff] }
  0x1e   : > { %179 = vst [vmem:[%s1190_s26 + $0x70] sm:$0xff] %v178_v14  ;;  %v240_v45 = vld [vmem:[%s1185_s25 + $0x468] sm:$0xff]  ;;  %v242_v46 = vld [vmem:[%s1185_s25 + $0x470] sm:$0xff]  ;;  %v244_v47 = vld [vmem:[%s1185_s25 + $0x478] sm:$0xff] }
  0x1f   : > { %181 = vst [vmem:[%s1190_s26 + $0x78] sm:$0xff] %v180_v15  ;;  %v246_v48 = vld [vmem:[%s1185_s25 + $0x600] sm:$0xff]  ;;  %v248_v49 = vld [vmem:[%s1185_s25 + $0x608] sm:$0xff]  ;;  %v250_v50 = vld [vmem:[%s1185_s25 + $0x610] sm:$0xff] }
  0x20   : > { %183 = vst [vmem:[%s1190_s26 + $0x80] sm:$0xff] %v182_v16  ;;  %v252_v51 = vld [vmem:[%s1185_s25 + $0x618] sm:$0xff]  ;;  %v254_v52 = vld [vmem:[%s1185_s25 + $0x620] sm:$0xff]  ;;  %v256_v53 = vld [vmem:[%s1185_s25 + $0x628] sm:$0xff] }
  0x21   : > { %185 = vst [vmem:[%s1190_s26 + $0x88] sm:$0xff] %v184_v17  ;;  %v258_v54 = vld [vmem:[%s1185_s25 + $0x630] sm:$0xff]  ;;  %v260_v55 = vld [vmem:[%s1185_s25 + $0x638] sm:$0xff]  ;;  %v262_v56 = vld [vmem:[%s1185_s25 + $0x640] sm:$0xff] }
  0x22   : > { %187 = vst [vmem:[%s1190_s26 + $0x90] sm:$0xff] %v186_v18  ;;  %v264_v57 = vld [vmem:[%s1185_s25 + $0x648] sm:$0xff]  ;;  %v266_v58 = vld [vmem:[%s1185_s25 + $0x650] sm:$0xff]  ;;  %v268_v59 = vld [vmem:[%s1185_s25 + $0x658] sm:$0xff] }
  0x23   : > { %189 = vst [vmem:[%s1190_s26 + $0x98] sm:$0xff] %v188_v19  ;;  %v270_v60 = vld [vmem:[%s1185_s25 + $0x660] sm:$0xff]  ;;  %v272_v61 = vld [vmem:[%s1185_s25 + $0x668] sm:$0xff]  ;;  %v274_v62 = vld [vmem:[%s1185_s25 + $0x670] sm:$0xff] }
  0x24   : > { %191 = vst [vmem:[%s1190_s26 + $0xa0] sm:$0xff] %v190_v20  ;;  %v276_v63 = vld [vmem:[%s1185_s25 + $0x678] sm:$0xff]  ;;  %v278_v0 = vld [vmem:[%s1185_s25 + $0x800] sm:$0xff]  ;;  %v280_v1 = vld [vmem:[%s1185_s25 + $0x808] sm:$0xff] }
  0x25   : > { %193 = vst [vmem:[%s1190_s26 + $0xa8] sm:$0xff] %v192_v21  ;;  %v282_v2 = vld [vmem:[%s1185_s25 + $0x810] sm:$0xff]  ;;  %v284_v3 = vld [vmem:[%s1185_s25 + $0x818] sm:$0xff]  ;;  %v286_v4 = vld [vmem:[%s1185_s25 + $0x820] sm:$0xff] }
  0x26   : > { %195 = vst [vmem:[%s1190_s26 + $0xb0] sm:$0xff] %v194_v22  ;;  %v288_v5 = vld [vmem:[%s1185_s25 + $0x828] sm:$0xff]  ;;  %v290_v6 = vld [vmem:[%s1185_s25 + $0x830] sm:$0xff]  ;;  %v292_v7 = vld [vmem:[%s1185_s25 + $0x838] sm:$0xff] }
  0x27   : > { %197 = vst [vmem:[%s1190_s26 + $0xb8] sm:$0xff] %v196_v23  ;;  %v294_v8 = vld [vmem:[%s1185_s25 + $0x840] sm:$0xff]  ;;  %v296_v9 = vld [vmem:[%s1185_s25 + $0x848] sm:$0xff]  ;;  %v298_v10 = vld [vmem:[%s1185_s25 + $0x850] sm:$0xff] }
  0x28   : > { %199 = vst [vmem:[%s1190_s26 + $0xc0] sm:$0xff] %v198_v24  ;;  %v300_v11 = vld [vmem:[%s1185_s25 + $0x858] sm:$0xff]  ;;  %v302_v12 = vld [vmem:[%s1185_s25 + $0x860] sm:$0xff]  ;;  %v304_v13 = vld [vmem:[%s1185_s25 + $0x868] sm:$0xff] }
  0x29   : > { %201 = vst [vmem:[%s1190_s26 + $0xc8] sm:$0xff] %v200_v25  ;;  %v306_v14 = vld [vmem:[%s1185_s25 + $0x870] sm:$0xff]  ;;  %v308_v15 = vld [vmem:[%s1185_s25 + $0x878] sm:$0xff]  ;;  %v310_v16 = vld [vmem:[%s1185_s25 + $0xa00] sm:$0xff] }
  0x2a   : > { %203 = vst [vmem:[%s1190_s26 + $0xd0] sm:$0xff] %v202_v26  ;;  %v312_v17 = vld [vmem:[%s1185_s25 + $0xa08] sm:$0xff]  ;;  %v314_v18 = vld [vmem:[%s1185_s25 + $0xa10] sm:$0xff]  ;;  %v316_v19 = vld [vmem:[%s1185_s25 + $0xa18] sm:$0xff] }
  0x2b   : > { %205 = vst [vmem:[%s1190_s26 + $0xd8] sm:$0xff] %v204_v27  ;;  %v318_v20 = vld [vmem:[%s1185_s25 + $0xa20] sm:$0xff]  ;;  %v320_v21 = vld [vmem:[%s1185_s25 + $0xa28] sm:$0xff]  ;;  %v322_v22 = vld [vmem:[%s1185_s25 + $0xa30] sm:$0xff] }
  0x2c   : > { %207 = vst [vmem:[%s1190_s26 + $0xe0] sm:$0xff] %v206_v28  ;;  %v324_v23 = vld [vmem:[%s1185_s25 + $0xa38] sm:$0xff]  ;;  %v326_v24 = vld [vmem:[%s1185_s25 + $0xa40] sm:$0xff]  ;;  %v328_v25 = vld [vmem:[%s1185_s25 + $0xa48] sm:$0xff] }
  0x2d   : > { %209 = vst [vmem:[%s1190_s26 + $0xe8] sm:$0xff] %v208_v29  ;;  %v330_v26 = vld [vmem:[%s1185_s25 + $0xa50] sm:$0xff]  ;;  %v332_v27 = vld [vmem:[%s1185_s25 + $0xa58] sm:$0xff]  ;;  %v334_v28 = vld [vmem:[%s1185_s25 + $0xa60] sm:$0xff] }
  0x2e   : > { %211 = vst [vmem:[%s1190_s26 + $0xf0] sm:$0xff] %v210_v30  ;;  %v336_v29 = vld [vmem:[%s1185_s25 + $0xa68] sm:$0xff]  ;;  %v338_v30 = vld [vmem:[%s1185_s25 + $0xa70] sm:$0xff] }
  0x2f   : > { %213 = vst [vmem:[%s1190_s26 + $0xf8] sm:$0xff] %v212_v31  ;;  %v340_v31 = vld [vmem:[%s1185_s25 + $0xa78] sm:$0xff] }
  0x30   : > { %215 = vst [vmem:[%s1190_s26 + $0x100] sm:$0xff] %v214_v32  ;;  %v342_v32 = vld [vmem:[%s1185_s25 + $0xc00] sm:$0xff] }
  0x31   : > { %217 = vst [vmem:[%s1190_s26 + $0x108] sm:$0xff] %v216_v33  ;;  %v344_v33 = vld [vmem:[%s1185_s25 + $0xc08] sm:$0xff] }
  0x32   : > { %219 = vst [vmem:[%s1190_s26 + $0x110] sm:$0xff] %v218_v34  ;;  %v346_v34 = vld [vmem:[%s1185_s25 + $0xc10] sm:$0xff] }
  0x33   : > { %221 = vst [vmem:[%s1190_s26 + $0x118] sm:$0xff] %v220_v35  ;;  %v348_v35 = vld [vmem:[%s1185_s25 + $0xc18] sm:$0xff] }
  0x34   : > { %223 = vst [vmem:[%s1190_s26 + $0x120] sm:$0xff] %v222_v36  ;;  %v350_v36 = vld [vmem:[%s1185_s25 + $0xc20] sm:$0xff] }
  0x35   : > { %225 = vst [vmem:[%s1190_s26 + $0x128] sm:$0xff] %v224_v37  ;;  %v352_v37 = vld [vmem:[%s1185_s25 + $0xc28] sm:$0xff] }
  0x36   : > { %227 = vst [vmem:[%s1190_s26 + $0x130] sm:$0xff] %v226_v38  ;;  %v354_v38 = vld [vmem:[%s1185_s25 + $0xc30] sm:$0xff] }
  0x37   : > { %229 = vst [vmem:[%s1190_s26 + $0x138] sm:$0xff] %v228_v39  ;;  %v356_v39 = vld [vmem:[%s1185_s25 + $0xc38] sm:$0xff] }
  0x38   : > { %231 = vst [vmem:[%s1190_s26 + $0x140] sm:$0xff] %v230_v40  ;;  %v358_v40 = vld [vmem:[%s1185_s25 + $0xc40] sm:$0xff] }
  0x39   : > { %233 = vst [vmem:[%s1190_s26 + $0x148] sm:$0xff] %v232_v41  ;;  %v360_v41 = vld [vmem:[%s1185_s25 + $0xc48] sm:$0xff] }
  0x3a   : > { %235 = vst [vmem:[%s1190_s26 + $0x150] sm:$0xff] %v234_v42  ;;  %v362_v42 = vld [vmem:[%s1185_s25 + $0xc50] sm:$0xff] }
  0x3b   : > { %237 = vst [vmem:[%s1190_s26 + $0x158] sm:$0xff] %v236_v43  ;;  %v364_v43 = vld [vmem:[%s1185_s25 + $0xc58] sm:$0xff] }
  0x3c   : > { %239 = vst [vmem:[%s1190_s26 + $0x160] sm:$0xff] %v238_v44  ;;  %v366_v44 = vld [vmem:[%s1185_s25 + $0xc60] sm:$0xff] }
  0x3d   : > { %241 = vst [vmem:[%s1190_s26 + $0x168] sm:$0xff] %v240_v45  ;;  %v368_v45 = vld [vmem:[%s1185_s25 + $0xc68] sm:$0xff] }
  0x3e   : > { %243 = vst [vmem:[%s1190_s26 + $0x170] sm:$0xff] %v242_v46  ;;  %v370_v46 = vld [vmem:[%s1185_s25 + $0xc70] sm:$0xff] }
  0x3f   : > { %245 = vst [vmem:[%s1190_s26 + $0x178] sm:$0xff] %v244_v47  ;;  %v372_v47 = vld [vmem:[%s1185_s25 + $0xc78] sm:$0xff] }
  0x40   : > { %247 = vst [vmem:[%s1190_s26 + $0x180] sm:$0xff] %v246_v48 }
  0x41   : > { %249 = vst [vmem:[%s1190_s26 + $0x188] sm:$0xff] %v248_v49 }
  0x42   : > { %251 = vst [vmem:[%s1190_s26 + $0x190] sm:$0xff] %v250_v50 }
  0x43   : > { %253 = vst [vmem:[%s1190_s26 + $0x198] sm:$0xff] %v252_v51 }
  0x44   : > { %255 = vst [vmem:[%s1190_s26 + $0x1a0] sm:$0xff] %v254_v52 }
  0x45   : > { %257 = vst [vmem:[%s1190_s26 + $0x1a8] sm:$0xff] %v256_v53 }
  0x46   : > { %259 = vst [vmem:[%s1190_s26 + $0x1b0] sm:$0xff] %v258_v54 }
  0x47   : > { %261 = vst [vmem:[%s1190_s26 + $0x1b8] sm:$0xff] %v260_v55 }
  0x48   : > { %263 = vst [vmem:[%s1190_s26 + $0x1c0] sm:$0xff] %v262_v56 }
  0x49   : > { %265 = vst [vmem:[%s1190_s26 + $0x1c8] sm:$0xff] %v264_v57 }
  0x4a   : > { %267 = vst [vmem:[%s1190_s26 + $0x1d0] sm:$0xff] %v266_v58 }
  0x4b   : > { %269 = vst [vmem:[%s1190_s26 + $0x1d8] sm:$0xff] %v268_v59 }
  0x4c   : > { %271 = vst [vmem:[%s1190_s26 + $0x1e0] sm:$0xff] %v270_v60 }
  0x4d   : > { %273 = vst [vmem:[%s1190_s26 + $0x1e8] sm:$0xff] %v272_v61 }
  0x4e   : > { %275 = vst [vmem:[%s1190_s26 + $0x1f0] sm:$0xff] %v274_v62 }
  0x4f   : > { %277 = vst [vmem:[%s1190_s26 + $0x1f8] sm:$0xff] %v276_v63 }
  0x50   : > { %279 = vst [vmem:[%s1190_s26 + $0x200] sm:$0xff] %v278_v0 }
  0x51   : > { %281 = vst [vmem:[%s1190_s26 + $0x208] sm:$0xff] %v280_v1 }
  0x52   : > { %283 = vst [vmem:[%s1190_s26 + $0x210] sm:$0xff] %v282_v2 }
  0x53   : > { %285 = vst [vmem:[%s1190_s26 + $0x218] sm:$0xff] %v284_v3 }
  0x54   : > { %287 = vst [vmem:[%s1190_s26 + $0x220] sm:$0xff] %v286_v4 }
  0x55   : > { %289 = vst [vmem:[%s1190_s26 + $0x228] sm:$0xff] %v288_v5 }
  0x56   : > { %291 = vst [vmem:[%s1190_s26 + $0x230] sm:$0xff] %v290_v6 }
  0x57   : > { %293 = vst [vmem:[%s1190_s26 + $0x238] sm:$0xff] %v292_v7 }
  0x58   : > { %295 = vst [vmem:[%s1190_s26 + $0x240] sm:$0xff] %v294_v8 }
  0x59   : > { %297 = vst [vmem:[%s1190_s26 + $0x248] sm:$0xff] %v296_v9 }
  0x5a   : > { %299 = vst [vmem:[%s1190_s26 + $0x250] sm:$0xff] %v298_v10 }
  0x5b   : > { %301 = vst [vmem:[%s1190_s26 + $0x258] sm:$0xff] %v300_v11 }
  0x5c   : > { %303 = vst [vmem:[%s1190_s26 + $0x260] sm:$0xff] %v302_v12 }
  0x5d   : > { %305 = vst [vmem:[%s1190_s26 + $0x268] sm:$0xff] %v304_v13 }
  0x5e   : > { %307 = vst [vmem:[%s1190_s26 + $0x270] sm:$0xff] %v306_v14 }
  0x5f   : > { %309 = vst [vmem:[%s1190_s26 + $0x278] sm:$0xff] %v308_v15 }
  0x60   : > { %311 = vst [vmem:[%s1190_s26 + $0x280] sm:$0xff] %v310_v16 }
  0x61   : > { %313 = vst [vmem:[%s1190_s26 + $0x288] sm:$0xff] %v312_v17 }
  0x62   : > { %315 = vst [vmem:[%s1190_s26 + $0x290] sm:$0xff] %v314_v18 }
  0x63   : > { %317 = vst [vmem:[%s1190_s26 + $0x298] sm:$0xff] %v316_v19 }
  0x64   : > { %319 = vst [vmem:[%s1190_s26 + $0x2a0] sm:$0xff] %v318_v20 }
  0x65   : > { %321 = vst [vmem:[%s1190_s26 + $0x2a8] sm:$0xff] %v320_v21 }
  0x66   : > { %323 = vst [vmem:[%s1190_s26 + $0x2b0] sm:$0xff] %v322_v22 }
  0x67   : > { %325 = vst [vmem:[%s1190_s26 + $0x2b8] sm:$0xff] %v324_v23 }
  0x68   : > { %327 = vst [vmem:[%s1190_s26 + $0x2c0] sm:$0xff] %v326_v24 }
  0x69   : > { %329 = vst [vmem:[%s1190_s26 + $0x2c8] sm:$0xff] %v328_v25 }
  0x6a   : > { %331 = vst [vmem:[%s1190_s26 + $0x2d0] sm:$0xff] %v330_v26 }
  0x6b   : > { %333 = vst [vmem:[%s1190_s26 + $0x2d8] sm:$0xff] %v332_v27 }
  0x6c   : > { %335 = vst [vmem:[%s1190_s26 + $0x2e0] sm:$0xff] %v334_v28 }
  0x6d   : > { %337 = vst [vmem:[%s1190_s26 + $0x2e8] sm:$0xff] %v336_v29 }
  0x6e   : > { %339 = vst [vmem:[%s1190_s26 + $0x2f0] sm:$0xff] %v338_v30 }
  0x6f   : > { %341 = vst [vmem:[%s1190_s26 + $0x2f8] sm:$0xff] %v340_v31 }
  0x70   : > { %343 = vst [vmem:[%s1190_s26 + $0x300] sm:$0xff] %v342_v32 }
  0x71   : > { %345 = vst [vmem:[%s1190_s26 + $0x308] sm:$0xff] %v344_v33 }
  0x72   : > { %347 = vst [vmem:[%s1190_s26 + $0x310] sm:$0xff] %v346_v34 }
  0x73   : > { %349 = vst [vmem:[%s1190_s26 + $0x318] sm:$0xff] %v348_v35 }
  0x74   : > { %351 = vst [vmem:[%s1190_s26 + $0x320] sm:$0xff] %v350_v36 }
  0x75   : > { %353 = vst [vmem:[%s1190_s26 + $0x328] sm:$0xff] %v352_v37 }
  0x76   : > { %355 = vst [vmem:[%s1190_s26 + $0x330] sm:$0xff] %v354_v38 }
  0x77   : > { %357 = vst [vmem:[%s1190_s26 + $0x338] sm:$0xff] %v356_v39 }
  0x78   : > { %359 = vst [vmem:[%s1190_s26 + $0x340] sm:$0xff] %v358_v40 }
  0x79   : > { %361 = vst [vmem:[%s1190_s26 + $0x348] sm:$0xff] %v360_v41 }
  0x7a   : > { %363 = vst [vmem:[%s1190_s26 + $0x350] sm:$0xff] %v362_v42 }
  0x7b   : > { %365 = vst [vmem:[%s1190_s26 + $0x358] sm:$0xff] %v364_v43 }
  0x7c   : > { %367 = vst [vmem:[%s1190_s26 + $0x360] sm:$0xff] %v366_v44 }
  0x7d   : > { %369 = vst [vmem:[%s1190_s26 + $0x368] sm:$0xff] %v368_v45 }
  0x7e   : > { %371 = vst [vmem:[%s1190_s26 + $0x370] sm:$0xff] %v370_v46 }
  0x7f   : > { %373 = vst [vmem:[%s1190_s26 + $0x378] sm:$0xff] %v372_v47 }
  0x80 PF: > { %p1040_p5 = scmp.ge.s32.totalorder %s1128_s14, 1  ;;  %p378_p6 = scmp.lt.s32.totalorder %s1128_s14, 5 }
  0x82   : > { %p379_p7 = pnand %p1040_p5, %p378_p6 }
  0x83   : > { %s385_s27 = sand.u32 (!%p379_p7), 1, %s1120_s12   ;;  %s1041_s7 = sshll.u32 (!%p379_p7), %s1034_s15, 4 }
  0x84   : > { %382 = sbr.rel (%p379_p7) target bundleno = 340 (0x154), region = 51  ;;  %p410_p8 = scmp.lt.s32.totalorder (!%p379_p7), %s1041_s7, 63 }
  0x85   : > { %s1079_s28 = smul.u32 (!%p379_p7), 896, %s385_s27 }
  0x87   : > { %s1416_s29 = scalar_lea.vmem (!%p379_p7), [#allocation2], %s1079_s28 }
  0x89   : > { %vm538_vm0 = vcmask 1045504   ;;  %v514_v48 = vld [vmem:[%s1416_s29 + $0x310] sm:$0x3f]  ;;  %v515_v49 = vld [vmem:[%s1416_s29 + $0x318] sm:$0x3f]  ;;  %v497_v56 = vld [vmem:[%s1416_s29 + $0x288] sm:$0xff] }
  0x8a   : > { %v498_v50 = vld [vmem:[%s1416_s29 + $0x290] sm:$0xff]  ;;  %1047 = vmatpush.msk.msra.mxu2 %vm538_vm0, %v514_v48  ;;  %1049 = vmatpush.msk.msra.mxu3 %vm538_vm0, %v515_v49  ;;  %v499_v51 = vld [vmem:[%s1416_s29 + $0x298] sm:$0xff]  ;;  %v513_v52 = vld [vmem:[%s1416_s29 + $0x308] sm:$0x3f]  ;;  %vm534_vm1 = vcmask 441344   ;;  %s1627_s7 = smov (!%p410_p8, %s1041_s7), 63 }
  0x8b   : > { %v482_v53 = vld [vmem:[%s1416_s29 + $0x210] sm:$0xff]  ;;  %1045 = vmatpush.msk.msra.mxu1 %vm538_vm0, %v513_v52  ;;  %v483_v54 = vld [vmem:[%s1416_s29 + $0x218] sm:$0xff]  ;;  %v512_v55 = vld [vmem:[%s1416_s29 + $0x300] sm:$0x3f]  ;;  %s1042_s8 = sshll.u32 %s1627_s7, 2  ;;  %vm947_vm2 = vcmask 1043456  }
  0x8c   : > { %637 = vmatpush.msra.mxu2 %v498_v50  ;;  %657 = vmatpush.msra.mxu3 %v499_v51  ;;  %v496_v57 = vld [vmem:[%s1416_s29 + $0x280] sm:$0xff]  ;;  %v466_v58 = vld [vmem:[%s1416_s29 + $0x190] sm:$0xff]  ;;  %v467_v59 = vld [vmem:[%s1416_s29 + $0x198] sm:$0xff]  ;;  %s1591_s11 = scalar_lea.vmem %s1622_s3, %s1042_s8 }
  0x8d   : > { %1043 = vmatpush.msk.msra.mxu0 %vm538_vm0, %v512_v55  ;;  %617 = vmatpush.msra.mxu1 %v497_v56  ;;  %v481_v60 = vld [vmem:[%s1416_s29 + $0x208] sm:$0xff]  ;;  %v480_v61 = vld [vmem:[%s1416_s29 + $0x200] sm:$0xff]  ;;  %v450_v63 = vld [vmem:[%s1416_s29 + $0x110] sm:$0xff] }
  0x8e   : > { %638 = vmatpush.msra.mxu2 %v482_v53  ;;  %658 = vmatpush.msra.mxu3 %v483_v54  ;;  %v465_v62 = vld [vmem:[%s1416_s29 + $0x188] sm:$0xff]  ;;  %v451_v0 = vld [vmem:[%s1416_s29 + $0x118] sm:$0xff]  ;;  %v464_v1 = vld [vmem:[%s1416_s29 + $0x180] sm:$0xff] }
  0x8f   : > { %597 = vmatpush.msra.mxu0 %v496_v57  ;;  %618 = vmatpush.msra.mxu1 %v481_v60  ;;  %v449_v2 = vld [vmem:[%s1416_s29 + $0x108] sm:$0xff]  ;;  %v434_v3 = vld [vmem:[%s1416_s29 + $0x90] sm:$0xff]  ;;  %v435_v4 = vld [vmem:[%s1416_s29 + $0x98] sm:$0xff] }
  0x90   : > { %639 = vmatpush.msra.mxu2 %v466_v58  ;;  %659 = vmatpush.msra.mxu3 %v467_v59  ;;  %v448_v5 = vld [vmem:[%s1416_s29 + $0x100] sm:$0xff]  ;;  %v433_v6 = vld [vmem:[%s1416_s29 + $0x88] sm:$0xff]  ;;  %v418_v7 = vld [vmem:[%s1416_s29 + $0x10] sm:$0xff] }
  0x91   : > { %598 = vmatpush.msra.mxu0 %v480_v61  ;;  %619 = vmatpush.msra.mxu1 %v465_v62  ;;  %v419_v8 = vld [vmem:[%s1416_s29 + $0x18] sm:$0xff]  ;;  %v518_v9 = vld [vmem:[%s1416_s29 + $0x330] sm:$0x3f]  ;;  %v432_v11 = vld [vmem:[%s1416_s29 + $0x80] sm:$0xff] }
  0x92   : > { %640 = vmatpush.msra.mxu2 %v450_v63  ;;  %660 = vmatpush.msra.mxu3 %v451_v0  ;;  %v519_v10 = vld [vmem:[%s1416_s29 + $0x338] sm:$0x3f]  ;;  %v417_v12 = vld [vmem:[%s1416_s29 + $0x8] sm:$0xff]  ;;  %v502_v13 = vld [vmem:[%s1416_s29 + $0x2b0] sm:$0xff] }
  0x93   : > { %599 = vmatpush.msra.mxu0 %v464_v1  ;;  %620 = vmatpush.msra.mxu1 %v449_v2  ;;  %v503_v14 = vld [vmem:[%s1416_s29 + $0x2b8] sm:$0xff]  ;;  %v517_v15 = vld [vmem:[%s1416_s29 + $0x328] sm:$0x3f]  ;;  %v416_v16 = vld [vmem:[%s1416_s29] sm:$0xff] }
  0x94   : > { %641 = vmatpush.msra.mxu2 %v434_v3  ;;  %661 = vmatpush.msra.mxu3 %v435_v4  ;;  %v486_v17 = vld [vmem:[%s1416_s29 + $0x230] sm:$0xff]  ;;  %v487_v18 = vld [vmem:[%s1416_s29 + $0x238] sm:$0xff]  ;;  %v516_v19 = vld [vmem:[%s1416_s29 + $0x320] sm:$0x3f] }
  0x95   : > { %600 = vmatpush.msra.mxu0 %v448_v5  ;;  %621 = vmatpush.msra.mxu1 %v433_v6  ;;  %v501_v20 = vld [vmem:[%s1416_s29 + $0x2a8] sm:$0xff]  ;;  %v470_v21 = vld [vmem:[%s1416_s29 + $0x1b0] sm:$0xff]  ;;  %v471_v22 = vld [vmem:[%s1416_s29 + $0x1b8] sm:$0xff] }
  0x96   : > { %642 = vmatpush.msra.mxu2 %v418_v7  ;;  %662 = vmatpush.msra.mxu3 %v419_v8  ;;  %v500_v23 = vld [vmem:[%s1416_s29 + $0x2a0] sm:$0xff]  ;;  %v485_v24 = vld [vmem:[%s1416_s29 + $0x228] sm:$0xff]  ;;  %v454_v25 = vld [vmem:[%s1416_s29 + $0x130] sm:$0xff] }
  0x97   : > { %601 = vmatpush.msra.mxu0 %v432_v11  ;;  %622 = vmatpush.msra.mxu1 %v417_v12  ;;  %v455_v26 = vld [vmem:[%s1416_s29 + $0x138] sm:$0xff]  ;;  %v484_v27 = vld [vmem:[%s1416_s29 + $0x220] sm:$0xff]  ;;  %v469_v28 = vld [vmem:[%s1416_s29 + $0x1a8] sm:$0xff] }
  0x98   : > { %1055 = vmatpush.msk.msrb.mxu2 %vm538_vm0, %v518_v9  ;;  %1057 = vmatpush.msk.msrb.mxu3 %vm538_vm0, %v519_v10  ;;  %v438_v29 = vld [vmem:[%s1416_s29 + $0xb0] sm:$0xff]  ;;  %v439_v30 = vld [vmem:[%s1416_s29 + $0xb8] sm:$0xff]  ;;  %v468_v31 = vld [vmem:[%s1416_s29 + $0x1a0] sm:$0xff]  ;;  %v1130_v9 = vmov 0  }
  0x99   : > { %1053 = vmatpush.msk.msrb.mxu1 %vm538_vm0, %v517_v15  ;;  %602 = vmatpush.msra.mxu0 %v416_v16  ;;  %v453_v32 = vld [vmem:[%s1416_s29 + $0x128] sm:$0xff]  ;;  %v422_v33 = vld [vmem:[%s1416_s29 + $0x30] sm:$0xff]  ;;  %v423_v34 = vld [vmem:[%s1416_s29 + $0x38] sm:$0xff] }
  0x9a   : > { %717 = vmatpush.msrb.mxu2 %v502_v13  ;;  %737 = vmatpush.msrb.mxu3 %v503_v14  ;;  %v1480_v35 = vld [vmem:[%s1620_s1] sm:$0xf]  ;;  %v522_v36 = vld [vmem:[%s1416_s29 + $0x350] sm:$0x3f]  ;;  %v523_v37 = vld [vmem:[%s1416_s29 + $0x358] sm:$0x3f] }
  0x9b   : > { %1051 = vmatpush.msk.msrb.mxu0 %vm538_vm0, %v516_v19  ;;  %697 = vmatpush.msrb.mxu1 %v501_v20  ;;  %v452_v38 = vld [vmem:[%s1416_s29 + $0x120] sm:$0xff]  ;;  %v437_v39 = vld [vmem:[%s1416_s29 + $0xa8] sm:$0xff]  ;;  %v506_v40 = vld [vmem:[%s1416_s29 + $0x2d0] sm:$0xff] }
  0x9c   : > { %718 = vmatpush.msrb.mxu2 %v486_v17  ;;  %738 = vmatpush.msrb.mxu3 %v487_v18  ;;  %v507_v41 = vld [vmem:[%s1416_s29 + $0x2d8] sm:$0xff]  ;;  %v436_v42 = vld [vmem:[%s1416_s29 + $0xa0] sm:$0xff]  ;;  %v421_v43 = vld [vmem:[%s1416_s29 + $0x28] sm:$0xff] }
  0x9d   : > { %677 = vmatpush.msrb.mxu0 %v500_v23  ;;  %698 = vmatpush.msrb.mxu1 %v485_v24  ;;  %v490_v44 = vld [vmem:[%s1416_s29 + $0x250] sm:$0xff]  ;;  %v521_v45 = vld [vmem:[%s1416_s29 + $0x348] sm:$0x3f]  ;;  %v491_v46 = vld [vmem:[%s1416_s29 + $0x258] sm:$0xff] }
  0x9e   : > { %719 = vmatpush.msrb.mxu2 %v470_v21  ;;  %739 = vmatpush.msrb.mxu3 %v471_v22  ;;  %v420_v47 = vld [vmem:[%s1416_s29 + $0x20] sm:$0xff]  ;;  %v474_v48 = vld [vmem:[%s1416_s29 + $0x1d0] sm:$0xff]  ;;  %v505_v49 = vld [vmem:[%s1416_s29 + $0x2c8] sm:$0xff] }
  0x9f   : > { %678 = vmatpush.msrb.mxu0 %v484_v27  ;;  %699 = vmatpush.msrb.mxu1 %v469_v28  ;;  %v520_v50 = vld [vmem:[%s1416_s29 + $0x340] sm:$0x3f]  ;;  %v475_v51 = vld [vmem:[%s1416_s29 + $0x1d8] sm:$0xff]  ;;  %v489_v52 = vld [vmem:[%s1416_s29 + $0x248] sm:$0xff] }
  0xa0   : > { %720 = vmatpush.msrb.mxu2 %v454_v25  ;;  %740 = vmatpush.msrb.mxu3 %v455_v26  ;;  %v458_v53 = vld [vmem:[%s1416_s29 + $0x150] sm:$0xff]  ;;  %v504_v54 = vld [vmem:[%s1416_s29 + $0x2c0] sm:$0xff]  ;;  %v459_v55 = vld [vmem:[%s1416_s29 + $0x158] sm:$0xff] }
  0xa1   : > { %679 = vmatpush.msrb.mxu0 %v468_v31  ;;  %700 = vmatpush.msrb.mxu1 %v453_v32  ;;  %v488_v56 = vld [vmem:[%s1416_s29 + $0x240] sm:$0xff]  ;;  %v473_v57 = vld [vmem:[%s1416_s29 + $0x1c8] sm:$0xff]  ;;  %v442_v58 = vld [vmem:[%s1416_s29 + $0xd0] sm:$0xff] }
  0xa2   : > { %721 = vmatpush.msrb.mxu2 %v438_v29  ;;  %741 = vmatpush.msrb.mxu3 %v439_v30  ;;  %v443_v59 = vld [vmem:[%s1416_s29 + $0xd8] sm:$0xff]  ;;  %v472_v60 = vld [vmem:[%s1416_s29 + $0x1c0] sm:$0xff]  ;;  %v457_v61 = vld [vmem:[%s1416_s29 + $0x148] sm:$0xff] }
  0xa3   : > { %1048 = vmatmul.msk.f32.vlgmr.msra.gmra.mxu2 %vm534_vm1, %v1480_v35  ;;  %1050 = vmatmul.msk.f32.vlgmr.msra.gmra.mxu3 %vm534_vm1, %v1480_v35  ;;  %v426_v62 = vld [vmem:[%s1416_s29 + $0x50] sm:$0xff]  ;;  %v427_v63 = vld [vmem:[%s1416_s29 + $0x58] sm:$0xff]  ;;  %v456_v2 = vld [vmem:[%s1416_s29 + $0x140] sm:$0xff] }
  0xa4   : > { %722 = vmatpush.msrb.mxu2 %v422_v33  ;;  %742 = vmatpush.msrb.mxu3 %v423_v34  ;;  %v526_v0 = vld [vmem:[%s1416_s29 + $0x370] sm:$0x3f]  ;;  %v527_v1 = vld [vmem:[%s1416_s29 + $0x378] sm:$0x3f]  ;;  %v441_v3 = vld [vmem:[%s1416_s29 + $0xc8] sm:$0xff] }
  0xa5   : > { %680 = vmatpush.msrb.mxu0 %v452_v38  ;;  %701 = vmatpush.msrb.mxu1 %v437_v39  ;;  %v510_v4 = vld [vmem:[%s1416_s29 + $0x2f0] sm:$0xff]  ;;  %v511_v5 = vld [vmem:[%s1416_s29 + $0x2f8] sm:$0xff]  ;;  %v425_v6 = vld [vmem:[%s1416_s29 + $0x48] sm:$0xff] }
  0xa6   : > { %1063 = vmatpush.msk.msra.mxu2 %vm538_vm0, %v522_v36  ;;  %1065 = vmatpush.msk.msra.mxu3 %vm538_vm0, %v523_v37  ;;  %v440_v7 = vld [vmem:[%s1416_s29 + $0xc0] sm:$0xff]  ;;  %v525_v10 = vld [vmem:[%s1416_s29 + $0x368] sm:$0x3f]  ;;  %v494_v11 = vld [vmem:[%s1416_s29 + $0x270] sm:$0xff] }
  0xa7   : > { %681 = vmatpush.msrb.mxu0 %v436_v42  ;;  %702 = vmatpush.msrb.mxu1 %v421_v43  ;;  %v528_v8 = vld [vmem:[%s1621_s2] sm:$0xf]  ;;  %v495_v12 = vld [vmem:[%s1416_s29 + $0x278] sm:$0xff]  ;;  %v509_v15 = vld [vmem:[%s1416_s29 + $0x2e8] sm:$0xff] }
  0xa8   : > { %797 = vmatpush.msra.mxu2 %v506_v40  ;;  %817 = vmatpush.msra.mxu3 %v507_v41  ;;  %v424_v13 = vld [vmem:[%s1416_s29 + $0x40] sm:$0xff]  ;;  %v478_v16 = vld [vmem:[%s1416_s29 + $0x1f0] sm:$0xff]  ;;  %v479_v17 = vld [vmem:[%s1416_s29 + $0x1f8] sm:$0xff] }
  0xa9   : > { %1046 = vmatmul.msk.f32.vlgmr.msra.gmra.mxu1 %vm534_vm1, %v1480_v35  ;;  %682 = vmatpush.msrb.mxu0 %v420_v47  ;;  %v524_v14 = vld [vmem:[%s1416_s29 + $0x360] sm:$0x3f]  ;;  %v493_v19 = vld [vmem:[%s1416_s29 + $0x268] sm:$0xff]  ;;  %v462_v20 = vld [vmem:[%s1416_s29 + $0x170] sm:$0xff] }
  0xaa   : > { %798 = vmatpush.msra.mxu2 %v490_v44  ;;  %1061 = vmatpush.msk.msra.mxu1 %vm538_vm0, %v521_v45  ;;  %v508_v18 = vld [vmem:[%s1416_s29 + $0x2e0] sm:$0xff]  ;;  %v463_v21 = vld [vmem:[%s1416_s29 + $0x178] sm:$0xff]  ;;  %v477_v23 = vld [vmem:[%s1416_s29 + $0x1e8] sm:$0xff] }
  0xab   : > { %818 = vmatpush.msra.mxu3 %v491_v46  ;;  %1044 = vmatmul.msk.f32.vlgmr.msra.gmra.mxu0 %vm534_vm1, %v1480_v35  ;;  %v492_v22 = vld [vmem:[%s1416_s29 + $0x260] sm:$0xff]  ;;  %v446_v24 = vld [vmem:[%s1416_s29 + $0xf0] sm:$0xff]  ;;  %v447_v25 = vld [vmem:[%s1416_s29 + $0xf8] sm:$0xff] }
  0xac   : > { %799 = vmatpush.msra.mxu2 %v474_v48  ;;  %777 = vmatpush.msra.mxu1 %v505_v49  ;;  %v476_v26 = vld [vmem:[%s1416_s29 + $0x1e0] sm:$0xff]  ;;  %v461_v27 = vld [vmem:[%s1416_s29 + $0x168] sm:$0xff]  ;;  %v430_v28 = vld [vmem:[%s1416_s29 + $0x70] sm:$0xff] }
  0xad   : > { %1059 = vmatpush.msk.msra.mxu0 %vm538_vm0, %v520_v50  ;;  %819 = vmatpush.msra.mxu3 %v475_v51  ;;  %v431_v29 = vld [vmem:[%s1416_s29 + $0x78] sm:$0xff]  ;;  %v460_v30 = vld [vmem:[%s1416_s29 + $0x160] sm:$0xff]  ;;  %v445_v31 = vld [vmem:[%s1416_s29 + $0xe8] sm:$0xff] }
  0xae   : > { %778 = vmatpush.msra.mxu1 %v489_v52  ;;  %800 = vmatpush.msra.mxu2 %v458_v53  ;;  %v444_v32 = vld [vmem:[%s1416_s29 + $0xe0] sm:$0xff]  ;;  %v429_v33 = vld [vmem:[%s1416_s29 + $0x68] sm:$0xff] }
  0xaf   : > { %757 = vmatpush.msra.mxu0 %v504_v54  ;;  %820 = vmatpush.msra.mxu3 %v459_v55  ;;  %v428_v34 = vld [vmem:[%s1416_s29 + $0x60] sm:$0xff] }
  0xb0   : > { %1056 = vmatmul.msk.f32.vlgmr.msrb.gmra.mxu2 %vm534_vm1, %v1480_v35  ;;  %1058 = vmatmul.msk.f32.vlgmr.msrb.gmra.mxu3 %vm534_vm1, %v1480_v35 }
  0xb1   : > { %758 = vmatpush.msra.mxu0 %v488_v56  ;;  %779 = vmatpush.msra.mxu1 %v473_v57 }
  0xb2   : > { %801 = vmatpush.msra.mxu2 %v442_v58  ;;  %821 = vmatpush.msra.mxu3 %v443_v59 }
  0xb3   : > { %759 = vmatpush.msra.mxu0 %v472_v60  ;;  %780 = vmatpush.msra.mxu1 %v457_v61 }
  0xb4   : > { %802 = vmatpush.msra.mxu2 %v426_v62  ;;  %822 = vmatpush.msra.mxu3 %v427_v63 }
  0xb5   : > { %1054 = vmatmul.msk.f32.vlgmr.msrb.gmra.mxu1 %vm534_vm1, %v1480_v35  ;;  %760 = vmatpush.msra.mxu0 %v456_v2 }
  0xb6   : > { %1071 = vmatpush.msk.msrb.mxu2 %vm538_vm0, %v526_v0  ;;  %1073 = vmatpush.msk.msrb.mxu3 %vm538_vm0, %v527_v1 }
  0xb7   : > { %781 = vmatpush.msra.mxu1 %v441_v3  ;;  %1105 = vset.pattern.permute.xlu0 %v1130_v9 }
  0xb8   : > { %877 = vmatpush.msrb.mxu2 %v510_v4  ;;  %897 = vmatpush.msrb.mxu3 %v511_v5 }
  0xb9   : > { %1052 = vmatmul.msk.f32.vlgmr.msrb.gmra.mxu0 %vm534_vm1, %v1480_v35  ;;  %782 = vmatpush.msra.mxu1 %v425_v6 }
  0xba   : > { %761 = vmatpush.msra.mxu0 %v440_v7  ;;  %531 = vperm.xlu0 %1105, %v528_v8  }
  0xbb   : > { %1069 = vmatpush.msk.msrb.mxu1 %vm538_vm0, %v525_v10  ;;  %878 = vmatpush.msrb.mxu2 %v494_v11 }
  0xbc   : > { %898 = vmatpush.msrb.mxu3 %v495_v12  ;;  %762 = vmatpush.msra.mxu0 %v424_v13 }
  0xbd   : > { %1064 = vmatmul.msk.f32.vlgmr.msra.gmra.mxu2 %vm534_vm1, %v1480_v35  ;;  %1066 = vmatmul.msk.f32.vlgmr.msra.gmra.mxu3 %vm534_vm1, %v1480_v35 }
  0xbe   : > { %1067 = vmatpush.msk.msrb.mxu0 %vm538_vm0, %v524_v14  ;;  %857 = vmatpush.msrb.mxu1 %v509_v15 }
  0xbf   : > { %879 = vmatpush.msrb.mxu2 %v478_v16  ;;  %899 = vmatpush.msrb.mxu3 %v479_v17 }
  0xc0   : > { %837 = vmatpush.msrb.mxu0 %v508_v18  ;;  %858 = vmatpush.msrb.mxu1 %v493_v19 }
  0xc1   : > { %880 = vmatpush.msrb.mxu2 %v462_v20  ;;  %900 = vmatpush.msrb.mxu3 %v463_v21 }
  0xc2   : > { %1062 = vmatmul.msk.f32.vlgmr.msra.gmra.mxu1 %vm534_vm1, %v1480_v35  ;;  %838 = vmatpush.msrb.mxu0 %v492_v22 }
  0xc3   : > { %859 = vmatpush.msrb.mxu1 %v477_v23  ;;  %881 = vmatpush.msrb.mxu2 %v446_v24 }
  0xc4   : > { %901 = vmatpush.msrb.mxu3 %v447_v25  ;;  %1060 = vmatmul.msk.f32.vlgmr.msra.gmra.mxu0 %vm534_vm1, %v1480_v35 }
  0xc5   : > { %839 = vmatpush.msrb.mxu0 %v476_v26  ;;  %860 = vmatpush.msrb.mxu1 %v461_v27 }
  0xc6   : > { %882 = vmatpush.msrb.mxu2 %v430_v28  ;;  %902 = vmatpush.msrb.mxu3 %v431_v29 }
  0xc7   : > { %1072 = vmatmul.msk.f32.vlgmr.msrb.gmra.mxu2 %vm534_vm1, %v1480_v35  ;;  %1074 = vmatmul.msk.f32.vlgmr.msrb.gmra.mxu3 %vm534_vm1, %v1480_v35 }
  0xc8   : > { %840 = vmatpush.msrb.mxu0 %v460_v30  ;;  %861 = vmatpush.msrb.mxu1 %v445_v31 }
  0xca   : > { %841 = vmatpush.msrb.mxu0 %v444_v32  ;;  %862 = vmatpush.msrb.mxu1 %v429_v33 }
  0xcb   : > { %1070 = vmatmul.msk.f32.vlgmr.msrb.gmra.mxu1 %vm534_vm1, %v1480_v35 }
  0xcc   : > { %842 = vmatpush.msrb.mxu0 %v428_v34 }
  0xcd   : > { %1068 = vmatmul.msk.f32.vlgmr.msrb.gmra.mxu0 %vm534_vm1, %v1480_v35 }
 0x126   : > { %v624_v36 = vpop.f32.mrf.mxu1  ;;  %v644_v37 = vpop.f32.mrf.mxu2 }
 0x127   : > { %v664_v38 = vpop.f32.mrf.mxu3 }
 0x128   : > { %v604_v39 = vpop.f32.mrf.mxu0 }
 0x12c   : > { %v532_v40 = vpop.permute.xlu0 %531 }
 0x12d   : > { %v625_v41 = vadd.f32 %v624_v36, %v532_v40  ;;  %v665_v42 = vadd.f32 %v664_v38, %v532_v40  ;;  %v605_v43 = vadd.f32 %v604_v39, %v532_v40  ;;  %v645_v44 = vadd.f32 %v644_v37, %v532_v40 }
 0x12f   : > { %v908_v45 = vmax.f32 %v625_v41, 0.0  ;;  %v910_v46 = vmax.f32 %v665_v42, 0.0  ;;  %v907_v47 = vmax.f32 %v605_v43, 0.0  ;;  %v909_v48 = vmax.f32 %v645_v44, 0.0 }
 0x131   : > { %v939_v35 = vrot.slane %v908_v45, 4  ;;  %v940_v49 = vrot.slane %v910_v46, 4 }
 0x132   : > { %v704_v52 = vpop.f32.mrf.mxu1 }
 0x133   : > { %v948_v50 = vsel %vm947_vm2, %v907_v47, %v939_v35  ;;  %v949_v51 = vsel %vm947_vm2, %v909_v48, %v940_v49  ;;  %v724_v53 = vpop.f32.mrf.mxu2  ;;  %v705_v54 = vadd.f32 %v704_v52, %v532_v40  ;;  %v744_v56 = vpop.f32.mrf.mxu3 }
 0x134   : > { %964 = vst [vmem:[%s1591_s11] sm:$0xff] %v948_v50  ;;  %v725_v55 = vadd.f32 %v724_v53, %v532_v40  ;;  %v745_v57 = vadd.f32 %v744_v56, %v532_v40 }
 0x135   : > { %965 = vst [vmem:[%s1591_s11 + $0x8] sm:$0xff] %v949_v51  ;;  %v912_v58 = vmax.f32 %v705_v54, 0.0 }
 0x136   : > { %v684_v59 = vpop.f32.mrf.mxu0  ;;  %v913_v61 = vmax.f32 %v725_v55, 0.0  ;;  %v914_v62 = vmax.f32 %v745_v57, 0.0 }
 0x137   : > { %v685_v60 = vadd.f32 %v684_v59, %v532_v40  ;;  %v941_v63 = vrot.slane %v912_v58, 4 }
 0x138   : > { %v942_v1 = vrot.slane %v914_v62, 4 }
 0x139   : > { %v911_v0 = vmax.f32 %v685_v60, 0.0 }
 0x13a   : > { %v951_v3 = vsel %vm947_vm2, %v913_v61, %v942_v1 }
 0x13b   : > { %v950_v2 = vsel %vm947_vm2, %v911_v0, %v941_v63  ;;  %967 = vst [vmem:[%s1591_s11 + $0x18] sm:$0xff] %v951_v3 }
 0x13c   : > { %966 = vst [vmem:[%s1591_s11 + $0x10] sm:$0xff] %v950_v2 }
 0x13f   : > { %v784_v4 = vpop.f32.mrf.mxu1 }
 0x140   : > { %v785_v5 = vadd.f32 %v784_v4, %v532_v40  ;;  %v804_v6 = vpop.f32.mrf.mxu2  ;;  %v824_v7 = vpop.f32.mrf.mxu3 }
 0x141   : > { %v764_v8 = vpop.f32.mrf.mxu0  ;;  %v805_v9 = vadd.f32 %v804_v6, %v532_v40  ;;  %v825_v10 = vadd.f32 %v824_v7, %v532_v40 }
 0x142   : > { %v916_v11 = vmax.f32 %v785_v5, 0.0  ;;  %v765_v12 = vadd.f32 %v764_v8, %v532_v40 }
 0x143   : > { %v917_v13 = vmax.f32 %v805_v9, 0.0  ;;  %v918_v14 = vmax.f32 %v825_v10, 0.0 }
 0x144   : > { %v943_v15 = vrot.slane %v916_v11, 4  ;;  %v915_v16 = vmax.f32 %v765_v12, 0.0 }
 0x145   : > { %v944_v17 = vrot.slane %v918_v14, 4 }
 0x146   : > { %v952_v18 = vsel %vm947_vm2, %v915_v16, %v943_v15 }
 0x147   : > { %968 = vst [vmem:[%s1591_s11 + $0x20] sm:$0xff] %v952_v18  ;;  %v953_v19 = vsel %vm947_vm2, %v917_v13, %v944_v17 }
 0x148   : > { %969 = vst [vmem:[%s1591_s11 + $0x28] sm:$0xff] %v953_v19  ;;  %v864_v20 = vpop.f32.mrf.mxu1 }
 0x149   : > { %v865_v21 = vadd.f32 %v864_v20, %v532_v40 }
 0x14a   : > { %v844_v22 = vpop.f32.mrf.mxu0  ;;  %v884_v23 = vpop.f32.mrf.mxu2 }
 0x14b   : > { %v920_v24 = vmax.f32 %v865_v21, 0.0  ;;  %v845_v25 = vadd.f32 %v844_v22, %v532_v40  ;;  %v904_v26 = vpop.f32.mrf.mxu3  ;;  %v885_v27 = vadd.f32 %v884_v23, %v532_v40 }
 0x14c   : > { %v905_v28 = vadd.f32 %v904_v26, %v532_v40 }
 0x14d   : > { %v945_v29 = vrot.slane %v920_v24, 4  ;;  %v919_v30 = vmax.f32 %v845_v25, 0.0  ;;  %v921_v33 = vmax.f32 %v885_v27, 0.0 }
 0x14e   : > { %v922_v31 = vmax.f32 %v905_v28, 0.0 }
 0x14f   : > { %v954_v32 = vsel %vm947_vm2, %v919_v30, %v945_v29 }
 0x150   : > { %970 = vst [vmem:[%s1591_s11 + $0x30] sm:$0xff] %v954_v32  ;;  %v946_v34 = vrot.slane %v922_v31, 4 }
 0x152   : > { %v955_v36 = vsel %vm947_vm2, %v921_v33, %v946_v34 }
 0x153   : > { %971 = vst [vmem:[%s1591_s11 + $0x38] sm:$0xff] %v955_v36 }
 0x154 PF: > { %p10_p9 = scmp.ge.s32.totalorder %s1168_s16, 6   ;;  %s1623_s12 = smov %s1124_s13 }
 0x155   : > { %s1624_s13 = smov %s1177_s19  ;;  %s1625_s14 = smov %s1168_s16 }
 0x156   :  { %12 = sbr.rel (!%p10_p9) target bundleno = 2 (0x2), region = 90 }

// kernel: geo_processor.13
= control target key start
LH: loop header
LB: loop body
LE: loop exit
PB: predicated region body
PF: predicated region fallthrough
CT: control target
= control target key end

     0   :  { %s335_s6 = smov 0   ;;  %s337_s7 = smov 0   ;;  %s408_s0 = inlined_call_operand.vmem [shape: f32[8,4,1024], index: 0, kind: input, shape index: {}]   ;;  %s409_s1 = inlined_call_operand.vmem [shape: f32[4,1024], index: 1, kind: output, shape index: {}]  }
   0x1   :  { %s339_s8 = smov 0  }
   0x2 LB: > { %s263_s9 = sadd.s32 4294967295, %s323_s8   ;;  %s352_s10 = sadd.s32 1, %s323_s8   ;;  %s323_s8 = sphi %s339_s8, %s412_s8   ;;  %s319_s7 = sphi %s337_s7, %s411_s7   ;;  %s315_s6 = sphi %s335_s6, %s410_s6  }
   0x3   : > { %s15_s11 = ssub.s32 %s323_s8, %s352_s10  ;;  %s18_s12 = sadd.s32 1, %s319_s7 }
   0x4   : > { %p16_p0 = scmp.eq.s32.totalorder %s15_s11, 0  ;;  %p25_p1 = scmp.ne.s32.totalorder %s319_s7, %s315_s6 }
   0x5   : > { %p26_p2 = scmp.eq.s32.totalorder %s323_s8, 0  ;;  %p266_p4 = scmp.ge.s32.totalorder %s323_s8, 2 }
   0x6   : > { %s361_s13 = scalar_select %p16_p0, %s319_s7, %s18_s12  }
   0x7   : > { %p27_p3 = por %p26_p2, %p25_p1  ;;  %77 = sbr.rel (%p266_p4) target bundleno = 32 (0x20), region = 16 }
   0xc   : > { %80 = sbr.rel (!%p27_p3) target bundleno = 32 (0x20), region = 20  ;;  %s82_s14 = sand.u32 (%p27_p3), 1, %s319_s7  }
   0xd   : > { %s276_s15 = sshll.u32 (%p27_p3), %s323_s8, 4  ;;  %s267_s16 = sshll.u32 (%p27_p3), %s82_s14, 7 }
   0xe   : > { %s369_s19 = scalar_lea.vmem (%p27_p3), %s408_s0, %s276_s15  ;;  %s84_s20 = scalar_lea.vmem (%p27_p3), [#allocation2], %s267_s16 }
   0xf   : > { %v100_v0 = vld [vmem:[%s369_s19] sm:$0xff] (%p27_p3)  ;;  %v102_v1 = vld [vmem:[%s369_s19 + $0x8] sm:$0xff] (%p27_p3) }
  0x10   : > { %v104_v2 = vld [vmem:[%s369_s19 + $0x20] sm:$0xff] (%p27_p3)  ;;  %101 = vst [vmem:[%s84_s20] sm:$0xff] (%p27_p3), %v100_v0  ;;  %v106_v3 = vld [vmem:[%s369_s19 + $0x28] sm:$0xff] (%p27_p3) }
  0x11   : > { %103 = vst [vmem:[%s84_s20 + $0x8] sm:$0xff] %v102_v1  ;;  %v108_v4 = vld [vmem:[%s369_s19 + $0x40] sm:$0xff]  ;;  %v110_v5 = vld [vmem:[%s369_s19 + $0x48] sm:$0xff] }
  0x12   : > { %105 = vst [vmem:[%s84_s20 + $0x10] sm:$0xff] %v104_v2  ;;  %v112_v6 = vld [vmem:[%s369_s19 + $0x60] sm:$0xff]  ;;  %v114_v7 = vld [vmem:[%s369_s19 + $0x68] sm:$0xff] }
  0x13   : > { %107 = vst [vmem:[%s84_s20 + $0x18] sm:$0xff] %v106_v3  ;;  %v116_v8 = vld [vmem:[%s369_s19 + $0x80] sm:$0xff]  ;;  %v118_v9 = vld [vmem:[%s369_s19 + $0x88] sm:$0xff] }
  0x14   : > { %109 = vst [vmem:[%s84_s20 + $0x20] sm:$0xff] %v108_v4  ;;  %v120_v10 = vld [vmem:[%s369_s19 + $0xa0] sm:$0xff]  ;;  %v122_v11 = vld [vmem:[%s369_s19 + $0xa8] sm:$0xff] }
  0x15   : > { %111 = vst [vmem:[%s84_s20 + $0x28] sm:$0xff] %v110_v5  ;;  %v124_v12 = vld [vmem:[%s369_s19 + $0xc0] sm:$0xff]  ;;  %v126_v13 = vld [vmem:[%s369_s19 + $0xc8] sm:$0xff] }
  0x16   : > { %113 = vst [vmem:[%s84_s20 + $0x30] sm:$0xff] %v112_v6  ;;  %v128_v14 = vld [vmem:[%s369_s19 + $0xe0] sm:$0xff]  ;;  %v130_v15 = vld [vmem:[%s369_s19 + $0xe8] sm:$0xff] }
  0x17   : > { %115 = vst [vmem:[%s84_s20 + $0x38] sm:$0xff] %v114_v7 }
  0x18   : > { %117 = vst [vmem:[%s84_s20 + $0x40] sm:$0xff] %v116_v8 }
  0x19   : > { %119 = vst [vmem:[%s84_s20 + $0x48] sm:$0xff] %v118_v9 }
  0x1a   : > { %121 = vst [vmem:[%s84_s20 + $0x50] sm:$0xff] %v120_v10 }
  0x1b   : > { %123 = vst [vmem:[%s84_s20 + $0x58] sm:$0xff] %v122_v11 }
  0x1c   : > { %125 = vst [vmem:[%s84_s20 + $0x60] sm:$0xff] %v124_v12 }
  0x1d   : > { %127 = vst [vmem:[%s84_s20 + $0x68] sm:$0xff] %v126_v13 }
  0x1e   : > { %129 = vst [vmem:[%s84_s20 + $0x70] sm:$0xff] %v128_v14 }
  0x1f   : > { %131 = vst [vmem:[%s84_s20 + $0x78] sm:$0xff] %v130_v15 }
  0x20 PF: > { %p270_p5 = scmp.ge.s32.totalorder %s323_s8, 1  ;;  %p136_p6 = scmp.lt.s32.totalorder %s323_s8, 3 }
  0x22   : > { %p137_p7 = pnand %p270_p5, %p136_p6 }
  0x23   : > { %s143_s21 = sand.u32 (!%p137_p7), 1, %s315_s6   ;;  %s272_s22 = sshll.u32 (!%p137_p7), %s263_s9, 2 }
  0x24   : > { %140 = sbr.rel (%p137_p7) target bundleno = 54 (0x36), region = 43  ;;  %s271_s23 = sshll.u32 (!%p137_p7), %s143_s21, 7 }
  0x25   : > { %p164_p8 = scmp.lt.s32.totalorder (!%p137_p7), %s272_s22, 7  ;;  %s145_s24 = scalar_lea.vmem (!%p137_p7), [#allocation2], %s271_s23 }
  0x29   : > { %s414_s22 = smov (!%p164_p8, %s272_s22), 7  ;;  %v169_v16 = vld [vmem:[%s145_s24] sm:$0xff]  ;;  %v171_v17 = vld [vmem:[%s145_s24 + $0x10] sm:$0xff]  ;;  %v170_v26 = vld [vmem:[%s145_s24 + $0x8] sm:$0xff] }
  0x2a   : > { %v173_v18 = vld [vmem:[%s145_s24 + $0x20] sm:$0xff]  ;;  %v175_v19 = vld [vmem:[%s145_s24 + $0x30] sm:$0xff]  ;;  %v172_v28 = vld [vmem:[%s145_s24 + $0x18] sm:$0xff]  ;;  %s273_s25 = sshll.u32 %s414_s22, 2 }
  0x2b   : > { %v177_v20 = vld [vmem:[%s145_s24 + $0x40] sm:$0xff]  ;;  %v179_v21 = vld [vmem:[%s145_s24 + $0x50] sm:$0xff]  ;;  %v185_v22 = vmax.f32 %v169_v16, %v173_v18  ;;  %v186_v25 = vmax.f32 %v171_v17, %v175_v19  ;;  %v174_v29 = vld [vmem:[%s145_s24 + $0x28] sm:$0xff]  ;;  %s167_s28 = scalar_lea.vmem %s409_s1, %s273_s25 }
  0x2c   : > { %v181_v23 = vld [vmem:[%s145_s24 + $0x60] sm:$0xff]  ;;  %v183_v24 = vld [vmem:[%s145_s24 + $0x70] sm:$0xff]  ;;  %v176_v30 = vld [vmem:[%s145_s24 + $0x38] sm:$0xff]  ;;  %v192_v34 = vmax.f32 %v170_v26, %v174_v29 }
  0x2d   : > { %v187_v27 = vmax.f32 %v185_v22, %v177_v20  ;;  %v188_v31 = vmax.f32 %v186_v25, %v179_v21  ;;  %v178_v32 = vld [vmem:[%s145_s24 + $0x48] sm:$0xff]  ;;  %v180_v33 = vld [vmem:[%s145_s24 + $0x58] sm:$0xff]  ;;  %v193_v35 = vmax.f32 %v172_v28, %v176_v30 }
  0x2e   : > { %v182_v37 = vld [vmem:[%s145_s24 + $0x68] sm:$0xff]  ;;  %v184_v38 = vld [vmem:[%s145_s24 + $0x78] sm:$0xff]  ;;  %v194_v40 = vmax.f32 %v192_v34, %v178_v32 }
  0x2f   : > { %v189_v36 = vmax.f32 %v187_v27, %v181_v23  ;;  %v190_v39 = vmax.f32 %v188_v31, %v183_v24  ;;  %v195_v41 = vmax.f32 %v193_v35, %v180_v33 }
  0x30   : > { %v196_v43 = vmax.f32 %v194_v40, %v182_v37 }
  0x31   : > { %v191_v42 = vmax.f32 %v189_v36, %v190_v39  ;;  %v197_v44 = vmax.f32 %v195_v41, %v184_v38 }
  0x33   : > { %199 = vst [vmem:[%s167_s28] sm:$0xff] %v191_v42  ;;  %v198_v45 = vmax.f32 %v196_v43, %v197_v44 }
  0x35   : > { %200 = vst [vmem:[%s167_s28 + $0x8] sm:$0xff] %v198_v45 }
  0x36 PF: > { %p8_p9 = scmp.ge.s32.totalorder %s352_s10, 4   ;;  %s410_s6 = smov %s319_s7 }
  0x37   : > { %s411_s7 = smov %s361_s13  ;;  %s412_s8 = smov %s352_s10 }
  0x38   :  { %10 = sbr.rel (!%p8_p9) target bundleno = 2 (0x2), region = 82 }

// kernel: geo_processor.14
= control target key start
LH: loop header
LB: loop body
LE: loop exit
PB: predicated region body
PF: predicated region fallthrough
CT: control target
= control target key end

     0   :  { %s626_s12 = smov 0   ;;  %s628_s13 = smov 0   ;;  %s858_s0 = inlined_call_operand.vmem [shape: f32[108,1024], index: 0, kind: input, shape index: {}]   ;;  %s859_s1 = inlined_call_operand.vmem [shape: f32[8,108], index: 1, kind: input, shape index: {}]   ;;  %s860_s2 = inlined_call_operand.vmem [shape: f32[8,1], index: 2, kind: input, shape index: {}]   ;;  %s861_s3 = inlined_call_operand.vmem [shape: f32[8,1024], index: 3, kind: output, shape index: {}]  }
   0x1   :  { %s630_s14 = smov 0  }
   0x2 LB: > { %s533_s15 = sadd.s32 4294967295, %s603_s14   ;;  %s643_s16 = sadd.s32 1, %s603_s14   ;;  %s603_s14 = sphi %s630_s14, %s864_s14   ;;  %s599_s13 = sphi %s628_s13, %s863_s13   ;;  %s595_s12 = sphi %s626_s12, %s862_s12  }
   0x3   : > { %s17_s17 = ssub.s32 %s603_s14, %s643_s16  ;;  %s20_s18 = sadd.s32 1, %s599_s13 }
   0x4   : > { %p18_p0 = scmp.eq.s32.totalorder %s17_s17, 0  ;;  %p27_p1 = scmp.ne.s32.totalorder %s599_s13, %s595_s12 }
   0x5   : > { %p28_p2 = scmp.eq.s32.totalorder %s603_s14, 0  ;;  %p536_p4 = scmp.ge.s32.totalorder %s603_s14, 2 }
   0x6   : > { %s652_s19 = scalar_select %p18_p0, %s599_s13, %s20_s18  }
   0x7   : > { %p29_p3 = por %p28_p2, %p27_p1  ;;  %127 = sbr.rel (%p536_p4) target bundleno = 72 (0x48), region = 24 }
   0xc   : > { %130 = sbr.rel (!%p29_p3) target bundleno = 72 (0x48), region = 28  ;;  %s132_s20 = sand.u32 (%p29_p3), 1, %s599_s13  }
   0xd   : > { %s552_s21 = sshll.u32 (%p29_p3), %s603_s14, 5  ;;  %s553_s22 = smul.u32 (%p29_p3), 448, %s132_s20 }
   0xe   : > { %s660_s25 = scalar_lea.vmem (%p29_p3), %s858_s0, %s552_s21 }
   0xf   : > { %v150_v0 = vld [vmem:[%s660_s25] sm:$0xff] (%p29_p3)  ;;  %v152_v1 = vld [vmem:[%s660_s25 + $0x8] sm:$0xff] (%p29_p3)  ;;  %v154_v2 = vld [vmem:[%s660_s25 + $0x10] sm:$0xff] (%p29_p3)  ;;  %s665_s26 = scalar_lea.vmem (%p29_p3), [#allocation2], %s553_s22 }
  0x10   : > { %151 = vst [vmem:[%s665_s26] sm:$0xff] (%p29_p3), %v150_v0  ;;  %v156_v3 = vld [vmem:[%s660_s25 + $0x18] sm:$0xff] (%p29_p3)  ;;  %v158_v4 = vld [vmem:[%s660_s25 + $0x40] sm:$0xff] (%p29_p3)  ;;  %v160_v5 = vld [vmem:[%s660_s25 + $0x48] sm:$0xff] (%p29_p3) }
  0x11   : > { %153 = vst [vmem:[%s665_s26 + $0x8] sm:$0xff] %v152_v1  ;;  %v162_v6 = vld [vmem:[%s660_s25 + $0x50] sm:$0xff]  ;;  %v164_v7 = vld [vmem:[%s660_s25 + $0x58] sm:$0xff]  ;;  %v166_v8 = vld [vmem:[%s660_s25 + $0x80] sm:$0xff] }
  0x12   : > { %155 = vst [vmem:[%s665_s26 + $0x10] sm:$0xff] %v154_v2  ;;  %v168_v9 = vld [vmem:[%s660_s25 + $0x88] sm:$0xff]  ;;  %v170_v10 = vld [vmem:[%s660_s25 + $0x90] sm:$0xff]  ;;  %v172_v11 = vld [vmem:[%s660_s25 + $0x98] sm:$0xff] }
  0x13   : > { %157 = vst [vmem:[%s665_s26 + $0x18] sm:$0xff] %v156_v3  ;;  %v174_v12 = vld [vmem:[%s660_s25 + $0xc0] sm:$0xff]  ;;  %v176_v13 = vld [vmem:[%s660_s25 + $0xc8] sm:$0xff]  ;;  %v178_v14 = vld [vmem:[%s660_s25 + $0xd0] sm:$0xff] }
  0x14   : > { %159 = vst [vmem:[%s665_s26 + $0x20] sm:$0xff] %v158_v4  ;;  %v180_v15 = vld [vmem:[%s660_s25 + $0xd8] sm:$0xff]  ;;  %v182_v16 = vld [vmem:[%s660_s25 + $0x100] sm:$0xff]  ;;  %v184_v17 = vld [vmem:[%s660_s25 + $0x108] sm:$0xff] }
  0x15   : > { %161 = vst [vmem:[%s665_s26 + $0x28] sm:$0xff] %v160_v5  ;;  %v186_v18 = vld [vmem:[%s660_s25 + $0x110] sm:$0xff]  ;;  %v188_v19 = vld [vmem:[%s660_s25 + $0x118] sm:$0xff]  ;;  %v190_v20 = vld [vmem:[%s660_s25 + $0x140] sm:$0xff] }
  0x16   : > { %163 = vst [vmem:[%s665_s26 + $0x30] sm:$0xff] %v162_v6  ;;  %v192_v21 = vld [vmem:[%s660_s25 + $0x148] sm:$0xff]  ;;  %v194_v22 = vld [vmem:[%s660_s25 + $0x150] sm:$0xff]  ;;  %v196_v23 = vld [vmem:[%s660_s25 + $0x158] sm:$0xff] }
  0x17   : > { %165 = vst [vmem:[%s665_s26 + $0x38] sm:$0xff] %v164_v7  ;;  %v198_v24 = vld [vmem:[%s660_s25 + $0x180] sm:$0xff]  ;;  %v200_v25 = vld [vmem:[%s660_s25 + $0x188] sm:$0xff]  ;;  %v202_v26 = vld [vmem:[%s660_s25 + $0x190] sm:$0xff] }
  0x18   : > { %167 = vst [vmem:[%s665_s26 + $0x40] sm:$0xff] %v166_v8  ;;  %v204_v27 = vld [vmem:[%s660_s25 + $0x198] sm:$0xff]  ;;  %v206_v28 = vld [vmem:[%s660_s25 + $0x1c0] sm:$0xff]  ;;  %v208_v29 = vld [vmem:[%s660_s25 + $0x1c8] sm:$0xff] }
  0x19   : > { %169 = vst [vmem:[%s665_s26 + $0x48] sm:$0xff] %v168_v9  ;;  %v210_v30 = vld [vmem:[%s660_s25 + $0x1d0] sm:$0xff]  ;;  %v212_v31 = vld [vmem:[%s660_s25 + $0x1d8] sm:$0xff]  ;;  %v214_v32 = vld [vmem:[%s660_s25 + $0x200] sm:$0xff] }
  0x1a   : > { %171 = vst [vmem:[%s665_s26 + $0x50] sm:$0xff] %v170_v10  ;;  %v216_v33 = vld [vmem:[%s660_s25 + $0x208] sm:$0xff]  ;;  %v218_v34 = vld [vmem:[%s660_s25 + $0x210] sm:$0xff]  ;;  %v220_v35 = vld [vmem:[%s660_s25 + $0x218] sm:$0xff] }
  0x1b   : > { %173 = vst [vmem:[%s665_s26 + $0x58] sm:$0xff] %v172_v11  ;;  %v222_v36 = vld [vmem:[%s660_s25 + $0x240] sm:$0xff]  ;;  %v224_v37 = vld [vmem:[%s660_s25 + $0x248] sm:$0xff]  ;;  %v226_v38 = vld [vmem:[%s660_s25 + $0x250] sm:$0xff] }
  0x1c   : > { %175 = vst [vmem:[%s665_s26 + $0x60] sm:$0xff] %v174_v12  ;;  %v228_v39 = vld [vmem:[%s660_s25 + $0x258] sm:$0xff]  ;;  %v230_v40 = vld [vmem:[%s660_s25 + $0x280] sm:$0xff]  ;;  %v232_v41 = vld [vmem:[%s660_s25 + $0x288] sm:$0xff] }
  0x1d   : > { %177 = vst [vmem:[%s665_s26 + $0x68] sm:$0xff] %v176_v13  ;;  %v234_v42 = vld [vmem:[%s660_s25 + $0x290] sm:$0xff]  ;;  %v236_v43 = vld [vmem:[%s660_s25 + $0x298] sm:$0xff]  ;;  %v238_v44 = vld [vmem:[%s660_s25 + $0x2c0] sm:$0xff] }
  0x1e   : > { %179 = vst [vmem:[%s665_s26 + $0x70] sm:$0xff] %v178_v14  ;;  %v240_v45 = vld [vmem:[%s660_s25 + $0x2c8] sm:$0xff]  ;;  %v242_v46 = vld [vmem:[%s660_s25 + $0x2d0] sm:$0xff]  ;;  %v244_v47 = vld [vmem:[%s660_s25 + $0x2d8] sm:$0xff] }
  0x1f   : > { %181 = vst [vmem:[%s665_s26 + $0x78] sm:$0xff] %v180_v15  ;;  %v246_v48 = vld [vmem:[%s660_s25 + $0x300] sm:$0xff]  ;;  %v248_v49 = vld [vmem:[%s660_s25 + $0x308] sm:$0xff]  ;;  %v250_v50 = vld [vmem:[%s660_s25 + $0x310] sm:$0xff] }
  0x20   : > { %183 = vst [vmem:[%s665_s26 + $0x80] sm:$0xff] %v182_v16  ;;  %v252_v51 = vld [vmem:[%s660_s25 + $0x318] sm:$0xff]  ;;  %v254_v52 = vld [vmem:[%s660_s25 + $0x340] sm:$0xff]  ;;  %v256_v53 = vld [vmem:[%s660_s25 + $0x348] sm:$0xff] }
  0x21   : > { %185 = vst [vmem:[%s665_s26 + $0x88] sm:$0xff] %v184_v17  ;;  %v258_v54 = vld [vmem:[%s660_s25 + $0x350] sm:$0xff]  ;;  %v260_v55 = vld [vmem:[%s660_s25 + $0x358] sm:$0xff] }
  0x22   : > { %187 = vst [vmem:[%s665_s26 + $0x90] sm:$0xff] %v186_v18 }
  0x23   : > { %189 = vst [vmem:[%s665_s26 + $0x98] sm:$0xff] %v188_v19 }
  0x24   : > { %191 = vst [vmem:[%s665_s26 + $0xa0] sm:$0xff] %v190_v20 }
  0x25   : > { %193 = vst [vmem:[%s665_s26 + $0xa8] sm:$0xff] %v192_v21 }
  0x26   : > { %195 = vst [vmem:[%s665_s26 + $0xb0] sm:$0xff] %v194_v22 }
  0x27   : > { %197 = vst [vmem:[%s665_s26 + $0xb8] sm:$0xff] %v196_v23 }
  0x28   : > { %199 = vst [vmem:[%s665_s26 + $0xc0] sm:$0xff] %v198_v24 }
  0x29   : > { %201 = vst [vmem:[%s665_s26 + $0xc8] sm:$0xff] %v200_v25 }
  0x2a   : > { %203 = vst [vmem:[%s665_s26 + $0xd0] sm:$0xff] %v202_v26 }
  0x2b   : > { %205 = vst [vmem:[%s665_s26 + $0xd8] sm:$0xff] %v204_v27 }
  0x2c   : > { %207 = vst [vmem:[%s665_s26 + $0xe0] sm:$0xff] %v206_v28 }
  0x2d   : > { %209 = vst [vmem:[%s665_s26 + $0xe8] sm:$0xff] %v208_v29 }
  0x2e   : > { %211 = vst [vmem:[%s665_s26 + $0xf0] sm:$0xff] %v210_v30 }
  0x2f   : > { %213 = vst [vmem:[%s665_s26 + $0xf8] sm:$0xff] %v212_v31 }
  0x30   : > { %215 = vst [vmem:[%s665_s26 + $0x100] sm:$0xff] %v214_v32 }
  0x31   : > { %217 = vst [vmem:[%s665_s26 + $0x108] sm:$0xff] %v216_v33 }
  0x32   : > { %219 = vst [vmem:[%s665_s26 + $0x110] sm:$0xff] %v218_v34 }
  0x33   : > { %221 = vst [vmem:[%s665_s26 + $0x118] sm:$0xff] %v220_v35 }
  0x34   : > { %223 = vst [vmem:[%s665_s26 + $0x120] sm:$0xff] %v222_v36 }
  0x35   : > { %225 = vst [vmem:[%s665_s26 + $0x128] sm:$0xff] %v224_v37 }
  0x36   : > { %227 = vst [vmem:[%s665_s26 + $0x130] sm:$0xff] %v226_v38 }
  0x37   : > { %229 = vst [vmem:[%s665_s26 + $0x138] sm:$0xff] %v228_v39 }
  0x38   : > { %231 = vst [vmem:[%s665_s26 + $0x140] sm:$0xff] %v230_v40 }
  0x39   : > { %233 = vst [vmem:[%s665_s26 + $0x148] sm:$0xff] %v232_v41 }
  0x3a   : > { %235 = vst [vmem:[%s665_s26 + $0x150] sm:$0xff] %v234_v42 }
  0x3b   : > { %237 = vst [vmem:[%s665_s26 + $0x158] sm:$0xff] %v236_v43 }
  0x3c   : > { %239 = vst [vmem:[%s665_s26 + $0x160] sm:$0xff] %v238_v44 }
  0x3d   : > { %241 = vst [vmem:[%s665_s26 + $0x168] sm:$0xff] %v240_v45 }
  0x3e   : > { %243 = vst [vmem:[%s665_s26 + $0x170] sm:$0xff] %v242_v46 }
  0x3f   : > { %245 = vst [vmem:[%s665_s26 + $0x178] sm:$0xff] %v244_v47 }
  0x40   : > { %247 = vst [vmem:[%s665_s26 + $0x180] sm:$0xff] %v246_v48 }
  0x41   : > { %249 = vst [vmem:[%s665_s26 + $0x188] sm:$0xff] %v248_v49 }
  0x42   : > { %251 = vst [vmem:[%s665_s26 + $0x190] sm:$0xff] %v250_v50 }
  0x43   : > { %253 = vst [vmem:[%s665_s26 + $0x198] sm:$0xff] %v252_v51 }
  0x44   : > { %255 = vst [vmem:[%s665_s26 + $0x1a0] sm:$0xff] %v254_v52 }
  0x45   : > { %257 = vst [vmem:[%s665_s26 + $0x1a8] sm:$0xff] %v256_v53 }
  0x46   : > { %259 = vst [vmem:[%s665_s26 + $0x1b0] sm:$0xff] %v258_v54 }
  0x47   : > { %261 = vst [vmem:[%s665_s26 + $0x1b8] sm:$0xff] %v260_v55 }
  0x48 PF: > { %p539_p5 = scmp.ge.s32.totalorder %s603_s14, 1  ;;  %p266_p6 = scmp.lt.s32.totalorder %s603_s14, 3 }
  0x4a   : > { %p267_p7 = pnand %p539_p5, %p266_p6 }
  0x4b   : > { %s273_s27 = sand.u32 (!%p267_p7), 1, %s595_s12   ;;  %s540_s7 = sshll.u32 (!%p267_p7), %s533_s15, 2 }
  0x4c   : > { %270 = sbr.rel (%p267_p7) target bundleno = 248 (0xf8), region = 51  ;;  %p298_p8 = scmp.lt.s32.totalorder (!%p267_p7), %s540_s7, 7 }
  0x4d   : > { %s554_s28 = smul.u32 (!%p267_p7), 448, %s273_s27 }
  0x4f   : > { %s782_s4 = scalar_lea.vmem (!%p267_p7), [#allocation2], %s554_s28 }
  0x51   : > { %vm370_vm0 = vcmask 1043456   ;;  %v360_v56 = vld [vmem:[%s860_s2] sm:$0xff]  ;;  %v605_v57 = vmov 0   ;;  %v358_v58 = vld [vmem:[%s782_s4 + $0x1b0] sm:$0xf]  ;;  %v355_v61 = vld [vmem:[%s782_s4 + $0x198] sm:$0xff] }
  0x52   : > { %580 = vset.pattern.permute.xlu0 %v605_v57  ;;  %v359_v59 = vld [vmem:[%s782_s4 + $0x1b8] sm:$0xf]  ;;  %v354_v60 = vld [vmem:[%s782_s4 + $0x190] sm:$0xff]  ;;  %546 = vmatpush.msk.msra.mxu2 %vm370_vm0, %v358_v58  ;;  %v356_v62 = vld [vmem:[%s782_s4 + $0x1a0] sm:$0xf]  ;;  %vm366_vm1 = vcmask 883712  }
  0x53   : > { %363 = vperm.xlu0 %580, %v360_v56   ;;  %548 = vmatpush.msk.msra.mxu3 %vm370_vm0, %v359_v59  ;;  %v357_v63 = vld [vmem:[%s782_s4 + $0x1a8] sm:$0xf]  ;;  %v350_v0 = vld [vmem:[%s782_s4 + $0x170] sm:$0xff]  ;;  %v351_v1 = vld [vmem:[%s782_s4 + $0x178] sm:$0xff]  ;;  %s866_s7 = smov (!%p298_p8, %s540_s7), 7 }
  0x54   : > { %542 = vmatpush.msk.msra.mxu0 %vm370_vm0, %v356_v62  ;;  %544 = vmatpush.msk.msra.mxu1 %vm370_vm0, %v357_v63  ;;  %v352_v2 = vld [vmem:[%s782_s4 + $0x180] sm:$0xff]  ;;  %v353_v3 = vld [vmem:[%s782_s4 + $0x188] sm:$0xff]  ;;  %v346_v4 = vld [vmem:[%s782_s4 + $0x150] sm:$0xff]  ;;  %s541_s8 = sshll.u32 %s866_s7, 3 }
  0x55   : > { %426 = vmatpush.msra.mxu2 %v354_v60  ;;  %446 = vmatpush.msra.mxu3 %v355_v61  ;;  %v347_v5 = vld [vmem:[%s782_s4 + $0x158] sm:$0xff]  ;;  %v348_v6 = vld [vmem:[%s782_s4 + $0x160] sm:$0xff]  ;;  %v349_v7 = vld [vmem:[%s782_s4 + $0x168] sm:$0xff]  ;;  %s301_s11 = scalar_lea.vmem %s861_s3, %s541_s8 }
  0x56   : > { %386 = vmatpush.msra.mxu0 %v352_v2  ;;  %406 = vmatpush.msra.mxu1 %v353_v3  ;;  %v344_v8 = vld [vmem:[%s782_s4 + $0x140] sm:$0xff]  ;;  %v345_v9 = vld [vmem:[%s782_s4 + $0x148] sm:$0xff]  ;;  %v342_v10 = vld [vmem:[%s782_s4 + $0x130] sm:$0xff] }
  0x57   : > { %427 = vmatpush.msra.mxu2 %v350_v0  ;;  %447 = vmatpush.msra.mxu3 %v351_v1  ;;  %v343_v11 = vld [vmem:[%s782_s4 + $0x138] sm:$0xff]  ;;  %v340_v12 = vld [vmem:[%s782_s4 + $0x120] sm:$0xff]  ;;  %v341_v13 = vld [vmem:[%s782_s4 + $0x128] sm:$0xff] }
  0x58   : > { %387 = vmatpush.msra.mxu0 %v348_v6  ;;  %407 = vmatpush.msra.mxu1 %v349_v7  ;;  %v338_v14 = vld [vmem:[%s782_s4 + $0x110] sm:$0xff]  ;;  %v339_v15 = vld [vmem:[%s782_s4 + $0x118] sm:$0xff]  ;;  %v336_v16 = vld [vmem:[%s782_s4 + $0x100] sm:$0xff] }
  0x59   : > { %428 = vmatpush.msra.mxu2 %v346_v4  ;;  %448 = vmatpush.msra.mxu3 %v347_v5  ;;  %v337_v17 = vld [vmem:[%s782_s4 + $0x108] sm:$0xff]  ;;  %v334_v18 = vld [vmem:[%s782_s4 + $0xf0] sm:$0xff]  ;;  %v335_v19 = vld [vmem:[%s782_s4 + $0xf8] sm:$0xff] }
  0x5a   : > { %388 = vmatpush.msra.mxu0 %v344_v8  ;;  %408 = vmatpush.msra.mxu1 %v345_v9  ;;  %v332_v20 = vld [vmem:[%s782_s4 + $0xe0] sm:$0xff]  ;;  %v333_v21 = vld [vmem:[%s782_s4 + $0xe8] sm:$0xff]  ;;  %v330_v22 = vld [vmem:[%s782_s4 + $0xd0] sm:$0xff] }
  0x5b   : > { %429 = vmatpush.msra.mxu2 %v342_v10  ;;  %449 = vmatpush.msra.mxu3 %v343_v11  ;;  %v331_v23 = vld [vmem:[%s782_s4 + $0xd8] sm:$0xff]  ;;  %v328_v24 = vld [vmem:[%s782_s4 + $0xc0] sm:$0xff]  ;;  %v329_v25 = vld [vmem:[%s782_s4 + $0xc8] sm:$0xff] }
  0x5c   : > { %389 = vmatpush.msra.mxu0 %v340_v12  ;;  %409 = vmatpush.msra.mxu1 %v341_v13  ;;  %v326_v26 = vld [vmem:[%s782_s4 + $0xb0] sm:$0xff]  ;;  %v327_v27 = vld [vmem:[%s782_s4 + $0xb8] sm:$0xff]  ;;  %v324_v28 = vld [vmem:[%s782_s4 + $0xa0] sm:$0xff] }
  0x5d   : > { %430 = vmatpush.msra.mxu2 %v338_v14  ;;  %450 = vmatpush.msra.mxu3 %v339_v15  ;;  %v325_v29 = vld [vmem:[%s782_s4 + $0xa8] sm:$0xff]  ;;  %v322_v30 = vld [vmem:[%s782_s4 + $0x90] sm:$0xff]  ;;  %v323_v31 = vld [vmem:[%s782_s4 + $0x98] sm:$0xff] }
  0x5e   : > { %390 = vmatpush.msra.mxu0 %v336_v16  ;;  %410 = vmatpush.msra.mxu1 %v337_v17  ;;  %v320_v32 = vld [vmem:[%s782_s4 + $0x80] sm:$0xff]  ;;  %v321_v33 = vld [vmem:[%s782_s4 + $0x88] sm:$0xff]  ;;  %v318_v34 = vld [vmem:[%s782_s4 + $0x70] sm:$0xff] }
  0x5f   : > { %431 = vmatpush.msra.mxu2 %v334_v18  ;;  %451 = vmatpush.msra.mxu3 %v335_v19  ;;  %v319_v35 = vld [vmem:[%s782_s4 + $0x78] sm:$0xff]  ;;  %v316_v36 = vld [vmem:[%s782_s4 + $0x60] sm:$0xff]  ;;  %v317_v37 = vld [vmem:[%s782_s4 + $0x68] sm:$0xff] }
  0x60   : > { %391 = vmatpush.msra.mxu0 %v332_v20  ;;  %411 = vmatpush.msra.mxu1 %v333_v21  ;;  %v314_v38 = vld [vmem:[%s782_s4 + $0x50] sm:$0xff]  ;;  %v315_v39 = vld [vmem:[%s782_s4 + $0x58] sm:$0xff]  ;;  %v312_v40 = vld [vmem:[%s782_s4 + $0x40] sm:$0xff] }
  0x61   : > { %432 = vmatpush.msra.mxu2 %v330_v22  ;;  %452 = vmatpush.msra.mxu3 %v331_v23  ;;  %v313_v41 = vld [vmem:[%s782_s4 + $0x48] sm:$0xff]  ;;  %v310_v42 = vld [vmem:[%s782_s4 + $0x30] sm:$0xff]  ;;  %v311_v43 = vld [vmem:[%s782_s4 + $0x38] sm:$0xff] }
  0x62   : > { %392 = vmatpush.msra.mxu0 %v328_v24  ;;  %412 = vmatpush.msra.mxu1 %v329_v25  ;;  %v308_v44 = vld [vmem:[%s782_s4 + $0x20] sm:$0xff]  ;;  %v309_v45 = vld [vmem:[%s782_s4 + $0x28] sm:$0xff]  ;;  %v306_v46 = vld [vmem:[%s782_s4 + $0x10] sm:$0xff] }
  0x63   : > { %433 = vmatpush.msra.mxu2 %v326_v26  ;;  %453 = vmatpush.msra.mxu3 %v327_v27  ;;  %v307_v47 = vld [vmem:[%s782_s4 + $0x18] sm:$0xff]  ;;  %v303_v48 = vld [vmem:[%s859_s1] sm:$0xff]  ;;  %v305_v50 = vld [vmem:[%s782_s4 + $0x8] sm:$0xff] }
  0x64   : > { %393 = vmatpush.msra.mxu0 %v324_v28  ;;  %413 = vmatpush.msra.mxu1 %v325_v29  ;;  %v304_v49 = vld [vmem:[%s782_s4] sm:$0xff] }
  0x65   : > { %434 = vmatpush.msra.mxu2 %v322_v30  ;;  %454 = vmatpush.msra.mxu3 %v323_v31 }
  0x66   : > { %394 = vmatpush.msra.mxu0 %v320_v32  ;;  %414 = vmatpush.msra.mxu1 %v321_v33 }
  0x67   : > { %435 = vmatpush.msra.mxu2 %v318_v34  ;;  %455 = vmatpush.msra.mxu3 %v319_v35 }
  0x68   : > { %395 = vmatpush.msra.mxu0 %v316_v36  ;;  %415 = vmatpush.msra.mxu1 %v317_v37 }
  0x69   : > { %436 = vmatpush.msra.mxu2 %v314_v38  ;;  %456 = vmatpush.msra.mxu3 %v315_v39 }
  0x6a   : > { %396 = vmatpush.msra.mxu0 %v312_v40  ;;  %416 = vmatpush.msra.mxu1 %v313_v41 }
  0x6b   : > { %437 = vmatpush.msra.mxu2 %v310_v42  ;;  %457 = vmatpush.msra.mxu3 %v311_v43 }
  0x6c   : > { %397 = vmatpush.msra.mxu0 %v308_v44  ;;  %417 = vmatpush.msra.mxu1 %v309_v45 }
  0x6d   : > { %438 = vmatpush.msra.mxu2 %v306_v46  ;;  %458 = vmatpush.msra.mxu3 %v307_v47 }
  0x6e   : > { %547 = vmatmul.msk.f32.vlgmr.msra.gmra.mxu2 %vm366_vm1, %v303_v48  ;;  %549 = vmatmul.msk.f32.vlgmr.msra.gmra.mxu3 %vm366_vm1, %v303_v48 }
  0x6f   : > { %398 = vmatpush.msra.mxu0 %v304_v49  ;;  %418 = vmatpush.msra.mxu1 %v305_v50 }
  0x70   : > { %543 = vmatmul.msk.f32.vlgmr.msra.gmra.mxu0 %vm366_vm1, %v303_v48  ;;  %545 = vmatmul.msk.f32.vlgmr.msra.gmra.mxu1 %vm366_vm1, %v303_v48 }
  0xc5   : > { %v364_v51 = vpop.permute.xlu0 %363 }
  0xed   : > { %v400_v52 = vpop.f32.mrf.mxu0  ;;  %v420_v53 = vpop.f32.mrf.mxu1 }
  0xee   : > { %v401_v54 = vadd.f32 %v400_v52, %v364_v51  ;;  %v421_v55 = vadd.f32 %v420_v53, %v364_v51 }
  0xf0   : > { %v463_v56 = vmax.f32 %v401_v54, 0.0  ;;  %v464_v57 = vmax.f32 %v421_v55, 0.0 }
  0xf1   : > { %v440_v58 = vpop.f32.mrf.mxu2  ;;  %v460_v59 = vpop.f32.mrf.mxu3 }
  0xf2   : > { %467 = vst [vmem:[%s301_s11] sm:$0xff] %v463_v56  ;;  %v441_v60 = vadd.f32 %v440_v58, %v364_v51  ;;  %v461_v61 = vadd.f32 %v460_v59, %v364_v51 }
  0xf3   : > { %468 = vst [vmem:[%s301_s11 + $0x8] sm:$0xff] %v464_v57 }
  0xf4   : > { %v465_v62 = vmax.f32 %v441_v60, 0.0  ;;  %v466_v63 = vmax.f32 %v461_v61, 0.0 }
  0xf6   : > { %469 = vst [vmem:[%s301_s11 + $0x10] sm:$0xff] %v465_v62 }
  0xf7   : > { %470 = vst [vmem:[%s301_s11 + $0x18] sm:$0xff] %v466_v63 }
  0xf8 PF: > { %p10_p9 = scmp.ge.s32.totalorder %s643_s16, 4   ;;  %s862_s12 = smov %s599_s13 }
  0xf9   : > { %s863_s13 = smov %s652_s19  ;;  %s864_s14 = smov %s643_s16 }
  0xfa   :  { %12 = sbr.rel (!%p10_p9) target bundleno = 2 (0x2), region = 90 }

// kernel: geo_processor.15
= control target key start
LH: loop header
LB: loop body
LE: loop exit
PB: predicated region body
PF: predicated region fallthrough
CT: control target
= control target key end

     0   :  { %s65_s0 = inlined_call_operand.vmem [shape: f32[8,8,128], index: 0, kind: input, shape index: {}]   ;;  %s66_s1 = inlined_call_operand.vmem [shape: f32[8,128], index: 1, kind: output, shape index: {}]  }
   0x1   :  { %v8_v0 = vld [vmem:[%s65_s0] sm:$0xff]  ;;  %v9_v1 = vld [vmem:[%s65_s0 + $0x8] sm:$0xff]  ;;  %v10_v2 = vld [vmem:[%s65_s0 + $0x10] sm:$0xff] }
   0x2   :  { %v11_v3 = vld [vmem:[%s65_s0 + $0x18] sm:$0xff]  ;;  %v12_v4 = vld [vmem:[%s65_s0 + $0x20] sm:$0xff]  ;;  %v13_v5 = vld [vmem:[%s65_s0 + $0x28] sm:$0xff] }
   0x3   :  { %v14_v6 = vld [vmem:[%s65_s0 + $0x30] sm:$0xff]  ;;  %v15_v7 = vld [vmem:[%s65_s0 + $0x38] sm:$0xff]  ;;  %v16_v8 = vmax.f32 %v8_v0, %v12_v4  ;;  %v17_v9 = vmax.f32 %v9_v1, %v13_v5 }
   0x4   :  { %v18_v10 = vmax.f32 %v10_v2, %v14_v6  ;;  %v19_v11 = vmax.f32 %v11_v3, %v15_v7 }
   0x5   :  { %v20_v12 = vmax.f32 %v16_v8, %v17_v9 }
   0x6   :  { %v21_v13 = vmax.f32 %v18_v10, %v19_v11 }
   0x8   :  { %v22_v14 = vmax.f32 %v20_v12, %v21_v13 }
   0xa   :  { %23 = vst [vmem:[%s66_s1] sm:$0xff] %v22_v14 }

// kernel: geo_processor.16
= control target key start
LH: loop header
LB: loop body
LE: loop exit
PB: predicated region body
PF: predicated region fallthrough
CT: control target
= control target key end

     0   :  { %v138_v2 = vmov 0   ;;  %vm57_vm0 = vcmask 719872   ;;  %s266_s0 = inlined_call_operand.vmem [shape: f32[216,128], index: 0, kind: input, shape index: {}]   ;;  %s267_s2 = inlined_call_operand.vmem [shape: f32[16,1], index: 2, kind: input, shape index: {}]   ;;  %s268_s1 = inlined_call_operand.vmem [shape: f32[16,216], index: 1, kind: input, shape index: {}]   ;;  %s269_s3 = inlined_call_operand.vmem [shape: f32[16,128], index: 3, kind: output, shape index: {}]  }
   0x1   :  { %v33_v0 = vld [vmem:[%s266_s0 + $0x78] sm:$0xff]  ;;  %v32_v1 = vld [vmem:[%s266_s0 + $0x70] sm:$0xff]  ;;  %137 = vset.pattern.permute.xlu0 %v138_v2  ;;  %v31_v3 = vld [vmem:[%s266_s0 + $0x68] sm:$0xff] }
   0x2   :  { %64 = vmatpush.msra.mxu0 %v33_v0  ;;  %120 = vmatpush.msra.mxu2 %v33_v0  ;;  %v44_v4 = vld [vmem:[%s266_s0 + $0xd0] sm:$0xff]  ;;  %v43_v5 = vld [vmem:[%s266_s0 + $0xc8] sm:$0xff]  ;;  %v30_v6 = vld [vmem:[%s266_s0 + $0x60] sm:$0xff] }
   0x3   :  { %92 = vmatpush.msra.mxu1 %v44_v4  ;;  %v42_v7 = vld [vmem:[%s266_s0 + $0xc0] sm:$0xff]  ;;  %v29_v8 = vld [vmem:[%s266_s0 + $0x58] sm:$0xff]  ;;  %v28_v10 = vld [vmem:[%s266_s0 + $0x50] sm:$0xff] }
   0x4   :  { %65 = vmatpush.msra.mxu0 %v32_v1  ;;  %121 = vmatpush.msra.mxu2 %v32_v1  ;;  %v41_v9 = vld [vmem:[%s266_s0 + $0xb8] sm:$0xff]  ;;  %v40_v11 = vld [vmem:[%s266_s0 + $0xb0] sm:$0xff]  ;;  %v27_v12 = vld [vmem:[%s266_s0 + $0x48] sm:$0xff] }
   0x5   :  { %93 = vmatpush.msra.mxu1 %v43_v5  ;;  %v45_v13 = vld [vmem:[%s267_s2] sm:$0xff]  ;;  %v39_v14 = vld [vmem:[%s266_s0 + $0xa8] sm:$0xff]  ;;  %v25_v17 = vld [vmem:[%s266_s0 + $0x38] sm:$0xff] }
   0x6   :  { %66 = vmatpush.msra.mxu0 %v31_v3  ;;  %122 = vmatpush.msra.mxu2 %v31_v3  ;;  %v26_v15 = vld [vmem:[%s266_s0 + $0x40] sm:$0xff]  ;;  %v37_v18 = vld [vmem:[%s266_s0 + $0x98] sm:$0xff]  ;;  %v24_v19 = vld [vmem:[%s266_s0 + $0x30] sm:$0xff] }
   0x7   :  { %94 = vmatpush.msra.mxu1 %v42_v7  ;;  %49 = vperm.xlu0 %137, %v45_v13   ;;  %v38_v16 = vld [vmem:[%s266_s0 + $0xa0] sm:$0xff]  ;;  %v36_v20 = vld [vmem:[%s266_s0 + $0x90] sm:$0xff]  ;;  %v46_v21 = vld [vmem:[%s267_s2 + $0x8] sm:$0xff] }
   0x8   :  { %67 = vmatpush.msra.mxu0 %v30_v6  ;;  %123 = vmatpush.msra.mxu2 %v30_v6  ;;  %v23_v22 = vld [vmem:[%s266_s0 + $0x28] sm:$0xff]  ;;  %v22_v24 = vld [vmem:[%s266_s0 + $0x20] sm:$0xff]  ;;  %v21_v26 = vld [vmem:[%s266_s0 + $0x18] sm:$0xff] }
   0x9   :  { %95 = vmatpush.msra.mxu1 %v41_v9  ;;  %v35_v23 = vld [vmem:[%s266_s0 + $0x88] sm:$0xff]  ;;  %v34_v25 = vld [vmem:[%s266_s0 + $0x80] sm:$0xff]  ;;  %v20_v28 = vld [vmem:[%s266_s0 + $0x10] sm:$0xff] }
   0xa   :  { %68 = vmatpush.msra.mxu0 %v29_v8  ;;  %124 = vmatpush.msra.mxu2 %v29_v8  ;;  %v15_v27 = vld [vmem:[%s268_s1 + $0x8] sm:$0xff]  ;;  %v18_v30 = vld [vmem:[%s266_s0] sm:$0xff]  ;;  %v16_v32 = vld [vmem:[%s268_s1 + $0x10] sm:$0xff] }
   0xb   :  { %96 = vmatpush.msra.mxu1 %v40_v11  ;;  %v19_v29 = vld [vmem:[%s266_s0 + $0x8] sm:$0xff]  ;;  %v14_v31 = vld [vmem:[%s268_s1] sm:$0xff]  ;;  %v17_v33 = vld [vmem:[%s268_s1 + $0x18] sm:$0xff] }
   0xc   :  { %69 = vmatpush.msra.mxu0 %v28_v10  ;;  %125 = vmatpush.msra.mxu2 %v28_v10 }
   0xd   :  { %97 = vmatpush.msra.mxu1 %v39_v14 }
   0xe   :  { %70 = vmatpush.msra.mxu0 %v27_v12  ;;  %126 = vmatpush.msra.mxu2 %v27_v12 }
   0xf   :  { %98 = vmatpush.msra.mxu1 %v38_v16  ;;  %54 = vperm.xlu0 %137, %v46_v21  }
  0x10   :  { %71 = vmatpush.msra.mxu0 %v26_v15  ;;  %127 = vmatpush.msra.mxu2 %v26_v15 }
  0x11   :  { %99 = vmatpush.msra.mxu1 %v37_v18 }
  0x12   :  { %72 = vmatpush.msra.mxu0 %v25_v17  ;;  %128 = vmatpush.msra.mxu2 %v25_v17 }
  0x13   :  { %100 = vmatpush.msra.mxu1 %v36_v20 }
  0x14   :  { %73 = vmatpush.msra.mxu0 %v24_v19  ;;  %129 = vmatpush.msra.mxu2 %v24_v19 }
  0x15   :  { %101 = vmatpush.msra.mxu1 %v35_v23 }
  0x16   :  { %74 = vmatpush.msra.mxu0 %v23_v22  ;;  %130 = vmatpush.msra.mxu2 %v23_v22 }
  0x17   :  { %102 = vmatpush.msra.mxu1 %v34_v25 }
  0x18   :  { %75 = vmatpush.msra.mxu0 %v22_v24  ;;  %131 = vmatpush.msra.mxu2 %v22_v24 }
  0x19   :  { %118 = vmatmul.msk.f32.vlgmr.msra.gmra.mxu1 %vm57_vm0, %v15_v27 }
  0x1a   :  { %76 = vmatpush.msra.mxu0 %v21_v26  ;;  %132 = vmatpush.msra.mxu2 %v21_v26 }
  0x1c   :  { %77 = vmatpush.msra.mxu0 %v20_v28  ;;  %133 = vmatpush.msra.mxu2 %v20_v28 }
  0x1e   :  { %78 = vmatpush.msra.mxu0 %v19_v29  ;;  %134 = vmatpush.msra.mxu2 %v19_v29 }
  0x20   :  { %79 = vmatpush.msra.mxu0 %v18_v30  ;;  %135 = vmatpush.msra.mxu2 %v18_v30 }
  0x21   :  { %80 = vmatmul.f32.vlgmr.msra.gmra.mxu0 %v14_v31  ;;  %83 = vmatmul.f32.vlgmr.msra.gmra.mxu2 %v16_v32 }
  0x22   :  { %119 = vmatmul.msk.f32.gmra.mxu1 %vm57_vm0, %v17_v33 }
  0x79   :  { %v50_v34 = vpop.permute.xlu0 %49 }
  0x81   :  { %v55_v39 = vpop.permute.xlu0 %54 }
  0x96   :  { %v104_v35 = vpop.f32.mrf.mxu1 }
  0x9e   :  { %v81_v36 = vpop.f32.mrf.mxu0 }
  0x9f   :  { %v82_v37 = vadd.f32 %v81_v36, %v50_v34  ;;  %v107_v42 = vpop.f32.mrf.mxu1 }
  0xa1   :  { %v105_v38 = vadd.f32 %v104_v35, %v82_v37 }
  0xa3   :  { %v110_v40 = vmax.f32 %v105_v38, 0.0 }
  0xa4   :  { %v84_v41 = vpop.f32.mrf.mxu2 }
  0xa5   :  { %112 = vst [vmem:[%s269_s3] sm:$0xff] %v110_v40  ;;  %v85_v43 = vadd.f32 %v84_v41, %v55_v39 }
  0xa7   :  { %v108_v44 = vadd.f32 %v107_v42, %v85_v43 }
  0xa9   :  { %v111_v45 = vmax.f32 %v108_v44, 0.0 }
  0xab   :  { %113 = vst [vmem:[%s269_s3 + $0x8] sm:$0xff] %v111_v45 }

// kernel: geo_processor.17
= control target key start
LH: loop header
LB: loop body
LE: loop exit
PB: predicated region body
PF: predicated region fallthrough
CT: control target
= control target key end

     0   :  { %s108_s0 = inlined_call_operand.vmem [shape: f32[8,16,128], index: 0, kind: input, shape index: {}]   ;;  %s109_s1 = inlined_call_operand.vmem [shape: f32[16,128], index: 1, kind: output, shape index: {}]  }
   0x1   :  { %v8_v0 = vld [vmem:[%s108_s0] sm:$0xff]  ;;  %v10_v1 = vld [vmem:[%s108_s0 + $0x10] sm:$0xff]  ;;  %v9_v10 = vld [vmem:[%s108_s0 + $0x8] sm:$0xff] }
   0x2   :  { %v12_v2 = vld [vmem:[%s108_s0 + $0x20] sm:$0xff]  ;;  %v14_v3 = vld [vmem:[%s108_s0 + $0x30] sm:$0xff]  ;;  %v11_v12 = vld [vmem:[%s108_s0 + $0x18] sm:$0xff] }
   0x3   :  { %v16_v4 = vld [vmem:[%s108_s0 + $0x40] sm:$0xff]  ;;  %v18_v5 = vld [vmem:[%s108_s0 + $0x50] sm:$0xff]  ;;  %v24_v6 = vmax.f32 %v8_v0, %v12_v2  ;;  %v25_v9 = vmax.f32 %v10_v1, %v14_v3  ;;  %v13_v13 = vld [vmem:[%s108_s0 + $0x28] sm:$0xff] }
   0x4   :  { %v20_v7 = vld [vmem:[%s108_s0 + $0x60] sm:$0xff]  ;;  %v22_v8 = vld [vmem:[%s108_s0 + $0x70] sm:$0xff]  ;;  %v15_v14 = vld [vmem:[%s108_s0 + $0x38] sm:$0xff]  ;;  %v31_v18 = vmax.f32 %v9_v10, %v13_v13 }
   0x5   :  { %v26_v11 = vmax.f32 %v24_v6, %v16_v4  ;;  %v27_v15 = vmax.f32 %v25_v9, %v18_v5  ;;  %v17_v16 = vld [vmem:[%s108_s0 + $0x48] sm:$0xff]  ;;  %v19_v17 = vld [vmem:[%s108_s0 + $0x58] sm:$0xff]  ;;  %v32_v19 = vmax.f32 %v11_v12, %v15_v14 }
   0x6   :  { %v21_v21 = vld [vmem:[%s108_s0 + $0x68] sm:$0xff]  ;;  %v23_v22 = vld [vmem:[%s108_s0 + $0x78] sm:$0xff]  ;;  %v33_v24 = vmax.f32 %v31_v18, %v17_v16 }
   0x7   :  { %v28_v20 = vmax.f32 %v26_v11, %v20_v7  ;;  %v29_v23 = vmax.f32 %v27_v15, %v22_v8  ;;  %v34_v25 = vmax.f32 %v32_v19, %v19_v17 }
   0x8   :  { %v35_v27 = vmax.f32 %v33_v24, %v21_v21 }
   0x9   :  { %v30_v26 = vmax.f32 %v28_v20, %v29_v23  ;;  %v36_v28 = vmax.f32 %v34_v25, %v23_v22 }
   0xb   :  { %38 = vst [vmem:[%s109_s1] sm:$0xff] %v30_v26  ;;  %v37_v29 = vmax.f32 %v35_v27, %v36_v28 }
   0xd   :  { %39 = vst [vmem:[%s109_s1 + $0x8] sm:$0xff] %v37_v29 }

// kernel: geo_processor.19
= control target key start
LH: loop header
LB: loop body
LE: loop exit
PB: predicated region body
PF: predicated region fallthrough
CT: control target
= control target key end

     0   :  { %v171_v11 = vmov 0   ;;  %vm78_vm0 = vcmask 392192   ;;  %s372_s0 = inlined_call_operand.vmem [shape: f32[432,128], index: 0, kind: input, shape index: {}]   ;;  %s373_s1 = inlined_call_operand.vmem [shape: f32[8,432], index: 1, kind: input, shape index: {}]   ;;  %s374_s2 = inlined_call_operand.vmem [shape: f32[8,1], index: 2, kind: input, shape index: {}]   ;;  %s375_s3 = inlined_call_operand.vmem [shape: f32[8,128], index: 3, kind: output, shape index: {}]  }
   0x1   :  { %v65_v0 = vld [vmem:[%s372_s0 + $0x178] sm:$0xff]  ;;  %v64_v2 = vld [vmem:[%s372_s0 + $0x170] sm:$0xff]  ;;  %v63_v5 = vld [vmem:[%s372_s0 + $0x168] sm:$0xff]  ;;  %170 = vset.pattern.permute.xlu0 %v171_v11 }
   0x2   :  { %v33_v1 = vld [vmem:[%s372_s0 + $0x78] sm:$0xff]  ;;  %122 = vmatpush.msra.mxu2 %v65_v0  ;;  %v32_v3 = vld [vmem:[%s372_s0 + $0x70] sm:$0xff]  ;;  %v31_v6 = vld [vmem:[%s372_s0 + $0x68] sm:$0xff] }
   0x3   :  { %82 = vmatpush.msra.mxu0 %v33_v1  ;;  %v49_v4 = vld [vmem:[%s372_s0 + $0xf8] sm:$0xff]  ;;  %v48_v7 = vld [vmem:[%s372_s0 + $0xf0] sm:$0xff]  ;;  %v47_v8 = vld [vmem:[%s372_s0 + $0xe8] sm:$0xff] }
   0x4   :  { %102 = vmatpush.msra.mxu1 %v49_v4  ;;  %123 = vmatpush.msra.mxu2 %v64_v2  ;;  %v62_v9 = vld [vmem:[%s372_s0 + $0x160] sm:$0xff]  ;;  %v61_v13 = vld [vmem:[%s372_s0 + $0x158] sm:$0xff]  ;;  %v60_v16 = vld [vmem:[%s372_s0 + $0x150] sm:$0xff] }
   0x5   :  { %83 = vmatpush.msra.mxu0 %v32_v3  ;;  %v30_v10 = vld [vmem:[%s372_s0 + $0x60] sm:$0xff]  ;;  %v29_v14 = vld [vmem:[%s372_s0 + $0x58] sm:$0xff]  ;;  %v28_v17 = vld [vmem:[%s372_s0 + $0x50] sm:$0xff] }
   0x6   :  { %103 = vmatpush.msra.mxu1 %v48_v7  ;;  %124 = vmatpush.msra.mxu2 %v63_v5  ;;  %v46_v12 = vld [vmem:[%s372_s0 + $0xe0] sm:$0xff]  ;;  %v45_v15 = vld [vmem:[%s372_s0 + $0xd8] sm:$0xff]  ;;  %v44_v18 = vld [vmem:[%s372_s0 + $0xd0] sm:$0xff] }
   0x7   :  { %84 = vmatpush.msra.mxu0 %v31_v6  ;;  %v59_v19 = vld [vmem:[%s372_s0 + $0x148] sm:$0xff]  ;;  %v58_v23 = vld [vmem:[%s372_s0 + $0x140] sm:$0xff]  ;;  %v69_v27 = vld [vmem:[%s372_s0 + $0x198] sm:$0xff] }
   0x8   :  { %104 = vmatpush.msra.mxu1 %v47_v8  ;;  %125 = vmatpush.msra.mxu2 %v62_v9  ;;  %v27_v20 = vld [vmem:[%s372_s0 + $0x48] sm:$0xff]  ;;  %v26_v24 = vld [vmem:[%s372_s0 + $0x40] sm:$0xff]  ;;  %v57_v28 = vld [vmem:[%s372_s0 + $0x138] sm:$0xff] }
   0x9   :  { %85 = vmatpush.msra.mxu0 %v30_v10  ;;  %v43_v21 = vld [vmem:[%s372_s0 + $0xc8] sm:$0xff]  ;;  %v70_v25 = vld [vmem:[%s372_s0 + $0x1a0] sm:$0xff]  ;;  %v25_v29 = vld [vmem:[%s372_s0 + $0x38] sm:$0xff] }
   0xa   :  { %105 = vmatpush.msra.mxu1 %v46_v12  ;;  %126 = vmatpush.msra.mxu2 %v61_v13  ;;  %v71_v22 = vld [vmem:[%s372_s0 + $0x1a8] sm:$0xff]  ;;  %v42_v26 = vld [vmem:[%s372_s0 + $0xc0] sm:$0xff]  ;;  %v41_v30 = vld [vmem:[%s372_s0 + $0xb8] sm:$0xff] }
   0xb   :  { %86 = vmatpush.msra.mxu0 %v29_v14  ;;  %152 = vmatpush.msra.mxu3 %v71_v22  ;;  %v68_v31 = vld [vmem:[%s372_s0 + $0x190] sm:$0xff]  ;;  %v67_v35 = vld [vmem:[%s372_s0 + $0x188] sm:$0xff]  ;;  %v66_v39 = vld [vmem:[%s372_s0 + $0x180] sm:$0xff] }
   0xc   :  { %106 = vmatpush.msra.mxu1 %v45_v15  ;;  %127 = vmatpush.msra.mxu2 %v60_v16  ;;  %v56_v32 = vld [vmem:[%s372_s0 + $0x130] sm:$0xff]  ;;  %v55_v36 = vld [vmem:[%s372_s0 + $0x128] sm:$0xff]  ;;  %v54_v40 = vld [vmem:[%s372_s0 + $0x120] sm:$0xff] }
   0xd   :  { %87 = vmatpush.msra.mxu0 %v28_v17  ;;  %153 = vmatpush.msra.mxu3 %v70_v25  ;;  %v24_v33 = vld [vmem:[%s372_s0 + $0x30] sm:$0xff]  ;;  %v23_v37 = vld [vmem:[%s372_s0 + $0x28] sm:$0xff]  ;;  %v22_v41 = vld [vmem:[%s372_s0 + $0x20] sm:$0xff] }
   0xe   :  { %107 = vmatpush.msra.mxu1 %v44_v18  ;;  %128 = vmatpush.msra.mxu2 %v59_v19  ;;  %v40_v34 = vld [vmem:[%s372_s0 + $0xb0] sm:$0xff]  ;;  %v39_v38 = vld [vmem:[%s372_s0 + $0xa8] sm:$0xff]  ;;  %v38_v42 = vld [vmem:[%s372_s0 + $0xa0] sm:$0xff] }
   0xf   :  { %88 = vmatpush.msra.mxu0 %v27_v20  ;;  %154 = vmatpush.msra.mxu3 %v69_v27  ;;  %v17_v43 = vld [vmem:[%s373_s1 + $0x18] sm:$0xff]  ;;  %v72_v47 = vld [vmem:[%s374_s2] sm:$0xff]  ;;  %v52_v48 = vld [vmem:[%s372_s0 + $0x110] sm:$0xff] }
  0x10   :  { %108 = vmatpush.msra.mxu1 %v43_v21  ;;  %129 = vmatpush.msra.mxu2 %v58_v23  ;;  %v53_v44 = vld [vmem:[%s372_s0 + $0x118] sm:$0xff]  ;;  %v20_v49 = vld [vmem:[%s372_s0 + $0x10] sm:$0xff]  ;;  %v51_v51 = vld [vmem:[%s372_s0 + $0x108] sm:$0xff] }
  0x11   :  { %89 = vmatpush.msra.mxu0 %v26_v24  ;;  %155 = vmatpush.msra.mxu3 %v68_v31  ;;  %v21_v45 = vld [vmem:[%s372_s0 + $0x18] sm:$0xff]  ;;  %v36_v50 = vld [vmem:[%s372_s0 + $0x90] sm:$0xff]  ;;  %v19_v52 = vld [vmem:[%s372_s0 + $0x8] sm:$0xff] }
  0x12   :  { %109 = vmatpush.msra.mxu1 %v42_v26  ;;  %130 = vmatpush.msra.mxu2 %v57_v28  ;;  %v37_v46 = vld [vmem:[%s372_s0 + $0x98] sm:$0xff]  ;;  %v35_v53 = vld [vmem:[%s372_s0 + $0x88] sm:$0xff]  ;;  %v50_v54 = vld [vmem:[%s372_s0 + $0x100] sm:$0xff] }
  0x13   :  { %90 = vmatpush.msra.mxu0 %v25_v29  ;;  %156 = vmatpush.msra.mxu3 %v67_v35  ;;  %v18_v55 = vld [vmem:[%s372_s0] sm:$0xff]  ;;  %v16_v56 = vld [vmem:[%s373_s1 + $0x10] sm:$0xff]  ;;  %v15_v59 = vld [vmem:[%s373_s1 + $0x8] sm:$0xff] }
  0x14   :  { %110 = vmatpush.msra.mxu1 %v41_v30  ;;  %131 = vmatpush.msra.mxu2 %v56_v32  ;;  %v14_v57 = vld [vmem:[%s373_s1] sm:$0xff] }
  0x15   :  { %91 = vmatpush.msra.mxu0 %v24_v33  ;;  %157 = vmatpush.msra.mxu3 %v66_v39  ;;  %v34_v58 = vld [vmem:[%s372_s0 + $0x80] sm:$0xff] }
  0x16   :  { %111 = vmatpush.msra.mxu1 %v40_v34  ;;  %132 = vmatpush.msra.mxu2 %v55_v36 }
  0x17   :  { %92 = vmatpush.msra.mxu0 %v23_v37  ;;  %168 = vmatmul.msk.f32.vlgmr.msra.gmra.mxu3 %vm78_vm0, %v17_v43 }
  0x18   :  { %112 = vmatpush.msra.mxu1 %v39_v38  ;;  %133 = vmatpush.msra.mxu2 %v54_v40 }
  0x19   :  { %93 = vmatpush.msra.mxu0 %v22_v41  ;;  %75 = vperm.xlu0 %170, %v72_v47  }
  0x1a   :  { %113 = vmatpush.msra.mxu1 %v38_v42  ;;  %134 = vmatpush.msra.mxu2 %v53_v44 }
  0x1b   :  { %94 = vmatpush.msra.mxu0 %v21_v45 }
  0x1c   :  { %114 = vmatpush.msra.mxu1 %v37_v46  ;;  %135 = vmatpush.msra.mxu2 %v52_v48 }
  0x1d   :  { %95 = vmatpush.msra.mxu0 %v20_v49 }
  0x1e   :  { %115 = vmatpush.msra.mxu1 %v36_v50  ;;  %136 = vmatpush.msra.mxu2 %v51_v51 }
  0x1f   :  { %96 = vmatpush.msra.mxu0 %v19_v52 }
  0x20   :  { %116 = vmatpush.msra.mxu1 %v35_v53  ;;  %137 = vmatpush.msra.mxu2 %v50_v54 }
  0x21   :  { %97 = vmatpush.msra.mxu0 %v18_v55  ;;  %138 = vmatmul.f32.vlgmr.msra.gmra.mxu2 %v16_v56 }
  0x22   :  { %98 = vmatmul.f32.vlgmr.msra.gmra.mxu0 %v14_v57  ;;  %117 = vmatpush.msra.mxu1 %v34_v58 }
  0x23   :  { %118 = vmatmul.f32.vlgmr.msra.gmra.mxu1 %v15_v59 }
  0x8b   :  { %v76_v60 = vpop.permute.xlu0 %75 }
  0x9a   :  { %v159_v2 = vpop.f32.mrf.mxu3 }
  0x9f   :  { %v99_v61 = vpop.f32.mrf.mxu0 }
  0xa0   :  { %v100_v62 = vadd.f32 %v99_v61, %v76_v60  ;;  %v119_v63 = vpop.f32.mrf.mxu1 }
  0xa2   :  { %v120_v0 = vadd.f32 %v119_v63, %v100_v62 }
  0xa4   :  { %v139_v1 = vpop.f32.mrf.mxu2 }
  0xa5   :  { %v140_v3 = vadd.f32 %v139_v1, %v120_v0 }
  0xa7   :  { %v160_v4 = vadd.f32 %v159_v2, %v140_v3 }
  0xa9   :  { %v162_v5 = vmax.f32 %v160_v4, 0.0 }
  0xab   :  { %163 = vst [vmem:[%s375_s3] sm:$0xff] %v162_v5 }

// kernel: geo_processor.18
= control target key start
LH: loop header
LB: loop body
LE: loop exit
PB: predicated region body
PF: predicated region fallthrough
CT: control target
= control target key end

     0   :  { %v199_v11 = vmov 0   ;;  %vm88_vm0 = vcmask 392192   ;;  %s420_s0 = inlined_call_operand.vmem [shape: f32[432,128], index: 0, kind: input, shape index: {}]   ;;  %s421_s1 = inlined_call_operand.vmem [shape: f32[16,432], index: 1, kind: input, shape index: {}]   ;;  %s422_s2 = inlined_call_operand.vmem [shape: f32[16,1], index: 2, kind: input, shape index: {}]   ;;  %s423_s3 = inlined_call_operand.vmem [shape: f32[16,128], index: 3, kind: output, shape index: {}]  }
   0x1   :  { %v37_v0 = vld [vmem:[%s420_s0 + $0x78] sm:$0xff]  ;;  %v36_v2 = vld [vmem:[%s420_s0 + $0x70] sm:$0xff]  ;;  %v35_v5 = vld [vmem:[%s420_s0 + $0x68] sm:$0xff]  ;;  %198 = vset.pattern.permute.xlu0 %v199_v11 }
   0x2   :  { %v69_v1 = vld [vmem:[%s420_s0 + $0x178] sm:$0xff]  ;;  %95 = vmatpush.msra.mxu0 %v37_v0  ;;  %v68_v4 = vld [vmem:[%s420_s0 + $0x170] sm:$0xff]  ;;  %v67_v7 = vld [vmem:[%s420_s0 + $0x168] sm:$0xff] }
   0x3   :  { %141 = vmatpush.msra.mxu2 %v69_v1  ;;  %v53_v3 = vld [vmem:[%s420_s0 + $0xf8] sm:$0xff]  ;;  %v52_v6 = vld [vmem:[%s420_s0 + $0xf0] sm:$0xff]  ;;  %v51_v8 = vld [vmem:[%s420_s0 + $0xe8] sm:$0xff] }
   0x4   :  { %118 = vmatpush.msra.mxu1 %v53_v3  ;;  %96 = vmatpush.msra.mxu0 %v36_v2  ;;  %v34_v9 = vld [vmem:[%s420_s0 + $0x60] sm:$0xff]  ;;  %v33_v13 = vld [vmem:[%s420_s0 + $0x58] sm:$0xff]  ;;  %v32_v16 = vld [vmem:[%s420_s0 + $0x50] sm:$0xff] }
   0x5   :  { %142 = vmatpush.msra.mxu2 %v68_v4  ;;  %v66_v10 = vld [vmem:[%s420_s0 + $0x160] sm:$0xff]  ;;  %v65_v14 = vld [vmem:[%s420_s0 + $0x158] sm:$0xff]  ;;  %v64_v17 = vld [vmem:[%s420_s0 + $0x150] sm:$0xff] }
   0x6   :  { %119 = vmatpush.msra.mxu1 %v52_v6  ;;  %97 = vmatpush.msra.mxu0 %v35_v5  ;;  %v50_v12 = vld [vmem:[%s420_s0 + $0xe0] sm:$0xff]  ;;  %v49_v15 = vld [vmem:[%s420_s0 + $0xd8] sm:$0xff]  ;;  %v48_v18 = vld [vmem:[%s420_s0 + $0xd0] sm:$0xff] }
   0x7   :  { %143 = vmatpush.msra.mxu2 %v67_v7  ;;  %v31_v19 = vld [vmem:[%s420_s0 + $0x48] sm:$0xff]  ;;  %v30_v23 = vld [vmem:[%s420_s0 + $0x40] sm:$0xff]  ;;  %v29_v27 = vld [vmem:[%s420_s0 + $0x38] sm:$0xff] }
   0x8   :  { %120 = vmatpush.msra.mxu1 %v51_v8  ;;  %98 = vmatpush.msra.mxu0 %v34_v9  ;;  %v63_v20 = vld [vmem:[%s420_s0 + $0x148] sm:$0xff]  ;;  %v62_v24 = vld [vmem:[%s420_s0 + $0x140] sm:$0xff]  ;;  %v61_v28 = vld [vmem:[%s420_s0 + $0x138] sm:$0xff] }
   0x9   :  { %144 = vmatpush.msra.mxu2 %v66_v10  ;;  %v47_v21 = vld [vmem:[%s420_s0 + $0xc8] sm:$0xff]  ;;  %v46_v25 = vld [vmem:[%s420_s0 + $0xc0] sm:$0xff]  ;;  %v73_v29 = vld [vmem:[%s420_s0 + $0x198] sm:$0xff] }
   0xa   :  { %121 = vmatpush.msra.mxu1 %v50_v12  ;;  %99 = vmatpush.msra.mxu0 %v33_v13  ;;  %v75_v22 = vld [vmem:[%s420_s0 + $0x1a8] sm:$0xff]  ;;  %v74_v26 = vld [vmem:[%s420_s0 + $0x1a0] sm:$0xff]  ;;  %v45_v30 = vld [vmem:[%s420_s0 + $0xb8] sm:$0xff] }
   0xb   :  { %145 = vmatpush.msra.mxu2 %v65_v14  ;;  %174 = vmatpush.msra.mxu3 %v75_v22  ;;  %v72_v31 = vld [vmem:[%s420_s0 + $0x190] sm:$0xff]  ;;  %v71_v35 = vld [vmem:[%s420_s0 + $0x188] sm:$0xff]  ;;  %v70_v39 = vld [vmem:[%s420_s0 + $0x180] sm:$0xff] }
   0xc   :  { %122 = vmatpush.msra.mxu1 %v49_v15  ;;  %100 = vmatpush.msra.mxu0 %v32_v16  ;;  %v28_v32 = vld [vmem:[%s420_s0 + $0x30] sm:$0xff]  ;;  %v27_v36 = vld [vmem:[%s420_s0 + $0x28] sm:$0xff]  ;;  %v26_v40 = vld [vmem:[%s420_s0 + $0x20] sm:$0xff] }
   0xd   :  { %146 = vmatpush.msra.mxu2 %v64_v17  ;;  %175 = vmatpush.msra.mxu3 %v74_v26  ;;  %v60_v33 = vld [vmem:[%s420_s0 + $0x130] sm:$0xff]  ;;  %v59_v37 = vld [vmem:[%s420_s0 + $0x128] sm:$0xff]  ;;  %v58_v41 = vld [vmem:[%s420_s0 + $0x120] sm:$0xff] }
   0xe   :  { %123 = vmatpush.msra.mxu1 %v48_v18  ;;  %101 = vmatpush.msra.mxu0 %v31_v19  ;;  %v44_v34 = vld [vmem:[%s420_s0 + $0xb0] sm:$0xff]  ;;  %v43_v38 = vld [vmem:[%s420_s0 + $0xa8] sm:$0xff]  ;;  %v42_v42 = vld [vmem:[%s420_s0 + $0xa0] sm:$0xff] }
   0xf   :  { %147 = vmatpush.msra.mxu2 %v63_v20  ;;  %176 = vmatpush.msra.mxu3 %v73_v29  ;;  %v17_v43 = vld [vmem:[%s421_s1 + $0x18] sm:$0xff]  ;;  %v76_v47 = vld [vmem:[%s422_s2] sm:$0xff]  ;;  %v24_v48 = vld [vmem:[%s420_s0 + $0x10] sm:$0xff] }
  0x10   :  { %124 = vmatpush.msra.mxu1 %v47_v21  ;;  %102 = vmatpush.msra.mxu0 %v30_v23  ;;  %v25_v44 = vld [vmem:[%s420_s0 + $0x18] sm:$0xff]  ;;  %v56_v49 = vld [vmem:[%s420_s0 + $0x110] sm:$0xff]  ;;  %v23_v51 = vld [vmem:[%s420_s0 + $0x8] sm:$0xff] }
  0x11   :  { %148 = vmatpush.msra.mxu2 %v62_v24  ;;  %177 = vmatpush.msra.mxu3 %v72_v31  ;;  %v57_v45 = vld [vmem:[%s420_s0 + $0x118] sm:$0xff]  ;;  %v40_v50 = vld [vmem:[%s420_s0 + $0x90] sm:$0xff]  ;;  %v55_v52 = vld [vmem:[%s420_s0 + $0x108] sm:$0xff] }
  0x12   :  { %125 = vmatpush.msra.mxu1 %v46_v25  ;;  %103 = vmatpush.msra.mxu0 %v29_v27  ;;  %v41_v46 = vld [vmem:[%s420_s0 + $0x98] sm:$0xff]  ;;  %v39_v53 = vld [vmem:[%s420_s0 + $0x88] sm:$0xff]  ;;  %v22_v54 = vld [vmem:[%s420_s0] sm:$0xff] }
  0x13   :  { %149 = vmatpush.msra.mxu2 %v61_v28  ;;  %178 = vmatpush.msra.mxu3 %v71_v35  ;;  %v54_v55 = vld [vmem:[%s420_s0 + $0x100] sm:$0xff]  ;;  %v16_v57 = vld [vmem:[%s421_s1 + $0x10] sm:$0xff]  ;;  %v21_v59 = vld [vmem:[%s421_s1 + $0x38] sm:$0xff] }
  0x14   :  { %126 = vmatpush.msra.mxu1 %v45_v30  ;;  %104 = vmatpush.msra.mxu0 %v28_v32  ;;  %v14_v56 = vld [vmem:[%s421_s1] sm:$0xff]  ;;  %v15_v60 = vld [vmem:[%s421_s1 + $0x8] sm:$0xff]  ;;  %v20_v63 = vld [vmem:[%s421_s1 + $0x30] sm:$0xff] }
  0x15   :  { %150 = vmatpush.msra.mxu2 %v60_v33  ;;  %179 = vmatpush.msra.mxu3 %v70_v39  ;;  %v38_v58 = vld [vmem:[%s420_s0 + $0x80] sm:$0xff]  ;;  %v77_v61 = vld [vmem:[%s422_s2 + $0x8] sm:$0xff] }
  0x16   :  { %127 = vmatpush.msra.mxu1 %v44_v34  ;;  %105 = vmatpush.msra.mxu0 %v27_v36  ;;  %v18_v62 = vld [vmem:[%s421_s1 + $0x20] sm:$0xff]  ;;  %v19_v0 = vld [vmem:[%s421_s1 + $0x28] sm:$0xff] }
  0x17   :  { %151 = vmatpush.msra.mxu2 %v59_v37  ;;  %195 = vmatmul.msk.f32.vlgmr.msra.gmra.mxu3 %vm88_vm0, %v17_v43 }
  0x18   :  { %128 = vmatpush.msra.mxu1 %v43_v38  ;;  %106 = vmatpush.msra.mxu0 %v26_v40 }
  0x19   :  { %152 = vmatpush.msra.mxu2 %v58_v41  ;;  %80 = vperm.xlu0 %198, %v76_v47  }
  0x1a   :  { %129 = vmatpush.msra.mxu1 %v42_v42  ;;  %107 = vmatpush.msra.mxu0 %v25_v44 }
  0x1b   :  { %153 = vmatpush.msra.mxu2 %v57_v45 }
  0x1c   :  { %130 = vmatpush.msra.mxu1 %v41_v46  ;;  %108 = vmatpush.msra.mxu0 %v24_v48 }
  0x1d   :  { %154 = vmatpush.msra.mxu2 %v56_v49 }
  0x1e   :  { %131 = vmatpush.msra.mxu1 %v40_v50  ;;  %109 = vmatpush.msra.mxu0 %v23_v51 }
  0x1f   :  { %155 = vmatpush.msra.mxu2 %v55_v52  ;;  %196 = vmatmul.msk.f32.gmra.mxu3 %vm88_vm0, %v21_v59 }
  0x20   :  { %132 = vmatpush.msra.mxu1 %v39_v53  ;;  %110 = vmatpush.msra.mxu0 %v22_v54 }
  0x21   :  { %156 = vmatpush.msra.mxu2 %v54_v55  ;;  %111 = vmatmul.f32.vlgmr.msra.gmra.mxu0 %v14_v56 }
  0x22   :  { %157 = vmatmul.f32.vlgmr.msra.gmra.mxu2 %v16_v57  ;;  %133 = vmatpush.msra.mxu1 %v38_v58 }
  0x23   :  { %134 = vmatmul.f32.vlgmr.msra.gmra.mxu1 %v15_v60  ;;  %85 = vperm.xlu0 %198, %v77_v61  }
  0x29   :  { %114 = vmatmul.f32.gmra.mxu0 %v18_v62 }
  0x2a   :  { %160 = vmatmul.f32.gmra.mxu2 %v20_v63 }
  0x2b   :  { %137 = vmatmul.f32.gmra.mxu1 %v19_v0 }
  0x8b   :  { %v81_v1 = vpop.permute.xlu0 %80 }
  0x95   :  { %v86_v9 = vpop.permute.xlu0 %85 }
  0x9a   :  { %v181_v6 = vpop.f32.mrf.mxu3 }
  0x9e   :  { %v112_v2 = vpop.f32.mrf.mxu0 }
  0x9f   :  { %v113_v3 = vadd.f32 %v112_v2, %v81_v1 }
  0xa0   :  { %v135_v4 = vpop.f32.mrf.mxu1 }
  0xa1   :  { %v136_v5 = vadd.f32 %v135_v4, %v113_v3 }
  0xa2   :  { %v184_v17 = vpop.f32.mrf.mxu3 }
  0xa5   :  { %v158_v7 = vpop.f32.mrf.mxu2 }
  0xa6   :  { %v159_v8 = vadd.f32 %v158_v7, %v136_v5  ;;  %v115_v10 = vpop.f32.mrf.mxu0 }
  0xa7   :  { %v116_v11 = vadd.f32 %v115_v10, %v86_v9 }
  0xa8   :  { %v182_v12 = vadd.f32 %v181_v6, %v159_v8  ;;  %v138_v13 = vpop.f32.mrf.mxu1 }
  0xa9   :  { %v139_v15 = vadd.f32 %v138_v13, %v116_v11 }
  0xaa   :  { %v187_v14 = vmax.f32 %v182_v12, 0.0 }
  0xac   :  { %189 = vst [vmem:[%s423_s3] sm:$0xff] %v187_v14 }
  0xad   :  { %v161_v16 = vpop.f32.mrf.mxu2 }
  0xae   :  { %v162_v18 = vadd.f32 %v161_v16, %v139_v15 }
  0xb0   :  { %v185_v19 = vadd.f32 %v184_v17, %v162_v18 }
  0xb2   :  { %v188_v20 = vmax.f32 %v185_v19, 0.0 }
  0xb4   :  { %190 = vst [vmem:[%s423_s3 + $0x8] sm:$0xff] %v188_v20 }

// kernel: geo_processor.20
= control target key start
LH: loop header
LB: loop body
LE: loop exit
PB: predicated region body
PF: predicated region fallthrough
CT: control target
= control target key end

     0   :  { %v180_v11 = vmov 0   ;;  %vm88_vm0 = vcmask 392192   ;;  %s375_s0 = inlined_call_operand.vmem [shape: f32[432,128], index: 0, kind: input, shape index: {}]   ;;  %s376_s1 = inlined_call_operand.vmem [shape: f32[4,432], index: 1, kind: input, shape index: {}]   ;;  %s377_s2 = inlined_call_operand.vmem [shape: f32[4,1], index: 2, kind: input, shape index: {}]   ;;  %s378_s3 = inlined_call_operand.vmem [shape: f32[4,128], index: 3, kind: output, shape index: {}]  }
   0x1   :  { %v63_v0 = vld [vmem:[%s375_s0 + $0x178] sm:$0xff]  ;;  %v62_v2 = vld [vmem:[%s375_s0 + $0x170] sm:$0xff]  ;;  %v61_v5 = vld [vmem:[%s375_s0 + $0x168] sm:$0xff]  ;;  %179 = vset.pattern.permute.xlu0 %v180_v11 }
   0x2   :  { %v31_v1 = vld [vmem:[%s375_s0 + $0x78] sm:$0xff]  ;;  %131 = vmatpush.msra.mxu2 %v63_v0  ;;  %v30_v3 = vld [vmem:[%s375_s0 + $0x70] sm:$0xff]  ;;  %v29_v6 = vld [vmem:[%s375_s0 + $0x68] sm:$0xff] }
   0x3   :  { %91 = vmatpush.msra.mxu0 %v31_v1  ;;  %v47_v4 = vld [vmem:[%s375_s0 + $0xf8] sm:$0xff]  ;;  %v46_v7 = vld [vmem:[%s375_s0 + $0xf0] sm:$0xff]  ;;  %v45_v8 = vld [vmem:[%s375_s0 + $0xe8] sm:$0xff] }
   0x4   :  { %111 = vmatpush.msra.mxu1 %v47_v4  ;;  %132 = vmatpush.msra.mxu2 %v62_v2  ;;  %v60_v9 = vld [vmem:[%s375_s0 + $0x160] sm:$0xff]  ;;  %v59_v13 = vld [vmem:[%s375_s0 + $0x158] sm:$0xff]  ;;  %v58_v16 = vld [vmem:[%s375_s0 + $0x150] sm:$0xff] }
   0x5   :  { %92 = vmatpush.msra.mxu0 %v30_v3  ;;  %v28_v10 = vld [vmem:[%s375_s0 + $0x60] sm:$0xff]  ;;  %v27_v14 = vld [vmem:[%s375_s0 + $0x58] sm:$0xff]  ;;  %v26_v17 = vld [vmem:[%s375_s0 + $0x50] sm:$0xff] }
   0x6   :  { %112 = vmatpush.msra.mxu1 %v46_v7  ;;  %133 = vmatpush.msra.mxu2 %v61_v5  ;;  %v44_v12 = vld [vmem:[%s375_s0 + $0xe0] sm:$0xff]  ;;  %v43_v15 = vld [vmem:[%s375_s0 + $0xd8] sm:$0xff]  ;;  %v42_v18 = vld [vmem:[%s375_s0 + $0xd0] sm:$0xff] }
   0x7   :  { %93 = vmatpush.msra.mxu0 %v29_v6  ;;  %v57_v19 = vld [vmem:[%s375_s0 + $0x148] sm:$0xff]  ;;  %v56_v23 = vld [vmem:[%s375_s0 + $0x140] sm:$0xff]  ;;  %v67_v27 = vld [vmem:[%s375_s0 + $0x198] sm:$0xff] }
   0x8   :  { %113 = vmatpush.msra.mxu1 %v45_v8  ;;  %134 = vmatpush.msra.mxu2 %v60_v9  ;;  %v25_v20 = vld [vmem:[%s375_s0 + $0x48] sm:$0xff]  ;;  %v24_v24 = vld [vmem:[%s375_s0 + $0x40] sm:$0xff]  ;;  %v55_v28 = vld [vmem:[%s375_s0 + $0x138] sm:$0xff] }
   0x9   :  { %94 = vmatpush.msra.mxu0 %v28_v10  ;;  %v41_v21 = vld [vmem:[%s375_s0 + $0xc8] sm:$0xff]  ;;  %v68_v25 = vld [vmem:[%s375_s0 + $0x1a0] sm:$0xff]  ;;  %v23_v29 = vld [vmem:[%s375_s0 + $0x38] sm:$0xff] }
   0xa   :  { %114 = vmatpush.msra.mxu1 %v44_v12  ;;  %135 = vmatpush.msra.mxu2 %v59_v13  ;;  %v69_v22 = vld [vmem:[%s375_s0 + $0x1a8] sm:$0xff]  ;;  %v40_v26 = vld [vmem:[%s375_s0 + $0xc0] sm:$0xff]  ;;  %v39_v30 = vld [vmem:[%s375_s0 + $0xb8] sm:$0xff] }
   0xb   :  { %95 = vmatpush.msra.mxu0 %v27_v14  ;;  %161 = vmatpush.msra.mxu3 %v69_v22  ;;  %v66_v31 = vld [vmem:[%s375_s0 + $0x190] sm:$0xff]  ;;  %v15_v34 = vld [vmem:[%s376_s1 + $0x8] sm:$0xff]  ;;  %v14_v39 = vld [vmem:[%s376_s1] sm:$0xff] }
   0xc   :  { %115 = vmatpush.msra.mxu1 %v43_v15  ;;  %136 = vmatpush.msra.mxu2 %v58_v16  ;;  %v54_v32 = vld [vmem:[%s375_s0 + $0x130] sm:$0xff]  ;;  %v65_v36 = vld [vmem:[%s375_s0 + $0x188] sm:$0xff]  ;;  %80 = vst [vmem:[#allocation1 + $0x10] ss:$2 sm:$0xff] %v15_v34  ;;  %v64_v41 = vld [vmem:[%s375_s0 + $0x180] sm:$0xff] }
   0xd   :  { %96 = vmatpush.msra.mxu0 %v26_v17  ;;  %162 = vmatpush.msra.mxu3 %v68_v25  ;;  %v22_v33 = vld [vmem:[%s375_s0 + $0x30] sm:$0xff]  ;;  %v53_v37 = vld [vmem:[%s375_s0 + $0x128] sm:$0xff]  ;;  %78 = vst [vmem:[#allocation1] ss:$2 sm:$0xff] %v14_v39  ;;  %v52_v42 = vld [vmem:[%s375_s0 + $0x120] sm:$0xff] }
   0xe   :  { %116 = vmatpush.msra.mxu1 %v42_v18  ;;  %137 = vmatpush.msra.mxu2 %v57_v19  ;;  %v38_v35 = vld [vmem:[%s375_s0 + $0xb0] sm:$0xff]  ;;  %v21_v38 = vld [vmem:[%s375_s0 + $0x28] sm:$0xff]  ;;  %v20_v43 = vld [vmem:[%s375_s0 + $0x20] sm:$0xff] }
   0xf   :  { %97 = vmatpush.msra.mxu0 %v25_v20  ;;  %163 = vmatpush.msra.mxu3 %v67_v27  ;;  %v37_v40 = vld [vmem:[%s375_s0 + $0xa8] sm:$0xff]  ;;  %v36_v44 = vld [vmem:[%s375_s0 + $0xa0] sm:$0xff]  ;;  %v51_v46 = vld [vmem:[%s375_s0 + $0x118] sm:$0xff] }
  0x10   :  { %117 = vmatpush.msra.mxu1 %v41_v21  ;;  %138 = vmatpush.msra.mxu2 %v56_v23  ;;  %v70_v45 = vld [vmem:[%s377_s2] sm:$0xf]  ;;  %v19_v47 = vld [vmem:[%s375_s0 + $0x18] sm:$0xff]  ;;  %v50_v49 = vld [vmem:[%s375_s0 + $0x110] sm:$0xff] }
  0x11   :  { %98 = vmatpush.msra.mxu0 %v24_v24  ;;  %164 = vmatpush.msra.mxu3 %v66_v31  ;;  %v35_v48 = vld [vmem:[%s375_s0 + $0x98] sm:$0xff]  ;;  %v18_v50 = vld [vmem:[%s375_s0 + $0x10] sm:$0xff]  ;;  %v49_v53 = vld [vmem:[%s375_s0 + $0x108] sm:$0xff] }
  0x12   :  { %118 = vmatpush.msra.mxu1 %v40_v26  ;;  %139 = vmatpush.msra.mxu2 %v55_v28  ;;  %v34_v52 = vld [vmem:[%s375_s0 + $0x90] sm:$0xff]  ;;  %v17_v54 = vld [vmem:[%s375_s0 + $0x8] sm:$0xff]  ;;  %v48_v56 = vld [vmem:[%s375_s0 + $0x100] sm:$0xff] }
  0x13   :  { %99 = vmatpush.msra.mxu0 %v23_v29  ;;  %165 = vmatpush.msra.mxu3 %v65_v36  ;;  %v84_v51 = vld.sshfl [vmem:[#allocation1 + $0x18] sm:$0xff pattern:$0x75316420]  ;;  %v33_v55 = vld [vmem:[%s375_s0 + $0x88] sm:$0xff]  ;;  %v16_v57 = vld [vmem:[%s375_s0] sm:$0xff] }
  0x14   :  { %119 = vmatpush.msra.mxu1 %v39_v30  ;;  %140 = vmatpush.msra.mxu2 %v54_v32  ;;  %v83_v58 = vld.sshfl [vmem:[#allocation1 + $0x10] sm:$0xff pattern:$0x75316420]  ;;  %v81_v59 = vld.sshfl [vmem:[#allocation1] sm:$0xff pattern:$0x75316420] }
  0x15   :  { %100 = vmatpush.msra.mxu0 %v22_v33  ;;  %166 = vmatpush.msra.mxu3 %v64_v41  ;;  %v32_v60 = vld [vmem:[%s375_s0 + $0x80] sm:$0xff]  ;;  %v82_v61 = vld.sshfl [vmem:[#allocation1 + $0x8] sm:$0xff pattern:$0x75316420] }
  0x16   :  { %120 = vmatpush.msra.mxu1 %v38_v35  ;;  %141 = vmatpush.msra.mxu2 %v53_v37 }
  0x17   :  { %101 = vmatpush.msra.mxu0 %v21_v38  ;;  %73 = vperm.xlu0 %179, %v70_v45  }
  0x18   :  { %121 = vmatpush.msra.mxu1 %v37_v40  ;;  %142 = vmatpush.msra.mxu2 %v52_v42 }
  0x19   :  { %102 = vmatpush.msra.mxu0 %v20_v43  ;;  %177 = vmatmul.msk.f32.vlgmr.msra.gmra.mxu3 %vm88_vm0, %v84_v51 }
  0x1a   :  { %122 = vmatpush.msra.mxu1 %v36_v44  ;;  %143 = vmatpush.msra.mxu2 %v51_v46 }
  0x1b   :  { %103 = vmatpush.msra.mxu0 %v19_v47 }
  0x1c   :  { %123 = vmatpush.msra.mxu1 %v35_v48  ;;  %144 = vmatpush.msra.mxu2 %v50_v49 }
  0x1d   :  { %104 = vmatpush.msra.mxu0 %v18_v50 }
  0x1e   :  { %124 = vmatpush.msra.mxu1 %v34_v52  ;;  %145 = vmatpush.msra.mxu2 %v49_v53 }
  0x1f   :  { %105 = vmatpush.msra.mxu0 %v17_v54 }
  0x20   :  { %125 = vmatpush.msra.mxu1 %v33_v55  ;;  %146 = vmatpush.msra.mxu2 %v48_v56 }
  0x21   :  { %106 = vmatpush.msra.mxu0 %v16_v57  ;;  %147 = vmatmul.f32.vlgmr.msra.gmra.mxu2 %v83_v58 }
  0x22   :  { %107 = vmatmul.f32.vlgmr.msra.gmra.mxu0 %v81_v59  ;;  %126 = vmatpush.msra.mxu1 %v32_v60 }
  0x23   :  { %127 = vmatmul.f32.vlgmr.msra.gmra.mxu1 %v82_v61 }
  0x89   :  { %v74_v62 = vpop.permute.xlu0 %73 }
  0x9c   :  { %v168_v4 = vpop.f32.mrf.mxu3 }
  0x9f   :  { %v108_v63 = vpop.f32.mrf.mxu0 }
  0xa0   :  { %v109_v0 = vadd.f32 %v108_v63, %v74_v62  ;;  %v128_v1 = vpop.f32.mrf.mxu1 }
  0xa2   :  { %v129_v2 = vadd.f32 %v128_v1, %v109_v0 }
  0xa4   :  { %v148_v3 = vpop.f32.mrf.mxu2 }
  0xa5   :  { %v149_v5 = vadd.f32 %v148_v3, %v129_v2 }
  0xa7   :  { %v169_v6 = vadd.f32 %v168_v4, %v149_v5 }
  0xa9   :  { %v171_v7 = vmax.f32 %v169_v6, 0.0 }
  0xab   :  { %172 = vst [vmem:[%s378_s3] sm:$0xf] %v171_v7 }

// kernel: geo_processor.21
= control target key start
LH: loop header
LB: loop body
LE: loop exit
PB: predicated region body
PF: predicated region fallthrough
CT: control target
= control target key end

     0   :  { %s860_s12 = smov 0   ;;  %s862_s13 = smov 0   ;;  %s1264_s0 = inlined_call_operand.vmem [shape: f32[216,1024], index: 0, kind: input, shape index: {}]   ;;  %s1265_s1 = inlined_call_operand.vmem [shape: f32[2,216], index: 1, kind: input, shape index: {}]   ;;  %s1266_s2 = inlined_call_operand.vmem [shape: f32[2,1], index: 2, kind: input, shape index: {}]   ;;  %s1267_s3 = inlined_call_operand.vmem [shape: f32[2,1024], index: 3, kind: output, shape index: {}]  }
   0x1   :  { %s864_s14 = smov 0  }
   0x2 LB: > { %s771_s15 = sadd.s32 4294967295, %s837_s14   ;;  %s877_s16 = sadd.s32 1, %s837_s14   ;;  %s837_s14 = sphi %s864_s14, %s1270_s14   ;;  %s833_s13 = sphi %s862_s13, %s1269_s13   ;;  %s829_s12 = sphi %s860_s12, %s1268_s12  }
   0x3   : > { %s17_s17 = ssub.s32 %s837_s14, %s877_s16  ;;  %s20_s18 = sadd.s32 1, %s833_s13 }
   0x4   : > { %p18_p0 = scmp.eq.s32.totalorder %s17_s17, 0  ;;  %p27_p1 = scmp.ne.s32.totalorder %s833_s13, %s829_s12 }
   0x5   : > { %p28_p2 = scmp.eq.s32.totalorder %s837_s14, 0  ;;  %p774_p4 = scmp.ge.s32.totalorder %s837_s14, 2 }
   0x6   : > { %s886_s19 = scalar_select %p18_p0, %s833_s13, %s20_s18  }
   0x7   : > { %p29_p3 = por %p28_p2, %p27_p1  ;;  %127 = sbr.rel (%p774_p4) target bundleno = 124 (0x7c), region = 24 }
   0xc   : > { %130 = sbr.rel (!%p29_p3) target bundleno = 124 (0x7c), region = 28  ;;  %s132_s20 = sand.u32 (%p29_p3), 1, %s833_s13  }
   0xd   : > { %s786_s21 = sshll.u32 (%p29_p3), %s837_s14, 5  ;;  %s787_s22 = smul.u32 (%p29_p3), 864, %s132_s20 }
   0xe   : > { %s894_s25 = scalar_lea.vmem (%p29_p3), %s1264_s0, %s786_s21 }
   0xf   : > { %v150_v0 = vld [vmem:[%s894_s25] sm:$0xff] (%p29_p3)  ;;  %v152_v1 = vld [vmem:[%s894_s25 + $0x8] sm:$0xff] (%p29_p3)  ;;  %v154_v2 = vld [vmem:[%s894_s25 + $0x10] sm:$0xff] (%p29_p3)  ;;  %s899_s26 = scalar_lea.vmem (%p29_p3), [#allocation2], %s787_s22 }
  0x10   : > { %151 = vst [vmem:[%s899_s26] sm:$0xff] (%p29_p3), %v150_v0  ;;  %v156_v3 = vld [vmem:[%s894_s25 + $0x18] sm:$0xff] (%p29_p3)  ;;  %v158_v4 = vld [vmem:[%s894_s25 + $0x40] sm:$0xff] (%p29_p3)  ;;  %v160_v5 = vld [vmem:[%s894_s25 + $0x48] sm:$0xff] (%p29_p3) }
  0x11   : > { %153 = vst [vmem:[%s899_s26 + $0x8] sm:$0xff] %v152_v1  ;;  %v162_v6 = vld [vmem:[%s894_s25 + $0x50] sm:$0xff]  ;;  %v164_v7 = vld [vmem:[%s894_s25 + $0x58] sm:$0xff]  ;;  %v166_v8 = vld [vmem:[%s894_s25 + $0x80] sm:$0xff] }
  0x12   : > { %155 = vst [vmem:[%s899_s26 + $0x10] sm:$0xff] %v154_v2  ;;  %v168_v9 = vld [vmem:[%s894_s25 + $0x88] sm:$0xff]  ;;  %v170_v10 = vld [vmem:[%s894_s25 + $0x90] sm:$0xff]  ;;  %v172_v11 = vld [vmem:[%s894_s25 + $0x98] sm:$0xff] }
  0x13   : > { %157 = vst [vmem:[%s899_s26 + $0x18] sm:$0xff] %v156_v3  ;;  %v174_v12 = vld [vmem:[%s894_s25 + $0xc0] sm:$0xff]  ;;  %v176_v13 = vld [vmem:[%s894_s25 + $0xc8] sm:$0xff]  ;;  %v178_v14 = vld [vmem:[%s894_s25 + $0xd0] sm:$0xff] }
  0x14   : > { %159 = vst [vmem:[%s899_s26 + $0x20] sm:$0xff] %v158_v4  ;;  %v180_v15 = vld [vmem:[%s894_s25 + $0xd8] sm:$0xff]  ;;  %v182_v16 = vld [vmem:[%s894_s25 + $0x100] sm:$0xff]  ;;  %v184_v17 = vld [vmem:[%s894_s25 + $0x108] sm:$0xff] }
  0x15   : > { %161 = vst [vmem:[%s899_s26 + $0x28] sm:$0xff] %v160_v5  ;;  %v186_v18 = vld [vmem:[%s894_s25 + $0x110] sm:$0xff]  ;;  %v188_v19 = vld [vmem:[%s894_s25 + $0x118] sm:$0xff]  ;;  %v190_v20 = vld [vmem:[%s894_s25 + $0x140] sm:$0xff] }
  0x16   : > { %163 = vst [vmem:[%s899_s26 + $0x30] sm:$0xff] %v162_v6  ;;  %v192_v21 = vld [vmem:[%s894_s25 + $0x148] sm:$0xff]  ;;  %v194_v22 = vld [vmem:[%s894_s25 + $0x150] sm:$0xff]  ;;  %v196_v23 = vld [vmem:[%s894_s25 + $0x158] sm:$0xff] }
  0x17   : > { %165 = vst [vmem:[%s899_s26 + $0x38] sm:$0xff] %v164_v7  ;;  %v198_v24 = vld [vmem:[%s894_s25 + $0x180] sm:$0xff]  ;;  %v200_v25 = vld [vmem:[%s894_s25 + $0x188] sm:$0xff]  ;;  %v202_v26 = vld [vmem:[%s894_s25 + $0x190] sm:$0xff] }
  0x18   : > { %167 = vst [vmem:[%s899_s26 + $0x40] sm:$0xff] %v166_v8  ;;  %v204_v27 = vld [vmem:[%s894_s25 + $0x198] sm:$0xff]  ;;  %v206_v28 = vld [vmem:[%s894_s25 + $0x1c0] sm:$0xff]  ;;  %v208_v29 = vld [vmem:[%s894_s25 + $0x1c8] sm:$0xff] }
  0x19   : > { %169 = vst [vmem:[%s899_s26 + $0x48] sm:$0xff] %v168_v9  ;;  %v210_v30 = vld [vmem:[%s894_s25 + $0x1d0] sm:$0xff]  ;;  %v212_v31 = vld [vmem:[%s894_s25 + $0x1d8] sm:$0xff]  ;;  %v214_v32 = vld [vmem:[%s894_s25 + $0x200] sm:$0xff] }
  0x1a   : > { %171 = vst [vmem:[%s899_s26 + $0x50] sm:$0xff] %v170_v10  ;;  %v216_v33 = vld [vmem:[%s894_s25 + $0x208] sm:$0xff]  ;;  %v218_v34 = vld [vmem:[%s894_s25 + $0x210] sm:$0xff]  ;;  %v220_v35 = vld [vmem:[%s894_s25 + $0x218] sm:$0xff] }
  0x1b   : > { %173 = vst [vmem:[%s899_s26 + $0x58] sm:$0xff] %v172_v11  ;;  %v222_v36 = vld [vmem:[%s894_s25 + $0x240] sm:$0xff]  ;;  %v224_v37 = vld [vmem:[%s894_s25 + $0x248] sm:$0xff]  ;;  %v226_v38 = vld [vmem:[%s894_s25 + $0x250] sm:$0xff] }
  0x1c   : > { %175 = vst [vmem:[%s899_s26 + $0x60] sm:$0xff] %v174_v12  ;;  %v228_v39 = vld [vmem:[%s894_s25 + $0x258] sm:$0xff]  ;;  %v230_v40 = vld [vmem:[%s894_s25 + $0x280] sm:$0xff]  ;;  %v232_v41 = vld [vmem:[%s894_s25 + $0x288] sm:$0xff] }
  0x1d   : > { %177 = vst [vmem:[%s899_s26 + $0x68] sm:$0xff] %v176_v13  ;;  %v234_v42 = vld [vmem:[%s894_s25 + $0x290] sm:$0xff]  ;;  %v236_v43 = vld [vmem:[%s894_s25 + $0x298] sm:$0xff]  ;;  %v238_v44 = vld [vmem:[%s894_s25 + $0x2c0] sm:$0xff] }
  0x1e   : > { %179 = vst [vmem:[%s899_s26 + $0x70] sm:$0xff] %v178_v14  ;;  %v240_v45 = vld [vmem:[%s894_s25 + $0x2c8] sm:$0xff]  ;;  %v242_v46 = vld [vmem:[%s894_s25 + $0x2d0] sm:$0xff]  ;;  %v244_v47 = vld [vmem:[%s894_s25 + $0x2d8] sm:$0xff] }
  0x1f   : > { %181 = vst [vmem:[%s899_s26 + $0x78] sm:$0xff] %v180_v15  ;;  %v246_v48 = vld [vmem:[%s894_s25 + $0x300] sm:$0xff]  ;;  %v248_v49 = vld [vmem:[%s894_s25 + $0x308] sm:$0xff]  ;;  %v250_v50 = vld [vmem:[%s894_s25 + $0x310] sm:$0xff] }
  0x20   : > { %183 = vst [vmem:[%s899_s26 + $0x80] sm:$0xff] %v182_v16  ;;  %v252_v51 = vld [vmem:[%s894_s25 + $0x318] sm:$0xff]  ;;  %v254_v52 = vld [vmem:[%s894_s25 + $0x340] sm:$0xff]  ;;  %v256_v53 = vld [vmem:[%s894_s25 + $0x348] sm:$0xff] }
  0x21   : > { %185 = vst [vmem:[%s899_s26 + $0x88] sm:$0xff] %v184_v17  ;;  %v258_v54 = vld [vmem:[%s894_s25 + $0x350] sm:$0xff]  ;;  %v260_v55 = vld [vmem:[%s894_s25 + $0x358] sm:$0xff]  ;;  %v262_v56 = vld [vmem:[%s894_s25 + $0x380] sm:$0xff] }
  0x22   : > { %187 = vst [vmem:[%s899_s26 + $0x90] sm:$0xff] %v186_v18  ;;  %v264_v57 = vld [vmem:[%s894_s25 + $0x388] sm:$0xff]  ;;  %v266_v58 = vld [vmem:[%s894_s25 + $0x390] sm:$0xff]  ;;  %v268_v59 = vld [vmem:[%s894_s25 + $0x398] sm:$0xff] }
  0x23   : > { %189 = vst [vmem:[%s899_s26 + $0x98] sm:$0xff] %v188_v19  ;;  %v270_v60 = vld [vmem:[%s894_s25 + $0x3c0] sm:$0xff]  ;;  %v272_v61 = vld [vmem:[%s894_s25 + $0x3c8] sm:$0xff]  ;;  %v274_v62 = vld [vmem:[%s894_s25 + $0x3d0] sm:$0xff] }
  0x24   : > { %191 = vst [vmem:[%s899_s26 + $0xa0] sm:$0xff] %v190_v20  ;;  %v276_v63 = vld [vmem:[%s894_s25 + $0x3d8] sm:$0xff]  ;;  %v278_v0 = vld [vmem:[%s894_s25 + $0x400] sm:$0xff]  ;;  %v280_v1 = vld [vmem:[%s894_s25 + $0x408] sm:$0xff] }
  0x25   : > { %193 = vst [vmem:[%s899_s26 + $0xa8] sm:$0xff] %v192_v21  ;;  %v282_v2 = vld [vmem:[%s894_s25 + $0x410] sm:$0xff]  ;;  %v284_v3 = vld [vmem:[%s894_s25 + $0x418] sm:$0xff]  ;;  %v286_v4 = vld [vmem:[%s894_s25 + $0x440] sm:$0xff] }
  0x26   : > { %195 = vst [vmem:[%s899_s26 + $0xb0] sm:$0xff] %v194_v22  ;;  %v288_v5 = vld [vmem:[%s894_s25 + $0x448] sm:$0xff]  ;;  %v290_v6 = vld [vmem:[%s894_s25 + $0x450] sm:$0xff]  ;;  %v292_v7 = vld [vmem:[%s894_s25 + $0x458] sm:$0xff] }
  0x27   : > { %197 = vst [vmem:[%s899_s26 + $0xb8] sm:$0xff] %v196_v23  ;;  %v294_v8 = vld [vmem:[%s894_s25 + $0x480] sm:$0xff]  ;;  %v296_v9 = vld [vmem:[%s894_s25 + $0x488] sm:$0xff]  ;;  %v298_v10 = vld [vmem:[%s894_s25 + $0x490] sm:$0xff] }
  0x28   : > { %199 = vst [vmem:[%s899_s26 + $0xc0] sm:$0xff] %v198_v24  ;;  %v300_v11 = vld [vmem:[%s894_s25 + $0x498] sm:$0xff]  ;;  %v302_v12 = vld [vmem:[%s894_s25 + $0x4c0] sm:$0xff]  ;;  %v304_v13 = vld [vmem:[%s894_s25 + $0x4c8] sm:$0xff] }
  0x29   : > { %201 = vst [vmem:[%s899_s26 + $0xc8] sm:$0xff] %v200_v25  ;;  %v306_v14 = vld [vmem:[%s894_s25 + $0x4d0] sm:$0xff]  ;;  %v308_v15 = vld [vmem:[%s894_s25 + $0x4d8] sm:$0xff]  ;;  %v310_v16 = vld [vmem:[%s894_s25 + $0x500] sm:$0xff] }
  0x2a   : > { %203 = vst [vmem:[%s899_s26 + $0xd0] sm:$0xff] %v202_v26  ;;  %v312_v17 = vld [vmem:[%s894_s25 + $0x508] sm:$0xff]  ;;  %v314_v18 = vld [vmem:[%s894_s25 + $0x510] sm:$0xff]  ;;  %v316_v19 = vld [vmem:[%s894_s25 + $0x518] sm:$0xff] }
  0x2b   : > { %205 = vst [vmem:[%s899_s26 + $0xd8] sm:$0xff] %v204_v27  ;;  %v318_v20 = vld [vmem:[%s894_s25 + $0x540] sm:$0xff]  ;;  %v320_v21 = vld [vmem:[%s894_s25 + $0x548] sm:$0xff]  ;;  %v322_v22 = vld [vmem:[%s894_s25 + $0x550] sm:$0xff] }
  0x2c   : > { %207 = vst [vmem:[%s899_s26 + $0xe0] sm:$0xff] %v206_v28  ;;  %v324_v23 = vld [vmem:[%s894_s25 + $0x558] sm:$0xff]  ;;  %v326_v24 = vld [vmem:[%s894_s25 + $0x580] sm:$0xff]  ;;  %v328_v25 = vld [vmem:[%s894_s25 + $0x588] sm:$0xff] }
  0x2d   : > { %209 = vst [vmem:[%s899_s26 + $0xe8] sm:$0xff] %v208_v29  ;;  %v330_v26 = vld [vmem:[%s894_s25 + $0x590] sm:$0xff]  ;;  %v332_v27 = vld [vmem:[%s894_s25 + $0x598] sm:$0xff]  ;;  %v334_v28 = vld [vmem:[%s894_s25 + $0x5c0] sm:$0xff] }
  0x2e   : > { %211 = vst [vmem:[%s899_s26 + $0xf0] sm:$0xff] %v210_v30  ;;  %v336_v29 = vld [vmem:[%s894_s25 + $0x5c8] sm:$0xff]  ;;  %v338_v30 = vld [vmem:[%s894_s25 + $0x5d0] sm:$0xff] }
  0x2f   : > { %213 = vst [vmem:[%s899_s26 + $0xf8] sm:$0xff] %v212_v31  ;;  %v340_v31 = vld [vmem:[%s894_s25 + $0x5d8] sm:$0xff] }
  0x30   : > { %215 = vst [vmem:[%s899_s26 + $0x100] sm:$0xff] %v214_v32  ;;  %v342_v32 = vld [vmem:[%s894_s25 + $0x600] sm:$0xff] }
  0x31   : > { %217 = vst [vmem:[%s899_s26 + $0x108] sm:$0xff] %v216_v33  ;;  %v344_v33 = vld [vmem:[%s894_s25 + $0x608] sm:$0xff] }
  0x32   : > { %219 = vst [vmem:[%s899_s26 + $0x110] sm:$0xff] %v218_v34  ;;  %v346_v34 = vld [vmem:[%s894_s25 + $0x610] sm:$0xff] }
  0x33   : > { %221 = vst [vmem:[%s899_s26 + $0x118] sm:$0xff] %v220_v35  ;;  %v348_v35 = vld [vmem:[%s894_s25 + $0x618] sm:$0xff] }
  0x34   : > { %223 = vst [vmem:[%s899_s26 + $0x120] sm:$0xff] %v222_v36  ;;  %v350_v36 = vld [vmem:[%s894_s25 + $0x640] sm:$0xff] }
  0x35   : > { %225 = vst [vmem:[%s899_s26 + $0x128] sm:$0xff] %v224_v37  ;;  %v352_v37 = vld [vmem:[%s894_s25 + $0x648] sm:$0xff] }
  0x36   : > { %227 = vst [vmem:[%s899_s26 + $0x130] sm:$0xff] %v226_v38  ;;  %v354_v38 = vld [vmem:[%s894_s25 + $0x650] sm:$0xff] }
  0x37   : > { %229 = vst [vmem:[%s899_s26 + $0x138] sm:$0xff] %v228_v39  ;;  %v356_v39 = vld [vmem:[%s894_s25 + $0x658] sm:$0xff] }
  0x38   : > { %231 = vst [vmem:[%s899_s26 + $0x140] sm:$0xff] %v230_v40  ;;  %v358_v40 = vld [vmem:[%s894_s25 + $0x680] sm:$0xff] }
  0x39   : > { %233 = vst [vmem:[%s899_s26 + $0x148] sm:$0xff] %v232_v41  ;;  %v360_v41 = vld [vmem:[%s894_s25 + $0x688] sm:$0xff] }
  0x3a   : > { %235 = vst [vmem:[%s899_s26 + $0x150] sm:$0xff] %v234_v42  ;;  %v362_v42 = vld [vmem:[%s894_s25 + $0x690] sm:$0xff] }
  0x3b   : > { %237 = vst [vmem:[%s899_s26 + $0x158] sm:$0xff] %v236_v43  ;;  %v364_v43 = vld [vmem:[%s894_s25 + $0x698] sm:$0xff] }
  0x3c   : > { %239 = vst [vmem:[%s899_s26 + $0x160] sm:$0xff] %v238_v44 }
  0x3d   : > { %241 = vst [vmem:[%s899_s26 + $0x168] sm:$0xff] %v240_v45 }
  0x3e   : > { %243 = vst [vmem:[%s899_s26 + $0x170] sm:$0xff] %v242_v46 }
  0x3f   : > { %245 = vst [vmem:[%s899_s26 + $0x178] sm:$0xff] %v244_v47 }
  0x40   : > { %247 = vst [vmem:[%s899_s26 + $0x180] sm:$0xff] %v246_v48 }
  0x41   : > { %249 = vst [vmem:[%s899_s26 + $0x188] sm:$0xff] %v248_v49 }
  0x42   : > { %251 = vst [vmem:[%s899_s26 + $0x190] sm:$0xff] %v250_v50 }
  0x43   : > { %253 = vst [vmem:[%s899_s26 + $0x198] sm:$0xff] %v252_v51 }
  0x44   : > { %255 = vst [vmem:[%s899_s26 + $0x1a0] sm:$0xff] %v254_v52 }
  0x45   : > { %257 = vst [vmem:[%s899_s26 + $0x1a8] sm:$0xff] %v256_v53 }
  0x46   : > { %259 = vst [vmem:[%s899_s26 + $0x1b0] sm:$0xff] %v258_v54 }
  0x47   : > { %261 = vst [vmem:[%s899_s26 + $0x1b8] sm:$0xff] %v260_v55 }
  0x48   : > { %263 = vst [vmem:[%s899_s26 + $0x1c0] sm:$0xff] %v262_v56 }
  0x49   : > { %265 = vst [vmem:[%s899_s26 + $0x1c8] sm:$0xff] %v264_v57 }
  0x4a   : > { %267 = vst [vmem:[%s899_s26 + $0x1d0] sm:$0xff] %v266_v58 }
  0x4b   : > { %269 = vst [vmem:[%s899_s26 + $0x1d8] sm:$0xff] %v268_v59 }
  0x4c   : > { %271 = vst [vmem:[%s899_s26 + $0x1e0] sm:$0xff] %v270_v60 }
  0x4d   : > { %273 = vst [vmem:[%s899_s26 + $0x1e8] sm:$0xff] %v272_v61 }
  0x4e   : > { %275 = vst [vmem:[%s899_s26 + $0x1f0] sm:$0xff] %v274_v62 }
  0x4f   : > { %277 = vst [vmem:[%s899_s26 + $0x1f8] sm:$0xff] %v276_v63 }
  0x50   : > { %279 = vst [vmem:[%s899_s26 + $0x200] sm:$0xff] %v278_v0 }
  0x51   : > { %281 = vst [vmem:[%s899_s26 + $0x208] sm:$0xff] %v280_v1 }
  0x52   : > { %283 = vst [vmem:[%s899_s26 + $0x210] sm:$0xff] %v282_v2 }
  0x53   : > { %285 = vst [vmem:[%s899_s26 + $0x218] sm:$0xff] %v284_v3 }
  0x54   : > { %287 = vst [vmem:[%s899_s26 + $0x220] sm:$0xff] %v286_v4 }
  0x55   : > { %289 = vst [vmem:[%s899_s26 + $0x228] sm:$0xff] %v288_v5 }
  0x56   : > { %291 = vst [vmem:[%s899_s26 + $0x230] sm:$0xff] %v290_v6 }
  0x57   : > { %293 = vst [vmem:[%s899_s26 + $0x238] sm:$0xff] %v292_v7 }
  0x58   : > { %295 = vst [vmem:[%s899_s26 + $0x240] sm:$0xff] %v294_v8 }
  0x59   : > { %297 = vst [vmem:[%s899_s26 + $0x248] sm:$0xff] %v296_v9 }
  0x5a   : > { %299 = vst [vmem:[%s899_s26 + $0x250] sm:$0xff] %v298_v10 }
  0x5b   : > { %301 = vst [vmem:[%s899_s26 + $0x258] sm:$0xff] %v300_v11 }
  0x5c   : > { %303 = vst [vmem:[%s899_s26 + $0x260] sm:$0xff] %v302_v12 }
  0x5d   : > { %305 = vst [vmem:[%s899_s26 + $0x268] sm:$0xff] %v304_v13 }
  0x5e   : > { %307 = vst [vmem:[%s899_s26 + $0x270] sm:$0xff] %v306_v14 }
  0x5f   : > { %309 = vst [vmem:[%s899_s26 + $0x278] sm:$0xff] %v308_v15 }
  0x60   : > { %311 = vst [vmem:[%s899_s26 + $0x280] sm:$0xff] %v310_v16 }
  0x61   : > { %313 = vst [vmem:[%s899_s26 + $0x288] sm:$0xff] %v312_v17 }
  0x62   : > { %315 = vst [vmem:[%s899_s26 + $0x290] sm:$0xff] %v314_v18 }
  0x63   : > { %317 = vst [vmem:[%s899_s26 + $0x298] sm:$0xff] %v316_v19 }
  0x64   : > { %319 = vst [vmem:[%s899_s26 + $0x2a0] sm:$0xff] %v318_v20 }
  0x65   : > { %321 = vst [vmem:[%s899_s26 + $0x2a8] sm:$0xff] %v320_v21 }
  0x66   : > { %323 = vst [vmem:[%s899_s26 + $0x2b0] sm:$0xff] %v322_v22 }
  0x67   : > { %325 = vst [vmem:[%s899_s26 + $0x2b8] sm:$0xff] %v324_v23 }
  0x68   : > { %327 = vst [vmem:[%s899_s26 + $0x2c0] sm:$0xff] %v326_v24 }
  0x69   : > { %329 = vst [vmem:[%s899_s26 + $0x2c8] sm:$0xff] %v328_v25 }
  0x6a   : > { %331 = vst [vmem:[%s899_s26 + $0x2d0] sm:$0xff] %v330_v26 }
  0x6b   : > { %333 = vst [vmem:[%s899_s26 + $0x2d8] sm:$0xff] %v332_v27 }
  0x6c   : > { %335 = vst [vmem:[%s899_s26 + $0x2e0] sm:$0xff] %v334_v28 }
  0x6d   : > { %337 = vst [vmem:[%s899_s26 + $0x2e8] sm:$0xff] %v336_v29 }
  0x6e   : > { %339 = vst [vmem:[%s899_s26 + $0x2f0] sm:$0xff] %v338_v30 }
  0x6f   : > { %341 = vst [vmem:[%s899_s26 + $0x2f8] sm:$0xff] %v340_v31 }
  0x70   : > { %343 = vst [vmem:[%s899_s26 + $0x300] sm:$0xff] %v342_v32 }
  0x71   : > { %345 = vst [vmem:[%s899_s26 + $0x308] sm:$0xff] %v344_v33 }
  0x72   : > { %347 = vst [vmem:[%s899_s26 + $0x310] sm:$0xff] %v346_v34 }
  0x73   : > { %349 = vst [vmem:[%s899_s26 + $0x318] sm:$0xff] %v348_v35 }
  0x74   : > { %351 = vst [vmem:[%s899_s26 + $0x320] sm:$0xff] %v350_v36 }
  0x75   : > { %353 = vst [vmem:[%s899_s26 + $0x328] sm:$0xff] %v352_v37 }
  0x76   : > { %355 = vst [vmem:[%s899_s26 + $0x330] sm:$0xff] %v354_v38 }
  0x77   : > { %357 = vst [vmem:[%s899_s26 + $0x338] sm:$0xff] %v356_v39 }
  0x78   : > { %359 = vst [vmem:[%s899_s26 + $0x340] sm:$0xff] %v358_v40 }
  0x79   : > { %361 = vst [vmem:[%s899_s26 + $0x348] sm:$0xff] %v360_v41 }
  0x7a   : > { %363 = vst [vmem:[%s899_s26 + $0x350] sm:$0xff] %v362_v42 }
  0x7b   : > { %365 = vst [vmem:[%s899_s26 + $0x358] sm:$0xff] %v364_v43 }
  0x7c PF: > { %p777_p5 = scmp.ge.s32.totalorder %s837_s14, 1  ;;  %p370_p6 = scmp.lt.s32.totalorder %s837_s14, 3 }
  0x7e   : > { %p371_p7 = pnand %p777_p5, %p370_p6 }
  0x7f   : > { %s377_s27 = sand.u32 (!%p371_p7), 1, %s829_s12   ;;  %s778_s7 = sshll.u32 (!%p371_p7), %s771_s15, 2 }
  0x80   : > { %374 = sbr.rel (%p371_p7) target bundleno = 334 (0x14e), region = 51  ;;  %p402_p8 = scmp.lt.s32.totalorder (!%p371_p7), %s778_s7, 7 }
  0x81   : > { %s788_s28 = smul.u32 (!%p371_p7), 864, %s377_s27 }
  0x83   : > { %s1117_s29 = scalar_lea.vmem (!%p371_p7), [#allocation2], %s788_s28 }
  0x85   : > { %v468_v44 = vld [vmem:[%s1117_s29 + $0x1e0] sm:$0xff]  ;;  %v469_v46 = vld [vmem:[%s1117_s29 + $0x1e8] sm:$0xff]  ;;  %v470_v23 = vld [vmem:[%s1117_s29 + $0x1f0] sm:$0xff]  ;;  %vm527_vm0 = vcmask 719872   ;;  %s1272_s7 = smov (!%p402_p8, %s778_s7), 7  ;;  %vm701_vm1 = vcmask 1041408  }
  0x86   : > { %v464_v45 = vld [vmem:[%s1117_s29 + $0x1c0] sm:$0xff]  ;;  %530 = vmatpush.msra.mxu0 %v468_v44  ;;  %570 = vmatpush.msra.mxu2 %v469_v46  ;;  %v465_v48 = vld [vmem:[%s1117_s29 + $0x1c8] sm:$0xff]  ;;  %v466_v27 = vld [vmem:[%s1117_s29 + $0x1d0] sm:$0xff]  ;;  %s779_s8 = sshll.u32 %s1272_s7, 1  ;;  %vm703_vm2 = vcmask 1045508   ;;  %vm705_vm3 = vcmask 1043456  }
  0x87   : > { %v460_v47 = vld [vmem:[%s1117_s29 + $0x1a0] sm:$0xff]  ;;  %v461_v50 = vld [vmem:[%s1117_s29 + $0x1a8] sm:$0xff]  ;;  %v462_v31 = vld [vmem:[%s1117_s29 + $0x1b0] sm:$0xff]  ;;  %s405_s11 = scalar_lea.vmem %s1267_s3, %s779_s8 }
  0x88   : > { %v512_v49 = vld [vmem:[%s1117_s29 + $0x340] sm:$0xff]  ;;  %531 = vmatpush.msra.mxu0 %v464_v45  ;;  %571 = vmatpush.msra.mxu2 %v465_v48  ;;  %v457_v54 = vld [vmem:[%s1117_s29 + $0x188] sm:$0xff]  ;;  %v407_v32 = vld [vmem:[%s1265_s1] sm:$0xf] }
  0x89   : > { %555 = vmatpush.msra.mxu1 %v512_v49  ;;  %v508_v51 = vld [vmem:[%s1117_s29 + $0x320] sm:$0xff]  ;;  %v513_v57 = vld [vmem:[%s1117_s29 + $0x348] sm:$0xff]  ;;  %523 = vst [vmem:[#allocation1] ss:$4 sm:$0xff] %v407_v32  ;;  %v458_v36 = vld [vmem:[%s1117_s29 + $0x190] sm:$0xff] }
  0x8a   : > { %v456_v52 = vld [vmem:[%s1117_s29 + $0x180] sm:$0xff]  ;;  %532 = vmatpush.msra.mxu0 %v460_v47  ;;  %572 = vmatpush.msra.mxu2 %v461_v50  ;;  %v453_v58 = vld [vmem:[%s1117_s29 + $0x168] sm:$0xff]  ;;  %v514_v38 = vld [vmem:[%s1117_s29 + $0x350] sm:$0xff] }
  0x8b   : > { %v504_v53 = vld [vmem:[%s1117_s29 + $0x300] sm:$0xff]  ;;  %556 = vmatpush.msra.mxu1 %v508_v51  ;;  %v509_v59 = vld [vmem:[%s1117_s29 + $0x328] sm:$0xff]  ;;  %595 = vmatpush.msra.mxu3 %v513_v57  ;;  %v471_v39 = vld [vmem:[%s1117_s29 + $0x1f8] sm:$0xff] }
  0x8c   : > { %v452_v55 = vld [vmem:[%s1117_s29 + $0x160] sm:$0xff]  ;;  %533 = vmatpush.msra.mxu0 %v456_v52  ;;  %573 = vmatpush.msra.mxu2 %v457_v54  ;;  %v449_v62 = vld [vmem:[%s1117_s29 + $0x148] sm:$0xff]  ;;  %v515_v41 = vld [vmem:[%s1117_s29 + $0x358] sm:$0xff] }
  0x8d   : > { %v500_v56 = vld [vmem:[%s1117_s29 + $0x2e0] sm:$0xff]  ;;  %557 = vmatpush.msra.mxu1 %v504_v53  ;;  %v505_v63 = vld [vmem:[%s1117_s29 + $0x308] sm:$0xff]  ;;  %596 = vmatpush.msra.mxu3 %v509_v59  ;;  %v454_v42 = vld [vmem:[%s1117_s29 + $0x170] sm:$0xff] }
  0x8e   : > { %v448_v60 = vld [vmem:[%s1117_s29 + $0x140] sm:$0xff]  ;;  %534 = vmatpush.msra.mxu0 %v452_v55  ;;  %574 = vmatpush.msra.mxu2 %v453_v58  ;;  %v445_v2 = vld [vmem:[%s1117_s29 + $0x128] sm:$0xff]  ;;  %v467_v43 = vld [vmem:[%s1117_s29 + $0x1d8] sm:$0xff] }
  0x8f   : > { %v496_v61 = vld [vmem:[%s1117_s29 + $0x2c0] sm:$0xff]  ;;  %558 = vmatpush.msra.mxu1 %v500_v56  ;;  %v501_v3 = vld [vmem:[%s1117_s29 + $0x2e8] sm:$0xff]  ;;  %597 = vmatpush.msra.mxu3 %v505_v63  ;;  %v510_v44 = vld [vmem:[%s1117_s29 + $0x330] sm:$0xff] }
  0x90   : > { %v444_v0 = vld [vmem:[%s1117_s29 + $0x120] sm:$0xff]  ;;  %535 = vmatpush.msra.mxu0 %v448_v60  ;;  %575 = vmatpush.msra.mxu2 %v449_v62  ;;  %v441_v6 = vld [vmem:[%s1117_s29 + $0x108] sm:$0xff]  ;;  %v511_v45 = vld [vmem:[%s1117_s29 + $0x338] sm:$0xff] }
  0x91   : > { %v492_v1 = vld [vmem:[%s1117_s29 + $0x2a0] sm:$0xff]  ;;  %559 = vmatpush.msra.mxu1 %v496_v61  ;;  %v497_v7 = vld [vmem:[%s1117_s29 + $0x2c8] sm:$0xff]  ;;  %598 = vmatpush.msra.mxu3 %v501_v3  ;;  %v450_v46 = vld [vmem:[%s1117_s29 + $0x150] sm:$0xff] }
  0x92   : > { %v440_v4 = vld [vmem:[%s1117_s29 + $0x100] sm:$0xff]  ;;  %536 = vmatpush.msra.mxu0 %v444_v0  ;;  %576 = vmatpush.msra.mxu2 %v445_v2  ;;  %v437_v10 = vld [vmem:[%s1117_s29 + $0xe8] sm:$0xff]  ;;  %v463_v47 = vld [vmem:[%s1117_s29 + $0x1b8] sm:$0xff] }
  0x93   : > { %v488_v5 = vld [vmem:[%s1117_s29 + $0x280] sm:$0xff]  ;;  %560 = vmatpush.msra.mxu1 %v492_v1  ;;  %v493_v11 = vld [vmem:[%s1117_s29 + $0x2a8] sm:$0xff]  ;;  %599 = vmatpush.msra.mxu3 %v497_v7  ;;  %v506_v48 = vld [vmem:[%s1117_s29 + $0x310] sm:$0xff] }
  0x94   : > { %v436_v8 = vld [vmem:[%s1117_s29 + $0xe0] sm:$0xff]  ;;  %537 = vmatpush.msra.mxu0 %v440_v4  ;;  %577 = vmatpush.msra.mxu2 %v441_v6  ;;  %v433_v14 = vld [vmem:[%s1117_s29 + $0xc8] sm:$0xff]  ;;  %v507_v49 = vld [vmem:[%s1117_s29 + $0x318] sm:$0xff] }
  0x95   : > { %v484_v9 = vld [vmem:[%s1117_s29 + $0x260] sm:$0xff]  ;;  %561 = vmatpush.msra.mxu1 %v488_v5  ;;  %v489_v15 = vld [vmem:[%s1117_s29 + $0x288] sm:$0xff]  ;;  %600 = vmatpush.msra.mxu3 %v493_v11  ;;  %v446_v50 = vld [vmem:[%s1117_s29 + $0x130] sm:$0xff] }
  0x96   : > { %v432_v12 = vld [vmem:[%s1117_s29 + $0xc0] sm:$0xff]  ;;  %538 = vmatpush.msra.mxu0 %v436_v8  ;;  %578 = vmatpush.msra.mxu2 %v437_v10  ;;  %v429_v18 = vld [vmem:[%s1117_s29 + $0xa8] sm:$0xff]  ;;  %v459_v51 = vld [vmem:[%s1117_s29 + $0x198] sm:$0xff] }
  0x97   : > { %v480_v13 = vld [vmem:[%s1117_s29 + $0x240] sm:$0xff]  ;;  %562 = vmatpush.msra.mxu1 %v484_v9  ;;  %v485_v19 = vld [vmem:[%s1117_s29 + $0x268] sm:$0xff]  ;;  %601 = vmatpush.msra.mxu3 %v489_v15  ;;  %v502_v52 = vld [vmem:[%s1117_s29 + $0x2f0] sm:$0xff] }
  0x98   : > { %v428_v16 = vld [vmem:[%s1117_s29 + $0xa0] sm:$0xff]  ;;  %539 = vmatpush.msra.mxu0 %v432_v12  ;;  %579 = vmatpush.msra.mxu2 %v433_v14  ;;  %v425_v22 = vld [vmem:[%s1117_s29 + $0x88] sm:$0xff]  ;;  %v503_v53 = vld [vmem:[%s1117_s29 + $0x2f8] sm:$0xff] }
  0x99   : > { %v476_v17 = vld [vmem:[%s1117_s29 + $0x220] sm:$0xff]  ;;  %563 = vmatpush.msra.mxu1 %v480_v13  ;;  %602 = vmatpush.msra.mxu3 %v485_v19  ;;  %v481_v25 = vld [vmem:[%s1117_s29 + $0x248] sm:$0xff]  ;;  %v442_v54 = vld [vmem:[%s1117_s29 + $0x110] sm:$0xff] }
  0x9a   : > { %v424_v20 = vld [vmem:[%s1117_s29 + $0x80] sm:$0xff]  ;;  %540 = vmatpush.msra.mxu0 %v428_v16  ;;  %580 = vmatpush.msra.mxu2 %v429_v18  ;;  %v421_v26 = vld [vmem:[%s1117_s29 + $0x68] sm:$0xff]  ;;  %v455_v55 = vld [vmem:[%s1117_s29 + $0x178] sm:$0xff] }
  0x9b   : > { %v472_v21 = vld [vmem:[%s1117_s29 + $0x200] sm:$0xff]  ;;  %564 = vmatpush.msra.mxu1 %v476_v17  ;;  %v477_v29 = vld [vmem:[%s1117_s29 + $0x228] sm:$0xff]  ;;  %603 = vmatpush.msra.mxu3 %v481_v25  ;;  %v1197_v56 = vld.sshfl [vmem:[#allocation1] sm:$0xff pattern:$0x73625140] }
  0x9c   : > { %v420_v24 = vld [vmem:[%s1117_s29 + $0x60] sm:$0xff]  ;;  %541 = vmatpush.msra.mxu0 %v424_v20  ;;  %581 = vmatpush.msra.mxu2 %v425_v22  ;;  %v417_v30 = vld [vmem:[%s1117_s29 + $0x48] sm:$0xff]  ;;  %v498_v57 = vld [vmem:[%s1117_s29 + $0x2d0] sm:$0xff] }
  0x9d   : > { %565 = vmatpush.msra.mxu1 %v472_v21  ;;  %v416_v28 = vld [vmem:[%s1117_s29 + $0x40] sm:$0xff]  ;;  %v473_v34 = vld [vmem:[%s1117_s29 + $0x208] sm:$0xff]  ;;  %604 = vmatpush.msra.mxu3 %v477_v29  ;;  %v499_v58 = vld [vmem:[%s1117_s29 + $0x2d8] sm:$0xff] }
  0x9e   : > { %542 = vmatpush.msra.mxu0 %v420_v24  ;;  %v412_v33 = vld [vmem:[%s1117_s29 + $0x20] sm:$0xff]  ;;  %582 = vmatpush.msra.mxu2 %v421_v26  ;;  %v413_v35 = vld [vmem:[%s1117_s29 + $0x28] sm:$0xff]  ;;  %v451_v59 = vld [vmem:[%s1117_s29 + $0x158] sm:$0xff] }
  0x9f   : > { %610 = vmatpush.msrb.mxu1 %v470_v23  ;;  %v408_v37 = vld [vmem:[%s1117_s29] sm:$0xff]  ;;  %v409_v40 = vld [vmem:[%s1117_s29 + $0x8] sm:$0xff]  ;;  %605 = vmatpush.msra.mxu3 %v473_v34  ;;  %v438_v61 = vld [vmem:[%s1117_s29 + $0xf0] sm:$0xff] }
  0xa0   : > { %543 = vmatpush.msra.mxu0 %v416_v28  ;;  %583 = vmatpush.msra.mxu2 %v417_v30  ;;  %v1202_v60 = vld.sshfl [vmem:[#allocation1 + $0x8] sm:$0xff pattern:$0x73625140]  ;;  %v494_v62 = vld [vmem:[%s1117_s29 + $0x2b0] sm:$0xff]  ;;  %v447_v63 = vld [vmem:[%s1117_s29 + $0x138] sm:$0xff] }
  0xa1   : > { %611 = vmatpush.msrb.mxu1 %v466_v27  ;;  %635 = vmatpush.msrb.mxu3 %v514_v38  ;;  %v495_v0 = vld [vmem:[%s1117_s29 + $0x2b8] sm:$0xff]  ;;  %v434_v1 = vld [vmem:[%s1117_s29 + $0xd0] sm:$0xff]  ;;  %v839_v27 = vmov 0  }
  0xa2   : > { %544 = vmatpush.msra.mxu0 %v412_v33  ;;  %584 = vmatpush.msra.mxu2 %v413_v35  ;;  %v490_v2 = vld [vmem:[%s1117_s29 + $0x290] sm:$0xff]  ;;  %v443_v3 = vld [vmem:[%s1117_s29 + $0x118] sm:$0xff] }
  0xa3   : > { %612 = vmatpush.msrb.mxu1 %v462_v31  ;;  %636 = vmatpush.msrb.mxu3 %v510_v44  ;;  %v491_v4 = vld [vmem:[%s1117_s29 + $0x298] sm:$0xff]  ;;  %v430_v5 = vld [vmem:[%s1117_s29 + $0xb0] sm:$0xff] }
  0xa4   : > { %545 = vmatpush.msra.mxu0 %v408_v37  ;;  %585 = vmatpush.msra.mxu2 %v409_v40  ;;  %v486_v6 = vld [vmem:[%s1117_s29 + $0x270] sm:$0xff]  ;;  %v439_v7 = vld [vmem:[%s1117_s29 + $0xf8] sm:$0xff] }
  0xa5   : > { %613 = vmatpush.msrb.mxu1 %v458_v36  ;;  %637 = vmatpush.msrb.mxu3 %v506_v48  ;;  %v487_v8 = vld [vmem:[%s1117_s29 + $0x278] sm:$0xff]  ;;  %v426_v9 = vld [vmem:[%s1117_s29 + $0x90] sm:$0xff] }
  0xa6   : > { %650 = vmatpush.msrb.mxu0 %v471_v39  ;;  %675 = vmatpush.msrb.mxu2 %v515_v41  ;;  %v435_v10 = vld [vmem:[%s1117_s29 + $0xd8] sm:$0xff]  ;;  %v482_v11 = vld [vmem:[%s1117_s29 + $0x250] sm:$0xff] }
  0xa7   : > { %614 = vmatpush.msrb.mxu1 %v454_v42  ;;  %638 = vmatpush.msrb.mxu3 %v502_v52  ;;  %v483_v12 = vld [vmem:[%s1117_s29 + $0x258] sm:$0xff]  ;;  %v422_v14 = vld [vmem:[%s1117_s29 + $0x70] sm:$0xff] }
  0xa8   : > { %651 = vmatpush.msrb.mxu0 %v467_v43  ;;  %676 = vmatpush.msrb.mxu2 %v511_v45  ;;  %v431_v13 = vld [vmem:[%s1117_s29 + $0xb8] sm:$0xff]  ;;  %v478_v15 = vld [vmem:[%s1117_s29 + $0x230] sm:$0xff] }
  0xa9   : > { %615 = vmatpush.msrb.mxu1 %v450_v46  ;;  %586 = vmatmul.f32.vlgmr.msra.gmra.mxu2 %v1197_v56  ;;  %v479_v16 = vld [vmem:[%s1117_s29 + $0x238] sm:$0xff]  ;;  %v418_v18 = vld [vmem:[%s1117_s29 + $0x50] sm:$0xff] }
  0xaa   : > { %652 = vmatpush.msrb.mxu0 %v463_v47  ;;  %677 = vmatpush.msrb.mxu2 %v507_v49  ;;  %v427_v17 = vld [vmem:[%s1117_s29 + $0x98] sm:$0xff]  ;;  %v474_v19 = vld [vmem:[%s1117_s29 + $0x210] sm:$0xff] }
  0xab   : > { %616 = vmatpush.msrb.mxu1 %v446_v50  ;;  %639 = vmatpush.msrb.mxu3 %v498_v57  ;;  %v475_v20 = vld [vmem:[%s1117_s29 + $0x218] sm:$0xff]  ;;  %v414_v22 = vld [vmem:[%s1117_s29 + $0x30] sm:$0xff] }
  0xac   : > { %653 = vmatpush.msrb.mxu0 %v459_v51  ;;  %678 = vmatpush.msrb.mxu2 %v503_v53  ;;  %v423_v21 = vld [vmem:[%s1117_s29 + $0x78] sm:$0xff]  ;;  %v410_v25 = vld [vmem:[%s1117_s29 + $0x10] sm:$0xff] }
  0xad   : > { %617 = vmatpush.msrb.mxu1 %v442_v54  ;;  %781 = vmatmul.msk.f32.vlgmr.msra.gmra.mxu3 %vm527_vm0, %v1202_v60  ;;  %v419_v23 = vld [vmem:[%s1117_s29 + $0x58] sm:$0xff] }
  0xae   : > { %654 = vmatpush.msrb.mxu0 %v455_v55  ;;  %679 = vmatpush.msrb.mxu2 %v499_v58  ;;  %v516_v24 = vld [vmem:[%s1266_s2] sm:$0x3] }
  0xaf   : > { %618 = vmatpush.msrb.mxu1 %v438_v61  ;;  %640 = vmatpush.msrb.mxu3 %v494_v62  ;;  %v415_v26 = vld [vmem:[%s1117_s29 + $0x38] sm:$0xff] }
  0xb0   : > { %655 = vmatpush.msrb.mxu0 %v451_v59  ;;  %680 = vmatpush.msrb.mxu2 %v495_v0  ;;  %v411_v28 = vld [vmem:[%s1117_s29 + $0x18] sm:$0xff] }
  0xb1   : > { %619 = vmatpush.msrb.mxu1 %v434_v1  ;;  %641 = vmatpush.msrb.mxu3 %v490_v2 }
  0xb2   : > { %656 = vmatpush.msrb.mxu0 %v447_v63  ;;  %681 = vmatpush.msrb.mxu2 %v491_v4 }
  0xb3   : > { %620 = vmatpush.msrb.mxu1 %v430_v5  ;;  %642 = vmatpush.msrb.mxu3 %v486_v6 }
  0xb4   : > { %657 = vmatpush.msrb.mxu0 %v443_v3  ;;  %682 = vmatpush.msrb.mxu2 %v487_v8 }
  0xb5   : > { %546 = vmatmul.f32.vlgmr.msra.gmra.mxu0 %v1197_v56  ;;  %621 = vmatpush.msrb.mxu1 %v426_v9 }
  0xb6   : > { %658 = vmatpush.msrb.mxu0 %v439_v7  ;;  %643 = vmatpush.msrb.mxu3 %v482_v11 }
  0xb7   : > { %683 = vmatpush.msrb.mxu2 %v483_v12  ;;  %780 = vmatmul.msk.f32.vlgmr.msra.gmra.mxu1 %vm527_vm0, %v1202_v60 }
  0xb8   : > { %659 = vmatpush.msrb.mxu0 %v435_v10  ;;  %622 = vmatpush.msrb.mxu1 %v422_v14 }
  0xb9   : > { %644 = vmatpush.msrb.mxu3 %v478_v15  ;;  %684 = vmatpush.msrb.mxu2 %v479_v16 }
  0xba   : > { %660 = vmatpush.msrb.mxu0 %v431_v13  ;;  %623 = vmatpush.msrb.mxu1 %v418_v18 }
  0xbb   : > { %645 = vmatpush.msrb.mxu3 %v474_v19  ;;  %685 = vmatpush.msrb.mxu2 %v475_v20 }
  0xbc   : > { %661 = vmatpush.msrb.mxu0 %v427_v17  ;;  %782 = vmatmul.msk.f32.vlgmr.msrb.gmra.mxu3 %vm527_vm0, %v1202_v60 }
  0xbd   : > { %783 = vmatmul.msk.f32.vlgmr.msrb.gmra.mxu2 %vm527_vm0, %v1202_v60  ;;  %624 = vmatpush.msrb.mxu1 %v414_v22 }
  0xbe   : > { %662 = vmatpush.msrb.mxu0 %v423_v21  ;;  %814 = vset.pattern.permute.xlu0 %v839_v27 }
  0xbf   : > { %519 = vperm.xlu0 %814, %v516_v24   ;;  %625 = vmatpush.msrb.mxu1 %v410_v25 }
  0xc0   : > { %663 = vmatpush.msrb.mxu0 %v419_v23  ;;  %626 = vmatmul.f32.vlgmr.msrb.gmra.mxu1 %v1197_v56 }
  0xc2   : > { %664 = vmatpush.msrb.mxu0 %v415_v26 }
  0xc4   : > { %665 = vmatpush.msrb.mxu0 %v411_v28 }
  0xc5   : > { %666 = vmatmul.f32.vlgmr.msrb.gmra.mxu0 %v1197_v56 }
 0x12c   : > { %v587_v31 = vpop.f32.mrf.mxu2 }
 0x130   : > { %v607_v32 = vpop.f32.mrf.mxu3 }
 0x131   : > { %v520_v30 = vpop.permute.xlu0 %519 }
 0x132   : > { %v547_v33 = vpop.f32.mrf.mxu0  ;;  %v588_v34 = vadd.f32 %v587_v31, %v520_v30 }
 0x133   : > { %v548_v35 = vadd.f32 %v547_v33, %v520_v30 }
 0x134   : > { %v567_v29 = vpop.f32.mrf.mxu1  ;;  %v608_v36 = vadd.f32 %v607_v32, %v588_v34 }
 0x135   : > { %v568_v44 = vadd.f32 %v567_v29, %v548_v35 }
 0x136   : > { %v691_v43 = vmax.f32 %v608_v36, 0.0 }
 0x137   : > { %v690_v49 = vmax.f32 %v568_v44, 0.0 }
 0x138   : > { %v698_v48 = vrot.slane %v691_v43, 6 }
 0x13a   : > { %v702_v53 = vsel %vm701_vm1, %v690_v49, %v698_v48 }
 0x13d   : > { %v627_v37 = vpop.f32.mrf.mxu1 }
 0x13e   : > { %v628_v38 = vadd.f32 %v627_v37, %v520_v30 }
 0x13f   : > { %v647_v39 = vpop.f32.mrf.mxu3 }
 0x140   : > { %v648_v41 = vadd.f32 %v647_v39, %v628_v38  ;;  %v687_v42 = vpop.f32.mrf.mxu2 }
 0x142   : > { %v667_v40 = vpop.f32.mrf.mxu0  ;;  %v692_v46 = vmax.f32 %v648_v41, 0.0 }
 0x143   : > { %v668_v45 = vadd.f32 %v667_v40, %v520_v30 }
 0x144   : > { %v699_v50 = vrot.slane %v692_v46, 4 }
 0x145   : > { %v688_v47 = vadd.f32 %v687_v42, %v668_v45 }
 0x147   : > { %v693_v51 = vmax.f32 %v688_v47, 0.0 }
 0x149   : > { %v700_v52 = vrot.slane %v693_v51, 2 }
 0x14b   : > { %v704_v54 = vsel %vm703_vm2, %v699_v50, %v700_v52 }
 0x14c   : > { %v706_v55 = vsel %vm705_vm3, %v702_v53, %v704_v54 }
 0x14d   : > { %708 = vst [vmem:[%s405_s11] sm:$0xff] %v706_v55 }
 0x14e PF: > { %p10_p9 = scmp.ge.s32.totalorder %s877_s16, 4   ;;  %s1268_s12 = smov %s833_s13 }
 0x14f   : > { %s1269_s13 = smov %s886_s19  ;;  %s1270_s14 = smov %s877_s16 }
 0x150   :  { %12 = sbr.rel (!%p10_p9) target bundleno = 2 (0x2), region = 90 }

// kernel: geo_processor.22
= control target key start
LH: loop header
LB: loop body
LE: loop exit
PB: predicated region body
PF: predicated region fallthrough
CT: control target
= control target key end

     0   :  { %s1488_s12 = smov 0   ;;  %s1490_s13 = smov 0   ;;  %s2310_s0 = inlined_call_operand.vmem [shape: f32[108,8192], index: 0, kind: input, shape index: {}]   ;;  %s2311_s1 = inlined_call_operand.vmem [shape: f32[2,108], index: 1, kind: input, shape index: {}]   ;;  %s2312_s2 = inlined_call_operand.vmem [shape: f32[2,1], index: 2, kind: input, shape index: {}]   ;;  %s2313_s3 = inlined_call_operand.vmem [shape: f32[2,8192], index: 3, kind: output, shape index: {}]  }
   0x1   :  { %s1492_s14 = smov 0  }
   0x2 LB: > { %s1371_s15 = sadd.s32 4294967295, %s1465_s14   ;;  %s1505_s16 = sadd.s32 1, %s1465_s14   ;;  %s1465_s14 = sphi %s1492_s14, %s2316_s14   ;;  %s1461_s13 = sphi %s1490_s13, %s2315_s13   ;;  %s1457_s12 = sphi %s1488_s12, %s2314_s12  }
   0x3   : > { %s17_s17 = ssub.s32 %s1465_s14, %s1505_s16  ;;  %s20_s18 = sadd.s32 1, %s1461_s13 }
   0x4   : > { %p18_p0 = scmp.eq.s32.totalorder %s17_s17, 0  ;;  %p27_p1 = scmp.ne.s32.totalorder %s1461_s13, %s1457_s12 }
   0x5   : > { %p28_p2 = scmp.eq.s32.totalorder %s1465_s14, 0  ;;  %p1374_p4 = scmp.ge.s32.totalorder %s1465_s14, 4 }
   0x6   : > { %s1514_s19 = scalar_select %p18_p0, %s1461_s13, %s20_s18  }
   0x7   : > { %p29_p3 = por %p28_p2, %p27_p1  ;;  %127 = sbr.rel (%p1374_p4) target bundleno = 240 (0xf0), region = 24 }
   0xc   : > { %130 = sbr.rel (!%p29_p3) target bundleno = 240 (0xf0), region = 28  ;;  %s132_s20 = sand.u32 (%p29_p3), 1, %s1461_s13  }
   0xd   : > { %s1414_s21 = sshll.u32 (%p29_p3), %s1465_s14, 7  ;;  %s1415_s22 = smul.u32 (%p29_p3), 1792, %s132_s20 }
   0xe   : > { %s1522_s25 = scalar_lea.vmem (%p29_p3), %s2310_s0, %s1414_s21 }
   0xf   : > { %v150_v0 = vld [vmem:[%s1522_s25] sm:$0xff] (%p29_p3)  ;;  %v152_v1 = vld [vmem:[%s1522_s25 + $0x8] sm:$0xff] (%p29_p3)  ;;  %v154_v2 = vld [vmem:[%s1522_s25 + $0x10] sm:$0xff] (%p29_p3)  ;;  %s1527_s26 = scalar_lea.vmem (%p29_p3), [#allocation2], %s1415_s22 }
  0x10   : > { %151 = vst [vmem:[%s1527_s26] sm:$0xff] (%p29_p3), %v150_v0  ;;  %v156_v3 = vld [vmem:[%s1522_s25 + $0x18] sm:$0xff] (%p29_p3)  ;;  %v158_v4 = vld [vmem:[%s1522_s25 + $0x20] sm:$0xff] (%p29_p3)  ;;  %v160_v5 = vld [vmem:[%s1522_s25 + $0x28] sm:$0xff] (%p29_p3) }
  0x11   : > { %153 = vst [vmem:[%s1527_s26 + $0x8] sm:$0xff] %v152_v1  ;;  %v162_v6 = vld [vmem:[%s1522_s25 + $0x30] sm:$0xff]  ;;  %v164_v7 = vld [vmem:[%s1522_s25 + $0x38] sm:$0xff]  ;;  %v166_v8 = vld [vmem:[%s1522_s25 + $0x40] sm:$0xff] }
  0x12   : > { %155 = vst [vmem:[%s1527_s26 + $0x10] sm:$0xff] %v154_v2  ;;  %v168_v9 = vld [vmem:[%s1522_s25 + $0x48] sm:$0xff]  ;;  %v170_v10 = vld [vmem:[%s1522_s25 + $0x50] sm:$0xff]  ;;  %v172_v11 = vld [vmem:[%s1522_s25 + $0x58] sm:$0xff] }
  0x13   : > { %157 = vst [vmem:[%s1527_s26 + $0x18] sm:$0xff] %v156_v3  ;;  %v174_v12 = vld [vmem:[%s1522_s25 + $0x60] sm:$0xff]  ;;  %v176_v13 = vld [vmem:[%s1522_s25 + $0x68] sm:$0xff]  ;;  %v178_v14 = vld [vmem:[%s1522_s25 + $0x70] sm:$0xff] }
  0x14   : > { %159 = vst [vmem:[%s1527_s26 + $0x20] sm:$0xff] %v158_v4  ;;  %v180_v15 = vld [vmem:[%s1522_s25 + $0x78] sm:$0xff]  ;;  %v182_v16 = vld [vmem:[%s1522_s25 + $0x200] sm:$0xff]  ;;  %v184_v17 = vld [vmem:[%s1522_s25 + $0x208] sm:$0xff] }
  0x15   : > { %161 = vst [vmem:[%s1527_s26 + $0x28] sm:$0xff] %v160_v5  ;;  %v186_v18 = vld [vmem:[%s1522_s25 + $0x210] sm:$0xff]  ;;  %v188_v19 = vld [vmem:[%s1522_s25 + $0x218] sm:$0xff]  ;;  %v190_v20 = vld [vmem:[%s1522_s25 + $0x220] sm:$0xff] }
  0x16   : > { %163 = vst [vmem:[%s1527_s26 + $0x30] sm:$0xff] %v162_v6  ;;  %v192_v21 = vld [vmem:[%s1522_s25 + $0x228] sm:$0xff]  ;;  %v194_v22 = vld [vmem:[%s1522_s25 + $0x230] sm:$0xff]  ;;  %v196_v23 = vld [vmem:[%s1522_s25 + $0x238] sm:$0xff] }
  0x17   : > { %165 = vst [vmem:[%s1527_s26 + $0x38] sm:$0xff] %v164_v7  ;;  %v198_v24 = vld [vmem:[%s1522_s25 + $0x240] sm:$0xff]  ;;  %v200_v25 = vld [vmem:[%s1522_s25 + $0x248] sm:$0xff]  ;;  %v202_v26 = vld [vmem:[%s1522_s25 + $0x250] sm:$0xff] }
  0x18   : > { %167 = vst [vmem:[%s1527_s26 + $0x40] sm:$0xff] %v166_v8  ;;  %v204_v27 = vld [vmem:[%s1522_s25 + $0x258] sm:$0xff]  ;;  %v206_v28 = vld [vmem:[%s1522_s25 + $0x260] sm:$0xff]  ;;  %v208_v29 = vld [vmem:[%s1522_s25 + $0x268] sm:$0xff] }
  0x19   : > { %169 = vst [vmem:[%s1527_s26 + $0x48] sm:$0xff] %v168_v9  ;;  %v210_v30 = vld [vmem:[%s1522_s25 + $0x270] sm:$0xff]  ;;  %v212_v31 = vld [vmem:[%s1522_s25 + $0x278] sm:$0xff]  ;;  %v214_v32 = vld [vmem:[%s1522_s25 + $0x400] sm:$0xff] }
  0x1a   : > { %171 = vst [vmem:[%s1527_s26 + $0x50] sm:$0xff] %v170_v10  ;;  %v216_v33 = vld [vmem:[%s1522_s25 + $0x408] sm:$0xff]  ;;  %v218_v34 = vld [vmem:[%s1522_s25 + $0x410] sm:$0xff]  ;;  %v220_v35 = vld [vmem:[%s1522_s25 + $0x418] sm:$0xff] }
  0x1b   : > { %173 = vst [vmem:[%s1527_s26 + $0x58] sm:$0xff] %v172_v11  ;;  %v222_v36 = vld [vmem:[%s1522_s25 + $0x420] sm:$0xff]  ;;  %v224_v37 = vld [vmem:[%s1522_s25 + $0x428] sm:$0xff]  ;;  %v226_v38 = vld [vmem:[%s1522_s25 + $0x430] sm:$0xff] }
  0x1c   : > { %175 = vst [vmem:[%s1527_s26 + $0x60] sm:$0xff] %v174_v12  ;;  %v228_v39 = vld [vmem:[%s1522_s25 + $0x438] sm:$0xff]  ;;  %v230_v40 = vld [vmem:[%s1522_s25 + $0x440] sm:$0xff]  ;;  %v232_v41 = vld [vmem:[%s1522_s25 + $0x448] sm:$0xff] }
  0x1d   : > { %177 = vst [vmem:[%s1527_s26 + $0x68] sm:$0xff] %v176_v13  ;;  %v234_v42 = vld [vmem:[%s1522_s25 + $0x450] sm:$0xff]  ;;  %v236_v43 = vld [vmem:[%s1522_s25 + $0x458] sm:$0xff]  ;;  %v238_v44 = vld [vmem:[%s1522_s25 + $0x460] sm:$0xff] }
  0x1e   : > { %179 = vst [vmem:[%s1527_s26 + $0x70] sm:$0xff] %v178_v14  ;;  %v240_v45 = vld [vmem:[%s1522_s25 + $0x468] sm:$0xff]  ;;  %v242_v46 = vld [vmem:[%s1522_s25 + $0x470] sm:$0xff]  ;;  %v244_v47 = vld [vmem:[%s1522_s25 + $0x478] sm:$0xff] }
  0x1f   : > { %181 = vst [vmem:[%s1527_s26 + $0x78] sm:$0xff] %v180_v15  ;;  %v246_v48 = vld [vmem:[%s1522_s25 + $0x600] sm:$0xff]  ;;  %v248_v49 = vld [vmem:[%s1522_s25 + $0x608] sm:$0xff]  ;;  %v250_v50 = vld [vmem:[%s1522_s25 + $0x610] sm:$0xff] }
  0x20   : > { %183 = vst [vmem:[%s1527_s26 + $0x80] sm:$0xff] %v182_v16  ;;  %v252_v51 = vld [vmem:[%s1522_s25 + $0x618] sm:$0xff]  ;;  %v254_v52 = vld [vmem:[%s1522_s25 + $0x620] sm:$0xff]  ;;  %v256_v53 = vld [vmem:[%s1522_s25 + $0x628] sm:$0xff] }
  0x21   : > { %185 = vst [vmem:[%s1527_s26 + $0x88] sm:$0xff] %v184_v17  ;;  %v258_v54 = vld [vmem:[%s1522_s25 + $0x630] sm:$0xff]  ;;  %v260_v55 = vld [vmem:[%s1522_s25 + $0x638] sm:$0xff]  ;;  %v262_v56 = vld [vmem:[%s1522_s25 + $0x640] sm:$0xff] }
  0x22   : > { %187 = vst [vmem:[%s1527_s26 + $0x90] sm:$0xff] %v186_v18  ;;  %v264_v57 = vld [vmem:[%s1522_s25 + $0x648] sm:$0xff]  ;;  %v266_v58 = vld [vmem:[%s1522_s25 + $0x650] sm:$0xff]  ;;  %v268_v59 = vld [vmem:[%s1522_s25 + $0x658] sm:$0xff] }
  0x23   : > { %189 = vst [vmem:[%s1527_s26 + $0x98] sm:$0xff] %v188_v19  ;;  %v270_v60 = vld [vmem:[%s1522_s25 + $0x660] sm:$0xff]  ;;  %v272_v61 = vld [vmem:[%s1522_s25 + $0x668] sm:$0xff]  ;;  %v274_v62 = vld [vmem:[%s1522_s25 + $0x670] sm:$0xff] }
  0x24   : > { %191 = vst [vmem:[%s1527_s26 + $0xa0] sm:$0xff] %v190_v20  ;;  %v276_v63 = vld [vmem:[%s1522_s25 + $0x678] sm:$0xff]  ;;  %v278_v0 = vld [vmem:[%s1522_s25 + $0x800] sm:$0xff]  ;;  %v280_v1 = vld [vmem:[%s1522_s25 + $0x808] sm:$0xff] }
  0x25   : > { %193 = vst [vmem:[%s1527_s26 + $0xa8] sm:$0xff] %v192_v21  ;;  %v282_v2 = vld [vmem:[%s1522_s25 + $0x810] sm:$0xff]  ;;  %v284_v3 = vld [vmem:[%s1522_s25 + $0x818] sm:$0xff]  ;;  %v286_v4 = vld [vmem:[%s1522_s25 + $0x820] sm:$0xff] }
  0x26   : > { %195 = vst [vmem:[%s1527_s26 + $0xb0] sm:$0xff] %v194_v22  ;;  %v288_v5 = vld [vmem:[%s1522_s25 + $0x828] sm:$0xff]  ;;  %v290_v6 = vld [vmem:[%s1522_s25 + $0x830] sm:$0xff]  ;;  %v292_v7 = vld [vmem:[%s1522_s25 + $0x838] sm:$0xff] }
  0x27   : > { %197 = vst [vmem:[%s1527_s26 + $0xb8] sm:$0xff] %v196_v23  ;;  %v294_v8 = vld [vmem:[%s1522_s25 + $0x840] sm:$0xff]  ;;  %v296_v9 = vld [vmem:[%s1522_s25 + $0x848] sm:$0xff]  ;;  %v298_v10 = vld [vmem:[%s1522_s25 + $0x850] sm:$0xff] }
  0x28   : > { %199 = vst [vmem:[%s1527_s26 + $0xc0] sm:$0xff] %v198_v24  ;;  %v300_v11 = vld [vmem:[%s1522_s25 + $0x858] sm:$0xff]  ;;  %v302_v12 = vld [vmem:[%s1522_s25 + $0x860] sm:$0xff]  ;;  %v304_v13 = vld [vmem:[%s1522_s25 + $0x868] sm:$0xff] }
  0x29   : > { %201 = vst [vmem:[%s1527_s26 + $0xc8] sm:$0xff] %v200_v25  ;;  %v306_v14 = vld [vmem:[%s1522_s25 + $0x870] sm:$0xff]  ;;  %v308_v15 = vld [vmem:[%s1522_s25 + $0x878] sm:$0xff]  ;;  %v310_v16 = vld [vmem:[%s1522_s25 + $0xa00] sm:$0xff] }
  0x2a   : > { %203 = vst [vmem:[%s1527_s26 + $0xd0] sm:$0xff] %v202_v26  ;;  %v312_v17 = vld [vmem:[%s1522_s25 + $0xa08] sm:$0xff]  ;;  %v314_v18 = vld [vmem:[%s1522_s25 + $0xa10] sm:$0xff]  ;;  %v316_v19 = vld [vmem:[%s1522_s25 + $0xa18] sm:$0xff] }
  0x2b   : > { %205 = vst [vmem:[%s1527_s26 + $0xd8] sm:$0xff] %v204_v27  ;;  %v318_v20 = vld [vmem:[%s1522_s25 + $0xa20] sm:$0xff]  ;;  %v320_v21 = vld [vmem:[%s1522_s25 + $0xa28] sm:$0xff]  ;;  %v322_v22 = vld [vmem:[%s1522_s25 + $0xa30] sm:$0xff] }
  0x2c   : > { %207 = vst [vmem:[%s1527_s26 + $0xe0] sm:$0xff] %v206_v28  ;;  %v324_v23 = vld [vmem:[%s1522_s25 + $0xa38] sm:$0xff]  ;;  %v326_v24 = vld [vmem:[%s1522_s25 + $0xa40] sm:$0xff]  ;;  %v328_v25 = vld [vmem:[%s1522_s25 + $0xa48] sm:$0xff] }
  0x2d   : > { %209 = vst [vmem:[%s1527_s26 + $0xe8] sm:$0xff] %v208_v29  ;;  %v330_v26 = vld [vmem:[%s1522_s25 + $0xa50] sm:$0xff]  ;;  %v332_v27 = vld [vmem:[%s1522_s25 + $0xa58] sm:$0xff]  ;;  %v334_v28 = vld [vmem:[%s1522_s25 + $0xa60] sm:$0xff] }
  0x2e   : > { %211 = vst [vmem:[%s1527_s26 + $0xf0] sm:$0xff] %v210_v30  ;;  %v336_v29 = vld [vmem:[%s1522_s25 + $0xa68] sm:$0xff]  ;;  %v338_v30 = vld [vmem:[%s1522_s25 + $0xa70] sm:$0xff] }
  0x2f   : > { %213 = vst [vmem:[%s1527_s26 + $0xf8] sm:$0xff] %v212_v31  ;;  %v340_v31 = vld [vmem:[%s1522_s25 + $0xa78] sm:$0xff] }
  0x30   : > { %215 = vst [vmem:[%s1527_s26 + $0x100] sm:$0xff] %v214_v32  ;;  %v342_v32 = vld [vmem:[%s1522_s25 + $0xc00] sm:$0xff] }
  0x31   : > { %217 = vst [vmem:[%s1527_s26 + $0x108] sm:$0xff] %v216_v33  ;;  %v344_v33 = vld [vmem:[%s1522_s25 + $0xc08] sm:$0xff] }
  0x32   : > { %219 = vst [vmem:[%s1527_s26 + $0x110] sm:$0xff] %v218_v34  ;;  %v346_v34 = vld [vmem:[%s1522_s25 + $0xc10] sm:$0xff] }
  0x33   : > { %221 = vst [vmem:[%s1527_s26 + $0x118] sm:$0xff] %v220_v35  ;;  %v348_v35 = vld [vmem:[%s1522_s25 + $0xc18] sm:$0xff] }
  0x34   : > { %223 = vst [vmem:[%s1527_s26 + $0x120] sm:$0xff] %v222_v36  ;;  %v350_v36 = vld [vmem:[%s1522_s25 + $0xc20] sm:$0xff] }
  0x35   : > { %225 = vst [vmem:[%s1527_s26 + $0x128] sm:$0xff] %v224_v37  ;;  %v352_v37 = vld [vmem:[%s1522_s25 + $0xc28] sm:$0xff] }
  0x36   : > { %227 = vst [vmem:[%s1527_s26 + $0x130] sm:$0xff] %v226_v38  ;;  %v354_v38 = vld [vmem:[%s1522_s25 + $0xc30] sm:$0xff] }
  0x37   : > { %229 = vst [vmem:[%s1527_s26 + $0x138] sm:$0xff] %v228_v39  ;;  %v356_v39 = vld [vmem:[%s1522_s25 + $0xc38] sm:$0xff] }
  0x38   : > { %231 = vst [vmem:[%s1527_s26 + $0x140] sm:$0xff] %v230_v40  ;;  %v358_v40 = vld [vmem:[%s1522_s25 + $0xc40] sm:$0xff] }
  0x39   : > { %233 = vst [vmem:[%s1527_s26 + $0x148] sm:$0xff] %v232_v41  ;;  %v360_v41 = vld [vmem:[%s1522_s25 + $0xc48] sm:$0xff] }
  0x3a   : > { %235 = vst [vmem:[%s1527_s26 + $0x150] sm:$0xff] %v234_v42  ;;  %v362_v42 = vld [vmem:[%s1522_s25 + $0xc50] sm:$0xff] }
  0x3b   : > { %237 = vst [vmem:[%s1527_s26 + $0x158] sm:$0xff] %v236_v43  ;;  %v364_v43 = vld [vmem:[%s1522_s25 + $0xc58] sm:$0xff] }
  0x3c   : > { %239 = vst [vmem:[%s1527_s26 + $0x160] sm:$0xff] %v238_v44  ;;  %v366_v44 = vld [vmem:[%s1522_s25 + $0xc60] sm:$0xff] }
  0x3d   : > { %241 = vst [vmem:[%s1527_s26 + $0x168] sm:$0xff] %v240_v45  ;;  %v368_v45 = vld [vmem:[%s1522_s25 + $0xc68] sm:$0xff] }
  0x3e   : > { %243 = vst [vmem:[%s1527_s26 + $0x170] sm:$0xff] %v242_v46  ;;  %v370_v46 = vld [vmem:[%s1522_s25 + $0xc70] sm:$0xff] }
  0x3f   : > { %245 = vst [vmem:[%s1527_s26 + $0x178] sm:$0xff] %v244_v47  ;;  %v372_v47 = vld [vmem:[%s1522_s25 + $0xc78] sm:$0xff] }
  0x40   : > { %247 = vst [vmem:[%s1527_s26 + $0x180] sm:$0xff] %v246_v48  ;;  %v374_v48 = vld [vmem:[%s1522_s25 + $0xe00] sm:$0xff] }
  0x41   : > { %249 = vst [vmem:[%s1527_s26 + $0x188] sm:$0xff] %v248_v49  ;;  %v376_v49 = vld [vmem:[%s1522_s25 + $0xe08] sm:$0xff] }
  0x42   : > { %251 = vst [vmem:[%s1527_s26 + $0x190] sm:$0xff] %v250_v50  ;;  %v378_v50 = vld [vmem:[%s1522_s25 + $0xe10] sm:$0xff] }
  0x43   : > { %253 = vst [vmem:[%s1527_s26 + $0x198] sm:$0xff] %v252_v51  ;;  %v380_v51 = vld [vmem:[%s1522_s25 + $0xe18] sm:$0xff] }
  0x44   : > { %255 = vst [vmem:[%s1527_s26 + $0x1a0] sm:$0xff] %v254_v52  ;;  %v382_v52 = vld [vmem:[%s1522_s25 + $0xe20] sm:$0xff] }
  0x45   : > { %257 = vst [vmem:[%s1527_s26 + $0x1a8] sm:$0xff] %v256_v53  ;;  %v384_v53 = vld [vmem:[%s1522_s25 + $0xe28] sm:$0xff] }
  0x46   : > { %259 = vst [vmem:[%s1527_s26 + $0x1b0] sm:$0xff] %v258_v54  ;;  %v386_v54 = vld [vmem:[%s1522_s25 + $0xe30] sm:$0xff] }
  0x47   : > { %261 = vst [vmem:[%s1527_s26 + $0x1b8] sm:$0xff] %v260_v55  ;;  %v388_v55 = vld [vmem:[%s1522_s25 + $0xe38] sm:$0xff] }
  0x48   : > { %263 = vst [vmem:[%s1527_s26 + $0x1c0] sm:$0xff] %v262_v56  ;;  %v390_v56 = vld [vmem:[%s1522_s25 + $0xe40] sm:$0xff] }
  0x49   : > { %265 = vst [vmem:[%s1527_s26 + $0x1c8] sm:$0xff] %v264_v57  ;;  %v392_v57 = vld [vmem:[%s1522_s25 + $0xe48] sm:$0xff] }
  0x4a   : > { %267 = vst [vmem:[%s1527_s26 + $0x1d0] sm:$0xff] %v266_v58  ;;  %v394_v58 = vld [vmem:[%s1522_s25 + $0xe50] sm:$0xff] }
  0x4b   : > { %269 = vst [vmem:[%s1527_s26 + $0x1d8] sm:$0xff] %v268_v59  ;;  %v396_v59 = vld [vmem:[%s1522_s25 + $0xe58] sm:$0xff] }
  0x4c   : > { %271 = vst [vmem:[%s1527_s26 + $0x1e0] sm:$0xff] %v270_v60  ;;  %v398_v60 = vld [vmem:[%s1522_s25 + $0xe60] sm:$0xff] }
  0x4d   : > { %273 = vst [vmem:[%s1527_s26 + $0x1e8] sm:$0xff] %v272_v61  ;;  %v400_v61 = vld [vmem:[%s1522_s25 + $0xe68] sm:$0xff] }
  0x4e   : > { %275 = vst [vmem:[%s1527_s26 + $0x1f0] sm:$0xff] %v274_v62  ;;  %v402_v62 = vld [vmem:[%s1522_s25 + $0xe70] sm:$0xff] }
  0x4f   : > { %277 = vst [vmem:[%s1527_s26 + $0x1f8] sm:$0xff] %v276_v63  ;;  %v404_v63 = vld [vmem:[%s1522_s25 + $0xe78] sm:$0xff] }
  0x50   : > { %279 = vst [vmem:[%s1527_s26 + $0x200] sm:$0xff] %v278_v0  ;;  %v406_v0 = vld [vmem:[%s1522_s25 + $0x1000] sm:$0xff] }
  0x51   : > { %281 = vst [vmem:[%s1527_s26 + $0x208] sm:$0xff] %v280_v1  ;;  %v408_v1 = vld [vmem:[%s1522_s25 + $0x1008] sm:$0xff] }
  0x52   : > { %283 = vst [vmem:[%s1527_s26 + $0x210] sm:$0xff] %v282_v2  ;;  %v410_v2 = vld [vmem:[%s1522_s25 + $0x1010] sm:$0xff] }
  0x53   : > { %285 = vst [vmem:[%s1527_s26 + $0x218] sm:$0xff] %v284_v3  ;;  %v412_v3 = vld [vmem:[%s1522_s25 + $0x1018] sm:$0xff] }
  0x54   : > { %287 = vst [vmem:[%s1527_s26 + $0x220] sm:$0xff] %v286_v4  ;;  %v414_v4 = vld [vmem:[%s1522_s25 + $0x1020] sm:$0xff] }
  0x55   : > { %289 = vst [vmem:[%s1527_s26 + $0x228] sm:$0xff] %v288_v5  ;;  %v416_v5 = vld [vmem:[%s1522_s25 + $0x1028] sm:$0xff] }
  0x56   : > { %291 = vst [vmem:[%s1527_s26 + $0x230] sm:$0xff] %v290_v6  ;;  %v418_v6 = vld [vmem:[%s1522_s25 + $0x1030] sm:$0xff] }
  0x57   : > { %293 = vst [vmem:[%s1527_s26 + $0x238] sm:$0xff] %v292_v7  ;;  %v420_v7 = vld [vmem:[%s1522_s25 + $0x1038] sm:$0xff] }
  0x58   : > { %295 = vst [vmem:[%s1527_s26 + $0x240] sm:$0xff] %v294_v8  ;;  %v422_v8 = vld [vmem:[%s1522_s25 + $0x1040] sm:$0xff] }
  0x59   : > { %297 = vst [vmem:[%s1527_s26 + $0x248] sm:$0xff] %v296_v9  ;;  %v424_v9 = vld [vmem:[%s1522_s25 + $0x1048] sm:$0xff] }
  0x5a   : > { %299 = vst [vmem:[%s1527_s26 + $0x250] sm:$0xff] %v298_v10  ;;  %v426_v10 = vld [vmem:[%s1522_s25 + $0x1050] sm:$0xff] }
  0x5b   : > { %301 = vst [vmem:[%s1527_s26 + $0x258] sm:$0xff] %v300_v11  ;;  %v428_v11 = vld [vmem:[%s1522_s25 + $0x1058] sm:$0xff] }
  0x5c   : > { %303 = vst [vmem:[%s1527_s26 + $0x260] sm:$0xff] %v302_v12  ;;  %v430_v12 = vld [vmem:[%s1522_s25 + $0x1060] sm:$0xff] }
  0x5d   : > { %305 = vst [vmem:[%s1527_s26 + $0x268] sm:$0xff] %v304_v13  ;;  %v432_v13 = vld [vmem:[%s1522_s25 + $0x1068] sm:$0xff] }
  0x5e   : > { %307 = vst [vmem:[%s1527_s26 + $0x270] sm:$0xff] %v306_v14  ;;  %v434_v14 = vld [vmem:[%s1522_s25 + $0x1070] sm:$0xff] }
  0x5f   : > { %309 = vst [vmem:[%s1527_s26 + $0x278] sm:$0xff] %v308_v15  ;;  %v436_v15 = vld [vmem:[%s1522_s25 + $0x1078] sm:$0xff] }
  0x60   : > { %311 = vst [vmem:[%s1527_s26 + $0x280] sm:$0xff] %v310_v16  ;;  %v438_v16 = vld [vmem:[%s1522_s25 + $0x1200] sm:$0xff] }
  0x61   : > { %313 = vst [vmem:[%s1527_s26 + $0x288] sm:$0xff] %v312_v17  ;;  %v440_v17 = vld [vmem:[%s1522_s25 + $0x1208] sm:$0xff] }
  0x62   : > { %315 = vst [vmem:[%s1527_s26 + $0x290] sm:$0xff] %v314_v18  ;;  %v442_v18 = vld [vmem:[%s1522_s25 + $0x1210] sm:$0xff] }
  0x63   : > { %317 = vst [vmem:[%s1527_s26 + $0x298] sm:$0xff] %v316_v19  ;;  %v444_v19 = vld [vmem:[%s1522_s25 + $0x1218] sm:$0xff] }
  0x64   : > { %319 = vst [vmem:[%s1527_s26 + $0x2a0] sm:$0xff] %v318_v20  ;;  %v446_v20 = vld [vmem:[%s1522_s25 + $0x1220] sm:$0xff] }
  0x65   : > { %321 = vst [vmem:[%s1527_s26 + $0x2a8] sm:$0xff] %v320_v21  ;;  %v448_v21 = vld [vmem:[%s1522_s25 + $0x1228] sm:$0xff] }
  0x66   : > { %323 = vst [vmem:[%s1527_s26 + $0x2b0] sm:$0xff] %v322_v22  ;;  %v450_v22 = vld [vmem:[%s1522_s25 + $0x1230] sm:$0xff] }
  0x67   : > { %325 = vst [vmem:[%s1527_s26 + $0x2b8] sm:$0xff] %v324_v23  ;;  %v452_v23 = vld [vmem:[%s1522_s25 + $0x1238] sm:$0xff] }
  0x68   : > { %327 = vst [vmem:[%s1527_s26 + $0x2c0] sm:$0xff] %v326_v24  ;;  %v454_v24 = vld [vmem:[%s1522_s25 + $0x1240] sm:$0xff] }
  0x69   : > { %329 = vst [vmem:[%s1527_s26 + $0x2c8] sm:$0xff] %v328_v25  ;;  %v456_v25 = vld [vmem:[%s1522_s25 + $0x1248] sm:$0xff] }
  0x6a   : > { %331 = vst [vmem:[%s1527_s26 + $0x2d0] sm:$0xff] %v330_v26  ;;  %v458_v26 = vld [vmem:[%s1522_s25 + $0x1250] sm:$0xff] }
  0x6b   : > { %333 = vst [vmem:[%s1527_s26 + $0x2d8] sm:$0xff] %v332_v27  ;;  %v460_v27 = vld [vmem:[%s1522_s25 + $0x1258] sm:$0xff] }
  0x6c   : > { %335 = vst [vmem:[%s1527_s26 + $0x2e0] sm:$0xff] %v334_v28  ;;  %v462_v28 = vld [vmem:[%s1522_s25 + $0x1260] sm:$0xff] }
  0x6d   : > { %337 = vst [vmem:[%s1527_s26 + $0x2e8] sm:$0xff] %v336_v29  ;;  %v464_v29 = vld [vmem:[%s1522_s25 + $0x1268] sm:$0xff] }
  0x6e   : > { %339 = vst [vmem:[%s1527_s26 + $0x2f0] sm:$0xff] %v338_v30  ;;  %v466_v30 = vld [vmem:[%s1522_s25 + $0x1270] sm:$0xff] }
  0x6f   : > { %341 = vst [vmem:[%s1527_s26 + $0x2f8] sm:$0xff] %v340_v31  ;;  %v468_v31 = vld [vmem:[%s1522_s25 + $0x1278] sm:$0xff] }
  0x70   : > { %343 = vst [vmem:[%s1527_s26 + $0x300] sm:$0xff] %v342_v32  ;;  %v470_v32 = vld [vmem:[%s1522_s25 + $0x1400] sm:$0xff] }
  0x71   : > { %345 = vst [vmem:[%s1527_s26 + $0x308] sm:$0xff] %v344_v33  ;;  %v472_v33 = vld [vmem:[%s1522_s25 + $0x1408] sm:$0xff] }
  0x72   : > { %347 = vst [vmem:[%s1527_s26 + $0x310] sm:$0xff] %v346_v34  ;;  %v474_v34 = vld [vmem:[%s1522_s25 + $0x1410] sm:$0xff] }
  0x73   : > { %349 = vst [vmem:[%s1527_s26 + $0x318] sm:$0xff] %v348_v35  ;;  %v476_v35 = vld [vmem:[%s1522_s25 + $0x1418] sm:$0xff] }
  0x74   : > { %351 = vst [vmem:[%s1527_s26 + $0x320] sm:$0xff] %v350_v36  ;;  %v478_v36 = vld [vmem:[%s1522_s25 + $0x1420] sm:$0xff] }
  0x75   : > { %353 = vst [vmem:[%s1527_s26 + $0x328] sm:$0xff] %v352_v37  ;;  %v480_v37 = vld [vmem:[%s1522_s25 + $0x1428] sm:$0xff] }
  0x76   : > { %355 = vst [vmem:[%s1527_s26 + $0x330] sm:$0xff] %v354_v38  ;;  %v482_v38 = vld [vmem:[%s1522_s25 + $0x1430] sm:$0xff] }
  0x77   : > { %357 = vst [vmem:[%s1527_s26 + $0x338] sm:$0xff] %v356_v39  ;;  %v484_v39 = vld [vmem:[%s1522_s25 + $0x1438] sm:$0xff] }
  0x78   : > { %359 = vst [vmem:[%s1527_s26 + $0x340] sm:$0xff] %v358_v40  ;;  %v486_v40 = vld [vmem:[%s1522_s25 + $0x1440] sm:$0xff] }
  0x79   : > { %361 = vst [vmem:[%s1527_s26 + $0x348] sm:$0xff] %v360_v41  ;;  %v488_v41 = vld [vmem:[%s1522_s25 + $0x1448] sm:$0xff] }
  0x7a   : > { %363 = vst [vmem:[%s1527_s26 + $0x350] sm:$0xff] %v362_v42  ;;  %v490_v42 = vld [vmem:[%s1522_s25 + $0x1450] sm:$0xff] }
  0x7b   : > { %365 = vst [vmem:[%s1527_s26 + $0x358] sm:$0xff] %v364_v43  ;;  %v492_v43 = vld [vmem:[%s1522_s25 + $0x1458] sm:$0xff] }
  0x7c   : > { %367 = vst [vmem:[%s1527_s26 + $0x360] sm:$0xff] %v366_v44  ;;  %v494_v44 = vld [vmem:[%s1522_s25 + $0x1460] sm:$0xff] }
  0x7d   : > { %369 = vst [vmem:[%s1527_s26 + $0x368] sm:$0xff] %v368_v45  ;;  %v496_v45 = vld [vmem:[%s1522_s25 + $0x1468] sm:$0xff] }
  0x7e   : > { %371 = vst [vmem:[%s1527_s26 + $0x370] sm:$0xff] %v370_v46  ;;  %v498_v46 = vld [vmem:[%s1522_s25 + $0x1470] sm:$0xff] }
  0x7f   : > { %373 = vst [vmem:[%s1527_s26 + $0x378] sm:$0xff] %v372_v47  ;;  %v500_v47 = vld [vmem:[%s1522_s25 + $0x1478] sm:$0xff] }
  0x80   : > { %375 = vst [vmem:[%s1527_s26 + $0x380] sm:$0xff] %v374_v48  ;;  %v502_v48 = vld [vmem:[%s1522_s25 + $0x1600] sm:$0xff] }
  0x81   : > { %377 = vst [vmem:[%s1527_s26 + $0x388] sm:$0xff] %v376_v49  ;;  %v504_v49 = vld [vmem:[%s1522_s25 + $0x1608] sm:$0xff] }
  0x82   : > { %379 = vst [vmem:[%s1527_s26 + $0x390] sm:$0xff] %v378_v50  ;;  %v506_v50 = vld [vmem:[%s1522_s25 + $0x1610] sm:$0xff] }
  0x83   : > { %381 = vst [vmem:[%s1527_s26 + $0x398] sm:$0xff] %v380_v51  ;;  %v508_v51 = vld [vmem:[%s1522_s25 + $0x1618] sm:$0xff] }
  0x84   : > { %383 = vst [vmem:[%s1527_s26 + $0x3a0] sm:$0xff] %v382_v52  ;;  %v510_v52 = vld [vmem:[%s1522_s25 + $0x1620] sm:$0xff] }
  0x85   : > { %385 = vst [vmem:[%s1527_s26 + $0x3a8] sm:$0xff] %v384_v53  ;;  %v512_v53 = vld [vmem:[%s1522_s25 + $0x1628] sm:$0xff] }
  0x86   : > { %387 = vst [vmem:[%s1527_s26 + $0x3b0] sm:$0xff] %v386_v54  ;;  %v514_v54 = vld [vmem:[%s1522_s25 + $0x1630] sm:$0xff] }
  0x87   : > { %389 = vst [vmem:[%s1527_s26 + $0x3b8] sm:$0xff] %v388_v55  ;;  %v516_v55 = vld [vmem:[%s1522_s25 + $0x1638] sm:$0xff] }
  0x88   : > { %391 = vst [vmem:[%s1527_s26 + $0x3c0] sm:$0xff] %v390_v56  ;;  %v518_v56 = vld [vmem:[%s1522_s25 + $0x1640] sm:$0xff] }
  0x89   : > { %393 = vst [vmem:[%s1527_s26 + $0x3c8] sm:$0xff] %v392_v57  ;;  %v520_v57 = vld [vmem:[%s1522_s25 + $0x1648] sm:$0xff] }
  0x8a   : > { %395 = vst [vmem:[%s1527_s26 + $0x3d0] sm:$0xff] %v394_v58  ;;  %v522_v58 = vld [vmem:[%s1522_s25 + $0x1650] sm:$0xff] }
  0x8b   : > { %397 = vst [vmem:[%s1527_s26 + $0x3d8] sm:$0xff] %v396_v59  ;;  %v524_v59 = vld [vmem:[%s1522_s25 + $0x1658] sm:$0xff] }
  0x8c   : > { %399 = vst [vmem:[%s1527_s26 + $0x3e0] sm:$0xff] %v398_v60  ;;  %v526_v60 = vld [vmem:[%s1522_s25 + $0x1660] sm:$0xff] }
  0x8d   : > { %401 = vst [vmem:[%s1527_s26 + $0x3e8] sm:$0xff] %v400_v61  ;;  %v528_v61 = vld [vmem:[%s1522_s25 + $0x1668] sm:$0xff] }
  0x8e   : > { %403 = vst [vmem:[%s1527_s26 + $0x3f0] sm:$0xff] %v402_v62  ;;  %v530_v62 = vld [vmem:[%s1522_s25 + $0x1670] sm:$0xff] }
  0x8f   : > { %405 = vst [vmem:[%s1527_s26 + $0x3f8] sm:$0xff] %v404_v63  ;;  %v532_v63 = vld [vmem:[%s1522_s25 + $0x1678] sm:$0xff] }
  0x90   : > { %407 = vst [vmem:[%s1527_s26 + $0x400] sm:$0xff] %v406_v0  ;;  %v534_v0 = vld [vmem:[%s1522_s25 + $0x1800] sm:$0xff] }
  0x91   : > { %409 = vst [vmem:[%s1527_s26 + $0x408] sm:$0xff] %v408_v1  ;;  %v536_v1 = vld [vmem:[%s1522_s25 + $0x1808] sm:$0xff] }
  0x92   : > { %411 = vst [vmem:[%s1527_s26 + $0x410] sm:$0xff] %v410_v2  ;;  %v538_v2 = vld [vmem:[%s1522_s25 + $0x1810] sm:$0xff] }
  0x93   : > { %413 = vst [vmem:[%s1527_s26 + $0x418] sm:$0xff] %v412_v3  ;;  %v540_v3 = vld [vmem:[%s1522_s25 + $0x1818] sm:$0xff] }
  0x94   : > { %415 = vst [vmem:[%s1527_s26 + $0x420] sm:$0xff] %v414_v4  ;;  %v542_v4 = vld [vmem:[%s1522_s25 + $0x1820] sm:$0xff] }
  0x95   : > { %417 = vst [vmem:[%s1527_s26 + $0x428] sm:$0xff] %v416_v5  ;;  %v544_v5 = vld [vmem:[%s1522_s25 + $0x1828] sm:$0xff] }
  0x96   : > { %419 = vst [vmem:[%s1527_s26 + $0x430] sm:$0xff] %v418_v6  ;;  %v546_v6 = vld [vmem:[%s1522_s25 + $0x1830] sm:$0xff] }
  0x97   : > { %421 = vst [vmem:[%s1527_s26 + $0x438] sm:$0xff] %v420_v7  ;;  %v548_v7 = vld [vmem:[%s1522_s25 + $0x1838] sm:$0xff] }
  0x98   : > { %423 = vst [vmem:[%s1527_s26 + $0x440] sm:$0xff] %v422_v8  ;;  %v550_v8 = vld [vmem:[%s1522_s25 + $0x1840] sm:$0xff] }
  0x99   : > { %425 = vst [vmem:[%s1527_s26 + $0x448] sm:$0xff] %v424_v9  ;;  %v552_v9 = vld [vmem:[%s1522_s25 + $0x1848] sm:$0xff] }
  0x9a   : > { %427 = vst [vmem:[%s1527_s26 + $0x450] sm:$0xff] %v426_v10  ;;  %v554_v10 = vld [vmem:[%s1522_s25 + $0x1850] sm:$0xff] }
  0x9b   : > { %429 = vst [vmem:[%s1527_s26 + $0x458] sm:$0xff] %v428_v11  ;;  %v556_v11 = vld [vmem:[%s1522_s25 + $0x1858] sm:$0xff] }
  0x9c   : > { %431 = vst [vmem:[%s1527_s26 + $0x460] sm:$0xff] %v430_v12  ;;  %v558_v12 = vld [vmem:[%s1522_s25 + $0x1860] sm:$0xff] }
  0x9d   : > { %433 = vst [vmem:[%s1527_s26 + $0x468] sm:$0xff] %v432_v13  ;;  %v560_v13 = vld [vmem:[%s1522_s25 + $0x1868] sm:$0xff] }
  0x9e   : > { %435 = vst [vmem:[%s1527_s26 + $0x470] sm:$0xff] %v434_v14  ;;  %v562_v14 = vld [vmem:[%s1522_s25 + $0x1870] sm:$0xff] }
  0x9f   : > { %437 = vst [vmem:[%s1527_s26 + $0x478] sm:$0xff] %v436_v15  ;;  %v564_v15 = vld [vmem:[%s1522_s25 + $0x1878] sm:$0xff] }
  0xa0   : > { %439 = vst [vmem:[%s1527_s26 + $0x480] sm:$0xff] %v438_v16  ;;  %v566_v16 = vld [vmem:[%s1522_s25 + $0x1a00] sm:$0xff] }
  0xa1   : > { %441 = vst [vmem:[%s1527_s26 + $0x488] sm:$0xff] %v440_v17  ;;  %v568_v17 = vld [vmem:[%s1522_s25 + $0x1a08] sm:$0xff] }
  0xa2   : > { %443 = vst [vmem:[%s1527_s26 + $0x490] sm:$0xff] %v442_v18  ;;  %v570_v18 = vld [vmem:[%s1522_s25 + $0x1a10] sm:$0xff] }
  0xa3   : > { %445 = vst [vmem:[%s1527_s26 + $0x498] sm:$0xff] %v444_v19  ;;  %v572_v19 = vld [vmem:[%s1522_s25 + $0x1a18] sm:$0xff] }
  0xa4   : > { %447 = vst [vmem:[%s1527_s26 + $0x4a0] sm:$0xff] %v446_v20  ;;  %v574_v20 = vld [vmem:[%s1522_s25 + $0x1a20] sm:$0xff] }
  0xa5   : > { %449 = vst [vmem:[%s1527_s26 + $0x4a8] sm:$0xff] %v448_v21  ;;  %v576_v21 = vld [vmem:[%s1522_s25 + $0x1a28] sm:$0xff] }
  0xa6   : > { %451 = vst [vmem:[%s1527_s26 + $0x4b0] sm:$0xff] %v450_v22  ;;  %v578_v22 = vld [vmem:[%s1522_s25 + $0x1a30] sm:$0xff] }
  0xa7   : > { %453 = vst [vmem:[%s1527_s26 + $0x4b8] sm:$0xff] %v452_v23  ;;  %v580_v23 = vld [vmem:[%s1522_s25 + $0x1a38] sm:$0xff] }
  0xa8   : > { %455 = vst [vmem:[%s1527_s26 + $0x4c0] sm:$0xff] %v454_v24  ;;  %v582_v24 = vld [vmem:[%s1522_s25 + $0x1a40] sm:$0xff] }
  0xa9   : > { %457 = vst [vmem:[%s1527_s26 + $0x4c8] sm:$0xff] %v456_v25  ;;  %v584_v25 = vld [vmem:[%s1522_s25 + $0x1a48] sm:$0xff] }
  0xaa   : > { %459 = vst [vmem:[%s1527_s26 + $0x4d0] sm:$0xff] %v458_v26  ;;  %v586_v26 = vld [vmem:[%s1522_s25 + $0x1a50] sm:$0xff] }
  0xab   : > { %461 = vst [vmem:[%s1527_s26 + $0x4d8] sm:$0xff] %v460_v27  ;;  %v588_v27 = vld [vmem:[%s1522_s25 + $0x1a58] sm:$0xff] }
  0xac   : > { %463 = vst [vmem:[%s1527_s26 + $0x4e0] sm:$0xff] %v462_v28  ;;  %v590_v28 = vld [vmem:[%s1522_s25 + $0x1a60] sm:$0xff] }
  0xad   : > { %465 = vst [vmem:[%s1527_s26 + $0x4e8] sm:$0xff] %v464_v29  ;;  %v592_v29 = vld [vmem:[%s1522_s25 + $0x1a68] sm:$0xff] }
  0xae   : > { %467 = vst [vmem:[%s1527_s26 + $0x4f0] sm:$0xff] %v466_v30  ;;  %v594_v30 = vld [vmem:[%s1522_s25 + $0x1a70] sm:$0xff] }
  0xaf   : > { %469 = vst [vmem:[%s1527_s26 + $0x4f8] sm:$0xff] %v468_v31  ;;  %v596_v31 = vld [vmem:[%s1522_s25 + $0x1a78] sm:$0xff] }
  0xb0   : > { %471 = vst [vmem:[%s1527_s26 + $0x500] sm:$0xff] %v470_v32 }
  0xb1   : > { %473 = vst [vmem:[%s1527_s26 + $0x508] sm:$0xff] %v472_v33 }
  0xb2   : > { %475 = vst [vmem:[%s1527_s26 + $0x510] sm:$0xff] %v474_v34 }
  0xb3   : > { %477 = vst [vmem:[%s1527_s26 + $0x518] sm:$0xff] %v476_v35 }
  0xb4   : > { %479 = vst [vmem:[%s1527_s26 + $0x520] sm:$0xff] %v478_v36 }
  0xb5   : > { %481 = vst [vmem:[%s1527_s26 + $0x528] sm:$0xff] %v480_v37 }
  0xb6   : > { %483 = vst [vmem:[%s1527_s26 + $0x530] sm:$0xff] %v482_v38 }
  0xb7   : > { %485 = vst [vmem:[%s1527_s26 + $0x538] sm:$0xff] %v484_v39 }
  0xb8   : > { %487 = vst [vmem:[%s1527_s26 + $0x540] sm:$0xff] %v486_v40 }
  0xb9   : > { %489 = vst [vmem:[%s1527_s26 + $0x548] sm:$0xff] %v488_v41 }
  0xba   : > { %491 = vst [vmem:[%s1527_s26 + $0x550] sm:$0xff] %v490_v42 }
  0xbb   : > { %493 = vst [vmem:[%s1527_s26 + $0x558] sm:$0xff] %v492_v43 }
  0xbc   : > { %495 = vst [vmem:[%s1527_s26 + $0x560] sm:$0xff] %v494_v44 }
  0xbd   : > { %497 = vst [vmem:[%s1527_s26 + $0x568] sm:$0xff] %v496_v45 }
  0xbe   : > { %499 = vst [vmem:[%s1527_s26 + $0x570] sm:$0xff] %v498_v46 }
  0xbf   : > { %501 = vst [vmem:[%s1527_s26 + $0x578] sm:$0xff] %v500_v47 }
  0xc0   : > { %503 = vst [vmem:[%s1527_s26 + $0x580] sm:$0xff] %v502_v48 }
  0xc1   : > { %505 = vst [vmem:[%s1527_s26 + $0x588] sm:$0xff] %v504_v49 }
  0xc2   : > { %507 = vst [vmem:[%s1527_s26 + $0x590] sm:$0xff] %v506_v50 }
  0xc3   : > { %509 = vst [vmem:[%s1527_s26 + $0x598] sm:$0xff] %v508_v51 }
  0xc4   : > { %511 = vst [vmem:[%s1527_s26 + $0x5a0] sm:$0xff] %v510_v52 }
  0xc5   : > { %513 = vst [vmem:[%s1527_s26 + $0x5a8] sm:$0xff] %v512_v53 }
  0xc6   : > { %515 = vst [vmem:[%s1527_s26 + $0x5b0] sm:$0xff] %v514_v54 }
  0xc7   : > { %517 = vst [vmem:[%s1527_s26 + $0x5b8] sm:$0xff] %v516_v55 }
  0xc8   : > { %519 = vst [vmem:[%s1527_s26 + $0x5c0] sm:$0xff] %v518_v56 }
  0xc9   : > { %521 = vst [vmem:[%s1527_s26 + $0x5c8] sm:$0xff] %v520_v57 }
  0xca   : > { %523 = vst [vmem:[%s1527_s26 + $0x5d0] sm:$0xff] %v522_v58 }
  0xcb   : > { %525 = vst [vmem:[%s1527_s26 + $0x5d8] sm:$0xff] %v524_v59 }
  0xcc   : > { %527 = vst [vmem:[%s1527_s26 + $0x5e0] sm:$0xff] %v526_v60 }
  0xcd   : > { %529 = vst [vmem:[%s1527_s26 + $0x5e8] sm:$0xff] %v528_v61 }
  0xce   : > { %531 = vst [vmem:[%s1527_s26 + $0x5f0] sm:$0xff] %v530_v62 }
  0xcf   : > { %533 = vst [vmem:[%s1527_s26 + $0x5f8] sm:$0xff] %v532_v63 }
  0xd0   : > { %535 = vst [vmem:[%s1527_s26 + $0x600] sm:$0xff] %v534_v0 }
  0xd1   : > { %537 = vst [vmem:[%s1527_s26 + $0x608] sm:$0xff] %v536_v1 }
  0xd2   : > { %539 = vst [vmem:[%s1527_s26 + $0x610] sm:$0xff] %v538_v2 }
  0xd3   : > { %541 = vst [vmem:[%s1527_s26 + $0x618] sm:$0xff] %v540_v3 }
  0xd4   : > { %543 = vst [vmem:[%s1527_s26 + $0x620] sm:$0xff] %v542_v4 }
  0xd5   : > { %545 = vst [vmem:[%s1527_s26 + $0x628] sm:$0xff] %v544_v5 }
  0xd6   : > { %547 = vst [vmem:[%s1527_s26 + $0x630] sm:$0xff] %v546_v6 }
  0xd7   : > { %549 = vst [vmem:[%s1527_s26 + $0x638] sm:$0xff] %v548_v7 }
  0xd8   : > { %551 = vst [vmem:[%s1527_s26 + $0x640] sm:$0xff] %v550_v8 }
  0xd9   : > { %553 = vst [vmem:[%s1527_s26 + $0x648] sm:$0xff] %v552_v9 }
  0xda   : > { %555 = vst [vmem:[%s1527_s26 + $0x650] sm:$0xff] %v554_v10 }
  0xdb   : > { %557 = vst [vmem:[%s1527_s26 + $0x658] sm:$0xff] %v556_v11 }
  0xdc   : > { %559 = vst [vmem:[%s1527_s26 + $0x660] sm:$0xff] %v558_v12 }
  0xdd   : > { %561 = vst [vmem:[%s1527_s26 + $0x668] sm:$0xff] %v560_v13 }
  0xde   : > { %563 = vst [vmem:[%s1527_s26 + $0x670] sm:$0xff] %v562_v14 }
  0xdf   : > { %565 = vst [vmem:[%s1527_s26 + $0x678] sm:$0xff] %v564_v15 }
  0xe0   : > { %567 = vst [vmem:[%s1527_s26 + $0x680] sm:$0xff] %v566_v16 }
  0xe1   : > { %569 = vst [vmem:[%s1527_s26 + $0x688] sm:$0xff] %v568_v17 }
  0xe2   : > { %571 = vst [vmem:[%s1527_s26 + $0x690] sm:$0xff] %v570_v18 }
  0xe3   : > { %573 = vst [vmem:[%s1527_s26 + $0x698] sm:$0xff] %v572_v19 }
  0xe4   : > { %575 = vst [vmem:[%s1527_s26 + $0x6a0] sm:$0xff] %v574_v20 }
  0xe5   : > { %577 = vst [vmem:[%s1527_s26 + $0x6a8] sm:$0xff] %v576_v21 }
  0xe6   : > { %579 = vst [vmem:[%s1527_s26 + $0x6b0] sm:$0xff] %v578_v22 }
  0xe7   : > { %581 = vst [vmem:[%s1527_s26 + $0x6b8] sm:$0xff] %v580_v23 }
  0xe8   : > { %583 = vst [vmem:[%s1527_s26 + $0x6c0] sm:$0xff] %v582_v24 }
  0xe9   : > { %585 = vst [vmem:[%s1527_s26 + $0x6c8] sm:$0xff] %v584_v25 }
  0xea   : > { %587 = vst [vmem:[%s1527_s26 + $0x6d0] sm:$0xff] %v586_v26 }
  0xeb   : > { %589 = vst [vmem:[%s1527_s26 + $0x6d8] sm:$0xff] %v588_v27 }
  0xec   : > { %591 = vst [vmem:[%s1527_s26 + $0x6e0] sm:$0xff] %v590_v28 }
  0xed   : > { %593 = vst [vmem:[%s1527_s26 + $0x6e8] sm:$0xff] %v592_v29 }
  0xee   : > { %595 = vst [vmem:[%s1527_s26 + $0x6f0] sm:$0xff] %v594_v30 }
  0xef   : > { %597 = vst [vmem:[%s1527_s26 + $0x6f8] sm:$0xff] %v596_v31 }
  0xf0 PF: > { %p1377_p5 = scmp.ge.s32.totalorder %s1465_s14, 1  ;;  %p602_p6 = scmp.lt.s32.totalorder %s1465_s14, 5 }
  0xf2   : > { %p603_p7 = pnand %p1377_p5, %p602_p6 }
  0xf3   : > { %s609_s27 = sand.u32 (!%p603_p7), 1, %s1457_s12   ;;  %s1378_s7 = sshll.u32 (!%p603_p7), %s1371_s15, 4 }
  0xf4   : > { %606 = sbr.rel (%p603_p7) target bundleno = 509 (0x1fd), region = 51  ;;  %p634_p8 = scmp.lt.s32.totalorder (!%p603_p7), %s1378_s7, 63 }
  0xf5   : > { %s1416_s28 = smul.u32 (!%p603_p7), 1792, %s609_s27 }
  0xf7   : > { %s1977_s29 = scalar_lea.vmem (!%p603_p7), [#allocation2], %s1416_s28 }
  0xf9   : > { %vm874_vm0 = vcmask 1043456   ;;  %v850_v32 = vld [vmem:[%s1977_s29 + $0x690] sm:$0xf]  ;;  %v851_v33 = vld [vmem:[%s1977_s29 + $0x698] sm:$0xf]  ;;  %v833_v40 = vld [vmem:[%s1977_s29 + $0x608] sm:$0xff] }
  0xfa   : > { %v834_v34 = vld [vmem:[%s1977_s29 + $0x610] sm:$0xff]  ;;  %1384 = vmatpush.msk.msra.mxu2 %vm874_vm0, %v850_v32  ;;  %1386 = vmatpush.msk.msra.mxu3 %vm874_vm0, %v851_v33  ;;  %v835_v35 = vld [vmem:[%s1977_s29 + $0x618] sm:$0xff]  ;;  %v849_v36 = vld [vmem:[%s1977_s29 + $0x688] sm:$0xf]  ;;  %vm870_vm1 = vcmask 883712   ;;  %s2318_s7 = smov (!%p634_p8, %s1378_s7), 63 }
  0xfb   : > { %v818_v37 = vld [vmem:[%s1977_s29 + $0x590] sm:$0xff]  ;;  %1382 = vmatpush.msk.msra.mxu1 %vm874_vm0, %v849_v36  ;;  %v819_v38 = vld [vmem:[%s1977_s29 + $0x598] sm:$0xff]  ;;  %v848_v39 = vld [vmem:[%s1977_s29 + $0x680] sm:$0xf]  ;;  %s1379_s8 = sshll.u32 %s2318_s7, 1  ;;  %vm1289_vm2 = vcmask 1045508  }
  0xfc   : > { %966 = vmatpush.msra.mxu2 %v834_v34  ;;  %986 = vmatpush.msra.mxu3 %v835_v35  ;;  %v832_v41 = vld [vmem:[%s1977_s29 + $0x600] sm:$0xff]  ;;  %v802_v42 = vld [vmem:[%s1977_s29 + $0x510] sm:$0xff]  ;;  %v803_v43 = vld [vmem:[%s1977_s29 + $0x518] sm:$0xff]  ;;  %vm1287_vm3 = vcmask 1041408   ;;  %s2270_s11 = scalar_lea.vmem %s2313_s3, %s1379_s8 }
  0xfd   : > { %1380 = vmatpush.msk.msra.mxu0 %vm874_vm0, %v848_v39  ;;  %946 = vmatpush.msra.mxu1 %v833_v40  ;;  %v817_v44 = vld [vmem:[%s1977_s29 + $0x588] sm:$0xff]  ;;  %v816_v45 = vld [vmem:[%s1977_s29 + $0x580] sm:$0xff]  ;;  %v786_v47 = vld [vmem:[%s1977_s29 + $0x490] sm:$0xff] }
  0xfe   : > { %967 = vmatpush.msra.mxu2 %v818_v37  ;;  %987 = vmatpush.msra.mxu3 %v819_v38  ;;  %v801_v46 = vld [vmem:[%s1977_s29 + $0x508] sm:$0xff]  ;;  %v787_v48 = vld [vmem:[%s1977_s29 + $0x498] sm:$0xff]  ;;  %v800_v49 = vld [vmem:[%s1977_s29 + $0x500] sm:$0xff] }
  0xff   : > { %926 = vmatpush.msra.mxu0 %v832_v41  ;;  %947 = vmatpush.msra.mxu1 %v817_v44  ;;  %v785_v50 = vld [vmem:[%s1977_s29 + $0x488] sm:$0xff]  ;;  %v770_v51 = vld [vmem:[%s1977_s29 + $0x410] sm:$0xff]  ;;  %v771_v52 = vld [vmem:[%s1977_s29 + $0x418] sm:$0xff] }
 0x100   : > { %968 = vmatpush.msra.mxu2 %v802_v42  ;;  %988 = vmatpush.msra.mxu3 %v803_v43  ;;  %v784_v53 = vld [vmem:[%s1977_s29 + $0x480] sm:$0xff]  ;;  %v769_v54 = vld [vmem:[%s1977_s29 + $0x408] sm:$0xff]  ;;  %v754_v55 = vld [vmem:[%s1977_s29 + $0x390] sm:$0xff] }
 0x101   : > { %927 = vmatpush.msra.mxu0 %v816_v45  ;;  %948 = vmatpush.msra.mxu1 %v801_v46  ;;  %v755_v56 = vld [vmem:[%s1977_s29 + $0x398] sm:$0xff]  ;;  %v768_v57 = vld [vmem:[%s1977_s29 + $0x400] sm:$0xff]  ;;  %v753_v58 = vld [vmem:[%s1977_s29 + $0x388] sm:$0xff] }
 0x102   : > { %969 = vmatpush.msra.mxu2 %v786_v47  ;;  %989 = vmatpush.msra.mxu3 %v787_v48  ;;  %v738_v59 = vld [vmem:[%s1977_s29 + $0x310] sm:$0xff]  ;;  %v739_v60 = vld [vmem:[%s1977_s29 + $0x318] sm:$0xff]  ;;  %v752_v61 = vld [vmem:[%s1977_s29 + $0x380] sm:$0xff] }
 0x103   : > { %928 = vmatpush.msra.mxu0 %v800_v49  ;;  %949 = vmatpush.msra.mxu1 %v785_v50  ;;  %v737_v62 = vld [vmem:[%s1977_s29 + $0x308] sm:$0xff]  ;;  %v722_v63 = vld [vmem:[%s1977_s29 + $0x290] sm:$0xff]  ;;  %v723_v0 = vld [vmem:[%s1977_s29 + $0x298] sm:$0xff] }
 0x104   : > { %970 = vmatpush.msra.mxu2 %v770_v51  ;;  %990 = vmatpush.msra.mxu3 %v771_v52  ;;  %v736_v1 = vld [vmem:[%s1977_s29 + $0x300] sm:$0xff]  ;;  %v721_v2 = vld [vmem:[%s1977_s29 + $0x288] sm:$0xff]  ;;  %v706_v3 = vld [vmem:[%s1977_s29 + $0x210] sm:$0xff] }
 0x105   : > { %929 = vmatpush.msra.mxu0 %v784_v53  ;;  %950 = vmatpush.msra.mxu1 %v769_v54  ;;  %v707_v4 = vld [vmem:[%s1977_s29 + $0x218] sm:$0xff]  ;;  %v720_v5 = vld [vmem:[%s1977_s29 + $0x280] sm:$0xff]  ;;  %v705_v6 = vld [vmem:[%s1977_s29 + $0x208] sm:$0xff] }
 0x106   : > { %971 = vmatpush.msra.mxu2 %v754_v55  ;;  %991 = vmatpush.msra.mxu3 %v755_v56  ;;  %v690_v7 = vld [vmem:[%s1977_s29 + $0x190] sm:$0xff]  ;;  %v691_v8 = vld [vmem:[%s1977_s29 + $0x198] sm:$0xff]  ;;  %v704_v9 = vld [vmem:[%s1977_s29 + $0x200] sm:$0xff] }
 0x107   : > { %930 = vmatpush.msra.mxu0 %v768_v57  ;;  %951 = vmatpush.msra.mxu1 %v753_v58  ;;  %v689_v10 = vld [vmem:[%s1977_s29 + $0x188] sm:$0xff]  ;;  %v674_v11 = vld [vmem:[%s1977_s29 + $0x110] sm:$0xff]  ;;  %v675_v12 = vld [vmem:[%s1977_s29 + $0x118] sm:$0xff] }
 0x108   : > { %972 = vmatpush.msra.mxu2 %v738_v59  ;;  %992 = vmatpush.msra.mxu3 %v739_v60  ;;  %v688_v13 = vld [vmem:[%s1977_s29 + $0x180] sm:$0xff]  ;;  %v673_v14 = vld [vmem:[%s1977_s29 + $0x108] sm:$0xff]  ;;  %v658_v15 = vld [vmem:[%s1977_s29 + $0x90] sm:$0xff] }
 0x109   : > { %931 = vmatpush.msra.mxu0 %v752_v61  ;;  %952 = vmatpush.msra.mxu1 %v737_v62  ;;  %v659_v16 = vld [vmem:[%s1977_s29 + $0x98] sm:$0xff]  ;;  %v672_v17 = vld [vmem:[%s1977_s29 + $0x100] sm:$0xff]  ;;  %v657_v18 = vld [vmem:[%s1977_s29 + $0x88] sm:$0xff] }
 0x10a   : > { %973 = vmatpush.msra.mxu2 %v722_v63  ;;  %993 = vmatpush.msra.mxu3 %v723_v0  ;;  %v642_v19 = vld [vmem:[%s1977_s29 + $0x10] sm:$0xff]  ;;  %v643_v20 = vld [vmem:[%s1977_s29 + $0x18] sm:$0xff]  ;;  %v656_v23 = vld [vmem:[%s1977_s29 + $0x80] sm:$0xff] }
 0x10b   : > { %932 = vmatpush.msra.mxu0 %v736_v1  ;;  %953 = vmatpush.msra.mxu1 %v721_v2  ;;  %v854_v21 = vld [vmem:[%s1977_s29 + $0x6b0] sm:$0xf]  ;;  %v855_v22 = vld [vmem:[%s1977_s29 + $0x6b8] sm:$0xf]  ;;  %v641_v24 = vld [vmem:[%s1977_s29 + $0x8] sm:$0xff] }
 0x10c   : > { %974 = vmatpush.msra.mxu2 %v706_v3  ;;  %994 = vmatpush.msra.mxu3 %v707_v4  ;;  %v838_v25 = vld [vmem:[%s1977_s29 + $0x630] sm:$0xff]  ;;  %v839_v26 = vld [vmem:[%s1977_s29 + $0x638] sm:$0xff]  ;;  %v853_v27 = vld [vmem:[%s1977_s29 + $0x6a8] sm:$0xf] }
 0x10d   : > { %933 = vmatpush.msra.mxu0 %v720_v5  ;;  %954 = vmatpush.msra.mxu1 %v705_v6  ;;  %v640_v28 = vld [vmem:[%s1977_s29] sm:$0xff]  ;;  %v822_v29 = vld [vmem:[%s1977_s29 + $0x5b0] sm:$0xff]  ;;  %v823_v30 = vld [vmem:[%s1977_s29 + $0x5b8] sm:$0xff] }
 0x10e   : > { %975 = vmatpush.msra.mxu2 %v690_v7  ;;  %995 = vmatpush.msra.mxu3 %v691_v8  ;;  %v852_v31 = vld [vmem:[%s1977_s29 + $0x6a0] sm:$0xf]  ;;  %v837_v32 = vld [vmem:[%s1977_s29 + $0x628] sm:$0xff]  ;;  %v806_v33 = vld [vmem:[%s1977_s29 + $0x530] sm:$0xff] }
 0x10f   : > { %934 = vmatpush.msra.mxu0 %v704_v9  ;;  %955 = vmatpush.msra.mxu1 %v689_v10  ;;  %v807_v34 = vld [vmem:[%s1977_s29 + $0x538] sm:$0xff]  ;;  %v836_v35 = vld [vmem:[%s1977_s29 + $0x620] sm:$0xff]  ;;  %v821_v36 = vld [vmem:[%s1977_s29 + $0x5a8] sm:$0xff] }
 0x110   : > { %976 = vmatpush.msra.mxu2 %v674_v11  ;;  %996 = vmatpush.msra.mxu3 %v675_v12  ;;  %v790_v37 = vld [vmem:[%s1977_s29 + $0x4b0] sm:$0xff]  ;;  %v791_v38 = vld [vmem:[%s1977_s29 + $0x4b8] sm:$0xff]  ;;  %v820_v39 = vld [vmem:[%s1977_s29 + $0x5a0] sm:$0xff] }
 0x111   : > { %935 = vmatpush.msra.mxu0 %v688_v13  ;;  %956 = vmatpush.msra.mxu1 %v673_v14  ;;  %v805_v40 = vld [vmem:[%s1977_s29 + $0x528] sm:$0xff]  ;;  %v774_v41 = vld [vmem:[%s1977_s29 + $0x430] sm:$0xff]  ;;  %v775_v42 = vld [vmem:[%s1977_s29 + $0x438] sm:$0xff] }
 0x112   : > { %977 = vmatpush.msra.mxu2 %v658_v15  ;;  %997 = vmatpush.msra.mxu3 %v659_v16  ;;  %v804_v43 = vld [vmem:[%s1977_s29 + $0x520] sm:$0xff]  ;;  %v789_v44 = vld [vmem:[%s1977_s29 + $0x4a8] sm:$0xff]  ;;  %v758_v45 = vld [vmem:[%s1977_s29 + $0x3b0] sm:$0xff] }
 0x113   : > { %936 = vmatpush.msra.mxu0 %v672_v17  ;;  %957 = vmatpush.msra.mxu1 %v657_v18  ;;  %v759_v46 = vld [vmem:[%s1977_s29 + $0x3b8] sm:$0xff]  ;;  %v788_v47 = vld [vmem:[%s1977_s29 + $0x4a0] sm:$0xff]  ;;  %v773_v48 = vld [vmem:[%s1977_s29 + $0x428] sm:$0xff] }
 0x114   : > { %978 = vmatpush.msra.mxu2 %v642_v19  ;;  %998 = vmatpush.msra.mxu3 %v643_v20  ;;  %v742_v49 = vld [vmem:[%s1977_s29 + $0x330] sm:$0xff]  ;;  %v743_v50 = vld [vmem:[%s1977_s29 + $0x338] sm:$0xff]  ;;  %v772_v51 = vld [vmem:[%s1977_s29 + $0x420] sm:$0xff] }
 0x115   : > { %937 = vmatpush.msra.mxu0 %v656_v23  ;;  %958 = vmatpush.msra.mxu1 %v641_v24  ;;  %v757_v52 = vld [vmem:[%s1977_s29 + $0x3a8] sm:$0xff]  ;;  %v726_v53 = vld [vmem:[%s1977_s29 + $0x2b0] sm:$0xff]  ;;  %v727_v54 = vld [vmem:[%s1977_s29 + $0x2b8] sm:$0xff] }
 0x116   : > { %1392 = vmatpush.msk.msrb.mxu2 %vm874_vm0, %v854_v21  ;;  %1394 = vmatpush.msk.msrb.mxu3 %vm874_vm0, %v855_v22  ;;  %v756_v55 = vld [vmem:[%s1977_s29 + $0x3a0] sm:$0xff]  ;;  %v741_v56 = vld [vmem:[%s1977_s29 + $0x328] sm:$0xff]  ;;  %v710_v57 = vld [vmem:[%s1977_s29 + $0x230] sm:$0xff] }
 0x117   : > { %1390 = vmatpush.msk.msrb.mxu1 %vm874_vm0, %v853_v27  ;;  %938 = vmatpush.msra.mxu0 %v640_v28  ;;  %v711_v58 = vld [vmem:[%s1977_s29 + $0x238] sm:$0xff]  ;;  %v740_v59 = vld [vmem:[%s1977_s29 + $0x320] sm:$0xff]  ;;  %v725_v60 = vld [vmem:[%s1977_s29 + $0x2a8] sm:$0xff] }
 0x118   : > { %1046 = vmatpush.msrb.mxu2 %v838_v25  ;;  %1066 = vmatpush.msrb.mxu3 %v839_v26  ;;  %v694_v61 = vld [vmem:[%s1977_s29 + $0x1b0] sm:$0xff]  ;;  %v695_v62 = vld [vmem:[%s1977_s29 + $0x1b8] sm:$0xff]  ;;  %v724_v63 = vld [vmem:[%s1977_s29 + $0x2a0] sm:$0xff] }
 0x119   : > { %1388 = vmatpush.msk.msrb.mxu0 %vm874_vm0, %v852_v31  ;;  %1026 = vmatpush.msrb.mxu1 %v837_v32  ;;  %v709_v0 = vld [vmem:[%s1977_s29 + $0x228] sm:$0xff]  ;;  %v678_v1 = vld [vmem:[%s1977_s29 + $0x130] sm:$0xff]  ;;  %v679_v2 = vld [vmem:[%s1977_s29 + $0x138] sm:$0xff] }
 0x11a   : > { %1047 = vmatpush.msrb.mxu2 %v822_v29  ;;  %1067 = vmatpush.msrb.mxu3 %v823_v30  ;;  %v708_v3 = vld [vmem:[%s1977_s29 + $0x220] sm:$0xff]  ;;  %v693_v4 = vld [vmem:[%s1977_s29 + $0x1a8] sm:$0xff]  ;;  %v662_v5 = vld [vmem:[%s1977_s29 + $0xb0] sm:$0xff] }
 0x11b   : > { %1006 = vmatpush.msrb.mxu0 %v836_v35  ;;  %1027 = vmatpush.msrb.mxu1 %v821_v36  ;;  %v663_v6 = vld [vmem:[%s1977_s29 + $0xb8] sm:$0xff]  ;;  %v692_v7 = vld [vmem:[%s1977_s29 + $0x1a0] sm:$0xff]  ;;  %v677_v8 = vld [vmem:[%s1977_s29 + $0x128] sm:$0xff] }
 0x11c   : > { %1048 = vmatpush.msrb.mxu2 %v806_v33  ;;  %1068 = vmatpush.msrb.mxu3 %v807_v34  ;;  %v646_v9 = vld [vmem:[%s1977_s29 + $0x30] sm:$0xff]  ;;  %v647_v10 = vld [vmem:[%s1977_s29 + $0x38] sm:$0xff]  ;;  %v2097_v11 = vld [vmem:[%s2311_s1] sm:$0x3] }
 0x11d   : > { %1007 = vmatpush.msrb.mxu0 %v820_v39  ;;  %1028 = vmatpush.msrb.mxu1 %v805_v40  ;;  %v858_v12 = vld [vmem:[%s1977_s29 + $0x6d0] sm:$0xf]  ;;  %v859_v13 = vld [vmem:[%s1977_s29 + $0x6d8] sm:$0xf]  ;;  %v676_v14 = vld [vmem:[%s1977_s29 + $0x120] sm:$0xff] }
 0x11e   : > { %1049 = vmatpush.msrb.mxu2 %v790_v37  ;;  %1069 = vmatpush.msrb.mxu3 %v791_v38  ;;  %v661_v15 = vld [vmem:[%s1977_s29 + $0xa8] sm:$0xff]  ;;  %v842_v16 = vld [vmem:[%s1977_s29 + $0x650] sm:$0xff]  ;;  %v843_v17 = vld [vmem:[%s1977_s29 + $0x658] sm:$0xff] }
 0x11f   : > { %1008 = vmatpush.msrb.mxu0 %v804_v43  ;;  %1029 = vmatpush.msrb.mxu1 %v789_v44  ;;  %v660_v18 = vld [vmem:[%s1977_s29 + $0xa0] sm:$0xff]  ;;  %v645_v19 = vld [vmem:[%s1977_s29 + $0x28] sm:$0xff]  ;;  %v826_v20 = vld [vmem:[%s1977_s29 + $0x5d0] sm:$0xff] }
 0x120   : > { %1050 = vmatpush.msrb.mxu2 %v774_v41  ;;  %1070 = vmatpush.msrb.mxu3 %v775_v42  ;;  %v857_v21 = vld [vmem:[%s1977_s29 + $0x6c8] sm:$0xf]  ;;  %v827_v22 = vld [vmem:[%s1977_s29 + $0x5d8] sm:$0xff]  ;;  %v644_v23 = vld [vmem:[%s1977_s29 + $0x20] sm:$0xff] }
 0x121   : > { %1009 = vmatpush.msrb.mxu0 %v788_v47  ;;  %1030 = vmatpush.msrb.mxu1 %v773_v48  ;;  %v810_v24 = vld [vmem:[%s1977_s29 + $0x550] sm:$0xff]  ;;  %v841_v25 = vld [vmem:[%s1977_s29 + $0x648] sm:$0xff]  ;;  %v856_v26 = vld [vmem:[%s1977_s29 + $0x6c0] sm:$0xf] }
 0x122   : > { %1051 = vmatpush.msrb.mxu2 %v758_v45  ;;  %1071 = vmatpush.msrb.mxu3 %v759_v46  ;;  %v811_v27 = vld [vmem:[%s1977_s29 + $0x558] sm:$0xff]  ;;  %v825_v28 = vld [vmem:[%s1977_s29 + $0x5c8] sm:$0xff]  ;;  %v794_v29 = vld [vmem:[%s1977_s29 + $0x4d0] sm:$0xff] }
 0x123   : > { %1010 = vmatpush.msrb.mxu0 %v772_v51  ;;  %1031 = vmatpush.msrb.mxu1 %v757_v52  ;;  %v840_v30 = vld [vmem:[%s1977_s29 + $0x640] sm:$0xff]  ;;  %v795_v31 = vld [vmem:[%s1977_s29 + $0x4d8] sm:$0xff]  ;;  %v809_v32 = vld [vmem:[%s1977_s29 + $0x548] sm:$0xff] }
 0x124   : > { %1052 = vmatpush.msrb.mxu2 %v742_v49  ;;  %1072 = vmatpush.msrb.mxu3 %v743_v50  ;;  %v778_v33 = vld [vmem:[%s1977_s29 + $0x450] sm:$0xff]  ;;  %v824_v34 = vld [vmem:[%s1977_s29 + $0x5c0] sm:$0xff]  ;;  %v779_v35 = vld [vmem:[%s1977_s29 + $0x458] sm:$0xff]  ;;  %v1467_v49 = vmov 0  }
 0x125   : > { %1011 = vmatpush.msrb.mxu0 %v756_v55  ;;  %1032 = vmatpush.msrb.mxu1 %v741_v56  ;;  %v793_v36 = vld [vmem:[%s1977_s29 + $0x4c8] sm:$0xff]  ;;  %v762_v37 = vld [vmem:[%s1977_s29 + $0x3d0] sm:$0xff]  ;;  %v808_v38 = vld [vmem:[%s1977_s29 + $0x540] sm:$0xff] }
 0x126   : > { %1053 = vmatpush.msrb.mxu2 %v726_v53  ;;  %1073 = vmatpush.msrb.mxu3 %v727_v54  ;;  %v763_v39 = vld [vmem:[%s1977_s29 + $0x3d8] sm:$0xff]  ;;  %v777_v40 = vld [vmem:[%s1977_s29 + $0x448] sm:$0xff]  ;;  %v746_v41 = vld [vmem:[%s1977_s29 + $0x350] sm:$0xff] }
 0x127   : > { %1012 = vmatpush.msrb.mxu0 %v740_v59  ;;  %1033 = vmatpush.msrb.mxu1 %v725_v60  ;;  %v792_v42 = vld [vmem:[%s1977_s29 + $0x4c0] sm:$0xff]  ;;  %v747_v43 = vld [vmem:[%s1977_s29 + $0x358] sm:$0xff]  ;;  %v761_v44 = vld [vmem:[%s1977_s29 + $0x3c8] sm:$0xff] }
 0x128   : > { %1054 = vmatpush.msrb.mxu2 %v710_v57  ;;  %1074 = vmatpush.msrb.mxu3 %v711_v58  ;;  %v776_v45 = vld [vmem:[%s1977_s29 + $0x440] sm:$0xff]  ;;  %v730_v46 = vld [vmem:[%s1977_s29 + $0x2d0] sm:$0xff]  ;;  %v731_v47 = vld [vmem:[%s1977_s29 + $0x2d8] sm:$0xff] }
 0x129   : > { %1013 = vmatpush.msrb.mxu0 %v724_v63  ;;  %1034 = vmatpush.msrb.mxu1 %v709_v0  ;;  %v864_v48 = vld [vmem:[%s2312_s2] sm:$0x3]  ;;  %v745_v51 = vld [vmem:[%s1977_s29 + $0x348] sm:$0xff]  ;;  %v714_v52 = vld [vmem:[%s1977_s29 + $0x250] sm:$0xff] }
 0x12a   : > { %1055 = vmatpush.msrb.mxu2 %v694_v61  ;;  %1075 = vmatpush.msrb.mxu3 %v695_v62  ;;  %v760_v50 = vld [vmem:[%s1977_s29 + $0x3c0] sm:$0xff]  ;;  %v715_v53 = vld [vmem:[%s1977_s29 + $0x258] sm:$0xff]  ;;  %v729_v55 = vld [vmem:[%s1977_s29 + $0x2c8] sm:$0xff] }
 0x12b   : > { %1014 = vmatpush.msrb.mxu0 %v708_v3  ;;  %1035 = vmatpush.msrb.mxu1 %v693_v4  ;;  %v744_v54 = vld [vmem:[%s1977_s29 + $0x340] sm:$0xff]  ;;  %v698_v56 = vld [vmem:[%s1977_s29 + $0x1d0] sm:$0xff]  ;;  %v699_v57 = vld [vmem:[%s1977_s29 + $0x1d8] sm:$0xff] }
 0x12c   : > { %1056 = vmatpush.msrb.mxu2 %v678_v1  ;;  %1076 = vmatpush.msrb.mxu3 %v679_v2  ;;  %v728_v58 = vld [vmem:[%s1977_s29 + $0x2c0] sm:$0xff]  ;;  %v713_v59 = vld [vmem:[%s1977_s29 + $0x248] sm:$0xff]  ;;  %v682_v60 = vld [vmem:[%s1977_s29 + $0x150] sm:$0xff] }
 0x12d   : > { %1015 = vmatpush.msrb.mxu0 %v692_v7  ;;  %1036 = vmatpush.msrb.mxu1 %v677_v8  ;;  %v683_v61 = vld [vmem:[%s1977_s29 + $0x158] sm:$0xff]  ;;  %v712_v62 = vld [vmem:[%s1977_s29 + $0x240] sm:$0xff]  ;;  %v697_v63 = vld [vmem:[%s1977_s29 + $0x1c8] sm:$0xff] }
 0x12e   : > { %1057 = vmatpush.msrb.mxu2 %v662_v5  ;;  %1077 = vmatpush.msrb.mxu3 %v663_v6  ;;  %v666_v0 = vld [vmem:[%s1977_s29 + $0xd0] sm:$0xff]  ;;  %v667_v1 = vld [vmem:[%s1977_s29 + $0xd8] sm:$0xff]  ;;  %v696_v2 = vld [vmem:[%s1977_s29 + $0x1c0] sm:$0xff] }
 0x12f   : > { %1385 = vmatmul.msk.f32.vlgmr.msra.gmra.mxu2 %vm870_vm1, %v2097_v11  ;;  %1387 = vmatmul.msk.f32.vlgmr.msra.gmra.mxu3 %vm870_vm1, %v2097_v11  ;;  %v681_v3 = vld [vmem:[%s1977_s29 + $0x148] sm:$0xff]  ;;  %v650_v4 = vld [vmem:[%s1977_s29 + $0x50] sm:$0xff]  ;;  %v651_v5 = vld [vmem:[%s1977_s29 + $0x58] sm:$0xff] }
 0x130   : > { %1058 = vmatpush.msrb.mxu2 %v646_v9  ;;  %1078 = vmatpush.msrb.mxu3 %v647_v10  ;;  %v862_v6 = vld [vmem:[%s1977_s29 + $0x6f0] sm:$0xf]  ;;  %v863_v7 = vld [vmem:[%s1977_s29 + $0x6f8] sm:$0xf]  ;;  %v680_v8 = vld [vmem:[%s1977_s29 + $0x140] sm:$0xff] }
 0x131   : > { %1016 = vmatpush.msrb.mxu0 %v676_v14  ;;  %1037 = vmatpush.msrb.mxu1 %v661_v15  ;;  %v665_v9 = vld [vmem:[%s1977_s29 + $0xc8] sm:$0xff]  ;;  %v846_v10 = vld [vmem:[%s1977_s29 + $0x670] sm:$0xff] }
 0x132   : > { %1400 = vmatpush.msk.msra.mxu2 %vm874_vm0, %v858_v12  ;;  %1402 = vmatpush.msk.msra.mxu3 %vm874_vm0, %v859_v13  ;;  %v847_v12 = vld [vmem:[%s1977_s29 + $0x678] sm:$0xff]  ;;  %v664_v13 = vld [vmem:[%s1977_s29 + $0xc0] sm:$0xff]  ;;  %v649_v14 = vld [vmem:[%s1977_s29 + $0x48] sm:$0xff] }
 0x133   : > { %1017 = vmatpush.msrb.mxu0 %v660_v18  ;;  %1038 = vmatpush.msrb.mxu1 %v645_v19  ;;  %v830_v15 = vld [vmem:[%s1977_s29 + $0x5f0] sm:$0xff]  ;;  %v648_v18 = vld [vmem:[%s1977_s29 + $0x40] sm:$0xff] }
 0x134   : > { %1126 = vmatpush.msra.mxu2 %v842_v16  ;;  %1146 = vmatpush.msra.mxu3 %v843_v17  ;;  %v861_v16 = vld [vmem:[%s1977_s29 + $0x6e8] sm:$0xf]  ;;  %v831_v17 = vld [vmem:[%s1977_s29 + $0x5f8] sm:$0xff]  ;;  %v814_v19 = vld [vmem:[%s1977_s29 + $0x570] sm:$0xff] }
 0x135   : > { %1383 = vmatmul.msk.f32.vlgmr.msra.gmra.mxu1 %vm870_vm1, %v2097_v11  ;;  %1018 = vmatpush.msrb.mxu0 %v644_v23  ;;  %v829_v23 = vld [vmem:[%s1977_s29 + $0x5e8] sm:$0xff] }
 0x136   : > { %1127 = vmatpush.msra.mxu2 %v826_v20  ;;  %1398 = vmatpush.msk.msra.mxu1 %vm874_vm0, %v857_v21  ;;  %v845_v20 = vld [vmem:[%s1977_s29 + $0x668] sm:$0xff]  ;;  %v860_v21 = vld [vmem:[%s1977_s29 + $0x6e0] sm:$0xf] }
 0x137   : > { %1147 = vmatpush.msra.mxu3 %v827_v22  ;;  %1381 = vmatmul.msk.f32.vlgmr.msra.gmra.mxu0 %vm870_vm1, %v2097_v11  ;;  %v815_v22 = vld [vmem:[%s1977_s29 + $0x578] sm:$0xff] }
 0x138   : > { %1128 = vmatpush.msra.mxu2 %v810_v24  ;;  %1106 = vmatpush.msra.mxu1 %v841_v25  ;;  %v798_v24 = vld [vmem:[%s1977_s29 + $0x4f0] sm:$0xff]  ;;  %v844_v25 = vld [vmem:[%s1977_s29 + $0x660] sm:$0xff] }
 0x139   : > { %1396 = vmatpush.msk.msra.mxu0 %vm874_vm0, %v856_v26  ;;  %1148 = vmatpush.msra.mxu3 %v811_v27  ;;  %v799_v26 = vld [vmem:[%s1977_s29 + $0x4f8] sm:$0xff]  ;;  %v813_v27 = vld [vmem:[%s1977_s29 + $0x568] sm:$0xff] }
 0x13a   : > { %1107 = vmatpush.msra.mxu1 %v825_v28  ;;  %1129 = vmatpush.msra.mxu2 %v794_v29  ;;  %v782_v28 = vld [vmem:[%s1977_s29 + $0x470] sm:$0xff]  ;;  %v828_v29 = vld [vmem:[%s1977_s29 + $0x5e0] sm:$0xff] }
 0x13b   : > { %1086 = vmatpush.msra.mxu0 %v840_v30  ;;  %1149 = vmatpush.msra.mxu3 %v795_v31  ;;  %v783_v30 = vld [vmem:[%s1977_s29 + $0x478] sm:$0xff]  ;;  %v797_v31 = vld [vmem:[%s1977_s29 + $0x4e8] sm:$0xff] }
 0x13c   : > { %1108 = vmatpush.msra.mxu1 %v809_v32  ;;  %1130 = vmatpush.msra.mxu2 %v778_v33  ;;  %v766_v32 = vld [vmem:[%s1977_s29 + $0x3f0] sm:$0xff]  ;;  %v812_v33 = vld [vmem:[%s1977_s29 + $0x560] sm:$0xff] }
 0x13d   : > { %1087 = vmatpush.msra.mxu0 %v824_v34  ;;  %1150 = vmatpush.msra.mxu3 %v779_v35  ;;  %v767_v34 = vld [vmem:[%s1977_s29 + $0x3f8] sm:$0xff]  ;;  %v781_v35 = vld [vmem:[%s1977_s29 + $0x468] sm:$0xff] }
 0x13e   : > { %1109 = vmatpush.msra.mxu1 %v793_v36  ;;  %1131 = vmatpush.msra.mxu2 %v762_v37  ;;  %v750_v36 = vld [vmem:[%s1977_s29 + $0x370] sm:$0xff]  ;;  %v796_v37 = vld [vmem:[%s1977_s29 + $0x4e0] sm:$0xff] }
 0x13f   : > { %1088 = vmatpush.msra.mxu0 %v808_v38  ;;  %1151 = vmatpush.msra.mxu3 %v763_v39  ;;  %v751_v38 = vld [vmem:[%s1977_s29 + $0x378] sm:$0xff]  ;;  %v765_v39 = vld [vmem:[%s1977_s29 + $0x3e8] sm:$0xff] }
 0x140   : > { %1110 = vmatpush.msra.mxu1 %v777_v40  ;;  %1132 = vmatpush.msra.mxu2 %v746_v41  ;;  %v734_v40 = vld [vmem:[%s1977_s29 + $0x2f0] sm:$0xff]  ;;  %v780_v41 = vld [vmem:[%s1977_s29 + $0x460] sm:$0xff] }
 0x141   : > { %1089 = vmatpush.msra.mxu0 %v792_v42  ;;  %1152 = vmatpush.msra.mxu3 %v747_v43  ;;  %v735_v42 = vld [vmem:[%s1977_s29 + $0x2f8] sm:$0xff]  ;;  %v749_v43 = vld [vmem:[%s1977_s29 + $0x368] sm:$0xff] }
 0x142   : > { %1442 = vset.pattern.permute.xlu0 %v1467_v49  ;;  %1111 = vmatpush.msra.mxu1 %v761_v44  ;;  %v718_v44 = vld [vmem:[%s1977_s29 + $0x270] sm:$0xff] }
 0x143   : > { %1090 = vmatpush.msra.mxu0 %v776_v45  ;;  %1133 = vmatpush.msra.mxu2 %v730_v46  ;;  %v764_v45 = vld [vmem:[%s1977_s29 + $0x3e0] sm:$0xff]  ;;  %v719_v46 = vld [vmem:[%s1977_s29 + $0x278] sm:$0xff]  ;;  %v702_v49 = vld [vmem:[%s1977_s29 + $0x1f0] sm:$0xff] }
 0x144   : > { %1153 = vmatpush.msra.mxu3 %v731_v47  ;;  %867 = vperm.xlu0 %1442, %v864_v48   ;;  %v748_v47 = vld [vmem:[%s1977_s29 + $0x360] sm:$0xff]  ;;  %v733_v48 = vld [vmem:[%s1977_s29 + $0x2e8] sm:$0xff] }
 0x145   : > { %1091 = vmatpush.msra.mxu0 %v760_v50  ;;  %1112 = vmatpush.msra.mxu1 %v745_v51  ;;  %v703_v50 = vld [vmem:[%s1977_s29 + $0x1f8] sm:$0xff]  ;;  %v732_v51 = vld [vmem:[%s1977_s29 + $0x2e0] sm:$0xff] }
 0x146   : > { %1134 = vmatpush.msra.mxu2 %v714_v52  ;;  %1154 = vmatpush.msra.mxu3 %v715_v53  ;;  %v717_v52 = vld [vmem:[%s1977_s29 + $0x268] sm:$0xff]  ;;  %v686_v53 = vld [vmem:[%s1977_s29 + $0x170] sm:$0xff] }
 0x147   : > { %1092 = vmatpush.msra.mxu0 %v744_v54  ;;  %1113 = vmatpush.msra.mxu1 %v729_v55  ;;  %v687_v54 = vld [vmem:[%s1977_s29 + $0x178] sm:$0xff]  ;;  %v716_v55 = vld [vmem:[%s1977_s29 + $0x260] sm:$0xff] }
 0x148   : > { %1135 = vmatpush.msra.mxu2 %v698_v56  ;;  %1155 = vmatpush.msra.mxu3 %v699_v57  ;;  %v701_v56 = vld [vmem:[%s1977_s29 + $0x1e8] sm:$0xff]  ;;  %v670_v57 = vld [vmem:[%s1977_s29 + $0xf0] sm:$0xff] }
 0x149   : > { %1093 = vmatpush.msra.mxu0 %v728_v58  ;;  %1114 = vmatpush.msra.mxu1 %v713_v59  ;;  %v671_v58 = vld [vmem:[%s1977_s29 + $0xf8] sm:$0xff]  ;;  %v700_v59 = vld [vmem:[%s1977_s29 + $0x1e0] sm:$0xff] }
 0x14a   : > { %1136 = vmatpush.msra.mxu2 %v682_v60  ;;  %1156 = vmatpush.msra.mxu3 %v683_v61  ;;  %v685_v60 = vld [vmem:[%s1977_s29 + $0x168] sm:$0xff]  ;;  %v654_v61 = vld [vmem:[%s1977_s29 + $0x70] sm:$0xff] }
 0x14b   : > { %1094 = vmatpush.msra.mxu0 %v712_v62  ;;  %1115 = vmatpush.msra.mxu1 %v697_v63  ;;  %v655_v62 = vld [vmem:[%s1977_s29 + $0x78] sm:$0xff]  ;;  %v684_v63 = vld [vmem:[%s1977_s29 + $0x160] sm:$0xff] }
 0x14c   : > { %1137 = vmatpush.msra.mxu2 %v666_v0  ;;  %1157 = vmatpush.msra.mxu3 %v667_v1  ;;  %v669_v0 = vld [vmem:[%s1977_s29 + $0xe8] sm:$0xff]  ;;  %v668_v1 = vld [vmem:[%s1977_s29 + $0xe0] sm:$0xff] }
 0x14d   : > { %1095 = vmatpush.msra.mxu0 %v696_v2  ;;  %1116 = vmatpush.msra.mxu1 %v681_v3  ;;  %v653_v2 = vld [vmem:[%s1977_s29 + $0x68] sm:$0xff]  ;;  %v652_v3 = vld [vmem:[%s1977_s29 + $0x60] sm:$0xff] }
 0x14e   : > { %1138 = vmatpush.msra.mxu2 %v650_v4  ;;  %1158 = vmatpush.msra.mxu3 %v651_v5 }
 0x14f   : > { %1393 = vmatmul.msk.f32.vlgmr.msrb.gmra.mxu2 %vm870_vm1, %v2097_v11  ;;  %1395 = vmatmul.msk.f32.vlgmr.msrb.gmra.mxu3 %vm870_vm1, %v2097_v11 }
 0x150   : > { %1408 = vmatpush.msk.msrb.mxu2 %vm874_vm0, %v862_v6  ;;  %1410 = vmatpush.msk.msrb.mxu3 %vm874_vm0, %v863_v7 }
 0x151   : > { %1096 = vmatpush.msra.mxu0 %v680_v8  ;;  %1117 = vmatpush.msra.mxu1 %v665_v9 }
 0x152   : > { %1206 = vmatpush.msrb.mxu2 %v846_v10  ;;  %1226 = vmatpush.msrb.mxu3 %v847_v12 }
 0x153   : > { %1097 = vmatpush.msra.mxu0 %v664_v13  ;;  %1118 = vmatpush.msra.mxu1 %v649_v14 }
 0x154   : > { %1391 = vmatmul.msk.f32.vlgmr.msrb.gmra.mxu1 %vm870_vm1, %v2097_v11  ;;  %1207 = vmatpush.msrb.mxu2 %v830_v15 }
 0x155   : > { %1406 = vmatpush.msk.msrb.mxu1 %vm874_vm0, %v861_v16  ;;  %1227 = vmatpush.msrb.mxu3 %v831_v17 }
 0x156   : > { %1098 = vmatpush.msra.mxu0 %v648_v18  ;;  %1208 = vmatpush.msrb.mxu2 %v814_v19 }
 0x157   : > { %1389 = vmatmul.msk.f32.vlgmr.msrb.gmra.mxu0 %vm870_vm1, %v2097_v11  ;;  %1186 = vmatpush.msrb.mxu1 %v845_v20 }
 0x158   : > { %1404 = vmatpush.msk.msrb.mxu0 %vm874_vm0, %v860_v21  ;;  %1228 = vmatpush.msrb.mxu3 %v815_v22 }
 0x159   : > { %1187 = vmatpush.msrb.mxu1 %v829_v23  ;;  %1209 = vmatpush.msrb.mxu2 %v798_v24 }
 0x15a   : > { %1166 = vmatpush.msrb.mxu0 %v844_v25  ;;  %1229 = vmatpush.msrb.mxu3 %v799_v26 }
 0x15b   : > { %1188 = vmatpush.msrb.mxu1 %v813_v27  ;;  %1210 = vmatpush.msrb.mxu2 %v782_v28 }
 0x15c   : > { %1167 = vmatpush.msrb.mxu0 %v828_v29  ;;  %1230 = vmatpush.msrb.mxu3 %v783_v30 }
 0x15d   : > { %1189 = vmatpush.msrb.mxu1 %v797_v31  ;;  %1211 = vmatpush.msrb.mxu2 %v766_v32 }
 0x15e   : > { %1168 = vmatpush.msrb.mxu0 %v812_v33  ;;  %1231 = vmatpush.msrb.mxu3 %v767_v34 }
 0x15f   : > { %1190 = vmatpush.msrb.mxu1 %v781_v35  ;;  %1212 = vmatpush.msrb.mxu2 %v750_v36 }
 0x160   : > { %1169 = vmatpush.msrb.mxu0 %v796_v37  ;;  %1232 = vmatpush.msrb.mxu3 %v751_v38 }
 0x161   : > { %1191 = vmatpush.msrb.mxu1 %v765_v39  ;;  %1213 = vmatpush.msrb.mxu2 %v734_v40 }
 0x162   : > { %1170 = vmatpush.msrb.mxu0 %v780_v41  ;;  %1233 = vmatpush.msrb.mxu3 %v735_v42 }
 0x163   : > { %1192 = vmatpush.msrb.mxu1 %v749_v43  ;;  %1214 = vmatpush.msrb.mxu2 %v718_v44 }
 0x164   : > { %1171 = vmatpush.msrb.mxu0 %v764_v45  ;;  %1234 = vmatpush.msrb.mxu3 %v719_v46 }
 0x165   : > { %1401 = vmatmul.msk.f32.vlgmr.msra.gmra.mxu2 %vm870_vm1, %v2097_v11  ;;  %1403 = vmatmul.msk.f32.vlgmr.msra.gmra.mxu3 %vm870_vm1, %v2097_v11 }
 0x166   : > { %1172 = vmatpush.msrb.mxu0 %v748_v47  ;;  %1193 = vmatpush.msrb.mxu1 %v733_v48 }
 0x167   : > { %1215 = vmatpush.msrb.mxu2 %v702_v49  ;;  %1235 = vmatpush.msrb.mxu3 %v703_v50 }
 0x168   : > { %1173 = vmatpush.msrb.mxu0 %v732_v51  ;;  %1194 = vmatpush.msrb.mxu1 %v717_v52 }
 0x169   : > { %1216 = vmatpush.msrb.mxu2 %v686_v53  ;;  %1236 = vmatpush.msrb.mxu3 %v687_v54 }
 0x16a   : > { %1399 = vmatmul.msk.f32.vlgmr.msra.gmra.mxu1 %vm870_vm1, %v2097_v11  ;;  %1174 = vmatpush.msrb.mxu0 %v716_v55 }
 0x16b   : > { %1195 = vmatpush.msrb.mxu1 %v701_v56  ;;  %1217 = vmatpush.msrb.mxu2 %v670_v57 }
 0x16c   : > { %1237 = vmatpush.msrb.mxu3 %v671_v58  ;;  %1397 = vmatmul.msk.f32.vlgmr.msra.gmra.mxu0 %vm870_vm1, %v2097_v11 }
 0x16d   : > { %1175 = vmatpush.msrb.mxu0 %v700_v59  ;;  %1196 = vmatpush.msrb.mxu1 %v685_v60 }
 0x16e   : > { %1218 = vmatpush.msrb.mxu2 %v654_v61  ;;  %1238 = vmatpush.msrb.mxu3 %v655_v62 }
 0x16f   : > { %1409 = vmatmul.msk.f32.vlgmr.msrb.gmra.mxu2 %vm870_vm1, %v2097_v11  ;;  %1411 = vmatmul.msk.f32.vlgmr.msrb.gmra.mxu3 %vm870_vm1, %v2097_v11 }
 0x170   : > { %1176 = vmatpush.msrb.mxu0 %v684_v63  ;;  %1197 = vmatpush.msrb.mxu1 %v669_v0 }
 0x172   : > { %1177 = vmatpush.msrb.mxu0 %v668_v1  ;;  %1198 = vmatpush.msrb.mxu1 %v653_v2 }
 0x173   : > { %1407 = vmatmul.msk.f32.vlgmr.msrb.gmra.mxu1 %vm870_vm1, %v2097_v11 }
 0x174   : > { %1178 = vmatpush.msrb.mxu0 %v652_v3 }
 0x175   : > { %1405 = vmatmul.msk.f32.vlgmr.msrb.gmra.mxu0 %vm870_vm1, %v2097_v11 }
 0x1b2   : > { %v960_v4 = vpop.f32.mrf.mxu1  ;;  %v980_v5 = vpop.f32.mrf.mxu2 }
 0x1b3   : > { %v1000_v6 = vpop.f32.mrf.mxu3 }
 0x1b4   : > { %v940_v7 = vpop.f32.mrf.mxu0 }
 0x1b6   : > { %v2261_v8 = vpop.permute.xlu0 %867 }
 0x1b7   : > { %v961_v9 = vadd.f32 %v960_v4, %v2261_v8  ;;  %v981_v10 = vadd.f32 %v980_v5, %v2261_v8  ;;  %v1001_v12 = vadd.f32 %v1000_v6, %v2261_v8  ;;  %v941_v13 = vadd.f32 %v940_v7, %v2261_v8 }
 0x1b9   : > { %v1244_v14 = vmax.f32 %v961_v9, 0.0  ;;  %v1245_v11 = vmax.f32 %v981_v10, 0.0  ;;  %v1246_v15 = vmax.f32 %v1001_v12, 0.0  ;;  %v1243_v16 = vmax.f32 %v941_v13, 0.0 }
 0x1bb   : > { %v1275_v17 = vrot.slane %v1244_v14, 6  ;;  %v1276_v18 = vrot.slane %v1245_v11, 4  ;;  %v1277_v19 = vrot.slane %v1246_v15, 2 }
 0x1bd   : > { %v1290_v20 = vsel %vm1289_vm2, %v1276_v18, %v1277_v19  ;;  %v1288_v21 = vsel %vm1287_vm3, %v1243_v16, %v1275_v17 }
 0x1be   : > { %v1291_v22 = vsel %vm874_vm0, %v1288_v21, %v1290_v20 }
 0x1bf   : > { %1305 = vst [vmem:[%s2270_s11] sm:$0xff] %v1291_v22 }
 0x1d1   : > { %v1040_v23 = vpop.f32.mrf.mxu1 }
 0x1d2   : > { %v1041_v24 = vadd.f32 %v1040_v23, %v2261_v8  ;;  %v1060_v25 = vpop.f32.mrf.mxu2  ;;  %v1080_v26 = vpop.f32.mrf.mxu3 }
 0x1d3   : > { %v1061_v27 = vadd.f32 %v1060_v25, %v2261_v8  ;;  %v1081_v28 = vadd.f32 %v1080_v26, %v2261_v8 }
 0x1d4   : > { %v1248_v29 = vmax.f32 %v1041_v24, 0.0  ;;  %v1020_v30 = vpop.f32.mrf.mxu0 }
 0x1d5   : > { %v1249_v31 = vmax.f32 %v1061_v27, 0.0  ;;  %v1250_v32 = vmax.f32 %v1081_v28, 0.0  ;;  %v1021_v33 = vadd.f32 %v1020_v30, %v2261_v8 }
 0x1d6   : > { %v1278_v34 = vrot.slane %v1248_v29, 6 }
 0x1d7   : > { %v1279_v35 = vrot.slane %v1249_v31, 4  ;;  %v1280_v36 = vrot.slane %v1250_v32, 2  ;;  %v1247_v37 = vmax.f32 %v1021_v33, 0.0 }
 0x1d9   : > { %v1293_v38 = vsel %vm1289_vm2, %v1279_v35, %v1280_v36  ;;  %v1292_v39 = vsel %vm1287_vm3, %v1247_v37, %v1278_v34 }
 0x1da   : > { %v1294_v40 = vsel %vm874_vm0, %v1292_v39, %v1293_v38 }
 0x1db   : > { %1306 = vst [vmem:[%s2270_s11 + $0x8] sm:$0xff] %v1294_v40 }
 0x1e7   : > { %v1120_v41 = vpop.f32.mrf.mxu1 }
 0x1e8   : > { %v1121_v42 = vadd.f32 %v1120_v41, %v2261_v8  ;;  %v1140_v43 = vpop.f32.mrf.mxu2  ;;  %v1160_v44 = vpop.f32.mrf.mxu3 }
 0x1e9   : > { %v1100_v45 = vpop.f32.mrf.mxu0  ;;  %v1141_v46 = vadd.f32 %v1140_v43, %v2261_v8  ;;  %v1161_v47 = vadd.f32 %v1160_v44, %v2261_v8 }
 0x1ea   : > { %v1252_v48 = vmax.f32 %v1121_v42, 0.0  ;;  %v1101_v49 = vadd.f32 %v1100_v45, %v2261_v8 }
 0x1eb   : > { %v1253_v50 = vmax.f32 %v1141_v46, 0.0  ;;  %v1254_v51 = vmax.f32 %v1161_v47, 0.0 }
 0x1ec   : > { %v1281_v52 = vrot.slane %v1252_v48, 6  ;;  %v1251_v53 = vmax.f32 %v1101_v49, 0.0 }
 0x1ed   : > { %v1282_v54 = vrot.slane %v1253_v50, 4  ;;  %v1283_v55 = vrot.slane %v1254_v51, 2 }
 0x1ee   : > { %v1295_v56 = vsel %vm1287_vm3, %v1251_v53, %v1281_v52 }
 0x1ef   : > { %v1296_v57 = vsel %vm1289_vm2, %v1282_v54, %v1283_v55 }
 0x1f0   : > { %v1297_v58 = vsel %vm874_vm0, %v1295_v56, %v1296_v57  ;;  %v1200_v59 = vpop.f32.mrf.mxu1 }
 0x1f1   : > { %1307 = vst [vmem:[%s2270_s11 + $0x10] sm:$0xff] %v1297_v58  ;;  %v1201_v60 = vadd.f32 %v1200_v59, %v2261_v8 }
 0x1f2   : > { %v1180_v61 = vpop.f32.mrf.mxu0  ;;  %v1220_v62 = vpop.f32.mrf.mxu2 }
 0x1f3   : > { %v1256_v63 = vmax.f32 %v1201_v60, 0.0  ;;  %v1181_v0 = vadd.f32 %v1180_v61, %v2261_v8  ;;  %v1221_v1 = vadd.f32 %v1220_v62, %v2261_v8  ;;  %v1240_v2 = vpop.f32.mrf.mxu3 }
 0x1f4   : > { %v1241_v3 = vadd.f32 %v1240_v2, %v2261_v8 }
 0x1f5   : > { %v1257_v4 = vmax.f32 %v1221_v1, 0.0  ;;  %v1284_v5 = vrot.slane %v1256_v63, 6  ;;  %v1255_v6 = vmax.f32 %v1181_v0, 0.0 }
 0x1f6   : > { %v1258_v7 = vmax.f32 %v1241_v3, 0.0 }
 0x1f7   : > { %v1285_v9 = vrot.slane %v1257_v4, 4  ;;  %v1298_v12 = vsel %vm1287_vm3, %v1255_v6, %v1284_v5 }
 0x1f8   : > { %v1286_v10 = vrot.slane %v1258_v7, 2 }
 0x1fa   : > { %v1299_v13 = vsel %vm1289_vm2, %v1285_v9, %v1286_v10 }
 0x1fb   : > { %v1300_v14 = vsel %vm874_vm0, %v1298_v12, %v1299_v13 }
 0x1fc   : > { %1308 = vst [vmem:[%s2270_s11 + $0x18] sm:$0xff] %v1300_v14 }
 0x1fd PF: > { %p10_p9 = scmp.ge.s32.totalorder %s1505_s16, 6   ;;  %s2314_s12 = smov %s1461_s13 }
 0x1fe   : > { %s2315_s13 = smov %s1514_s19  ;;  %s2316_s14 = smov %s1505_s16 }
 0x1ff   :  { %12 = sbr.rel (!%p10_p9) target bundleno = 2 (0x2), region = 90 }

// kernel: geo_processor.23
= control target key start
LH: loop header
LB: loop body
LE: loop exit
PB: predicated region body
PF: predicated region fallthrough
CT: control target
= control target key end

     0   :  { %s1604_s0 = inlined_call_operand.vmem [shape: f32[54,8192], index: 0, kind: input, shape index: {}]   ;;  %s1605_s1 = inlined_call_operand.vmem [shape: f32[1,54], index: 1, kind: input, shape index: {}]   ;;  %s1606_s2 = inlined_call_operand.<no memory space> [shape: f32[1,1], index: 2, kind: input, shape index: {}]   ;;  %s1607_s3 = inlined_call_operand.vmem [shape: f32[1,8192], index: 3, kind: output, shape index: {}]  }
   0x1   :  { %v8_v0 = vstv %s1606_s2 }
   0x2   :  { %9 = vst [vmem:[#allocation2] sm:$0x1] %v8_v0 }
   0x3   :  { %s1138_s14 = smov 0   ;;  %s1140_s15 = smov 0  }
   0x4   :  { %s1142_s16 = smov 0  }
   0x5 LB: > { %s1019_s2 = sadd.s32 4294967295, %s1112_s16   ;;  %s1155_s17 = sadd.s32 1, %s1112_s16   ;;  %s1112_s16 = sphi %s1142_s16, %s1610_s16   ;;  %s1108_s15 = sphi %s1140_s15, %s1609_s15   ;;  %s1104_s14 = sphi %s1138_s14, %s1608_s14  }
   0x6   : > { %s19_s18 = ssub.s32 %s1112_s16, %s1155_s17  ;;  %s22_s19 = sadd.s32 1, %s1108_s15 }
   0x7   : > { %p20_p0 = scmp.eq.s32.totalorder %s19_s18, 0  ;;  %p29_p1 = scmp.ne.s32.totalorder %s1108_s15, %s1104_s14 }
   0x8   : > { %p30_p2 = scmp.eq.s32.totalorder %s1112_s16, 0  ;;  %p1022_p4 = scmp.ge.s32.totalorder %s1112_s16, 4 }
   0x9   : > { %s1164_s20 = scalar_select %p20_p0, %s1108_s15, %s22_s19  }
   0xa   : > { %p31_p3 = por %p30_p2, %p29_p1  ;;  %129 = sbr.rel (%p1022_p4) target bundleno = 131 (0x83), region = 24 }
   0xf   : > { %132 = sbr.rel (!%p31_p3) target bundleno = 131 (0x83), region = 28  ;;  %s134_s21 = sand.u32 (%p31_p3), 1, %s1108_s15  }
  0x10   : > { %s1061_s22 = sshll.u32 (%p31_p3), %s1112_s16, 7  ;;  %s1062_s23 = smul.u32 (%p31_p3), 896, %s134_s21 }
  0x11   : > { %s1172_s26 = scalar_lea.vmem (%p31_p3), %s1604_s0, %s1061_s22 }
  0x12   : > { %v152_v1 = vld [vmem:[%s1172_s26] sm:$0xff] (%p31_p3)  ;;  %v154_v2 = vld [vmem:[%s1172_s26 + $0x8] sm:$0xff] (%p31_p3)  ;;  %v156_v3 = vld [vmem:[%s1172_s26 + $0x10] sm:$0xff] (%p31_p3)  ;;  %s1177_s27 = scalar_lea.vmem (%p31_p3), [#allocation3], %s1062_s23 }
  0x13   : > { %153 = vst [vmem:[%s1177_s27] sm:$0xff] (%p31_p3), %v152_v1  ;;  %v158_v4 = vld [vmem:[%s1172_s26 + $0x18] sm:$0xff] (%p31_p3)  ;;  %v160_v5 = vld [vmem:[%s1172_s26 + $0x20] sm:$0xff] (%p31_p3)  ;;  %v162_v6 = vld [vmem:[%s1172_s26 + $0x28] sm:$0xff] (%p31_p3) }
  0x14   : > { %155 = vst [vmem:[%s1177_s27 + $0x8] sm:$0xff] %v154_v2  ;;  %v164_v7 = vld [vmem:[%s1172_s26 + $0x30] sm:$0xff]  ;;  %v166_v8 = vld [vmem:[%s1172_s26 + $0x38] sm:$0xff]  ;;  %v168_v9 = vld [vmem:[%s1172_s26 + $0x40] sm:$0xff] }
  0x15   : > { %157 = vst [vmem:[%s1177_s27 + $0x10] sm:$0xff] %v156_v3  ;;  %v170_v10 = vld [vmem:[%s1172_s26 + $0x48] sm:$0xff]  ;;  %v172_v11 = vld [vmem:[%s1172_s26 + $0x50] sm:$0xff]  ;;  %v174_v12 = vld [vmem:[%s1172_s26 + $0x58] sm:$0xff] }
  0x16   : > { %159 = vst [vmem:[%s1177_s27 + $0x18] sm:$0xff] %v158_v4  ;;  %v176_v13 = vld [vmem:[%s1172_s26 + $0x60] sm:$0xff]  ;;  %v178_v14 = vld [vmem:[%s1172_s26 + $0x68] sm:$0xff]  ;;  %v180_v15 = vld [vmem:[%s1172_s26 + $0x70] sm:$0xff] }
  0x17   : > { %161 = vst [vmem:[%s1177_s27 + $0x20] sm:$0xff] %v160_v5  ;;  %v182_v16 = vld [vmem:[%s1172_s26 + $0x78] sm:$0xff]  ;;  %v184_v17 = vld [vmem:[%s1172_s26 + $0x200] sm:$0xff]  ;;  %v186_v18 = vld [vmem:[%s1172_s26 + $0x208] sm:$0xff] }
  0x18   : > { %163 = vst [vmem:[%s1177_s27 + $0x28] sm:$0xff] %v162_v6  ;;  %v188_v19 = vld [vmem:[%s1172_s26 + $0x210] sm:$0xff]  ;;  %v190_v20 = vld [vmem:[%s1172_s26 + $0x218] sm:$0xff]  ;;  %v192_v21 = vld [vmem:[%s1172_s26 + $0x220] sm:$0xff] }
  0x19   : > { %165 = vst [vmem:[%s1177_s27 + $0x30] sm:$0xff] %v164_v7  ;;  %v194_v22 = vld [vmem:[%s1172_s26 + $0x228] sm:$0xff]  ;;  %v196_v23 = vld [vmem:[%s1172_s26 + $0x230] sm:$0xff]  ;;  %v198_v24 = vld [vmem:[%s1172_s26 + $0x238] sm:$0xff] }
  0x1a   : > { %167 = vst [vmem:[%s1177_s27 + $0x38] sm:$0xff] %v166_v8  ;;  %v200_v25 = vld [vmem:[%s1172_s26 + $0x240] sm:$0xff]  ;;  %v202_v26 = vld [vmem:[%s1172_s26 + $0x248] sm:$0xff]  ;;  %v204_v27 = vld [vmem:[%s1172_s26 + $0x250] sm:$0xff] }
  0x1b   : > { %169 = vst [vmem:[%s1177_s27 + $0x40] sm:$0xff] %v168_v9  ;;  %v206_v28 = vld [vmem:[%s1172_s26 + $0x258] sm:$0xff]  ;;  %v208_v29 = vld [vmem:[%s1172_s26 + $0x260] sm:$0xff]  ;;  %v210_v30 = vld [vmem:[%s1172_s26 + $0x268] sm:$0xff] }
  0x1c   : > { %171 = vst [vmem:[%s1177_s27 + $0x48] sm:$0xff] %v170_v10  ;;  %v212_v31 = vld [vmem:[%s1172_s26 + $0x270] sm:$0xff]  ;;  %v214_v32 = vld [vmem:[%s1172_s26 + $0x278] sm:$0xff]  ;;  %v216_v33 = vld [vmem:[%s1172_s26 + $0x400] sm:$0xff] }
  0x1d   : > { %173 = vst [vmem:[%s1177_s27 + $0x50] sm:$0xff] %v172_v11  ;;  %v218_v34 = vld [vmem:[%s1172_s26 + $0x408] sm:$0xff]  ;;  %v220_v35 = vld [vmem:[%s1172_s26 + $0x410] sm:$0xff]  ;;  %v222_v36 = vld [vmem:[%s1172_s26 + $0x418] sm:$0xff] }
  0x1e   : > { %175 = vst [vmem:[%s1177_s27 + $0x58] sm:$0xff] %v174_v12  ;;  %v224_v37 = vld [vmem:[%s1172_s26 + $0x420] sm:$0xff]  ;;  %v226_v38 = vld [vmem:[%s1172_s26 + $0x428] sm:$0xff]  ;;  %v228_v39 = vld [vmem:[%s1172_s26 + $0x430] sm:$0xff] }
  0x1f   : > { %177 = vst [vmem:[%s1177_s27 + $0x60] sm:$0xff] %v176_v13  ;;  %v230_v40 = vld [vmem:[%s1172_s26 + $0x438] sm:$0xff]  ;;  %v232_v41 = vld [vmem:[%s1172_s26 + $0x440] sm:$0xff]  ;;  %v234_v42 = vld [vmem:[%s1172_s26 + $0x448] sm:$0xff] }
  0x20   : > { %179 = vst [vmem:[%s1177_s27 + $0x68] sm:$0xff] %v178_v14  ;;  %v236_v43 = vld [vmem:[%s1172_s26 + $0x450] sm:$0xff]  ;;  %v238_v44 = vld [vmem:[%s1172_s26 + $0x458] sm:$0xff]  ;;  %v240_v45 = vld [vmem:[%s1172_s26 + $0x460] sm:$0xff] }
  0x21   : > { %181 = vst [vmem:[%s1177_s27 + $0x70] sm:$0xff] %v180_v15  ;;  %v242_v46 = vld [vmem:[%s1172_s26 + $0x468] sm:$0xff]  ;;  %v244_v47 = vld [vmem:[%s1172_s26 + $0x470] sm:$0xff]  ;;  %v246_v48 = vld [vmem:[%s1172_s26 + $0x478] sm:$0xff] }
  0x22   : > { %183 = vst [vmem:[%s1177_s27 + $0x78] sm:$0xff] %v182_v16  ;;  %v248_v49 = vld [vmem:[%s1172_s26 + $0x600] sm:$0xff]  ;;  %v250_v50 = vld [vmem:[%s1172_s26 + $0x608] sm:$0xff]  ;;  %v252_v51 = vld [vmem:[%s1172_s26 + $0x610] sm:$0xff] }
  0x23   : > { %185 = vst [vmem:[%s1177_s27 + $0x80] sm:$0xff] %v184_v17  ;;  %v254_v52 = vld [vmem:[%s1172_s26 + $0x618] sm:$0xff]  ;;  %v256_v53 = vld [vmem:[%s1172_s26 + $0x620] sm:$0xff]  ;;  %v258_v54 = vld [vmem:[%s1172_s26 + $0x628] sm:$0xff] }
  0x24   : > { %187 = vst [vmem:[%s1177_s27 + $0x88] sm:$0xff] %v186_v18  ;;  %v260_v55 = vld [vmem:[%s1172_s26 + $0x630] sm:$0xff]  ;;  %v262_v56 = vld [vmem:[%s1172_s26 + $0x638] sm:$0xff]  ;;  %v264_v57 = vld [vmem:[%s1172_s26 + $0x640] sm:$0xff] }
  0x25   : > { %189 = vst [vmem:[%s1177_s27 + $0x90] sm:$0xff] %v188_v19  ;;  %v266_v58 = vld [vmem:[%s1172_s26 + $0x648] sm:$0xff]  ;;  %v268_v59 = vld [vmem:[%s1172_s26 + $0x650] sm:$0xff]  ;;  %v270_v60 = vld [vmem:[%s1172_s26 + $0x658] sm:$0xff] }
  0x26   : > { %191 = vst [vmem:[%s1177_s27 + $0x98] sm:$0xff] %v190_v20  ;;  %v272_v61 = vld [vmem:[%s1172_s26 + $0x660] sm:$0xff]  ;;  %v274_v62 = vld [vmem:[%s1172_s26 + $0x668] sm:$0xff]  ;;  %v276_v63 = vld [vmem:[%s1172_s26 + $0x670] sm:$0xff] }
  0x27   : > { %193 = vst [vmem:[%s1177_s27 + $0xa0] sm:$0xff] %v192_v21  ;;  %v278_v0 = vld [vmem:[%s1172_s26 + $0x678] sm:$0xff]  ;;  %v280_v1 = vld [vmem:[%s1172_s26 + $0x800] sm:$0xff]  ;;  %v282_v2 = vld [vmem:[%s1172_s26 + $0x808] sm:$0xff] }
  0x28   : > { %195 = vst [vmem:[%s1177_s27 + $0xa8] sm:$0xff] %v194_v22  ;;  %v284_v3 = vld [vmem:[%s1172_s26 + $0x810] sm:$0xff]  ;;  %v286_v4 = vld [vmem:[%s1172_s26 + $0x818] sm:$0xff]  ;;  %v288_v5 = vld [vmem:[%s1172_s26 + $0x820] sm:$0xff] }
  0x29   : > { %197 = vst [vmem:[%s1177_s27 + $0xb0] sm:$0xff] %v196_v23  ;;  %v290_v6 = vld [vmem:[%s1172_s26 + $0x828] sm:$0xff]  ;;  %v292_v7 = vld [vmem:[%s1172_s26 + $0x830] sm:$0xff]  ;;  %v294_v8 = vld [vmem:[%s1172_s26 + $0x838] sm:$0xff] }
  0x2a   : > { %199 = vst [vmem:[%s1177_s27 + $0xb8] sm:$0xff] %v198_v24  ;;  %v296_v9 = vld [vmem:[%s1172_s26 + $0x840] sm:$0xff]  ;;  %v298_v10 = vld [vmem:[%s1172_s26 + $0x848] sm:$0xff]  ;;  %v300_v11 = vld [vmem:[%s1172_s26 + $0x850] sm:$0xff] }
  0x2b   : > { %201 = vst [vmem:[%s1177_s27 + $0xc0] sm:$0xff] %v200_v25  ;;  %v302_v12 = vld [vmem:[%s1172_s26 + $0x858] sm:$0xff]  ;;  %v304_v13 = vld [vmem:[%s1172_s26 + $0x860] sm:$0xff]  ;;  %v306_v14 = vld [vmem:[%s1172_s26 + $0x868] sm:$0xff] }
  0x2c   : > { %203 = vst [vmem:[%s1177_s27 + $0xc8] sm:$0xff] %v202_v26  ;;  %v308_v15 = vld [vmem:[%s1172_s26 + $0x870] sm:$0xff]  ;;  %v310_v16 = vld [vmem:[%s1172_s26 + $0x878] sm:$0xff]  ;;  %v312_v17 = vld [vmem:[%s1172_s26 + $0xa00] sm:$0xff] }
  0x2d   : > { %205 = vst [vmem:[%s1177_s27 + $0xd0] sm:$0xff] %v204_v27  ;;  %v314_v18 = vld [vmem:[%s1172_s26 + $0xa08] sm:$0xff]  ;;  %v316_v19 = vld [vmem:[%s1172_s26 + $0xa10] sm:$0xff]  ;;  %v318_v20 = vld [vmem:[%s1172_s26 + $0xa18] sm:$0xff] }
  0x2e   : > { %207 = vst [vmem:[%s1177_s27 + $0xd8] sm:$0xff] %v206_v28  ;;  %v320_v21 = vld [vmem:[%s1172_s26 + $0xa20] sm:$0xff]  ;;  %v322_v22 = vld [vmem:[%s1172_s26 + $0xa28] sm:$0xff]  ;;  %v324_v23 = vld [vmem:[%s1172_s26 + $0xa30] sm:$0xff] }
  0x2f   : > { %209 = vst [vmem:[%s1177_s27 + $0xe0] sm:$0xff] %v208_v29  ;;  %v326_v24 = vld [vmem:[%s1172_s26 + $0xa38] sm:$0xff]  ;;  %v328_v25 = vld [vmem:[%s1172_s26 + $0xa40] sm:$0xff]  ;;  %v330_v26 = vld [vmem:[%s1172_s26 + $0xa48] sm:$0xff] }
  0x30   : > { %211 = vst [vmem:[%s1177_s27 + $0xe8] sm:$0xff] %v210_v30  ;;  %v332_v27 = vld [vmem:[%s1172_s26 + $0xa50] sm:$0xff]  ;;  %v334_v28 = vld [vmem:[%s1172_s26 + $0xa58] sm:$0xff]  ;;  %v336_v29 = vld [vmem:[%s1172_s26 + $0xa60] sm:$0xff] }
  0x31   : > { %213 = vst [vmem:[%s1177_s27 + $0xf0] sm:$0xff] %v212_v31  ;;  %v338_v30 = vld [vmem:[%s1172_s26 + $0xa68] sm:$0xff]  ;;  %v340_v31 = vld [vmem:[%s1172_s26 + $0xa70] sm:$0xff] }
  0x32   : > { %215 = vst [vmem:[%s1177_s27 + $0xf8] sm:$0xff] %v214_v32  ;;  %v342_v32 = vld [vmem:[%s1172_s26 + $0xa78] sm:$0xff] }
  0x33   : > { %217 = vst [vmem:[%s1177_s27 + $0x100] sm:$0xff] %v216_v33  ;;  %v344_v33 = vld [vmem:[%s1172_s26 + $0xc00] sm:$0xff] }
  0x34   : > { %219 = vst [vmem:[%s1177_s27 + $0x108] sm:$0xff] %v218_v34  ;;  %v346_v34 = vld [vmem:[%s1172_s26 + $0xc08] sm:$0xff] }
  0x35   : > { %221 = vst [vmem:[%s1177_s27 + $0x110] sm:$0xff] %v220_v35  ;;  %v348_v35 = vld [vmem:[%s1172_s26 + $0xc10] sm:$0xff] }
  0x36   : > { %223 = vst [vmem:[%s1177_s27 + $0x118] sm:$0xff] %v222_v36  ;;  %v350_v36 = vld [vmem:[%s1172_s26 + $0xc18] sm:$0xff] }
  0x37   : > { %225 = vst [vmem:[%s1177_s27 + $0x120] sm:$0xff] %v224_v37  ;;  %v352_v37 = vld [vmem:[%s1172_s26 + $0xc20] sm:$0xff] }
  0x38   : > { %227 = vst [vmem:[%s1177_s27 + $0x128] sm:$0xff] %v226_v38  ;;  %v354_v38 = vld [vmem:[%s1172_s26 + $0xc28] sm:$0xff] }
  0x39   : > { %229 = vst [vmem:[%s1177_s27 + $0x130] sm:$0xff] %v228_v39  ;;  %v356_v39 = vld [vmem:[%s1172_s26 + $0xc30] sm:$0xff] }
  0x3a   : > { %231 = vst [vmem:[%s1177_s27 + $0x138] sm:$0xff] %v230_v40  ;;  %v358_v40 = vld [vmem:[%s1172_s26 + $0xc38] sm:$0xff] }
  0x3b   : > { %233 = vst [vmem:[%s1177_s27 + $0x140] sm:$0xff] %v232_v41  ;;  %v360_v41 = vld [vmem:[%s1172_s26 + $0xc40] sm:$0xff] }
  0x3c   : > { %235 = vst [vmem:[%s1177_s27 + $0x148] sm:$0xff] %v234_v42  ;;  %v362_v42 = vld [vmem:[%s1172_s26 + $0xc48] sm:$0xff] }
  0x3d   : > { %237 = vst [vmem:[%s1177_s27 + $0x150] sm:$0xff] %v236_v43  ;;  %v364_v43 = vld [vmem:[%s1172_s26 + $0xc50] sm:$0xff] }
  0x3e   : > { %239 = vst [vmem:[%s1177_s27 + $0x158] sm:$0xff] %v238_v44  ;;  %v366_v44 = vld [vmem:[%s1172_s26 + $0xc58] sm:$0xff] }
  0x3f   : > { %241 = vst [vmem:[%s1177_s27 + $0x160] sm:$0xff] %v240_v45  ;;  %v368_v45 = vld [vmem:[%s1172_s26 + $0xc60] sm:$0xff] }
  0x40   : > { %243 = vst [vmem:[%s1177_s27 + $0x168] sm:$0xff] %v242_v46  ;;  %v370_v46 = vld [vmem:[%s1172_s26 + $0xc68] sm:$0xff] }
  0x41   : > { %245 = vst [vmem:[%s1177_s27 + $0x170] sm:$0xff] %v244_v47  ;;  %v372_v47 = vld [vmem:[%s1172_s26 + $0xc70] sm:$0xff] }
  0x42   : > { %247 = vst [vmem:[%s1177_s27 + $0x178] sm:$0xff] %v246_v48  ;;  %v374_v48 = vld [vmem:[%s1172_s26 + $0xc78] sm:$0xff] }
  0x43   : > { %249 = vst [vmem:[%s1177_s27 + $0x180] sm:$0xff] %v248_v49 }
  0x44   : > { %251 = vst [vmem:[%s1177_s27 + $0x188] sm:$0xff] %v250_v50 }
  0x45   : > { %253 = vst [vmem:[%s1177_s27 + $0x190] sm:$0xff] %v252_v51 }
  0x46   : > { %255 = vst [vmem:[%s1177_s27 + $0x198] sm:$0xff] %v254_v52 }
  0x47   : > { %257 = vst [vmem:[%s1177_s27 + $0x1a0] sm:$0xff] %v256_v53 }
  0x48   : > { %259 = vst [vmem:[%s1177_s27 + $0x1a8] sm:$0xff] %v258_v54 }
  0x49   : > { %261 = vst [vmem:[%s1177_s27 + $0x1b0] sm:$0xff] %v260_v55 }
  0x4a   : > { %263 = vst [vmem:[%s1177_s27 + $0x1b8] sm:$0xff] %v262_v56 }
  0x4b   : > { %265 = vst [vmem:[%s1177_s27 + $0x1c0] sm:$0xff] %v264_v57 }
  0x4c   : > { %267 = vst [vmem:[%s1177_s27 + $0x1c8] sm:$0xff] %v266_v58 }
  0x4d   : > { %269 = vst [vmem:[%s1177_s27 + $0x1d0] sm:$0xff] %v268_v59 }
  0x4e   : > { %271 = vst [vmem:[%s1177_s27 + $0x1d8] sm:$0xff] %v270_v60 }
  0x4f   : > { %273 = vst [vmem:[%s1177_s27 + $0x1e0] sm:$0xff] %v272_v61 }
  0x50   : > { %275 = vst [vmem:[%s1177_s27 + $0x1e8] sm:$0xff] %v274_v62 }
  0x51   : > { %277 = vst [vmem:[%s1177_s27 + $0x1f0] sm:$0xff] %v276_v63 }
  0x52   : > { %279 = vst [vmem:[%s1177_s27 + $0x1f8] sm:$0xff] %v278_v0 }
  0x53   : > { %281 = vst [vmem:[%s1177_s27 + $0x200] sm:$0xff] %v280_v1 }
  0x54   : > { %283 = vst [vmem:[%s1177_s27 + $0x208] sm:$0xff] %v282_v2 }
  0x55   : > { %285 = vst [vmem:[%s1177_s27 + $0x210] sm:$0xff] %v284_v3 }
  0x56   : > { %287 = vst [vmem:[%s1177_s27 + $0x218] sm:$0xff] %v286_v4 }
  0x57   : > { %289 = vst [vmem:[%s1177_s27 + $0x220] sm:$0xff] %v288_v5 }
  0x58   : > { %291 = vst [vmem:[%s1177_s27 + $0x228] sm:$0xff] %v290_v6 }
  0x59   : > { %293 = vst [vmem:[%s1177_s27 + $0x230] sm:$0xff] %v292_v7 }
  0x5a   : > { %295 = vst [vmem:[%s1177_s27 + $0x238] sm:$0xff] %v294_v8 }
  0x5b   : > { %297 = vst [vmem:[%s1177_s27 + $0x240] sm:$0xff] %v296_v9 }
  0x5c   : > { %299 = vst [vmem:[%s1177_s27 + $0x248] sm:$0xff] %v298_v10 }
  0x5d   : > { %301 = vst [vmem:[%s1177_s27 + $0x250] sm:$0xff] %v300_v11 }
  0x5e   : > { %303 = vst [vmem:[%s1177_s27 + $0x258] sm:$0xff] %v302_v12 }
  0x5f   : > { %305 = vst [vmem:[%s1177_s27 + $0x260] sm:$0xff] %v304_v13 }
  0x60   : > { %307 = vst [vmem:[%s1177_s27 + $0x268] sm:$0xff] %v306_v14 }
  0x61   : > { %309 = vst [vmem:[%s1177_s27 + $0x270] sm:$0xff] %v308_v15 }
  0x62   : > { %311 = vst [vmem:[%s1177_s27 + $0x278] sm:$0xff] %v310_v16 }
  0x63   : > { %313 = vst [vmem:[%s1177_s27 + $0x280] sm:$0xff] %v312_v17 }
  0x64   : > { %315 = vst [vmem:[%s1177_s27 + $0x288] sm:$0xff] %v314_v18 }
  0x65   : > { %317 = vst [vmem:[%s1177_s27 + $0x290] sm:$0xff] %v316_v19 }
  0x66   : > { %319 = vst [vmem:[%s1177_s27 + $0x298] sm:$0xff] %v318_v20 }
  0x67   : > { %321 = vst [vmem:[%s1177_s27 + $0x2a0] sm:$0xff] %v320_v21 }
  0x68   : > { %323 = vst [vmem:[%s1177_s27 + $0x2a8] sm:$0xff] %v322_v22 }
  0x69   : > { %325 = vst [vmem:[%s1177_s27 + $0x2b0] sm:$0xff] %v324_v23 }
  0x6a   : > { %327 = vst [vmem:[%s1177_s27 + $0x2b8] sm:$0xff] %v326_v24 }
  0x6b   : > { %329 = vst [vmem:[%s1177_s27 + $0x2c0] sm:$0xff] %v328_v25 }
  0x6c   : > { %331 = vst [vmem:[%s1177_s27 + $0x2c8] sm:$0xff] %v330_v26 }
  0x6d   : > { %333 = vst [vmem:[%s1177_s27 + $0x2d0] sm:$0xff] %v332_v27 }
  0x6e   : > { %335 = vst [vmem:[%s1177_s27 + $0x2d8] sm:$0xff] %v334_v28 }
  0x6f   : > { %337 = vst [vmem:[%s1177_s27 + $0x2e0] sm:$0xff] %v336_v29 }
  0x70   : > { %339 = vst [vmem:[%s1177_s27 + $0x2e8] sm:$0xff] %v338_v30 }
  0x71   : > { %341 = vst [vmem:[%s1177_s27 + $0x2f0] sm:$0xff] %v340_v31 }
  0x72   : > { %343 = vst [vmem:[%s1177_s27 + $0x2f8] sm:$0xff] %v342_v32 }
  0x73   : > { %345 = vst [vmem:[%s1177_s27 + $0x300] sm:$0xff] %v344_v33 }
  0x74   : > { %347 = vst [vmem:[%s1177_s27 + $0x308] sm:$0xff] %v346_v34 }
  0x75   : > { %349 = vst [vmem:[%s1177_s27 + $0x310] sm:$0xff] %v348_v35 }
  0x76   : > { %351 = vst [vmem:[%s1177_s27 + $0x318] sm:$0xff] %v350_v36 }
  0x77   : > { %353 = vst [vmem:[%s1177_s27 + $0x320] sm:$0xff] %v352_v37 }
  0x78   : > { %355 = vst [vmem:[%s1177_s27 + $0x328] sm:$0xff] %v354_v38 }
  0x79   : > { %357 = vst [vmem:[%s1177_s27 + $0x330] sm:$0xff] %v356_v39 }
  0x7a   : > { %359 = vst [vmem:[%s1177_s27 + $0x338] sm:$0xff] %v358_v40 }
  0x7b   : > { %361 = vst [vmem:[%s1177_s27 + $0x340] sm:$0xff] %v360_v41 }
  0x7c   : > { %363 = vst [vmem:[%s1177_s27 + $0x348] sm:$0xff] %v362_v42 }
  0x7d   : > { %365 = vst [vmem:[%s1177_s27 + $0x350] sm:$0xff] %v364_v43 }
  0x7e   : > { %367 = vst [vmem:[%s1177_s27 + $0x358] sm:$0xff] %v366_v44 }
  0x7f   : > { %369 = vst [vmem:[%s1177_s27 + $0x360] sm:$0xff] %v368_v45 }
  0x80   : > { %371 = vst [vmem:[%s1177_s27 + $0x368] sm:$0xff] %v370_v46 }
  0x81   : > { %373 = vst [vmem:[%s1177_s27 + $0x370] sm:$0xff] %v372_v47 }
  0x82   : > { %375 = vst [vmem:[%s1177_s27 + $0x378] sm:$0xff] %v374_v48 }
  0x83 PF: > { %p1025_p5 = scmp.ge.s32.totalorder %s1112_s16, 1  ;;  %p380_p6 = scmp.lt.s32.totalorder %s1112_s16, 5 }
  0x85   : > { %p381_p7 = pnand %p1025_p5, %p380_p6 }
  0x86   : > { %s387_s28 = sand.u32 (!%p381_p7), 1, %s1104_s14   ;;  %s1026_s6 = sshll.u32 (!%p381_p7), %s1019_s2, 4 }
  0x87   : > { %384 = sbr.rel (%p381_p7) target bundleno = 342 (0x156), region = 51  ;;  %p411_p8 = scmp.lt.s32.totalorder (!%p381_p7), %s1026_s6, 63 }
  0x88   : > { %s1063_s29 = smul.u32 (!%p381_p7), 896, %s387_s28 }
  0x8a   : > { %s1403_s30 = scalar_lea.vmem (!%p381_p7), [#allocation3], %s1063_s29 }
  0x8c   : > { %vm539_vm0 = vcmask 1045504   ;;  %v514_v49 = vld [vmem:[%s1403_s30 + $0x310] sm:$0x3f]  ;;  %v515_v50 = vld [vmem:[%s1403_s30 + $0x318] sm:$0x3f]  ;;  %v496_v57 = vld [vmem:[%s1403_s30 + $0x280] sm:$0xff] }
  0x8d   : > { %v498_v51 = vld [vmem:[%s1403_s30 + $0x290] sm:$0xff]  ;;  %1031 = vmatpush.msk.msra.mxu2 %vm539_vm0, %v514_v49  ;;  %1033 = vmatpush.msk.msra.mxu3 %vm539_vm0, %v515_v50  ;;  %v499_v52 = vld [vmem:[%s1403_s30 + $0x298] sm:$0xff]  ;;  %v512_v55 = vld [vmem:[%s1403_s30 + $0x300] sm:$0x3f]  ;;  %vm535_vm1 = vcmask 441344   ;;  %vm944_vm2 = vcmask 1044484  }
  0x8e   : > { %v482_v53 = vld [vmem:[%s1403_s30 + $0x210] sm:$0xff]  ;;  %v483_v54 = vld [vmem:[%s1403_s30 + $0x218] sm:$0xff]  ;;  %v513_v56 = vld [vmem:[%s1403_s30 + $0x308] sm:$0x3f]  ;;  %1027 = vmatpush.msk.msra.mxu0 %vm539_vm0, %v512_v55  ;;  %vm946_vm3 = vcmask 1046534   ;;  %vm948_vm4 = vcmask 1045508  }
  0x8f   : > { %638 = vmatpush.msra.mxu2 %v498_v51  ;;  %658 = vmatpush.msra.mxu3 %v499_v52  ;;  %v497_v58 = vld [vmem:[%s1403_s30 + $0x288] sm:$0xff]  ;;  %v466_v59 = vld [vmem:[%s1403_s30 + $0x190] sm:$0xff]  ;;  %v467_v60 = vld [vmem:[%s1403_s30 + $0x198] sm:$0xff]  ;;  %vm940_vm5 = vcmask 1042434   ;;  %vm938_vm6 = vcmask 1040384   ;;  %s1612_s6 = smov (!%p411_p8, %s1026_s6), 63 }
  0x90   : > { %1029 = vmatpush.msk.msra.mxu1 %vm539_vm0, %v513_v56  ;;  %v480_v61 = vld [vmem:[%s1403_s30 + $0x200] sm:$0xff]  ;;  %v481_v62 = vld [vmem:[%s1403_s30 + $0x208] sm:$0xff]  ;;  %598 = vmatpush.msra.mxu0 %v496_v57  ;;  %v450_v63 = vld [vmem:[%s1403_s30 + $0x110] sm:$0xff]  ;;  %vm942_vm7 = vcmask 1041408   ;;  %vm950_vm8 = vcmask 1043456   ;;  %s1580_s9 = scalar_lea.vmem %s1607_s3, %s1612_s6 }
  0x91   : > { %639 = vmatpush.msra.mxu2 %v482_v53  ;;  %659 = vmatpush.msra.mxu3 %v483_v54  ;;  %v451_v0 = vld [vmem:[%s1403_s30 + $0x118] sm:$0xff]  ;;  %v464_v1 = vld [vmem:[%s1403_s30 + $0x180] sm:$0xff]  ;;  %v465_v2 = vld [vmem:[%s1403_s30 + $0x188] sm:$0xff] }
  0x92   : > { %618 = vmatpush.msra.mxu1 %v497_v58  ;;  %599 = vmatpush.msra.mxu0 %v480_v61  ;;  %v434_v3 = vld [vmem:[%s1403_s30 + $0x90] sm:$0xff]  ;;  %v435_v4 = vld [vmem:[%s1403_s30 + $0x98] sm:$0xff]  ;;  %v448_v5 = vld [vmem:[%s1403_s30 + $0x100] sm:$0xff] }
  0x93   : > { %640 = vmatpush.msra.mxu2 %v466_v59  ;;  %660 = vmatpush.msra.mxu3 %v467_v60  ;;  %v449_v6 = vld [vmem:[%s1403_s30 + $0x108] sm:$0xff]  ;;  %v418_v7 = vld [vmem:[%s1403_s30 + $0x10] sm:$0xff]  ;;  %v419_v8 = vld [vmem:[%s1403_s30 + $0x18] sm:$0xff] }
  0x94   : > { %619 = vmatpush.msra.mxu1 %v481_v62  ;;  %600 = vmatpush.msra.mxu0 %v464_v1  ;;  %v518_v9 = vld [vmem:[%s1403_s30 + $0x330] sm:$0x3f]  ;;  %v519_v10 = vld [vmem:[%s1403_s30 + $0x338] sm:$0x3f]  ;;  %v432_v11 = vld [vmem:[%s1403_s30 + $0x80] sm:$0xff]  ;;  %v1114_v1 = vmov 0  }
  0x95   : > { %641 = vmatpush.msra.mxu2 %v450_v63  ;;  %661 = vmatpush.msra.mxu3 %v451_v0  ;;  %v433_v12 = vld [vmem:[%s1403_s30 + $0x88] sm:$0xff]  ;;  %v502_v13 = vld [vmem:[%s1403_s30 + $0x2b0] sm:$0xff]  ;;  %v503_v14 = vld [vmem:[%s1403_s30 + $0x2b8] sm:$0xff] }
  0x96   : > { %620 = vmatpush.msra.mxu1 %v465_v2  ;;  %601 = vmatpush.msra.mxu0 %v448_v5  ;;  %v416_v15 = vld [vmem:[%s1403_s30] sm:$0xff]  ;;  %v417_v16 = vld [vmem:[%s1403_s30 + $0x8] sm:$0xff]  ;;  %v486_v17 = vld [vmem:[%s1403_s30 + $0x230] sm:$0xff] }
  0x97   : > { %642 = vmatpush.msra.mxu2 %v434_v3  ;;  %662 = vmatpush.msra.mxu3 %v435_v4  ;;  %v487_v18 = vld [vmem:[%s1403_s30 + $0x238] sm:$0xff]  ;;  %v516_v20 = vld [vmem:[%s1403_s30 + $0x320] sm:$0x3f]  ;;  %v517_v21 = vld [vmem:[%s1403_s30 + $0x328] sm:$0x3f] }
  0x98   : > { %621 = vmatpush.msra.mxu1 %v449_v6  ;;  %602 = vmatpush.msra.mxu0 %v432_v11  ;;  %v1448_v19 = vld [vmem:[%s1605_s1] sm:$0x1]  ;;  %v470_v22 = vld [vmem:[%s1403_s30 + $0x1b0] sm:$0xff]  ;;  %v500_v24 = vld [vmem:[%s1403_s30 + $0x2a0] sm:$0xff] }
  0x99   : > { %643 = vmatpush.msra.mxu2 %v418_v7  ;;  %663 = vmatpush.msra.mxu3 %v419_v8  ;;  %v471_v23 = vld [vmem:[%s1403_s30 + $0x1b8] sm:$0xff]  ;;  %v501_v25 = vld [vmem:[%s1403_s30 + $0x2a8] sm:$0xff]  ;;  %v454_v26 = vld [vmem:[%s1403_s30 + $0x130] sm:$0xff] }
  0x9a   : > { %622 = vmatpush.msra.mxu1 %v433_v12  ;;  %603 = vmatpush.msra.mxu0 %v416_v15  ;;  %v455_v27 = vld [vmem:[%s1403_s30 + $0x138] sm:$0xff]  ;;  %v484_v28 = vld [vmem:[%s1403_s30 + $0x220] sm:$0xff]  ;;  %v485_v29 = vld [vmem:[%s1403_s30 + $0x228] sm:$0xff] }
  0x9b   : > { %1039 = vmatpush.msk.msrb.mxu2 %vm539_vm0, %v518_v9  ;;  %1041 = vmatpush.msk.msrb.mxu3 %vm539_vm0, %v519_v10  ;;  %v438_v30 = vld [vmem:[%s1403_s30 + $0xb0] sm:$0xff]  ;;  %v439_v31 = vld [vmem:[%s1403_s30 + $0xb8] sm:$0xff]  ;;  %v468_v32 = vld [vmem:[%s1403_s30 + $0x1a0] sm:$0xff] }
  0x9c   : > { %623 = vmatpush.msra.mxu1 %v417_v16  ;;  %1032 = vmatmul.msk.f32.vlgmr.msra.gmra.mxu2 %vm535_vm1, %v1448_v19  ;;  %v469_v33 = vld [vmem:[%s1403_s30 + $0x1a8] sm:$0xff]  ;;  %v422_v34 = vld [vmem:[%s1403_s30 + $0x30] sm:$0xff]  ;;  %v423_v35 = vld [vmem:[%s1403_s30 + $0x38] sm:$0xff] }
  0x9d   : > { %718 = vmatpush.msrb.mxu2 %v502_v13  ;;  %738 = vmatpush.msrb.mxu3 %v503_v14  ;;  %v522_v36 = vld [vmem:[%s1403_s30 + $0x350] sm:$0x3f]  ;;  %v523_v37 = vld [vmem:[%s1403_s30 + $0x358] sm:$0x3f]  ;;  %v452_v38 = vld [vmem:[%s1403_s30 + $0x120] sm:$0xff] }
  0x9e   : > { %1034 = vmatmul.msk.f32.vlgmr.msra.gmra.mxu3 %vm535_vm1, %v1448_v19  ;;  %1035 = vmatpush.msk.msrb.mxu0 %vm539_vm0, %v516_v20  ;;  %v453_v39 = vld [vmem:[%s1403_s30 + $0x128] sm:$0xff]  ;;  %v506_v40 = vld [vmem:[%s1403_s30 + $0x2d0] sm:$0xff]  ;;  %v507_v41 = vld [vmem:[%s1403_s30 + $0x2d8] sm:$0xff] }
  0x9f   : > { %719 = vmatpush.msrb.mxu2 %v486_v17  ;;  %739 = vmatpush.msrb.mxu3 %v487_v18  ;;  %v436_v42 = vld [vmem:[%s1403_s30 + $0xa0] sm:$0xff]  ;;  %v437_v43 = vld [vmem:[%s1403_s30 + $0xa8] sm:$0xff]  ;;  %v490_v44 = vld [vmem:[%s1403_s30 + $0x250] sm:$0xff] }
  0xa0   : > { %1037 = vmatpush.msk.msrb.mxu1 %vm539_vm0, %v517_v21  ;;  %678 = vmatpush.msrb.mxu0 %v500_v24  ;;  %v491_v45 = vld [vmem:[%s1403_s30 + $0x258] sm:$0xff]  ;;  %v420_v46 = vld [vmem:[%s1403_s30 + $0x20] sm:$0xff]  ;;  %v421_v47 = vld [vmem:[%s1403_s30 + $0x28] sm:$0xff] }
  0xa1   : > { %720 = vmatpush.msrb.mxu2 %v470_v22  ;;  %740 = vmatpush.msrb.mxu3 %v471_v23  ;;  %v520_v48 = vld [vmem:[%s1403_s30 + $0x340] sm:$0x3f]  ;;  %v521_v49 = vld [vmem:[%s1403_s30 + $0x348] sm:$0x3f]  ;;  %v474_v50 = vld [vmem:[%s1403_s30 + $0x1d0] sm:$0xff] }
  0xa2   : > { %698 = vmatpush.msrb.mxu1 %v501_v25  ;;  %679 = vmatpush.msrb.mxu0 %v484_v28  ;;  %v475_v51 = vld [vmem:[%s1403_s30 + $0x1d8] sm:$0xff]  ;;  %v504_v52 = vld [vmem:[%s1403_s30 + $0x2c0] sm:$0xff]  ;;  %v505_v53 = vld [vmem:[%s1403_s30 + $0x2c8] sm:$0xff] }
  0xa3   : > { %721 = vmatpush.msrb.mxu2 %v454_v26  ;;  %741 = vmatpush.msrb.mxu3 %v455_v27  ;;  %v458_v54 = vld [vmem:[%s1403_s30 + $0x150] sm:$0xff]  ;;  %v459_v55 = vld [vmem:[%s1403_s30 + $0x158] sm:$0xff]  ;;  %v488_v56 = vld [vmem:[%s1403_s30 + $0x240] sm:$0xff] }
  0xa4   : > { %699 = vmatpush.msrb.mxu1 %v485_v29  ;;  %1028 = vmatmul.msk.f32.vlgmr.msra.gmra.mxu0 %vm535_vm1, %v1448_v19  ;;  %v489_v57 = vld [vmem:[%s1403_s30 + $0x248] sm:$0xff]  ;;  %v442_v58 = vld [vmem:[%s1403_s30 + $0xd0] sm:$0xff]  ;;  %v443_v59 = vld [vmem:[%s1403_s30 + $0xd8] sm:$0xff] }
  0xa5   : > { %722 = vmatpush.msrb.mxu2 %v438_v30  ;;  %742 = vmatpush.msrb.mxu3 %v439_v31  ;;  %v472_v60 = vld [vmem:[%s1403_s30 + $0x1c0] sm:$0xff]  ;;  %v473_v61 = vld [vmem:[%s1403_s30 + $0x1c8] sm:$0xff]  ;;  %v426_v62 = vld [vmem:[%s1403_s30 + $0x50] sm:$0xff] }
  0xa6   : > { %1030 = vmatmul.msk.f32.vlgmr.msra.gmra.mxu1 %vm535_vm1, %v1448_v19  ;;  %680 = vmatpush.msrb.mxu0 %v468_v32  ;;  %v427_v63 = vld [vmem:[%s1403_s30 + $0x58] sm:$0xff]  ;;  %v526_v2 = vld [vmem:[%s1403_s30 + $0x370] sm:$0x3f]  ;;  %v456_v4 = vld [vmem:[%s1403_s30 + $0x140] sm:$0xff] }
  0xa7   : > { %700 = vmatpush.msrb.mxu1 %v469_v33  ;;  %723 = vmatpush.msrb.mxu2 %v422_v34  ;;  %v528_v0 = vld [vmem:[#allocation2] sm:$0x1]  ;;  %v527_v3 = vld [vmem:[%s1403_s30 + $0x378] sm:$0x3f]  ;;  %v457_v5 = vld [vmem:[%s1403_s30 + $0x148] sm:$0xff] }
  0xa8   : > { %743 = vmatpush.msrb.mxu3 %v423_v35  ;;  %1040 = vmatmul.msk.f32.vlgmr.msrb.gmra.mxu2 %vm535_vm1, %v1448_v19  ;;  %v510_v6 = vld [vmem:[%s1403_s30 + $0x2f0] sm:$0xff]  ;;  %v511_v7 = vld [vmem:[%s1403_s30 + $0x2f8] sm:$0xff]  ;;  %v440_v8 = vld [vmem:[%s1403_s30 + $0xc0] sm:$0xff] }
  0xa9   : > { %1042 = vmatmul.msk.f32.vlgmr.msrb.gmra.mxu3 %vm535_vm1, %v1448_v19  ;;  %1047 = vmatpush.msk.msra.mxu2 %vm539_vm0, %v522_v36  ;;  %v441_v9 = vld [vmem:[%s1403_s30 + $0xc8] sm:$0xff]  ;;  %v494_v10 = vld [vmem:[%s1403_s30 + $0x270] sm:$0xff]  ;;  %v495_v11 = vld [vmem:[%s1403_s30 + $0x278] sm:$0xff] }
  0xaa   : > { %1049 = vmatpush.msk.msra.mxu3 %vm539_vm0, %v523_v37  ;;  %681 = vmatpush.msrb.mxu0 %v452_v38  ;;  %v424_v12 = vld [vmem:[%s1403_s30 + $0x40] sm:$0xff]  ;;  %v425_v13 = vld [vmem:[%s1403_s30 + $0x48] sm:$0xff]  ;;  %v478_v16 = vld [vmem:[%s1403_s30 + $0x1f0] sm:$0xff] }
  0xab   : > { %701 = vmatpush.msrb.mxu1 %v453_v39  ;;  %798 = vmatpush.msra.mxu2 %v506_v40  ;;  %v524_v14 = vld [vmem:[%s1403_s30 + $0x360] sm:$0x3f]  ;;  %v525_v15 = vld [vmem:[%s1403_s30 + $0x368] sm:$0x3f]  ;;  %v479_v17 = vld [vmem:[%s1403_s30 + $0x1f8] sm:$0xff] }
  0xac   : > { %818 = vmatpush.msra.mxu3 %v507_v41  ;;  %682 = vmatpush.msrb.mxu0 %v436_v42  ;;  %v508_v18 = vld [vmem:[%s1403_s30 + $0x2e0] sm:$0xff]  ;;  %v509_v20 = vld [vmem:[%s1403_s30 + $0x2e8] sm:$0xff]  ;;  %v462_v21 = vld [vmem:[%s1403_s30 + $0x170] sm:$0xff] }
  0xad   : > { %702 = vmatpush.msrb.mxu1 %v437_v43  ;;  %799 = vmatpush.msra.mxu2 %v490_v44  ;;  %v463_v22 = vld [vmem:[%s1403_s30 + $0x178] sm:$0xff]  ;;  %v492_v23 = vld [vmem:[%s1403_s30 + $0x260] sm:$0xff]  ;;  %v493_v24 = vld [vmem:[%s1403_s30 + $0x268] sm:$0xff] }
  0xae   : > { %819 = vmatpush.msra.mxu3 %v491_v45  ;;  %683 = vmatpush.msrb.mxu0 %v420_v46  ;;  %v446_v25 = vld [vmem:[%s1403_s30 + $0xf0] sm:$0xff]  ;;  %v447_v26 = vld [vmem:[%s1403_s30 + $0xf8] sm:$0xff]  ;;  %v476_v27 = vld [vmem:[%s1403_s30 + $0x1e0] sm:$0xff] }
  0xaf   : > { %703 = vmatpush.msrb.mxu1 %v421_v47  ;;  %1036 = vmatmul.msk.f32.vlgmr.msrb.gmra.mxu0 %vm535_vm1, %v1448_v19  ;;  %v477_v28 = vld [vmem:[%s1403_s30 + $0x1e8] sm:$0xff]  ;;  %v430_v29 = vld [vmem:[%s1403_s30 + $0x70] sm:$0xff]  ;;  %v431_v30 = vld [vmem:[%s1403_s30 + $0x78] sm:$0xff] }
  0xb0   : > { %1038 = vmatmul.msk.f32.vlgmr.msrb.gmra.mxu1 %vm535_vm1, %v1448_v19  ;;  %1043 = vmatpush.msk.msra.mxu0 %vm539_vm0, %v520_v48  ;;  %v460_v31 = vld [vmem:[%s1403_s30 + $0x160] sm:$0xff]  ;;  %v461_v32 = vld [vmem:[%s1403_s30 + $0x168] sm:$0xff] }
  0xb1   : > { %1045 = vmatpush.msk.msra.mxu1 %vm539_vm0, %v521_v49  ;;  %800 = vmatpush.msra.mxu2 %v474_v50  ;;  %v444_v33 = vld [vmem:[%s1403_s30 + $0xe0] sm:$0xff]  ;;  %v445_v34 = vld [vmem:[%s1403_s30 + $0xe8] sm:$0xff] }
  0xb2   : > { %820 = vmatpush.msra.mxu3 %v475_v51  ;;  %758 = vmatpush.msra.mxu0 %v504_v52  ;;  %v428_v35 = vld [vmem:[%s1403_s30 + $0x60] sm:$0xff]  ;;  %v429_v36 = vld [vmem:[%s1403_s30 + $0x68] sm:$0xff] }
  0xb3   : > { %778 = vmatpush.msra.mxu1 %v505_v53  ;;  %801 = vmatpush.msra.mxu2 %v458_v54 }
  0xb4   : > { %821 = vmatpush.msra.mxu3 %v459_v55  ;;  %759 = vmatpush.msra.mxu0 %v488_v56 }
  0xb5   : > { %779 = vmatpush.msra.mxu1 %v489_v57  ;;  %802 = vmatpush.msra.mxu2 %v442_v58 }
  0xb6   : > { %822 = vmatpush.msra.mxu3 %v443_v59  ;;  %1089 = vset.pattern.permute.xlu0 %v1114_v1 }
  0xb7   : > { %760 = vmatpush.msra.mxu0 %v472_v60  ;;  %780 = vmatpush.msra.mxu1 %v473_v61 }
  0xb8   : > { %803 = vmatpush.msra.mxu2 %v426_v62  ;;  %823 = vmatpush.msra.mxu3 %v427_v63 }
  0xb9   : > { %531 = vperm.xlu0 %1089, %v528_v0   ;;  %761 = vmatpush.msra.mxu0 %v456_v4 }
  0xba   : > { %1055 = vmatpush.msk.msrb.mxu2 %vm539_vm0, %v526_v2  ;;  %1057 = vmatpush.msk.msrb.mxu3 %vm539_vm0, %v527_v3 }
  0xbb   : > { %781 = vmatpush.msra.mxu1 %v457_v5  ;;  %762 = vmatpush.msra.mxu0 %v440_v8 }
  0xbc   : > { %878 = vmatpush.msrb.mxu2 %v510_v6  ;;  %898 = vmatpush.msrb.mxu3 %v511_v7 }
  0xbd   : > { %782 = vmatpush.msra.mxu1 %v441_v9  ;;  %1048 = vmatmul.msk.f32.vlgmr.msra.gmra.mxu2 %vm535_vm1, %v1448_v19 }
  0xbe   : > { %1050 = vmatmul.msk.f32.vlgmr.msra.gmra.mxu3 %vm535_vm1, %v1448_v19  ;;  %879 = vmatpush.msrb.mxu2 %v494_v10 }
  0xbf   : > { %899 = vmatpush.msrb.mxu3 %v495_v11  ;;  %763 = vmatpush.msra.mxu0 %v424_v12 }
  0xc0   : > { %783 = vmatpush.msra.mxu1 %v425_v13  ;;  %880 = vmatpush.msrb.mxu2 %v478_v16 }
  0xc1   : > { %1051 = vmatpush.msk.msrb.mxu0 %vm539_vm0, %v524_v14  ;;  %900 = vmatpush.msrb.mxu3 %v479_v17 }
  0xc2   : > { %1053 = vmatpush.msk.msrb.mxu1 %vm539_vm0, %v525_v15  ;;  %881 = vmatpush.msrb.mxu2 %v462_v21 }
  0xc3   : > { %838 = vmatpush.msrb.mxu0 %v508_v18  ;;  %901 = vmatpush.msrb.mxu3 %v463_v22 }
  0xc4   : > { %858 = vmatpush.msrb.mxu1 %v509_v20  ;;  %882 = vmatpush.msrb.mxu2 %v446_v25 }
  0xc5   : > { %1046 = vmatmul.msk.f32.vlgmr.msra.gmra.mxu1 %vm535_vm1, %v1448_v19  ;;  %839 = vmatpush.msrb.mxu0 %v492_v23 }
  0xc6   : > { %859 = vmatpush.msrb.mxu1 %v493_v24  ;;  %902 = vmatpush.msrb.mxu3 %v447_v26 }
  0xc7   : > { %1044 = vmatmul.msk.f32.vlgmr.msra.gmra.mxu0 %vm535_vm1, %v1448_v19  ;;  %883 = vmatpush.msrb.mxu2 %v430_v29 }
  0xc8   : > { %840 = vmatpush.msrb.mxu0 %v476_v27  ;;  %860 = vmatpush.msrb.mxu1 %v477_v28 }
  0xc9   : > { %903 = vmatpush.msrb.mxu3 %v431_v30  ;;  %1056 = vmatmul.msk.f32.vlgmr.msrb.gmra.mxu2 %vm535_vm1, %v1448_v19 }
  0xca   : > { %1058 = vmatmul.msk.f32.vlgmr.msrb.gmra.mxu3 %vm535_vm1, %v1448_v19  ;;  %841 = vmatpush.msrb.mxu0 %v460_v31 }
  0xcb   : > { %861 = vmatpush.msrb.mxu1 %v461_v32 }
  0xcc   : > { %842 = vmatpush.msrb.mxu0 %v444_v33 }
  0xcd   : > { %862 = vmatpush.msrb.mxu1 %v445_v34 }
  0xce   : > { %843 = vmatpush.msrb.mxu0 %v428_v35 }
  0xcf   : > { %863 = vmatpush.msrb.mxu1 %v429_v36  ;;  %1052 = vmatmul.msk.f32.vlgmr.msrb.gmra.mxu0 %vm535_vm1, %v1448_v19 }
  0xd0   : > { %1054 = vmatmul.msk.f32.vlgmr.msrb.gmra.mxu1 %vm535_vm1, %v1448_v19 }
 0x11f   : > { %v645_v37 = vpop.f32.mrf.mxu2 }
 0x121   : > { %v665_v38 = vpop.f32.mrf.mxu3  ;;  %v605_v39 = vpop.f32.mrf.mxu0 }
 0x123   : > { %v625_v40 = vpop.f32.mrf.mxu1 }
 0x12b   : > { %v532_v41 = vpop.permute.xlu0 %531  ;;  %v725_v43 = vpop.f32.mrf.mxu2 }
 0x12c   : > { %v534_v42 = vperm.slane %v532_v41, 0  ;;  %v745_v44 = vpop.f32.mrf.mxu3  ;;  %v685_v45 = vpop.f32.mrf.mxu0 }
 0x12d   : > { %v705_v46 = vpop.f32.mrf.mxu1 }
 0x12e   : > { %v686_v47 = vadd.f32 %v685_v45, %v534_v42  ;;  %v706_v19 = vadd.f32 %v705_v46, %v534_v42  ;;  %v726_v48 = vadd.f32 %v725_v43, %v534_v42  ;;  %v746_v49 = vadd.f32 %v745_v44, %v534_v42 }
 0x12f   : > { %v646_v50 = vadd.f32 %v645_v37, %v534_v42  ;;  %v666_v51 = vadd.f32 %v665_v38, %v534_v42  ;;  %v606_v52 = vadd.f32 %v605_v39, %v534_v42  ;;  %v626_v53 = vadd.f32 %v625_v40, %v534_v42 }
 0x130   : > { %v927_v54 = vrot.slane %v686_v47, 4  ;;  %v928_v55 = vrot.slane %v706_v19, 3  ;;  %v929_v56 = vrot.slane %v726_v48, 2  ;;  %v930_v57 = vrot.slane %v746_v49, 1 }
 0x131   : > { %v925_v58 = vrot.slane %v646_v50, 6  ;;  %v926_v59 = vrot.slane %v666_v51, 5  ;;  %v924_v60 = vrot.slane %v626_v53, 7 }
 0x132   : > { %v945_v61 = vsel %vm944_vm2, %v927_v54, %v928_v55  ;;  %v947_v62 = vsel %vm946_vm3, %v929_v56, %v930_v57 }
 0x133   : > { %v949_v63 = vsel %vm948_vm4, %v945_v61, %v947_v62  ;;  %v941_v0 = vsel %vm940_vm5, %v925_v58, %v926_v59  ;;  %v939_v1 = vsel %vm938_vm6, %v606_v52, %v924_v60 }
 0x134   : > { %v943_v2 = vsel %vm942_vm7, %v939_v1, %v941_v0 }
 0x135   : > { %v951_v3 = vsel %vm950_vm8, %v943_v2, %v949_v63 }
 0x136   : > { %961 = vst [vmem:[%s1580_s9] sm:$0xff] %v951_v3 }
 0x140   : > { %v805_v6 = vpop.f32.mrf.mxu2 }
 0x141   : > { %v825_v7 = vpop.f32.mrf.mxu3  ;;  %v806_v9 = vadd.f32 %v805_v6, %v534_v42 }
 0x142   : > { %v785_v5 = vpop.f32.mrf.mxu1  ;;  %v826_v10 = vadd.f32 %v825_v7, %v534_v42 }
 0x143   : > { %v786_v8 = vadd.f32 %v785_v5, %v534_v42  ;;  %v932_v12 = vrot.slane %v806_v9, 6 }
 0x144   : > { %v765_v4 = vpop.f32.mrf.mxu0  ;;  %v933_v13 = vrot.slane %v826_v10, 5 }
 0x145   : > { %v931_v11 = vrot.slane %v786_v8, 7  ;;  %v766_v14 = vadd.f32 %v765_v4, %v534_v42 }
 0x146   : > { %v953_v26 = vsel %vm940_vm5, %v932_v12, %v933_v13 }
 0x147   : > { %v952_v27 = vsel %vm938_vm6, %v766_v14, %v931_v11 }
 0x148   : > { %v954_v32 = vsel %vm942_vm7, %v952_v27, %v953_v26 }
 0x14c   : > { %v845_v15 = vpop.f32.mrf.mxu0  ;;  %v885_v20 = vpop.f32.mrf.mxu2 }
 0x14d   : > { %v865_v16 = vpop.f32.mrf.mxu1  ;;  %v846_v17 = vadd.f32 %v845_v15, %v534_v42  ;;  %v905_v21 = vpop.f32.mrf.mxu3  ;;  %v886_v22 = vadd.f32 %v885_v20, %v534_v42 }
 0x14e   : > { %v866_v18 = vadd.f32 %v865_v16, %v534_v42  ;;  %v906_v23 = vadd.f32 %v905_v21, %v534_v42 }
 0x14f   : > { %v934_v24 = vrot.slane %v846_v17, 4  ;;  %v936_v28 = vrot.slane %v886_v22, 2 }
 0x150   : > { %v935_v25 = vrot.slane %v866_v18, 3  ;;  %v937_v29 = vrot.slane %v906_v23, 1 }
 0x152   : > { %v955_v30 = vsel %vm944_vm2, %v934_v24, %v935_v25  ;;  %v956_v31 = vsel %vm946_vm3, %v936_v28, %v937_v29 }
 0x153   : > { %v957_v33 = vsel %vm948_vm4, %v955_v30, %v956_v31 }
 0x154   : > { %v958_v34 = vsel %vm950_vm8, %v954_v32, %v957_v33 }
 0x155   : > { %962 = vst [vmem:[%s1580_s9 + $0x8] sm:$0xff] %v958_v34 }
 0x156 PF: > { %p12_p9 = scmp.ge.s32.totalorder %s1155_s17, 6   ;;  %s1608_s14 = smov %s1108_s15 }
 0x157   : > { %s1609_s15 = smov %s1164_s20  ;;  %s1610_s16 = smov %s1155_s17 }
 0x158   :  { %14 = sbr.rel (!%p12_p9) target bundleno = 5 (0x5), region = 90 }

</bundles_post_ra>
